<compile_context>
chip_gen: v5e
topology: v5e:2x2
jax: 0.10.0
libtpu: 0.0.40
codegen_flags: <defaults>
</compile_context>

<pallas_src>
import math
from functools import partial

import jax
import jax.numpy as jnp
from jax.experimental import pallas as pl
from jax.experimental.pallas import tpu as pltpu


# ----------------------------- tiling helper --------------------------------

def _tile(n, target, align):
    """Largest multiple of `align` that divides n and is <= target, else n (full)."""
    if n <= target:
        return n
    t = (target // align) * align
    while t >= align:
        if n % t == 0:
            return t
        t -= align
    return n


# ------------------------- fused linear kernels ------------------------------

def _linear_1pass_kernel(*refs, act, has_residual, has_ln, eps):
    """Single K-step: no accumulator scratch; optional fused LayerNorm prologue."""
    it = iter(refs)
    x_ref = next(it)
    w_ref = next(it)
    b_ref = next(it)
    g_ref = gb_ref = None
    if has_ln:
        g_ref = next(it)
        gb_ref = next(it)
    res_ref = next(it) if has_residual else None
    o_ref = next(it)

    x = x_ref[...]
    if has_ln:
        xf = x.astype(jnp.float32)                      # LN stats in f32
        mu = jnp.mean(xf, axis=-1, keepdims=True)
        var = jnp.mean(jnp.square(xf - mu), axis=-1, keepdims=True)
        xf = (xf - mu) * jax.lax.rsqrt(var + eps)
        xf = xf * g_ref[...].astype(jnp.float32) + gb_ref[...].astype(jnp.float32)
        x = xf.astype(x_ref.dtype)                      # back to bf16 for the MXU

    y = jnp.dot(x, w_ref[...], preferred_element_type=jnp.float32)
    y = y + b_ref[...].astype(jnp.float32)
    if act == "gelu":
        # TODO(synk): PyTorch nn.GELU default is the exact erf form; the tanh
        # approximation is used here for a guaranteed TPU lowering.
        y = jax.nn.gelu(y, approximate=True)
    if has_residual:
        y = y + res_ref[...].astype(jnp.float32)
    o_ref[...] = y.astype(o_ref.dtype)


def _linear_kpass_kernel(*refs, act, has_residual):
    """Multi K-step: f32 VMEM accumulator with pl.when init/finalize."""
    if has_residual:
        x_ref, w_ref, b_ref, res_ref, o_ref, acc_ref = refs
    else:
        x_ref, w_ref, b_ref, o_ref, acc_ref = refs
        res_ref = None
    k = pl.program_id(2)

    @pl.when(k == 0)
    def _init():
        acc_ref[...] = jnp.zeros_like(acc_ref)

    acc_ref[...] += jnp.dot(x_ref[...], w_ref[...],
                            preferred_element_type=jnp.float32)

    @pl.when(k == pl.num_programs(2) - 1)
    def _finalize():
        y = acc_ref[...] + b_ref[...].astype(jnp.float32)
        if act == "gelu":
            y = jax.nn.gelu(y, approximate=True)
        if has_residual:
            y = y + res_ref[...].astype(jnp.float32)
        o_ref[...] = y.astype(o_ref.dtype)


def pallas_linear(x, w, b, *, act=None, residual=None, ln=None, ln_eps=1e-6,
                  alias_residual=False,
                  tm_target=256, tn_target=512, tk_target=1024):
    M, K = x.shape
    K2, N = w.shape
    assert K == K2 and b.shape == (1, N)
    tm = _tile(M, tm_target, 8)
    tn = _tile(N, tn_target, 128)
    tk = _tile(K, tk_target, 128)
    ksteps = K // tk

    if ln is not None and ksteps > 1:
        # LN fusion needs the whole feature row in one VMEM block; fall back.
        x = pallas_layernorm(x, ln[0], ln[1], eps=ln_eps)
        ln = None

    if residual is not None:
        assert residual.shape == (M, N)

    if ksteps == 1:
        in_specs = [
            pl.BlockSpec((tm, K), lambda i, j: (i, 0)),
            pl.BlockSpec((K, tn), lambda i, j: (0, j)),
            pl.BlockSpec((1, tn), lambda i, j: (0, j)),
        ]
        inputs = [x, w, b]
        if ln is not None:
            in_specs += [pl.BlockSpec((1, K), lambda i, j: (0, 0)),
                         pl.BlockSpec((1, K), lambda i, j: (0, 0))]
            inputs += [ln[0], ln[1]]
        if residual is not None:
            in_specs.append(pl.BlockSpec((tm, tn), lambda i, j: (i, j)))
            inputs.append(residual)
        io_alias = {len(inputs) - 1: 0} if (residual is not None and alias_residual) else {}
        return pl.pallas_call(
            partial(_linear_1pass_kernel, act=act,
                    has_residual=residual is not None,
                    has_ln=ln is not None, eps=ln_eps),
            out_shape=jax.ShapeDtypeStruct((M, N), x.dtype),
            grid=(M // tm, N // tn),
            in_specs=in_specs,
            out_specs=pl.BlockSpec((tm, tn), lambda i, j: (i, j)),
            input_output_aliases=io_alias,
            compiler_params=pltpu.CompilerParams(
                dimension_semantics=("parallel", "parallel")),
        )(*inputs)

    # Multi K-step path (not hit at these test sizes, kept for larger configs).
    in_specs = [
        pl.BlockSpec((tm, tk), lambda i, j, k: (i, k)),
        pl.BlockSpec((tk, tn), lambda i, j, k: (k, j)),
        pl.BlockSpec((1, tn), lambda i, j, k: (0, j)),
    ]
    inputs = [x, w, b]
    if residual is not None:
        in_specs.append(pl.BlockSpec((tm, tn), lambda i, j, k: (i, j)))
        inputs.append(residual)
    io_alias = {len(inputs) - 1: 0} if (residual is not None and alias_residual) else {}
    return pl.pallas_call(
        partial(_linear_kpass_kernel, act=act, has_residual=residual is not None),
        out_shape=jax.ShapeDtypeStruct((M, N), x.dtype),
        grid=(M // tm, N // tn, ksteps),
        in_specs=in_specs,
        out_specs=pl.BlockSpec((tm, tn), lambda i, j, k: (i, j)),
        scratch_shapes=[pltpu.VMEM((tm, tn), jnp.float32)],
        input_output_aliases=io_alias,
        compiler_params=pltpu.CompilerParams(
            dimension_semantics=("parallel", "parallel", "arbitrary")),
    )(*inputs)


# ------------------------------ layernorm kernel ------------------------------

def _layernorm_kernel(x_ref, g_ref, b_ref, o_ref, *, eps):
    x = x_ref[...].astype(jnp.float32)
    mu = jnp.mean(x, axis=-1, keepdims=True)
    var = jnp.mean(jnp.square(x - mu), axis=-1, keepdims=True)
    y = (x - mu) * jax.lax.rsqrt(var + eps)
    y = y * g_ref[...].astype(jnp.float32) + b_ref[...].astype(jnp.float32)
    o_ref[...] = y.astype(o_ref.dtype)


def pallas_layernorm(x, g, b, eps=1e-6):
    M, D = x.shape
    tm = _tile(M, 256, 8)
    return pl.pallas_call(
        partial(_layernorm_kernel, eps=eps),
        out_shape=jax.ShapeDtypeStruct((M, D), x.dtype),
        grid=(M // tm,),
        in_specs=[
            pl.BlockSpec((tm, D), lambda i: (i, 0)),
            pl.BlockSpec((1, D), lambda i: (0, 0)),
            pl.BlockSpec((1, D), lambda i: (0, 0)),
        ],
        out_specs=pl.BlockSpec((tm, D), lambda i: (i, 0)),
        compiler_params=pltpu.CompilerParams(dimension_semantics=("parallel",)),
    )(x, g, b)


# --------------------------- flash attention kernel ---------------------------

def _flash_attn_kernel(q_ref, k_ref, v_ref, o_ref, m_sc, l_sc, acc_sc,
                       *, heads, dh, scale):
    kv_i = pl.program_id(1)

    @pl.when(kv_i == 0)
    def _init():
        m_sc[...] = jnp.full_like(m_sc, -jnp.inf)
        l_sc[...] = jnp.zeros_like(l_sc)
        acc_sc[...] = jnp.zeros_like(acc_sc)

    # Per-head loop over static lane slices: keeps only one (tq, tkv) f32 score
    # block live at a time (heads x smaller peak VMEM vs a batched einsum) and
    # avoids 3-D reshape/transpose relayouts.
    for h in range(heads):
        c0, c1 = h * dh, (h + 1) * dh
        q_h = q_ref[:, c0:c1] * scale                      # (tq, dh) bf16, scale folded in
        k_h = k_ref[:, c0:c1]                              # (tkv, dh) bf16
        v_h = v_ref[:, c0:c1]                              # (tkv, dh) bf16

        # NOTE: contraction depth is only dh, so this kernel is VPU/EUP-bound, not
        # MXU-bound; keep elementwise work minimal.
        s = jax.lax.dot_general(q_h, k_h, (((1,), (1,)), ((), ())),
                                preferred_element_type=jnp.float32)  # (tq, tkv) f32

        m_prev = m_sc[:, h:h + 1]                          # (tq, 1) f32
        m_new = jnp.maximum(m_prev, jnp.max(s, axis=-1, keepdims=True))
        alpha = jnp.exp(m_prev - m_new)
        p = jnp.exp(s - m_new)
        l_sc[:, h:h + 1] = alpha * l_sc[:, h:h + 1] + jnp.sum(p, axis=-1, keepdims=True)
        acc_sc[:, c0:c1] = alpha * acc_sc[:, c0:c1] + jnp.dot(
            p.astype(v_h.dtype), v_h, preferred_element_type=jnp.float32)
        m_sc[:, h:h + 1] = m_new

    @pl.when(kv_i == pl.num_programs(1) - 1)
    def _finalize():
        for h in range(heads):
            c0, c1 = h * dh, (h + 1) * dh
            inv = pl.reciprocal(l_sc[:, h:h + 1], approx=True)
            acc_sc[:, c0:c1] = acc_sc[:, c0:c1] * inv
        # Single lane-dense (tq, heads*dh) store.
        o_ref[...] = acc_sc[...].astype(o_ref.dtype)


def pallas_flash_attention(q, k, v, *, heads, scale, tq_target=256, tkv_target=512):
    T, dim = q.shape
    dh = dim // heads
    tq = _tile(T, tq_target, 8)
    tkv = _tile(T, tkv_target, 8)
    grid = (T // tq, T // tkv)
    return pl.pallas_call(
        partial(_flash_attn_kernel, heads=heads, dh=dh, scale=scale),
        out_shape=jax.ShapeDtypeStruct((T, dim), q.dtype),
        grid=grid,
        in_specs=[
            pl.BlockSpec((tq, dim), lambda qi, ki: (qi, 0)),
            pl.BlockSpec((tkv, dim), lambda qi, ki: (ki, 0)),
            pl.BlockSpec((tkv, dim), lambda qi, ki: (ki, 0)),
        ],
        out_specs=pl.BlockSpec((tq, dim), lambda qi, ki: (qi, 0)),
        scratch_shapes=[
            pltpu.VMEM((tq, heads), jnp.float32),      # running max (per head, lane-packed)
            pltpu.VMEM((tq, heads), jnp.float32),      # running sum
            pltpu.VMEM((tq, dim), jnp.float32),        # lane-dense output accumulator
        ],
        compiler_params=pltpu.CompilerParams(
            dimension_semantics=("parallel", "arbitrary")),
    )(q, k, v)


# ------------------------------ 3x3 conv kernel -------------------------------

def _conv3x3_kernel(xp_ref, w_ref, o_ref, *, tr, gw):
    cin = w_ref.shape[1]
    r0 = pl.program_id(0) * tr
    acc = None
    for di in range(3):
        # One load of the shifted row band, reused for its 3 column taps.
        rows = xp_ref[pl.ds(r0 + di, tr), :, :]            # (tr, gw+2, cin) bf16
        for dj in range(3):
            patch = rows[:, dj:dj + gw, :].reshape(tr * gw, cin)
            contrib = jnp.dot(patch, w_ref[di * 3 + dj],
                              preferred_element_type=jnp.float32)
            acc = contrib if acc is None else acc + contrib
    o_ref[...] = acc.astype(o_ref.dtype)


def pallas_conv3x3(tokens, w, gh, gw):
    """tokens: (gh*gw, Cin) channels-last map; w: (9, Cin, Cout); pad=1, bias=False."""
    Cin = tokens.shape[-1]
    Cout = w.shape[-1]
    xp = jnp.pad(tokens.reshape(gh, gw, Cin), ((1, 1), (1, 1), (0, 0)))
    tr = _tile(gh, 32, 1)                                   # row-band size (divides gh)
    return pl.pallas_call(
        partial(_conv3x3_kernel, tr=tr, gw=gw),
        out_shape=jax.ShapeDtypeStruct((gh * gw, Cout), tokens.dtype),
        grid=(gh // tr,),
        in_specs=[
            pl.BlockSpec((gh + 2, gw + 2, Cin), lambda i: (0, 0, 0)),   # resident
            pl.BlockSpec((9, Cin, Cout), lambda i: (0, 0, 0)),          # resident
        ],
        out_specs=pl.BlockSpec((tr * gw, Cout), lambda i: (i, 0)),
        compiler_params=pltpu.CompilerParams(dimension_semantics=("parallel",)),
    )(xp, w)


# ------------------------------- parameters ----------------------------------

def make_params(key, cfg):
    dim, mlp, out_c = cfg["dim"], cfg["mlp"], cfg["out"]
    p, C = cfg["patch"], cfg["in_chans"]
    T = (cfg["img_size"] // p) ** 2

    def nrm(k, shape, scale=0.02):
        return (scale * jax.random.normal(k, shape, jnp.float32)).astype(jnp.bfloat16)

    keys = iter(jax.random.split(key, 64))
    params = {
        "patch_w": nrm(next(keys), (C * p * p, dim)),
        "patch_b": jnp.zeros((1, dim), jnp.float32),
        "pos_embed": nrm(next(keys), (T, dim)),
        "blocks": [],
        "neck1_w": nrm(next(keys), (dim, out_c)),           # 1x1 conv, bias=False
        "neck2_w": nrm(next(keys), (9, out_c, out_c)),      # 3x3 conv, bias=False
        "zeros_out": jnp.zeros((1, out_c), jnp.float32),
        "ln_n1_g": jnp.ones((1, out_c), jnp.float32),
        "ln_n1_b": jnp.zeros((1, out_c), jnp.float32),
        "ln_n2_g": jnp.ones((1, out_c), jnp.float32),
        "ln_n2_b": jnp.zeros((1, out_c), jnp.float32),
    }
    for _ in range(cfg["depth"]):
        params["blocks"].append({
            "ln1_g": jnp.ones((1, dim), jnp.float32),
            "ln1_b": jnp.zeros((1, dim), jnp.float32),
            "qkv_w": nrm(next(keys), (dim, 3 * dim)),
            "qkv_b": jnp.zeros((1, 3 * dim), jnp.float32),
            "proj_w": nrm(next(keys), (dim, dim)),
            "proj_b": jnp.zeros((1, dim), jnp.float32),
            "ln2_g": jnp.ones((1, dim), jnp.float32),
            "ln2_b": jnp.zeros((1, dim), jnp.float32),
            "fc1_w": nrm(next(keys), (dim, mlp)),
            "fc1_b": jnp.zeros((1, mlp), jnp.float32),
            "fc2_w": nrm(next(keys), (mlp, dim)),
            "fc2_b": jnp.zeros((1, dim), jnp.float32),
        })
    return params


# ------------------------------- forward pass ---------------------------------

def sam_encoder_nuke_forward(x, params, *, cfg):
    """x: (1, in_chans, H, W) float32 NCHW, like the PyTorch module input."""
    # --- prologue: *255 and pixel mean/std normalization in f32, then cast to
    #     bf16 (the TPU analog of x.half()). ---
    mean = jnp.asarray([123.675, 116.28, 103.53], jnp.float32).reshape(1, 3, 1, 1)
    std = jnp.asarray([58.395, 57.12, 57.375], jnp.float32).reshape(1, 3, 1, 1)
    image = ((x * 255.0 - mean) / std).astype(jnp.bfloat16)
    # TODO(synk): SAM's preprocess also resizes/pads to 1024x1024; inputs here are
    # assumed to already be at cfg["img_size"] (scaled-down synthetic model).

    p, C = cfg["patch"], cfg["in_chans"]
    H = W = cfg["img_size"]
    gh, gw = H // p, W // p
    T = gh * gw
    dim, heads = cfg["dim"], cfg["heads"]
    dh = dim // heads

    # --- patch embed (conv kxk stride k == matmul on flattened patches),
    #     with the positional-embedding add fused into the matmul epilogue ---
    patches = (image[0]                                   # (C, H, W)
               .reshape(C, gh, p, gw, p)
               .transpose(1, 3, 0, 2, 4)
               .reshape(T, C * p * p))
    tokens = pallas_linear(patches, params["patch_w"], params["patch_b"],
                           residual=params["pos_embed"])

    # --- transformer blocks (global attention, no rel-pos; see TODO above) ---
    scale = 1.0 / math.sqrt(dh)
    for blk in params["blocks"]:
        # LayerNorm fused into the QKV matmul prologue.
        qkv = pallas_linear(tokens, blk["qkv_w"], blk["qkv_b"],
                            ln=(blk["ln1_g"], blk["ln1_b"]))          # (T, 3*dim)
        # Contiguous column slices; heads are split inside the attention kernel.
        q = qkv[:, :dim]
        k = qkv[:, dim:2 * dim]
        v = qkv[:, 2 * dim:]
        attn = pallas_flash_attention(q, k, v, heads=heads, scale=scale)  # (T, dim)
        # proj matmul with residual add fused and the residual buffer aliased to the output.
        tokens = pallas_linear(attn, blk["proj_w"], blk["proj_b"],
                               residual=tokens, alias_residual=True)

        # LayerNorm fused into the fc1 matmul prologue; GELU fused in its epilogue.
        hidden = pallas_linear(tokens, blk["fc1_w"], blk["fc1_b"], act="gelu",
                               ln=(blk["ln2_g"], blk["ln2_b"]))
        tokens = pallas_linear(hidden, blk["fc2_w"], blk["fc2_b"],
                               residual=tokens, alias_residual=True)

    # --- neck: conv1x1 -> LayerNorm2d -> conv3x3(pad=1) -> LayerNorm2d ---
    y = pallas_linear(tokens, params["neck1_w"], params["zeros_out"])
    y = pallas_layernorm(y, params["ln_n1_g"], params["ln_n1_b"])
    y = pallas_conv3x3(y, params["neck2_w"], gh, gw)
    y = pallas_layernorm(y, params["ln_n2_g"], params["ln_n2_b"])

    # --- back to NCHW and flatten like output.reshape(1, 1, 1024, 1024) ---
    out_c = cfg["out"]
    feat = y.reshape(gh, gw, out_c).transpose(2, 0, 1)[None]          # (1, out_c, gh, gw)
    total = out_c * gh * gw
    side = int(math.isqrt(total))
    assert side * side == total, "final feature map cannot be reshaped to a square"
    return feat.reshape(1, 1, side, side)


# ----------------------------------- main --------------------------------------

if __name__ == "__main__":
    cfg = dict(img_size=64, patch=8, in_chans=3, dim=64, depth=2,
               heads=4, mlp=256, out=64)
    key = jax.random.PRNGKey(0)
    pkey, xkey = jax.random.split(key)
    params = make_params(pkey, cfg)

    x = jax.random.uniform(
        xkey, (1, cfg["in_chans"], cfg["img_size"], cfg["img_size"]), jnp.float32)

    fwd = jax.jit(partial(sam_encoder_nuke_forward, cfg=cfg))
    out = fwd(x, params)
    out = jax.block_until_ready(out)

    side = int(math.isqrt(cfg["out"] * (cfg["img_size"] // cfg["patch"]) ** 2))
    assert out.shape == (1, 1, side, side), out.shape
    assert jnp.all(jnp.isfinite(out.astype(jnp.float32)))
    print("KERNEL_OK")
</pallas_src>

<mosaic_0001>
module attributes {stable_mosaic.version = 11 : i64} {
  func.func @_linear_1pass_kernel(%arg0: i32, %arg1: i32, %arg2: memref<64x192xbf16, #tpu.memory_space<vmem>>, %arg3: memref<192x64xbf16, #tpu.memory_space<vmem>>, %arg4: memref<1x64xf32, #tpu.memory_space<vmem>>, %arg5: memref<64x64xbf16, #tpu.memory_space<vmem>>, %arg6: memref<64x64xbf16, #tpu.memory_space<vmem>>) attributes {dimension_semantics = [#tpu.dimension_semantics<parallel>, #tpu.dimension_semantics<parallel>], iteration_bounds = array<i64: 1, 1>, scalar_prefetch = 0 : i64, scratch_operands = 0 : i64, tpu.core_type = #tpu.core_type<tc>, window_params = [{transform_indices = @transform_0, window_bounds = array<i64: 64, 192>}, {transform_indices = @transform_1, window_bounds = array<i64: 192, 64>}, {transform_indices = @transform_2, window_bounds = array<i64: 1, 64>}, {transform_indices = @transform_3, window_bounds = array<i64: 64, 64>}, {transform_indices = @transform_4, window_bounds = array<i64: 64, 64>}]} {
    %c0 = arith.constant 0 : index
    %c0_0 = arith.constant 0 : index
    %0 = vector.load %arg2[%c0, %c0_0] : memref<64x192xbf16, #tpu.memory_space<vmem>>, vector<64x192xbf16>
    %c0_1 = arith.constant 0 : index
    %c0_2 = arith.constant 0 : index
    %1 = vector.load %arg3[%c0_1, %c0_2] : memref<192x64xbf16, #tpu.memory_space<vmem>>, vector<192x64xbf16>
    %cst = arith.constant dense<0.000000e+00> : vector<64x64xf32>
    %2 = tpu.matmul %0, %1, %cst {dimension_numbers = #tpu.dot_dimension_numbers<[1], [0], [0], [1], [0, 0, 1, 1], [], []>} : vector<64x192xbf16>, vector<192x64xbf16>, vector<64x64xf32> -> vector<64x64xf32>
    %c0_3 = arith.constant 0 : index
    %c0_4 = arith.constant 0 : index
    %3 = vector.load %arg4[%c0_3, %c0_4] : memref<1x64xf32, #tpu.memory_space<vmem>>, vector<1x64xf32>
    %4 = vector.broadcast %3 : vector<1x64xf32> to vector<64x64xf32>
    %5 = arith.addf %2, %4 : vector<64x64xf32>
    %c0_5 = arith.constant 0 : index
    %c0_6 = arith.constant 0 : index
    %6 = vector.load %arg5[%c0_5, %c0_6] : memref<64x64xbf16, #tpu.memory_space<vmem>>, vector<64x64xbf16>
    %7 = arith.extf %6 : vector<64x64xbf16> to vector<64x64xf32>
    %8 = arith.addf %5, %7 : vector<64x64xf32>
    %9 = arith.truncf %8 : vector<64x64xf32> to vector<64x64xbf16>
    %c0_7 = arith.constant 0 : index
    %c0_8 = arith.constant 0 : index
    %10 = vector.load %arg6[%c0_7, %c0_8] : memref<64x64xbf16, #tpu.memory_space<vmem>>, vector<64x64xbf16>
    tpu.vector_store %arg6[%c0_7, %c0_8], %9 {strides = array<i32>} : memref<64x64xbf16, #tpu.memory_space<vmem>>, vector<64x64xbf16>,
    return
  }
  func.func @transform_0(%arg0: i32, %arg1: i32) -> (i32, i32) {
    %c0_i32 = arith.constant 0 : i32
    %c0_i32_0 = arith.constant 0 : i32
    return %arg0, %c0_i32 : i32, i32
  }
  func.func @transform_1(%arg0: i32, %arg1: i32) -> (i32, i32) {
    %c0_i32 = arith.constant 0 : i32
    %c0_i32_0 = arith.constant 0 : i32
    return %c0_i32, %arg1 : i32, i32
  }
  func.func @transform_2(%arg0: i32, %arg1: i32) -> (i32, i32) {
    %c0_i32 = arith.constant 0 : i32
    %c0_i32_0 = arith.constant 0 : i32
    return %c0_i32, %arg1 : i32, i32
  }
  func.func @transform_3(%arg0: i32, %arg1: i32) -> (i32, i32) {
    %c0_i32 = arith.constant 0 : i32
    return %arg0, %arg1 : i32, i32
  }
  func.func @transform_4(%arg0: i32, %arg1: i32) -> (i32, i32) {
    %c0_i32 = arith.constant 0 : i32
    return %arg0, %arg1 : i32, i32
  }
}

module attributes {stable_mosaic.version = 11 : i64} {
  func.func @_linear_1pass_kernel(%arg0: i32, %arg1: i32, %arg2: memref<64x64xbf16, #tpu.memory_space<vmem>>, %arg3: memref<64x192xbf16, #tpu.memory_space<vmem>>, %arg4: memref<1x192xf32, #tpu.memory_space<vmem>>, %arg5: memref<1x64xf32, #tpu.memory_space<vmem>>, %arg6: memref<1x64xf32, #tpu.memory_space<vmem>>, %arg7: memref<64x192xbf16, #tpu.memory_space<vmem>>) attributes {dimension_semantics = [#tpu.dimension_semantics<parallel>, #tpu.dimension_semantics<parallel>], iteration_bounds = array<i64: 1, 1>, scalar_prefetch = 0 : i64, scratch_operands = 0 : i64, tpu.core_type = #tpu.core_type<tc>, window_params = [{transform_indices = @transform_0, window_bounds = array<i64: 64, 64>}, {transform_indices = @transform_1, window_bounds = array<i64: 64, 192>}, {transform_indices = @transform_2, window_bounds = array<i64: 1, 192>}, {pipeline_mode = #tpu.pipeline_mode<synchronous>, transform_indices = @transform_3, window_bounds = array<i64: 1, 64>}, {pipeline_mode = #tpu.pipeline_mode<synchronous>, transform_indices = @transform_4, window_bounds = array<i64: 1, 64>}, {transform_indices = @transform_5, window_bounds = array<i64: 64, 192>}]} {
    %c0 = arith.constant 0 : index
    %c0_0 = arith.constant 0 : index
    %0 = vector.load %arg2[%c0, %c0_0] : memref<64x64xbf16, #tpu.memory_space<vmem>>, vector<64x64xbf16>
    %1 = arith.extf %0 : vector<64x64xbf16> to vector<64x64xf32>
    %cst = arith.constant dense<0.000000e+00> : vector<64xf32>
    %2 = vector.multi_reduction <add>, %1, %cst [1] : vector<64x64xf32> to vector<64xf32>
    %3 = vector.shape_cast %2 : vector<64xf32> to vector<64x1xf32>
    %cst_1 = arith.constant 6.400000e+01 : f32
    %4 = vector.broadcast %cst_1 : f32 to vector<64x1xf32>
    %5 = arith.divf %3, %4 : vector<64x1xf32>
    %6 = vector.broadcast %5 : vector<64x1xf32> to vector<64x64xf32>
    %7 = arith.subf %1, %6 : vector<64x64xf32>
    %8 = arith.mulf %7, %7 : vector<64x64xf32>
    %cst_2 = arith.constant dense<0.000000e+00> : vector<64xf32>
    %9 = vector.multi_reduction <add>, %8, %cst_2 [1] : vector<64x64xf32> to vector<64xf32>
    %10 = vector.shape_cast %9 : vector<64xf32> to vector<64x1xf32>
    %cst_3 = arith.constant 6.400000e+01 : f32
    %11 = vector.broadcast %cst_3 : f32 to vector<64x1xf32>
    %12 = arith.divf %10, %11 : vector<64x1xf32>
    %13 = vector.broadcast %5 : vector<64x1xf32> to vector<64x64xf32>
    %14 = arith.subf %1, %13 : vector<64x64xf32>
    %cst_4 = arith.constant 9.99999997E-7 : f32
    %15 = vector.broadcast %cst_4 : f32 to vector<64x1xf32>
    %16 = arith.addf %12, %15 : vector<64x1xf32>
    %17 = math.rsqrt %16 : vector<64x1xf32>
    %18 = vector.broadcast %17 : vector<64x1xf32> to vector<64x64xf32>
    %19 = arith.mulf %14, %18 : vector<64x64xf32>
    %c0_5 = arith.constant 0 : index
    %c0_6 = arith.constant 0 : index
    %20 = vector.load %arg5[%c0_5, %c0_6] : memref<1x64xf32, #tpu.memory_space<vmem>>, vector<1x64xf32>
    %21 = vector.broadcast %20 : vector<1x64xf32> to vector<64x64xf32>
    %22 = arith.mulf %19, %21 : vector<64x64xf32>
    %c0_7 = arith.constant 0 : index
    %c0_8 = arith.constant 0 : index
    %23 = vector.load %arg6[%c0_7, %c0_8] : memref<1x64xf32, #tpu.memory_space<vmem>>, vector<1x64xf32>
    %24 = vector.broadcast %23 : vector<1x64xf32> to vector<64x64xf32>
    %25 = arith.addf %22, %24 : vector<64x64xf32>
    %26 = arith.truncf %25 : vector<64x64xf32> to vector<64x64xbf16>
    %c0_9 = arith.constant 0 : index
    %c0_10 = arith.constant 0 : index
    %27 = vector.load %arg3[%c0_9, %c0_10] : memref<64x192xbf16, #tpu.memory_space<vmem>>, vector<64x192xbf16>
    %cst_11 = arith.constant dense<0.000000e+00> : vector<64x192xf32>
    %28 = tpu.matmul %26, %27, %cst_11 {dimension_numbers = #tpu.dot_dimension_numbers<[1], [0], [0], [1], [0, 0, 1, 1], [], []>} : vector<64x64xbf16>, vector<64x192xbf16>, vector<64x192xf32> -> vector<64x192xf32>
    %c0_12 = arith.constant 0 : index
    %c0_13 = arith.constant 0 : index
    %29 = vector.load %arg4[%c0_12, %c0_13] : memref<1x192xf32, #tpu.memory_space<vmem>>, vector<1x192xf32>
    %30 = vector.broadcast %29 : vector<1x192xf32> to vector<64x192xf32>
    %31 = arith.addf %28, %30 : vector<64x192xf32>
    %32 = arith.truncf %31 : vector<64x192xf32> to vector<64x192xbf16>
    %c0_14 = arith.constant 0 : index
    %c0_15 = arith.constant 0 : index
    %33 = vector.load %arg7[%c0_14, %c0_15] : memref<64x192xbf16, #tpu.memory_space<vmem>>, vector<64x192xbf16>
    tpu.vector_store %arg7[%c0_14, %c0_15], %32 {strides = array<i32>} : memref<64x192xbf16, #tpu.memory_space<vmem>>, vector<64x192xbf16>,
    return
  }
  func.func @transform_0(%arg0: i32, %arg1: i32) -> (i32, i32) {
    %c0_i32 = arith.constant 0 : i32
    %c0_i32_0 = arith.constant 0 : i32
    return %arg0, %c0_i32 : i32, i32
  }
  func.func @transform_1(%arg0: i32, %arg1: i32) -> (i32, i32) {
    %c0_i32 = arith.constant 0 : i32
    %c0_i32_0 = arith.constant 0 : i32
    return %c0_i32, %arg1 : i32, i32
  }
  func.func @transform_2(%arg0: i32, %arg1: i32) -> (i32, i32) {
    %c0_i32 = arith.constant 0 : i32
    %c0_i32_0 = arith.constant 0 : i32
    return %c0_i32, %arg1 : i32, i32
  }
  func.func @transform_3(%arg0: i32, %arg1: i32) -> (i32, i32) {
    %c0_i32 = arith.constant 0 : i32
    %c0_i32_0 = arith.constant 0 : i32
    %c0_i32_1 = arith.constant 0 : i32
    return %c0_i32, %c0_i32_0 : i32, i32
  }
  func.func @transform_4(%arg0: i32, %arg1: i32) -> (i32, i32) {
    %c0_i32 = arith.constant 0 : i32
    %c0_i32_0 = arith.constant 0 : i32
    %c0_i32_1 = arith.constant 0 : i32
    return %c0_i32, %c0_i32_0 : i32, i32
  }
  func.func @transform_5(%arg0: i32, %arg1: i32) -> (i32, i32) {
    %c0_i32 = arith.constant 0 : i32
    return %arg0, %arg1 : i32, i32
  }
}

module attributes {stable_mosaic.version = 11 : i64} {
  func.func @_flash_attn_kernel(%arg0: i32, %arg1: i32, %arg2: memref<64x64xbf16, #tpu.memory_space<vmem>>, %arg3: memref<64x64xbf16, #tpu.memory_space<vmem>>, %arg4: memref<64x64xbf16, #tpu.memory_space<vmem>>, %arg5: memref<64x64xbf16, #tpu.memory_space<vmem>>, %arg6: memref<64x4xf32, #tpu.memory_space<vmem>>, %arg7: memref<64x4xf32, #tpu.memory_space<vmem>>, %arg8: memref<64x64xf32, #tpu.memory_space<vmem>>) attributes {dimension_semantics = [#tpu.dimension_semantics<parallel>, #tpu.dimension_semantics<arbitrary>], iteration_bounds = array<i64: 1, 1>, scalar_prefetch = 0 : i64, scratch_operands = 3 : i64, tpu.core_type = #tpu.core_type<tc>, window_params = [{transform_indices = @transform_0, window_bounds = array<i64: 64, 64>}, {transform_indices = @transform_1, window_bounds = array<i64: 64, 64>}, {transform_indices = @transform_2, window_bounds = array<i64: 64, 64>}, {transform_indices = @transform_3, window_bounds = array<i64: 64, 64>}]} {
    %c0_i32 = arith.constant 0 : i32
    %0 = arith.cmpi eq, %arg1, %c0_i32 : i32
    %1 = arith.extui %0 : i1 to i32
    %c0_i32_0 = arith.constant 0 : i32
    %2 = arith.cmpi ne, %1, %c0_i32_0 : i32
    scf.if %2 {
      %cst_87 = arith.constant 0xFF800000 : f32
      %122 = vector.broadcast %cst_87 : f32 to vector<64x4xf32>
      %c0_88 = arith.constant 0 : index
      %c0_89 = arith.constant 0 : index
      %123 = vector.load %arg6[%c0_88, %c0_89] : memref<64x4xf32, #tpu.memory_space<vmem>>, vector<64x4xf32>
      tpu.vector_store %arg6[%c0_88, %c0_89], %122 {strides = array<i32>} : memref<64x4xf32, #tpu.memory_space<vmem>>, vector<64x4xf32>,
      %cst_90 = arith.constant 0.000000e+00 : f32
      %124 = vector.broadcast %cst_90 : f32 to vector<64x4xf32>
      %c0_91 = arith.constant 0 : index
      %c0_92 = arith.constant 0 : index
      %125 = vector.load %arg7[%c0_91, %c0_92] : memref<64x4xf32, #tpu.memory_space<vmem>>, vector<64x4xf32>
      tpu.vector_store %arg7[%c0_91, %c0_92], %124 {strides = array<i32>} : memref<64x4xf32, #tpu.memory_space<vmem>>, vector<64x4xf32>,
      %cst_93 = arith.constant 0.000000e+00 : f32
      %126 = vector.broadcast %cst_93 : f32 to vector<64x64xf32>
      %c0_94 = arith.constant 0 : index
      %c0_95 = arith.constant 0 : index
      %127 = vector.load %arg8[%c0_94, %c0_95] : memref<64x64xf32, #tpu.memory_space<vmem>>, vector<64x64xf32>
      tpu.vector_store %arg8[%c0_94, %c0_95], %126 {strides = array<i32>} : memref<64x64xf32, #tpu.memory_space<vmem>>, vector<64x64xf32>,
    } else {
    }
    %c0 = arith.constant 0 : index
    %c0_1 = arith.constant 0 : index
    %3 = vector.load %arg2[%c0, %c0_1] : memref<64x64xbf16, #tpu.memory_space<vmem>>, vector<64x16xbf16>
    %cst = arith.constant 2.500000e-01 : bf16
    %4 = vector.broadcast %cst : bf16 to vector<64x16xbf16>
    %5 = arith.mulf %3, %4 : vector<64x16xbf16>
    %c0_2 = arith.constant 0 : index
    %c0_3 = arith.constant 0 : index
    %6 = vector.load %arg3[%c0_2, %c0_3] : memref<64x64xbf16, #tpu.memory_space<vmem>>, vector<64x16xbf16>
    %c0_4 = arith.constant 0 : index
    %c0_5 = arith.constant 0 : index
    %7 = vector.load %arg4[%c0_4, %c0_5] : memref<64x64xbf16, #tpu.memory_space<vmem>>, vector<64x16xbf16>
    %cst_6 = arith.constant dense<0.000000e+00> : vector<64x64xf32>
    %8 = tpu.matmul %5, %6, %cst_6 {dimension_numbers = #tpu.dot_dimension_numbers<[1], [1], [0], [0], [0, 0, 1, 0], [], []>} : vector<64x16xbf16>, vector<64x16xbf16>, vector<64x64xf32> -> vector<64x64xf32>
    %c0_7 = arith.constant 0 : index
    %c0_8 = arith.constant 0 : index
    %9 = vector.load %arg6[%c0_7, %c0_8] : memref<64x4xf32, #tpu.memory_space<vmem>>, vector<64x1xf32>
    %cst_9 = arith.constant dense<0xFF800000> : vector<64xf32>
    %10 = vector.multi_reduction <maximumf>, %8, %cst_9 [1] : vector<64x64xf32> to vector<64xf32>
    %11 = vector.shape_cast %10 : vector<64xf32> to vector<64x1xf32>
    %12 = arith.maximumf %9, %11 : vector<64x1xf32>
    %13 = arith.subf %9, %12 : vector<64x1xf32>
    %14 = math.exp %13 : vector<64x1xf32>
    %15 = vector.broadcast %12 : vector<64x1xf32> to vector<64x64xf32>
    %16 = arith.subf %8, %15 : vector<64x64xf32>
    %17 = math.exp %16 : vector<64x64xf32>
    %c0_10 = arith.constant 0 : index
    %c0_11 = arith.constant 0 : index
    %18 = vector.load %arg7[%c0_10, %c0_11] : memref<64x4xf32, #tpu.memory_space<vmem>>, vector<64x1xf32>
    %19 = arith.mulf %14, %18 : vector<64x1xf32>
    %cst_12 = arith.constant dense<0.000000e+00> : vector<64xf32>
    %20 = vector.multi_reduction <add>, %17, %cst_12 [1] : vector<64x64xf32> to vector<64xf32>
    %21 = vector.shape_cast %20 : vector<64xf32> to vector<64x1xf32>
    %22 = arith.addf %19, %21 : vector<64x1xf32>
    %c0_13 = arith.constant 0 : index
    %c0_14 = arith.constant 0 : index
    %23 = vector.load %arg7[%c0_13, %c0_14] : memref<64x4xf32, #tpu.memory_space<vmem>>, vector<64x1xf32>
    tpu.vector_store %arg7[%c0_13, %c0_14], %22 {strides = array<i32>} : memref<64x4xf32, #tpu.memory_space<vmem>>, vector<64x1xf32>,
    %c0_15 = arith.constant 0 : index
    %c0_16 = arith.constant 0 : index
    %24 = vector.load %arg8[%c0_15, %c0_16] : memref<64x64xf32, #tpu.memory_space<vmem>>, vector<64x16xf32>
    %25 = vector.broadcast %14 : vector<64x1xf32> to vector<64x16xf32>
    %26 = arith.mulf %25, %24 : vector<64x16xf32>
    %27 = arith.truncf %17 : vector<64x64xf32> to vector<64x64xbf16>
    %cst_17 = arith.constant dense<0.000000e+00> : vector<64x16xf32>
    %28 = tpu.matmul %27, %7, %cst_17 {dimension_numbers = #tpu.dot_dimension_numbers<[1], [0], [0], [1], [0, 0, 1, 1], [], []>} : vector<64x64xbf16>, vector<64x16xbf16>, vector<64x16xf32> -> vector<64x16xf32>
    %29 = arith.addf %26, %28 : vector<64x16xf32>
    %c0_18 = arith.constant 0 : index
    %c0_19 = arith.constant 0 : index
    %30 = vector.load %arg8[%c0_18, %c0_19] : memref<64x64xf32, #tpu.memory_space<vmem>>, vector<64x16xf32>
    tpu.vector_store %arg8[%c0_18, %c0_19], %29 {strides = array<i32>} : memref<64x64xf32, #tpu.memory_space<vmem>>, vector<64x16xf32>,
    %c0_20 = arith.constant 0 : index
    %c0_21 = arith.constant 0 : index
    %31 = vector.load %arg6[%c0_20, %c0_21] : memref<64x4xf32, #tpu.memory_space<vmem>>, vector<64x1xf32>
    tpu.vector_store %arg6[%c0_20, %c0_21], %12 {strides = array<i32>} : memref<64x4xf32, #tpu.memory_space<vmem>>, vector<64x1xf32>,
    %c0_22 = arith.constant 0 : index
    %c16 = arith.constant 16 : index
    %32 = vector.load %arg2[%c0_22, %c16] : memref<64x64xbf16, #tpu.memory_space<vmem>>, vector<64x16xbf16>
    %cst_23 = arith.constant 2.500000e-01 : bf16
    %33 = vector.broadcast %cst_23 : bf16 to vector<64x16xbf16>
    %34 = arith.mulf %32, %33 : vector<64x16xbf16>
    %c0_24 = arith.constant 0 : index
    %c16_25 = arith.constant 16 : index
    %35 = vector.load %arg3[%c0_24, %c16_25] : memref<64x64xbf16, #tpu.memory_space<vmem>>, vector<64x16xbf16>
    %c0_26 = arith.constant 0 : index
    %c16_27 = arith.constant 16 : index
    %36 = vector.load %arg4[%c0_26, %c16_27] : memref<64x64xbf16, #tpu.memory_space<vmem>>, vector<64x16xbf16>
    %cst_28 = arith.constant dense<0.000000e+00> : vector<64x64xf32>
    %37 = tpu.matmul %34, %35, %cst_28 {dimension_numbers = #tpu.dot_dimension_numbers<[1], [1], [0], [0], [0, 0, 1, 0], [], []>} : vector<64x16xbf16>, vector<64x16xbf16>, vector<64x64xf32> -> vector<64x64xf32>
    %c0_29 = arith.constant 0 : index
    %c1 = arith.constant 1 : index
    %38 = vector.load %arg6[%c0_29, %c1] : memref<64x4xf32, #tpu.memory_space<vmem>>, vector<64x1xf32>
    %cst_30 = arith.constant dense<0xFF800000> : vector<64xf32>
    %39 = vector.multi_reduction <maximumf>, %37, %cst_30 [1] : vector<64x64xf32> to vector<64xf32>
    %40 = vector.shape_cast %39 : vector<64xf32> to vector<64x1xf32>
    %41 = arith.maximumf %38, %40 : vector<64x1xf32>
    %42 = arith.subf %38, %41 : vector<64x1xf32>
    %43 = math.exp %42 : vector<64x1xf32>
    %44 = vector.broadcast %41 : vector<64x1xf32> to vector<64x64xf32>
    %45 = arith.subf %37, %44 : vector<64x64xf32>
    %46 = math.exp %45 : vector<64x64xf32>
    %c0_31 = arith.constant 0 : index
    %c1_32 = arith.constant 1 : index
    %47 = vector.load %arg7[%c0_31, %c1_32] : memref<64x4xf32, #tpu.memory_space<vmem>>, vector<64x1xf32>
    %48 = arith.mulf %43, %47 : vector<64x1xf32>
    %cst_33 = arith.constant dense<0.000000e+00> : vector<64xf32>
    %49 = vector.multi_reduction <add>, %46, %cst_33 [1] : vector<64x64xf32> to vector<64xf32>
    %50 = vector.shape_cast %49 : vector<64xf32> to vector<64x1xf32>
    %51 = arith.addf %48, %50 : vector<64x1xf32>
    %c0_34 = arith.constant 0 : index
    %c1_35 = arith.constant 1 : index
    %52 = vector.load %arg7[%c0_34, %c1_35] : memref<64x4xf32, #tpu.memory_space<vmem>>, vector<64x1xf32>
    tpu.vector_store %arg7[%c0_34, %c1_35], %51 {strides = array<i32>} : memref<64x4xf32, #tpu.memory_space<vmem>>, vector<64x1xf32>,
    %c0_36 = arith.constant 0 : index
    %c16_37 = arith.constant 16 : index
    %53 = vector.load %arg8[%c0_36, %c16_37] : memref<64x64xf32, #tpu.memory_space<vmem>>, vector<64x16xf32>
    %54 = vector.broadcast %43 : vector<64x1xf32> to vector<64x16xf32>
    %55 = arith.mulf %54, %53 : vector<64x16xf32>
    %56 = arith.truncf %46 : vector<64x64xf32> to vector<64x64xbf16>
    %cst_38 = arith.constant dense<0.000000e+00> : vector<64x16xf32>
    %57 = tpu.matmul %56, %36, %cst_38 {dimension_numbers = #tpu.dot_dimension_numbers<[1], [0], [0], [1], [0, 0, 1, 1], [], []>} : vector<64x64xbf16>, vector<64x16xbf16>, vector<64x16xf32> -> vector<64x16xf32>
    %58 = arith.addf %55, %57 : vector<64x16xf32>
    %c0_39 = arith.constant 0 : index
    %c16_40 = arith.constant 16 : index
    %59 = vector.load %arg8[%c0_39, %c16_40] : memref<64x64xf32, #tpu.memory_space<vmem>>, vector<64x16xf32>
    tpu.vector_store %arg8[%c0_39, %c16_40], %58 {strides = array<i32>} : memref<64x64xf32, #tpu.memory_space<vmem>>, vector<64x16xf32>,
    %c0_41 = arith.constant 0 : index
    %c1_42 = arith.constant 1 : index
    %60 = vector.load %arg6[%c0_41, %c1_42] : memref<64x4xf32, #tpu.memory_space<vmem>>, vector<64x1xf32>
    tpu.vector_store %arg6[%c0_41, %c1_42], %41 {strides = array<i32>} : memref<64x4xf32, #tpu.memory_space<vmem>>, vector<64x1xf32>,
    %c0_43 = arith.constant 0 : index
    %c32 = arith.constant 32 : index
    %61 = vector.load %arg2[%c0_43, %c32] : memref<64x64xbf16, #tpu.memory_space<vmem>>, vector<64x16xbf16>
    %cst_44 = arith.constant 2.500000e-01 : bf16
    %62 = vector.broadcast %cst_44 : bf16 to vector<64x16xbf16>
    %63 = arith.mulf %61, %62 : vector<64x16xbf16>
    %c0_45 = arith.constant 0 : index
    %c32_46 = arith.constant 32 : index
    %64 = vector.load %arg3[%c0_45, %c32_46] : memref<64x64xbf16, #tpu.memory_space<vmem>>, vector<64x16xbf16>
    %c0_47 = arith.constant 0 : index
    %c32_48 = arith.constant 32 : index
    %65 = vector.load %arg4[%c0_47, %c32_48] : memref<64x64xbf16, #tpu.memory_space<vmem>>, vector<64x16xbf16>
    %cst_49 = arith.constant dense<0.000000e+00> : vector<64x64xf32>
    %66 = tpu.matmul %63, %64, %cst_49 {dimension_numbers = #tpu.dot_dimension_numbers<[1], [1], [0], [0], [0, 0, 1, 0], [], []>} : vector<64x16xbf16>, vector<64x16xbf16>, vector<64x64xf32> -> vector<64x64xf32>
    %c0_50 = arith.constant 0 : index
    %c2 = arith.constant 2 : index
    %67 = vector.load %arg6[%c0_50, %c2] : memref<64x4xf32, #tpu.memory_space<vmem>>, vector<64x1xf32>
    %cst_51 = arith.constant dense<0xFF800000> : vector<64xf32>
    %68 = vector.multi_reduction <maximumf>, %66, %cst_51 [1] : vector<64x64xf32> to vector<64xf32>
    %69 = vector.shape_cast %68 : vector<64xf32> to vector<64x1xf32>
    %70 = arith.maximumf %67, %69 : vector<64x1xf32>
    %71 = arith.subf %67, %70 : vector<64x1xf32>
    %72 = math.exp %71 : vector<64x1xf32>
    %73 = vector.broadcast %70 : vector<64x1xf32> to vector<64x64xf32>
    %74 = arith.subf %66, %73 : vector<64x64xf32>
    %75 = math.exp %74 : vector<64x64xf32>
    %c0_52 = arith.constant 0 : index
    %c2_53 = arith.constant 2 : index
    %76 = vector.load %arg7[%c0_52, %c2_53] : memref<64x4xf32, #tpu.memory_space<vmem>>, vector<64x1xf32>
    %77 = arith.mulf %72, %76 : vector<64x1xf32>
    %cst_54 = arith.constant dense<0.000000e+00> : vector<64xf32>
    %78 = vector.multi_reduction <add>, %75, %cst_54 [1] : vector<64x64xf32> to vector<64xf32>
    %79 = vector.shape_cast %78 : vector<64xf32> to vector<64x1xf32>
    %80 = arith.addf %77, %79 : vector<64x1xf32>
    %c0_55 = arith.constant 0 : index
    %c2_56 = arith.constant 2 : index
    %81 = vector.load %arg7[%c0_55, %c2_56] : memref<64x4xf32, #tpu.memory_space<vmem>>, vector<64x1xf32>
    tpu.vector_store %arg7[%c0_55, %c2_56], %80 {strides = array<i32>} : memref<64x4xf32, #tpu.memory_space<vmem>>, vector<64x1xf32>,
    %c0_57 = arith.constant 0 : index
    %c32_58 = arith.constant 32 : index
    %82 = vector.load %arg8[%c0_57, %c32_58] : memref<64x64xf32, #tpu.memory_space<vmem>>, vector<64x16xf32>
    %83 = vector.broadcast %72 : vector<64x1xf32> to vector<64x16xf32>
    %84 = arith.mulf %83, %82 : vector<64x16xf32>
    %85 = arith.truncf %75 : vector<64x64xf32> to vector<64x64xbf16>
    %cst_59 = arith.constant dense<0.000000e+00> : vector<64x16xf32>
    %86 = tpu.matmul %85, %65, %cst_59 {dimension_numbers = #tpu.dot_dimension_numbers<[1], [0], [0], [1], [0, 0, 1, 1], [], []>} : vector<64x64xbf16>, vector<64x16xbf16>, vector<64x16xf32> -> vector<64x16xf32>
    %87 = arith.addf %84, %86 : vector<64x16xf32>
    %c0_60 = arith.constant 0 : index
    %c32_61 = arith.constant 32 : index
    %88 = vector.load %arg8[%c0_60, %c32_61] : memref<64x64xf32, #tpu.memory_space<vmem>>, vector<64x16xf32>
    tpu.vector_store %arg8[%c0_60, %c32_61], %87 {strides = array<i32>} : memref<64x64xf32, #tpu.memory_space<vmem>>, vector<64x16xf32>,
    %c0_62 = arith.constant 0 : index
    %c2_63 = arith.constant 2 : index
    %89 = vector.load %arg6[%c0_62, %c2_63] : memref<64x4xf32, #tpu.memory_space<vmem>>, vector<64x1xf32>
    tpu.vector_store %arg6[%c0_62, %c2_63], %70 {strides = array<i32>} : memref<64x4xf32, #tpu.memory_space<vmem>>, vector<64x1xf32>,
    %c0_64 = arith.constant 0 : index
    %c48 = arith.constant 48 : index
    %90 = vector.load %arg2[%c0_64, %c48] : memref<64x64xbf16, #tpu.memory_space<vmem>>, vector<64x16xbf16>
    %cst_65 = arith.constant 2.500000e-01 : bf16
    %91 = vector.broadcast %cst_65 : bf16 to vector<64x16xbf16>
    %92 = arith.mulf %90, %91 : vector<64x16xbf16>
    %c0_66 = arith.constant 0 : index
    %c48_67 = arith.constant 48 : index
    %93 = vector.load %arg3[%c0_66, %c48_67] : memref<64x64xbf16, #tpu.memory_space<vmem>>, vector<64x16xbf16>
    %c0_68 = arith.constant 0 : index
    %c48_69 = arith.constant 48 : index
    %94 = vector.load %arg4[%c0_68, %c48_69] : memref<64x64xbf16, #tpu.memory_space<vmem>>, vector<64x16xbf16>
    %cst_70 = arith.constant dense<0.000000e+00> : vector<64x64xf32>
    %95 = tpu.matmul %92, %93, %cst_70 {dimension_numbers = #tpu.dot_dimension_numbers<[1], [1], [0], [0], [0, 0, 1, 0], [], []>} : vector<64x16xbf16>, vector<64x16xbf16>, vector<64x64xf32> -> vector<64x64xf32>
    %c0_71 = arith.constant 0 : index
    %c3 = arith.constant 3 : index
    %96 = vector.load %arg6[%c0_71, %c3] : memref<64x4xf32, #tpu.memory_space<vmem>>, vector<64x1xf32>
    %cst_72 = arith.constant dense<0xFF800000> : vector<64xf32>
    %97 = vector.multi_reduction <maximumf>, %95, %cst_72 [1] : vector<64x64xf32> to vector<64xf32>
    %98 = vector.shape_cast %97 : vector<64xf32> to vector<64x1xf32>
    %99 = arith.maximumf %96, %98 : vector<64x1xf32>
    %100 = arith.subf %96, %99 : vector<64x1xf32>
    %101 = math.exp %100 : vector<64x1xf32>
    %102 = vector.broadcast %99 : vector<64x1xf32> to vector<64x64xf32>
    %103 = arith.subf %95, %102 : vector<64x64xf32>
    %104 = math.exp %103 : vector<64x64xf32>
    %c0_73 = arith.constant 0 : index
    %c3_74 = arith.constant 3 : index
    %105 = vector.load %arg7[%c0_73, %c3_74] : memref<64x4xf32, #tpu.memory_space<vmem>>, vector<64x1xf32>
    %106 = arith.mulf %101, %105 : vector<64x1xf32>
    %cst_75 = arith.constant dense<0.000000e+00> : vector<64xf32>
    %107 = vector.multi_reduction <add>, %104, %cst_75 [1] : vector<64x64xf32> to vector<64xf32>
    %108 = vector.shape_cast %107 : vector<64xf32> to vector<64x1xf32>
    %109 = arith.addf %106, %108 : vector<64x1xf32>
    %c0_76 = arith.constant 0 : index
    %c3_77 = arith.constant 3 : index
    %110 = vector.load %arg7[%c0_76, %c3_77] : memref<64x4xf32, #tpu.memory_space<vmem>>, vector<64x1xf32>
    tpu.vector_store %arg7[%c0_76, %c3_77], %109 {strides = array<i32>} : memref<64x4xf32, #tpu.memory_space<vmem>>, vector<64x1xf32>,
    %c0_78 = arith.constant 0 : index
    %c48_79 = arith.constant 48 : index
    %111 = vector.load %arg8[%c0_78, %c48_79] : memref<64x64xf32, #tpu.memory_space<vmem>>, vector<64x16xf32>
    %112 = vector.broadcast %101 : vector<64x1xf32> to vector<64x16xf32>
    %113 = arith.mulf %112, %111 : vector<64x16xf32>
    %114 = arith.truncf %104 : vector<64x64xf32> to vector<64x64xbf16>
    %cst_80 = arith.constant dense<0.000000e+00> : vector<64x16xf32>
    %115 = tpu.matmul %114, %94, %cst_80 {dimension_numbers = #tpu.dot_dimension_numbers<[1], [0], [0], [1], [0, 0, 1, 1], [], []>} : vector<64x64xbf16>, vector<64x16xbf16>, vector<64x16xf32> -> vector<64x16xf32>
    %116 = arith.addf %113, %115 : vector<64x16xf32>
    %c0_81 = arith.constant 0 : index
    %c48_82 = arith.constant 48 : index
    %117 = vector.load %arg8[%c0_81, %c48_82] : memref<64x64xf32, #tpu.memory_space<vmem>>, vector<64x16xf32>
    tpu.vector_store %arg8[%c0_81, %c48_82], %116 {strides = array<i32>} : memref<64x64xf32, #tpu.memory_space<vmem>>, vector<64x16xf32>,
    %c0_83 = arith.constant 0 : index
    %c3_84 = arith.constant 3 : index
    %118 = vector.load %arg6[%c0_83, %c3_84] : memref<64x4xf32, #tpu.memory_space<vmem>>, vector<64x1xf32>
    tpu.vector_store %arg6[%c0_83, %c3_84], %99 {strides = array<i32>} : memref<64x4xf32, #tpu.memory_space<vmem>>, vector<64x1xf32>,
    %c0_i32_85 = arith.constant 0 : i32
    %119 = arith.cmpi eq, %arg1, %c0_i32_85 : i32
    %120 = arith.extui %119 : i1 to i32
    %c0_i32_86 = arith.constant 0 : i32
    %121 = arith.cmpi ne, %120, %c0_i32_86 : i32
    scf.if %121 {
      %c0_87 = arith.constant 0 : index
      %c0_88 = arith.constant 0 : index
      %122 = vector.load %arg7[%c0_87, %c0_88] : memref<64x4xf32, #tpu.memory_space<vmem>>, vector<64x1xf32>
      %123 = tpu.reciprocal %122 {approx = true} : vector<64x1xf32> -> vector<64x1xf32>
      %c0_89 = arith.constant 0 : index
      %c0_90 = arith.constant 0 : index
      %124 = vector.load %arg8[%c0_89, %c0_90] : memref<64x64xf32, #tpu.memory_space<vmem>>, vector<64x16xf32>
      %125 = vector.broadcast %123 : vector<64x1xf32> to vector<64x16xf32>
      %126 = arith.mulf %124, %125 : vector<64x16xf32>
      %c0_91 = arith.constant 0 : index
      %c0_92 = arith.constant 0 : index
      %127 = vector.load %arg8[%c0_91, %c0_92] : memref<64x64xf32, #tpu.memory_space<vmem>>, vector<64x16xf32>
      tpu.vector_store %arg8[%c0_91, %c0_92], %126 {strides = array<i32>} : memref<64x64xf32, #tpu.memory_space<vmem>>, vector<64x16xf32>,
      %c0_93 = arith.constant 0 : index
      %c1_94 = arith.constant 1 : index
      %128 = vector.load %arg7[%c0_93, %c1_94] : memref<64x4xf32, #tpu.memory_space<vmem>>, vector<64x1xf32>
      %129 = tpu.reciprocal %128 {approx = true} : vector<64x1xf32> -> vector<64x1xf32>
      %c0_95 = arith.constant 0 : index
      %c16_96 = arith.constant 16 : index
      %130 = vector.load %arg8[%c0_95, %c16_96] : memref<64x64xf32, #tpu.memory_space<vmem>>, vector<64x16xf32>
      %131 = vector.broadcast %129 : vector<64x1xf32> to vector<64x16xf32>
      %132 = arith.mulf %130, %131 : vector<64x16xf32>
      %c0_97 = arith.constant 0 : index
      %c16_98 = arith.constant 16 : index
      %133 = vector.load %arg8[%c0_97, %c16_98] : memref<64x64xf32, #tpu.memory_space<vmem>>, vector<64x16xf32>
      tpu.vector_store %arg8[%c0_97, %c16_98], %132 {strides = array<i32>} : memref<64x64xf32, #tpu.memory_space<vmem>>, vector<64x16xf32>,
      %c0_99 = arith.constant 0 : index
      %c2_100 = arith.constant 2 : index
      %134 = vector.load %arg7[%c0_99, %c2_100] : memref<64x4xf32, #tpu.memory_space<vmem>>, vector<64x1xf32>
      %135 = tpu.reciprocal %134 {approx = true} : vector<64x1xf32> -> vector<64x1xf32>
      %c0_101 = arith.constant 0 : index
      %c32_102 = arith.constant 32 : index
      %136 = vector.load %arg8[%c0_101, %c32_102] : memref<64x64xf32, #tpu.memory_space<vmem>>, vector<64x16xf32>
      %137 = vector.broadcast %135 : vector<64x1xf32> to vector<64x16xf32>
      %138 = arith.mulf %136, %137 : vector<64x16xf32>
      %c0_103 = arith.constant 0 : index
      %c32_104 = arith.constant 32 : index
      %139 = vector.load %arg8[%c0_103, %c32_104] : memref<64x64xf32, #tpu.memory_space<vmem>>, vector<64x16xf32>
      tpu.vector_store %arg8[%c0_103, %c32_104], %138 {strides = array<i32>} : memref<64x64xf32, #tpu.memory_space<vmem>>, vector<64x16xf32>,
      %c0_105 = arith.constant 0 : index
      %c3_106 = arith.constant 3 : index
      %140 = vector.load %arg7[%c0_105, %c3_106] : memref<64x4xf32, #tpu.memory_space<vmem>>, vector<64x1xf32>
      %141 = tpu.reciprocal %140 {approx = true} : vector<64x1xf32> -> vector<64x1xf32>
      %c0_107 = arith.constant 0 : index
      %c48_108 = arith.constant 48 : index
      %142 = vector.load %arg8[%c0_107, %c48_108] : memref<64x64xf32, #tpu.memory_space<vmem>>, vector<64x16xf32>
      %143 = vector.broadcast %141 : vector<64x1xf32> to vector<64x16xf32>
      %144 = arith.mulf %142, %143 : vector<64x16xf32>
      %c0_109 = arith.constant 0 : index
      %c48_110 = arith.constant 48 : index
      %145 = vector.load %arg8[%c0_109, %c48_110] : memref<64x64xf32, #tpu.memory_space<vmem>>, vector<64x16xf32>
      tpu.vector_store %arg8[%c0_109, %c48_110], %144 {strides = array<i32>} : memref<64x64xf32, #tpu.memory_space<vmem>>, vector<64x16xf32>,
      %c0_111 = arith.constant 0 : index
      %c0_112 = arith.constant 0 : index
      %146 = vector.load %arg8[%c0_111, %c0_112] : memref<64x64xf32, #tpu.memory_space<vmem>>, vector<64x64xf32>
      %147 = arith.truncf %146 : vector<64x64xf32> to vector<64x64xbf16>
      %c0_113 = arith.constant 0 : index
      %c0_114 = arith.constant 0 : index
      %148 = vector.load %arg5[%c0_113, %c0_114] : memref<64x64xbf16, #tpu.memory_space<vmem>>, vector<64x64xbf16>
      tpu.vector_store %arg5[%c0_113, %c0_114], %147 {strides = array<i32>} : memref<64x64xbf16, #tpu.memory_space<vmem>>, vector<64x64xbf16>,
    } else {
    }
    return
  }
  func.func @transform_0(%arg0: i32, %arg1: i32) -> (i32, i32) {
    %c0_i32 = arith.constant 0 : i32
    %c0_i32_0 = arith.constant 0 : i32
    return %arg0, %c0_i32 : i32, i32
  }
  func.func @transform_1(%arg0: i32, %arg1: i32) -> (i32, i32) {
    %c0_i32 = arith.constant 0 : i32
    %c0_i32_0 = arith.constant 0 : i32
    return %arg1, %c0_i32 : i32, i32
  }
  func.func @transform_2(%arg0: i32, %arg1: i32) -> (i32, i32) {
    %c0_i32 = arith.constant 0 : i32
    %c0_i32_0 = arith.constant 0 : i32
    return %arg1, %c0_i32 : i32, i32
  }
  func.func @transform_3(%arg0: i32, %arg1: i32) -> (i32, i32) {
    %c0_i32 = arith.constant 0 : i32
    %c0_i32_0 = arith.constant 0 : i32
    return %arg0, %c0_i32 : i32, i32
  }
}

module attributes {stable_mosaic.version = 11 : i64} {
  func.func @_linear_1pass_kernel(%arg0: i32, %arg1: i32, %arg2: memref<64x64xbf16, #tpu.memory_space<vmem>>, %arg3: memref<64x64xbf16, #tpu.memory_space<vmem>>, %arg4: memref<1x64xf32, #tpu.memory_space<vmem>>, %arg5: memref<64x64xbf16, #tpu.memory_space<vmem>>, %arg6: memref<64x64xbf16, #tpu.memory_space<vmem>>) attributes {dimension_semantics = [#tpu.dimension_semantics<parallel>, #tpu.dimension_semantics<parallel>], iteration_bounds = array<i64: 1, 1>, scalar_prefetch = 0 : i64, scratch_operands = 0 : i64, tpu.core_type = #tpu.core_type<tc>, window_params = [{transform_indices = @transform_0, window_bounds = array<i64: 64, 64>}, {transform_indices = @transform_1, window_bounds = array<i64: 64, 64>}, {transform_indices = @transform_2, window_bounds = array<i64: 1, 64>}, {transform_indices = @transform_3, window_bounds = array<i64: 64, 64>}, {transform_indices = @transform_4, window_bounds = array<i64: 64, 64>}]} {
    %c0 = arith.constant 0 : index
    %c0_0 = arith.constant 0 : index
    %0 = vector.load %arg2[%c0, %c0_0] : memref<64x64xbf16, #tpu.memory_space<vmem>>, vector<64x64xbf16>
    %c0_1 = arith.constant 0 : index
    %c0_2 = arith.constant 0 : index
    %1 = vector.load %arg3[%c0_1, %c0_2] : memref<64x64xbf16, #tpu.memory_space<vmem>>, vector<64x64xbf16>
    %cst = arith.constant dense<0.000000e+00> : vector<64x64xf32>
    %2 = tpu.matmul %0, %1, %cst {dimension_numbers = #tpu.dot_dimension_numbers<[1], [0], [0], [1], [0, 0, 1, 1], [], []>} : vector<64x64xbf16>, vector<64x64xbf16>, vector<64x64xf32> -> vector<64x64xf32>
    %c0_3 = arith.constant 0 : index
    %c0_4 = arith.constant 0 : index
    %3 = vector.load %arg4[%c0_3, %c0_4] : memref<1x64xf32, #tpu.memory_space<vmem>>, vector<1x64xf32>
    %4 = vector.broadcast %3 : vector<1x64xf32> to vector<64x64xf32>
    %5 = arith.addf %2, %4 : vector<64x64xf32>
    %c0_5 = arith.constant 0 : index
    %c0_6 = arith.constant 0 : index
    %6 = vector.load %arg5[%c0_5, %c0_6] : memref<64x64xbf16, #tpu.memory_space<vmem>>, vector<64x64xbf16>
    %7 = arith.extf %6 : vector<64x64xbf16> to vector<64x64xf32>
    %8 = arith.addf %5, %7 : vector<64x64xf32>
    %9 = arith.truncf %8 : vector<64x64xf32> to vector<64x64xbf16>
    %c0_7 = arith.constant 0 : index
    %c0_8 = arith.constant 0 : index
    %10 = vector.load %arg6[%c0_7, %c0_8] : memref<64x64xbf16, #tpu.memory_space<vmem>>, vector<64x64xbf16>
    tpu.vector_store %arg6[%c0_7, %c0_8], %9 {strides = array<i32>} : memref<64x64xbf16, #tpu.memory_space<vmem>>, vector<64x64xbf16>,
    return
  }
  func.func @transform_0(%arg0: i32, %arg1: i32) -> (i32, i32) {
    %c0_i32 = arith.constant 0 : i32
    %c0_i32_0 = arith.constant 0 : i32
    return %arg0, %c0_i32 : i32, i32
  }
  func.func @transform_1(%arg0: i32, %arg1: i32) -> (i32, i32) {
    %c0_i32 = arith.constant 0 : i32
    %c0_i32_0 = arith.constant 0 : i32
    return %c0_i32, %arg1 : i32, i32
  }
  func.func @transform_2(%arg0: i32, %arg1: i32) -> (i32, i32) {
    %c0_i32 = arith.constant 0 : i32
    %c0_i32_0 = arith.constant 0 : i32
    return %c0_i32, %arg1 : i32, i32
  }
  func.func @transform_3(%arg0: i32, %arg1: i32) -> (i32, i32) {
    %c0_i32 = arith.constant 0 : i32
    return %arg0, %arg1 : i32, i32
  }
  func.func @transform_4(%arg0: i32, %arg1: i32) -> (i32, i32) {
    %c0_i32 = arith.constant 0 : i32
    return %arg0, %arg1 : i32, i32
  }
}

module attributes {stable_mosaic.version = 11 : i64} {
  func.func @_linear_1pass_kernel(%arg0: i32, %arg1: i32, %arg2: memref<64x64xbf16, #tpu.memory_space<vmem>>, %arg3: memref<64x256xbf16, #tpu.memory_space<vmem>>, %arg4: memref<1x256xf32, #tpu.memory_space<vmem>>, %arg5: memref<1x64xf32, #tpu.memory_space<vmem>>, %arg6: memref<1x64xf32, #tpu.memory_space<vmem>>, %arg7: memref<64x256xbf16, #tpu.memory_space<vmem>>) attributes {dimension_semantics = [#tpu.dimension_semantics<parallel>, #tpu.dimension_semantics<parallel>], iteration_bounds = array<i64: 1, 1>, scalar_prefetch = 0 : i64, scratch_operands = 0 : i64, tpu.core_type = #tpu.core_type<tc>, window_params = [{transform_indices = @transform_0, window_bounds = array<i64: 64, 64>}, {transform_indices = @transform_1, window_bounds = array<i64: 64, 256>}, {transform_indices = @transform_2, window_bounds = array<i64: 1, 256>}, {pipeline_mode = #tpu.pipeline_mode<synchronous>, transform_indices = @transform_3, window_bounds = array<i64: 1, 64>}, {pipeline_mode = #tpu.pipeline_mode<synchronous>, transform_indices = @transform_4, window_bounds = array<i64: 1, 64>}, {transform_indices = @transform_5, window_bounds = array<i64: 64, 256>}]} {
    %c0 = arith.constant 0 : index
    %c0_0 = arith.constant 0 : index
    %0 = vector.load %arg2[%c0, %c0_0] : memref<64x64xbf16, #tpu.memory_space<vmem>>, vector<64x64xbf16>
    %1 = arith.extf %0 : vector<64x64xbf16> to vector<64x64xf32>
    %cst = arith.constant dense<0.000000e+00> : vector<64xf32>
    %2 = vector.multi_reduction <add>, %1, %cst [1] : vector<64x64xf32> to vector<64xf32>
    %3 = vector.shape_cast %2 : vector<64xf32> to vector<64x1xf32>
    %cst_1 = arith.constant 6.400000e+01 : f32
    %4 = vector.broadcast %cst_1 : f32 to vector<64x1xf32>
    %5 = arith.divf %3, %4 : vector<64x1xf32>
    %6 = vector.broadcast %5 : vector<64x1xf32> to vector<64x64xf32>
    %7 = arith.subf %1, %6 : vector<64x64xf32>
    %8 = arith.mulf %7, %7 : vector<64x64xf32>
    %cst_2 = arith.constant dense<0.000000e+00> : vector<64xf32>
    %9 = vector.multi_reduction <add>, %8, %cst_2 [1] : vector<64x64xf32> to vector<64xf32>
    %10 = vector.shape_cast %9 : vector<64xf32> to vector<64x1xf32>
    %cst_3 = arith.constant 6.400000e+01 : f32
    %11 = vector.broadcast %cst_3 : f32 to vector<64x1xf32>
    %12 = arith.divf %10, %11 : vector<64x1xf32>
    %13 = vector.broadcast %5 : vector<64x1xf32> to vector<64x64xf32>
    %14 = arith.subf %1, %13 : vector<64x64xf32>
    %cst_4 = arith.constant 9.99999997E-7 : f32
    %15 = vector.broadcast %cst_4 : f32 to vector<64x1xf32>
    %16 = arith.addf %12, %15 : vector<64x1xf32>
    %17 = math.rsqrt %16 : vector<64x1xf32>
    %18 = vector.broadcast %17 : vector<64x1xf32> to vector<64x64xf32>
    %19 = arith.mulf %14, %18 : vector<64x64xf32>
    %c0_5 = arith.constant 0 : index
    %c0_6 = arith.constant 0 : index
    %20 = vector.load %arg5[%c0_5, %c0_6] : memref<1x64xf32, #tpu.memory_space<vmem>>, vector<1x64xf32>
    %21 = vector.broadcast %20 : vector<1x64xf32> to vector<64x64xf32>
    %22 = arith.mulf %19, %21 : vector<64x64xf32>
    %c0_7 = arith.constant 0 : index
    %c0_8 = arith.constant 0 : index
    %23 = vector.load %arg6[%c0_7, %c0_8] : memref<1x64xf32, #tpu.memory_space<vmem>>, vector<1x64xf32>
    %24 = vector.broadcast %23 : vector<1x64xf32> to vector<64x64xf32>
    %25 = arith.addf %22, %24 : vector<64x64xf32>
    %26 = arith.truncf %25 : vector<64x64xf32> to vector<64x64xbf16>
    %c0_9 = arith.constant 0 : index
    %c0_10 = arith.constant 0 : index
    %27 = vector.load %arg3[%c0_9, %c0_10] : memref<64x256xbf16, #tpu.memory_space<vmem>>, vector<64x256xbf16>
    %cst_11 = arith.constant dense<0.000000e+00> : vector<64x256xf32>
    %28 = tpu.matmul %26, %27, %cst_11 {dimension_numbers = #tpu.dot_dimension_numbers<[1], [0], [0], [1], [0, 0, 1, 1], [], []>} : vector<64x64xbf16>, vector<64x256xbf16>, vector<64x256xf32> -> vector<64x256xf32>
    %c0_12 = arith.constant 0 : index
    %c0_13 = arith.constant 0 : index
    %29 = vector.load %arg4[%c0_12, %c0_13] : memref<1x256xf32, #tpu.memory_space<vmem>>, vector<1x256xf32>
    %30 = vector.broadcast %29 : vector<1x256xf32> to vector<64x256xf32>
    %31 = arith.addf %28, %30 : vector<64x256xf32>
    %32 = arith.mulf %31, %31 : vector<64x256xf32>
    %33 = arith.mulf %31, %32 : vector<64x256xf32>
    %cst_14 = arith.constant 4.471500e-02 : f32
    %34 = vector.broadcast %cst_14 : f32 to vector<64x256xf32>
    %35 = arith.mulf %34, %33 : vector<64x256xf32>
    %36 = arith.addf %31, %35 : vector<64x256xf32>
    %cst_15 = arith.constant 0.797884583 : f32
    %37 = vector.broadcast %cst_15 : f32 to vector<64x256xf32>
    %38 = arith.mulf %37, %36 : vector<64x256xf32>
    %39 = math.tanh %38 : vector<64x256xf32>
    %cst_16 = arith.constant 1.000000e+00 : f32
    %40 = vector.broadcast %cst_16 : f32 to vector<64x256xf32>
    %41 = arith.addf %40, %39 : vector<64x256xf32>
    %cst_17 = arith.constant 5.000000e-01 : f32
    %42 = vector.broadcast %cst_17 : f32 to vector<64x256xf32>
    %43 = arith.mulf %42, %41 : vector<64x256xf32>
    %44 = arith.mulf %31, %43 : vector<64x256xf32>
    %45 = arith.truncf %44 : vector<64x256xf32> to vector<64x256xbf16>
    %c0_18 = arith.constant 0 : index
    %c0_19 = arith.constant 0 : index
    %46 = vector.load %arg7[%c0_18, %c0_19] : memref<64x256xbf16, #tpu.memory_space<vmem>>, vector<64x256xbf16>
    tpu.vector_store %arg7[%c0_18, %c0_19], %45 {strides = array<i32>} : memref<64x256xbf16, #tpu.memory_space<vmem>>, vector<64x256xbf16>,
    return
  }
  func.func @transform_0(%arg0: i32, %arg1: i32) -> (i32, i32) {
    %c0_i32 = arith.constant 0 : i32
    %c0_i32_0 = arith.constant 0 : i32
    return %arg0, %c0_i32 : i32, i32
  }
  func.func @transform_1(%arg0: i32, %arg1: i32) -> (i32, i32) {
    %c0_i32 = arith.constant 0 : i32
    %c0_i32_0 = arith.constant 0 : i32
    return %c0_i32, %arg1 : i32, i32
  }
  func.func @transform_2(%arg0: i32, %arg1: i32) -> (i32, i32) {
    %c0_i32 = arith.constant 0 : i32
    %c0_i32_0 = arith.constant 0 : i32
    return %c0_i32, %arg1 : i32, i32
  }
  func.func @transform_3(%arg0: i32, %arg1: i32) -> (i32, i32) {
    %c0_i32 = arith.constant 0 : i32
    %c0_i32_0 = arith.constant 0 : i32
    %c0_i32_1 = arith.constant 0 : i32
    return %c0_i32, %c0_i32_0 : i32, i32
  }
  func.func @transform_4(%arg0: i32, %arg1: i32) -> (i32, i32) {
    %c0_i32 = arith.constant 0 : i32
    %c0_i32_0 = arith.constant 0 : i32
    %c0_i32_1 = arith.constant 0 : i32
    return %c0_i32, %c0_i32_0 : i32, i32
  }
  func.func @transform_5(%arg0: i32, %arg1: i32) -> (i32, i32) {
    %c0_i32 = arith.constant 0 : i32
    return %arg0, %arg1 : i32, i32
  }
}

module attributes {stable_mosaic.version = 11 : i64} {
  func.func @_linear_1pass_kernel(%arg0: i32, %arg1: i32, %arg2: memref<64x256xbf16, #tpu.memory_space<vmem>>, %arg3: memref<256x64xbf16, #tpu.memory_space<vmem>>, %arg4: memref<1x64xf32, #tpu.memory_space<vmem>>, %arg5: memref<64x64xbf16, #tpu.memory_space<vmem>>, %arg6: memref<64x64xbf16, #tpu.memory_space<vmem>>) attributes {dimension_semantics = [#tpu.dimension_semantics<parallel>, #tpu.dimension_semantics<parallel>], iteration_bounds = array<i64: 1, 1>, scalar_prefetch = 0 : i64, scratch_operands = 0 : i64, tpu.core_type = #tpu.core_type<tc>, window_params = [{transform_indices = @transform_0, window_bounds = array<i64: 64, 256>}, {transform_indices = @transform_1, window_bounds = array<i64: 256, 64>}, {transform_indices = @transform_2, window_bounds = array<i64: 1, 64>}, {transform_indices = @transform_3, window_bounds = array<i64: 64, 64>}, {transform_indices = @transform_4, window_bounds = array<i64: 64, 64>}]} {
    %c0 = arith.constant 0 : index
    %c0_0 = arith.constant 0 : index
    %0 = vector.load %arg2[%c0, %c0_0] : memref<64x256xbf16, #tpu.memory_space<vmem>>, vector<64x256xbf16>
    %c0_1 = arith.constant 0 : index
    %c0_2 = arith.constant 0 : index
    %1 = vector.load %arg3[%c0_1, %c0_2] : memref<256x64xbf16, #tpu.memory_space<vmem>>, vector<256x64xbf16>
    %cst = arith.constant dense<0.000000e+00> : vector<64x64xf32>
    %2 = tpu.matmul %0, %1, %cst {dimension_numbers = #tpu.dot_dimension_numbers<[1], [0], [0], [1], [0, 0, 1, 1], [], []>} : vector<64x256xbf16>, vector<256x64xbf16>, vector<64x64xf32> -> vector<64x64xf32>
    %c0_3 = arith.constant 0 : index
    %c0_4 = arith.constant 0 : index
    %3 = vector.load %arg4[%c0_3, %c0_4] : memref<1x64xf32, #tpu.memory_space<vmem>>, vector<1x64xf32>
    %4 = vector.broadcast %3 : vector<1x64xf32> to vector<64x64xf32>
    %5 = arith.addf %2, %4 : vector<64x64xf32>
    %c0_5 = arith.constant 0 : index
    %c0_6 = arith.constant 0 : index
    %6 = vector.load %arg5[%c0_5, %c0_6] : memref<64x64xbf16, #tpu.memory_space<vmem>>, vector<64x64xbf16>
    %7 = arith.extf %6 : vector<64x64xbf16> to vector<64x64xf32>
    %8 = arith.addf %5, %7 : vector<64x64xf32>
    %9 = arith.truncf %8 : vector<64x64xf32> to vector<64x64xbf16>
    %c0_7 = arith.constant 0 : index
    %c0_8 = arith.constant 0 : index
    %10 = vector.load %arg6[%c0_7, %c0_8] : memref<64x64xbf16, #tpu.memory_space<vmem>>, vector<64x64xbf16>
    tpu.vector_store %arg6[%c0_7, %c0_8], %9 {strides = array<i32>} : memref<64x64xbf16, #tpu.memory_space<vmem>>, vector<64x64xbf16>,
    return
  }
  func.func @transform_0(%arg0: i32, %arg1: i32) -> (i32, i32) {
    %c0_i32 = arith.constant 0 : i32
    %c0_i32_0 = arith.constant 0 : i32
    return %arg0, %c0_i32 : i32, i32
  }
  func.func @transform_1(%arg0: i32, %arg1: i32) -> (i32, i32) {
    %c0_i32 = arith.constant 0 : i32
    %c0_i32_0 = arith.constant 0 : i32
    return %c0_i32, %arg1 : i32, i32
  }
  func.func @transform_2(%arg0: i32, %arg1: i32) -> (i32, i32) {
    %c0_i32 = arith.constant 0 : i32
    %c0_i32_0 = arith.constant 0 : i32
    return %c0_i32, %arg1 : i32, i32
  }
  func.func @transform_3(%arg0: i32, %arg1: i32) -> (i32, i32) {
    %c0_i32 = arith.constant 0 : i32
    return %arg0, %arg1 : i32, i32
  }
  func.func @transform_4(%arg0: i32, %arg1: i32) -> (i32, i32) {
    %c0_i32 = arith.constant 0 : i32
    return %arg0, %arg1 : i32, i32
  }
}

module attributes {stable_mosaic.version = 11 : i64} {
  func.func @_linear_1pass_kernel(%arg0: i32, %arg1: i32, %arg2: memref<64x64xbf16, #tpu.memory_space<vmem>>, %arg3: memref<64x64xbf16, #tpu.memory_space<vmem>>, %arg4: memref<1x64xf32, #tpu.memory_space<vmem>>, %arg5: memref<64x64xbf16, #tpu.memory_space<vmem>>) attributes {dimension_semantics = [#tpu.dimension_semantics<parallel>, #tpu.dimension_semantics<parallel>], iteration_bounds = array<i64: 1, 1>, scalar_prefetch = 0 : i64, scratch_operands = 0 : i64, tpu.core_type = #tpu.core_type<tc>, window_params = [{transform_indices = @transform_0, window_bounds = array<i64: 64, 64>}, {transform_indices = @transform_1, window_bounds = array<i64: 64, 64>}, {transform_indices = @transform_2, window_bounds = array<i64: 1, 64>}, {transform_indices = @transform_3, window_bounds = array<i64: 64, 64>}]} {
    %c0 = arith.constant 0 : index
    %c0_0 = arith.constant 0 : index
    %0 = vector.load %arg2[%c0, %c0_0] : memref<64x64xbf16, #tpu.memory_space<vmem>>, vector<64x64xbf16>
    %c0_1 = arith.constant 0 : index
    %c0_2 = arith.constant 0 : index
    %1 = vector.load %arg3[%c0_1, %c0_2] : memref<64x64xbf16, #tpu.memory_space<vmem>>, vector<64x64xbf16>
    %cst = arith.constant dense<0.000000e+00> : vector<64x64xf32>
    %2 = tpu.matmul %0, %1, %cst {dimension_numbers = #tpu.dot_dimension_numbers<[1], [0], [0], [1], [0, 0, 1, 1], [], []>} : vector<64x64xbf16>, vector<64x64xbf16>, vector<64x64xf32> -> vector<64x64xf32>
    %c0_3 = arith.constant 0 : index
    %c0_4 = arith.constant 0 : index
    %3 = vector.load %arg4[%c0_3, %c0_4] : memref<1x64xf32, #tpu.memory_space<vmem>>, vector<1x64xf32>
    %4 = vector.broadcast %3 : vector<1x64xf32> to vector<64x64xf32>
    %5 = arith.addf %2, %4 : vector<64x64xf32>
    %6 = arith.truncf %5 : vector<64x64xf32> to vector<64x64xbf16>
    %c0_5 = arith.constant 0 : index
    %c0_6 = arith.constant 0 : index
    %7 = vector.load %arg5[%c0_5, %c0_6] : memref<64x64xbf16, #tpu.memory_space<vmem>>, vector<64x64xbf16>
    tpu.vector_store %arg5[%c0_5, %c0_6], %6 {strides = array<i32>} : memref<64x64xbf16, #tpu.memory_space<vmem>>, vector<64x64xbf16>,
    return
  }
  func.func @transform_0(%arg0: i32, %arg1: i32) -> (i32, i32) {
    %c0_i32 = arith.constant 0 : i32
    %c0_i32_0 = arith.constant 0 : i32
    return %arg0, %c0_i32 : i32, i32
  }
  func.func @transform_1(%arg0: i32, %arg1: i32) -> (i32, i32) {
    %c0_i32 = arith.constant 0 : i32
    %c0_i32_0 = arith.constant 0 : i32
    return %c0_i32, %arg1 : i32, i32
  }
  func.func @transform_2(%arg0: i32, %arg1: i32) -> (i32, i32) {
    %c0_i32 = arith.constant 0 : i32
    %c0_i32_0 = arith.constant 0 : i32
    return %c0_i32, %arg1 : i32, i32
  }
  func.func @transform_3(%arg0: i32, %arg1: i32) -> (i32, i32) {
    %c0_i32 = arith.constant 0 : i32
    return %arg0, %arg1 : i32, i32
  }
}

module attributes {stable_mosaic.version = 11 : i64} {
  func.func @_layernorm_kernel(%arg0: i32, %arg1: memref<64x64xbf16, #tpu.memory_space<vmem>>, %arg2: memref<1x64xf32, #tpu.memory_space<vmem>>, %arg3: memref<1x64xf32, #tpu.memory_space<vmem>>, %arg4: memref<64x64xbf16, #tpu.memory_space<vmem>>) attributes {dimension_semantics = [#tpu.dimension_semantics<parallel>], iteration_bounds = array<i64: 1>, scalar_prefetch = 0 : i64, scratch_operands = 0 : i64, tpu.core_type = #tpu.core_type<tc>, window_params = [{transform_indices = @transform_0, window_bounds = array<i64: 64, 64>}, {pipeline_mode = #tpu.pipeline_mode<synchronous>, transform_indices = @transform_1, window_bounds = array<i64: 1, 64>}, {pipeline_mode = #tpu.pipeline_mode<synchronous>, transform_indices = @transform_2, window_bounds = array<i64: 1, 64>}, {transform_indices = @transform_3, window_bounds = array<i64: 64, 64>}]} {
    %c0 = arith.constant 0 : index
    %c0_0 = arith.constant 0 : index
    %0 = vector.load %arg1[%c0, %c0_0] : memref<64x64xbf16, #tpu.memory_space<vmem>>, vector<64x64xbf16>
    %1 = arith.extf %0 : vector<64x64xbf16> to vector<64x64xf32>
    %cst = arith.constant dense<0.000000e+00> : vector<64xf32>
    %2 = vector.multi_reduction <add>, %1, %cst [1] : vector<64x64xf32> to vector<64xf32>
    %3 = vector.shape_cast %2 : vector<64xf32> to vector<64x1xf32>
    %cst_1 = arith.constant 6.400000e+01 : f32
    %4 = vector.broadcast %cst_1 : f32 to vector<64x1xf32>
    %5 = arith.divf %3, %4 : vector<64x1xf32>
    %6 = vector.broadcast %5 : vector<64x1xf32> to vector<64x64xf32>
    %7 = arith.subf %1, %6 : vector<64x64xf32>
    %8 = arith.mulf %7, %7 : vector<64x64xf32>
    %cst_2 = arith.constant dense<0.000000e+00> : vector<64xf32>
    %9 = vector.multi_reduction <add>, %8, %cst_2 [1] : vector<64x64xf32> to vector<64xf32>
    %10 = vector.shape_cast %9 : vector<64xf32> to vector<64x1xf32>
    %cst_3 = arith.constant 6.400000e+01 : f32
    %11 = vector.broadcast %cst_3 : f32 to vector<64x1xf32>
    %12 = arith.divf %10, %11 : vector<64x1xf32>
    %13 = vector.broadcast %5 : vector<64x1xf32> to vector<64x64xf32>
    %14 = arith.subf %1, %13 : vector<64x64xf32>
    %cst_4 = arith.constant 9.99999997E-7 : f32
    %15 = vector.broadcast %cst_4 : f32 to vector<64x1xf32>
    %16 = arith.addf %12, %15 : vector<64x1xf32>
    %17 = math.rsqrt %16 : vector<64x1xf32>
    %18 = vector.broadcast %17 : vector<64x1xf32> to vector<64x64xf32>
    %19 = arith.mulf %14, %18 : vector<64x64xf32>
    %c0_5 = arith.constant 0 : index
    %c0_6 = arith.constant 0 : index
    %20 = vector.load %arg2[%c0_5, %c0_6] : memref<1x64xf32, #tpu.memory_space<vmem>>, vector<1x64xf32>
    %21 = vector.broadcast %20 : vector<1x64xf32> to vector<64x64xf32>
    %22 = arith.mulf %19, %21 : vector<64x64xf32>
    %c0_7 = arith.constant 0 : index
    %c0_8 = arith.constant 0 : index
    %23 = vector.load %arg3[%c0_7, %c0_8] : memref<1x64xf32, #tpu.memory_space<vmem>>, vector<1x64xf32>
    %24 = vector.broadcast %23 : vector<1x64xf32> to vector<64x64xf32>
    %25 = arith.addf %22, %24 : vector<64x64xf32>
    %26 = arith.truncf %25 : vector<64x64xf32> to vector<64x64xbf16>
    %c0_9 = arith.constant 0 : index
    %c0_10 = arith.constant 0 : index
    %27 = vector.load %arg4[%c0_9, %c0_10] : memref<64x64xbf16, #tpu.memory_space<vmem>>, vector<64x64xbf16>
    tpu.vector_store %arg4[%c0_9, %c0_10], %26 {strides = array<i32>} : memref<64x64xbf16, #tpu.memory_space<vmem>>, vector<64x64xbf16>,
    return
  }
  func.func @transform_0(%arg0: i32) -> (i32, i32) {
    %c0_i32 = arith.constant 0 : i32
    %c0_i32_0 = arith.constant 0 : i32
    return %arg0, %c0_i32 : i32, i32
  }
  func.func @transform_1(%arg0: i32) -> (i32, i32) {
    %c0_i32 = arith.constant 0 : i32
    %c0_i32_0 = arith.constant 0 : i32
    %c0_i32_1 = arith.constant 0 : i32
    return %c0_i32, %c0_i32_0 : i32, i32
  }
  func.func @transform_2(%arg0: i32) -> (i32, i32) {
    %c0_i32 = arith.constant 0 : i32
    %c0_i32_0 = arith.constant 0 : i32
    %c0_i32_1 = arith.constant 0 : i32
    return %c0_i32, %c0_i32_0 : i32, i32
  }
  func.func @transform_3(%arg0: i32) -> (i32, i32) {
    %c0_i32 = arith.constant 0 : i32
    %c0_i32_0 = arith.constant 0 : i32
    return %arg0, %c0_i32 : i32, i32
  }
}

module attributes {stable_mosaic.version = 11 : i64} {
  func.func @_conv3x3_kernel(%arg0: i32, %arg1: memref<10x10x64xbf16, #tpu.memory_space<vmem>>, %arg2: memref<9x64x64xbf16, #tpu.memory_space<vmem>>, %arg3: memref<64x64xbf16, #tpu.memory_space<vmem>>) attributes {dimension_semantics = [#tpu.dimension_semantics<parallel>], iteration_bounds = array<i64: 1>, scalar_prefetch = 0 : i64, scratch_operands = 0 : i64, tpu.core_type = #tpu.core_type<tc>, window_params = [{pipeline_mode = #tpu.pipeline_mode<synchronous>, transform_indices = @transform_0, window_bounds = array<i64: 10, 10, 64>}, {pipeline_mode = #tpu.pipeline_mode<synchronous>, transform_indices = @transform_1, window_bounds = array<i64: 9, 64, 64>}, {transform_indices = @transform_2, window_bounds = array<i64: 64, 64>}]} {
    %c8_i32 = arith.constant 8 : i32
    %0 = arith.muli %arg0, %c8_i32 : i32
    %c0_i32 = arith.constant 0 : i32
    %1 = arith.addi %0, %c0_i32 : i32
    %2 = arith.index_cast %1 : i32 to index
    %c0 = arith.constant 0 : index
    %c0_0 = arith.constant 0 : index
    %3 = vector.load %arg1[%2, %c0, %c0_0] : memref<10x10x64xbf16, #tpu.memory_space<vmem>>, vector<8x10x64xbf16>
    %4 = vector.extract_strided_slice %3 {offsets = [0, 0, 0], sizes = [8, 8, 64], strides = [1, 1, 1]} : vector<8x10x64xbf16> to vector<8x8x64xbf16>
    %5 = vector.shape_cast %4 : vector<8x8x64xbf16> to vector<64x64xbf16>
    %c0_1 = arith.constant 0 : index
    %c0_2 = arith.constant 0 : index
    %c0_3 = arith.constant 0 : index
    %6 = vector.load %arg2[%c0_1, %c0_2, %c0_3] : memref<9x64x64xbf16, #tpu.memory_space<vmem>>, vector<1x64x64xbf16>
    %7 = vector.shape_cast %6 : vector<1x64x64xbf16> to vector<64x64xbf16>
    %cst = arith.constant dense<0.000000e+00> : vector<64x64xf32>
    %8 = tpu.matmul %5, %7, %cst {dimension_numbers = #tpu.dot_dimension_numbers<[1], [0], [0], [1], [0, 0, 1, 1], [], []>} : vector<64x64xbf16>, vector<64x64xbf16>, vector<64x64xf32> -> vector<64x64xf32>
    %9 = vector.extract_strided_slice %3 {offsets = [0, 1, 0], sizes = [8, 8, 64], strides = [1, 1, 1]} : vector<8x10x64xbf16> to vector<8x8x64xbf16>
    %10 = vector.shape_cast %9 : vector<8x8x64xbf16> to vector<64x64xbf16>
    %c1 = arith.constant 1 : index
    %c0_4 = arith.constant 0 : index
    %c0_5 = arith.constant 0 : index
    %11 = vector.load %arg2[%c1, %c0_4, %c0_5] : memref<9x64x64xbf16, #tpu.memory_space<vmem>>, vector<1x64x64xbf16>
    %12 = vector.shape_cast %11 : vector<1x64x64xbf16> to vector<64x64xbf16>
    %cst_6 = arith.constant dense<0.000000e+00> : vector<64x64xf32>
    %13 = tpu.matmul %10, %12, %cst_6 {dimension_numbers = #tpu.dot_dimension_numbers<[1], [0], [0], [1], [0, 0, 1, 1], [], []>} : vector<64x64xbf16>, vector<64x64xbf16>, vector<64x64xf32> -> vector<64x64xf32>
    %14 = arith.addf %8, %13 : vector<64x64xf32>
    %15 = vector.extract_strided_slice %3 {offsets = [0, 2, 0], sizes = [8, 8, 64], strides = [1, 1, 1]} : vector<8x10x64xbf16> to vector<8x8x64xbf16>
    %16 = vector.shape_cast %15 : vector<8x8x64xbf16> to vector<64x64xbf16>
    %c2 = arith.constant 2 : index
    %c0_7 = arith.constant 0 : index
    %c0_8 = arith.constant 0 : index
    %17 = vector.load %arg2[%c2, %c0_7, %c0_8] : memref<9x64x64xbf16, #tpu.memory_space<vmem>>, vector<1x64x64xbf16>
    %18 = vector.shape_cast %17 : vector<1x64x64xbf16> to vector<64x64xbf16>
    %cst_9 = arith.constant dense<0.000000e+00> : vector<64x64xf32>
    %19 = tpu.matmul %16, %18, %cst_9 {dimension_numbers = #tpu.dot_dimension_numbers<[1], [0], [0], [1], [0, 0, 1, 1], [], []>} : vector<64x64xbf16>, vector<64x64xbf16>, vector<64x64xf32> -> vector<64x64xf32>
    %20 = arith.addf %14, %19 : vector<64x64xf32>
    %c1_i32 = arith.constant 1 : i32
    %21 = arith.addi %0, %c1_i32 : i32
    %22 = arith.index_cast %21 : i32 to index
    %c0_10 = arith.constant 0 : index
    %c0_11 = arith.constant 0 : index
    %23 = vector.load %arg1[%22, %c0_10, %c0_11] : memref<10x10x64xbf16, #tpu.memory_space<vmem>>, vector<8x10x64xbf16>
    %24 = vector.extract_strided_slice %23 {offsets = [0, 0, 0], sizes = [8, 8, 64], strides = [1, 1, 1]} : vector<8x10x64xbf16> to vector<8x8x64xbf16>
    %25 = vector.shape_cast %24 : vector<8x8x64xbf16> to vector<64x64xbf16>
    %c3 = arith.constant 3 : index
    %c0_12 = arith.constant 0 : index
    %c0_13 = arith.constant 0 : index
    %26 = vector.load %arg2[%c3, %c0_12, %c0_13] : memref<9x64x64xbf16, #tpu.memory_space<vmem>>, vector<1x64x64xbf16>
    %27 = vector.shape_cast %26 : vector<1x64x64xbf16> to vector<64x64xbf16>
    %cst_14 = arith.constant dense<0.000000e+00> : vector<64x64xf32>
    %28 = tpu.matmul %25, %27, %cst_14 {dimension_numbers = #tpu.dot_dimension_numbers<[1], [0], [0], [1], [0, 0, 1, 1], [], []>} : vector<64x64xbf16>, vector<64x64xbf16>, vector<64x64xf32> -> vector<64x64xf32>
    %29 = arith.addf %20, %28 : vector<64x64xf32>
    %30 = vector.extract_strided_slice %23 {offsets = [0, 1, 0], sizes = [8, 8, 64], strides = [1, 1, 1]} : vector<8x10x64xbf16> to vector<8x8x64xbf16>
    %31 = vector.shape_cast %30 : vector<8x8x64xbf16> to vector<64x64xbf16>
    %c4 = arith.constant 4 : index
    %c0_15 = arith.constant 0 : index
    %c0_16 = arith.constant 0 : index
    %32 = vector.load %arg2[%c4, %c0_15, %c0_16] : memref<9x64x64xbf16, #tpu.memory_space<vmem>>, vector<1x64x64xbf16>
    %33 = vector.shape_cast %32 : vector<1x64x64xbf16> to vector<64x64xbf16>
    %cst_17 = arith.constant dense<0.000000e+00> : vector<64x64xf32>
    %34 = tpu.matmul %31, %33, %cst_17 {dimension_numbers = #tpu.dot_dimension_numbers<[1], [0], [0], [1], [0, 0, 1, 1], [], []>} : vector<64x64xbf16>, vector<64x64xbf16>, vector<64x64xf32> -> vector<64x64xf32>
    %35 = arith.addf %29, %34 : vector<64x64xf32>
    %36 = vector.extract_strided_slice %23 {offsets = [0, 2, 0], sizes = [8, 8, 64], strides = [1, 1, 1]} : vector<8x10x64xbf16> to vector<8x8x64xbf16>
    %37 = vector.shape_cast %36 : vector<8x8x64xbf16> to vector<64x64xbf16>
    %c5 = arith.constant 5 : index
    %c0_18 = arith.constant 0 : index
    %c0_19 = arith.constant 0 : index
    %38 = vector.load %arg2[%c5, %c0_18, %c0_19] : memref<9x64x64xbf16, #tpu.memory_space<vmem>>, vector<1x64x64xbf16>
    %39 = vector.shape_cast %38 : vector<1x64x64xbf16> to vector<64x64xbf16>
    %cst_20 = arith.constant dense<0.000000e+00> : vector<64x64xf32>
    %40 = tpu.matmul %37, %39, %cst_20 {dimension_numbers = #tpu.dot_dimension_numbers<[1], [0], [0], [1], [0, 0, 1, 1], [], []>} : vector<64x64xbf16>, vector<64x64xbf16>, vector<64x64xf32> -> vector<64x64xf32>
    %41 = arith.addf %35, %40 : vector<64x64xf32>
    %c2_i32 = arith.constant 2 : i32
    %42 = arith.addi %0, %c2_i32 : i32
    %43 = arith.index_cast %42 : i32 to index
    %c0_21 = arith.constant 0 : index
    %c0_22 = arith.constant 0 : index
    %44 = vector.load %arg1[%43, %c0_21, %c0_22] : memref<10x10x64xbf16, #tpu.memory_space<vmem>>, vector<8x10x64xbf16>
    %45 = vector.extract_strided_slice %44 {offsets = [0, 0, 0], sizes = [8, 8, 64], strides = [1, 1, 1]} : vector<8x10x64xbf16> to vector<8x8x64xbf16>
    %46 = vector.shape_cast %45 : vector<8x8x64xbf16> to vector<64x64xbf16>
    %c6 = arith.constant 6 : index
    %c0_23 = arith.constant 0 : index
    %c0_24 = arith.constant 0 : index
    %47 = vector.load %arg2[%c6, %c0_23, %c0_24] : memref<9x64x64xbf16, #tpu.memory_space<vmem>>, vector<1x64x64xbf16>
    %48 = vector.shape_cast %47 : vector<1x64x64xbf16> to vector<64x64xbf16>
    %cst_25 = arith.constant dense<0.000000e+00> : vector<64x64xf32>
    %49 = tpu.matmul %46, %48, %cst_25 {dimension_numbers = #tpu.dot_dimension_numbers<[1], [0], [0], [1], [0, 0, 1, 1], [], []>} : vector<64x64xbf16>, vector<64x64xbf16>, vector<64x64xf32> -> vector<64x64xf32>
    %50 = arith.addf %41, %49 : vector<64x64xf32>
    %51 = vector.extract_strided_slice %44 {offsets = [0, 1, 0], sizes = [8, 8, 64], strides = [1, 1, 1]} : vector<8x10x64xbf16> to vector<8x8x64xbf16>
    %52 = vector.shape_cast %51 : vector<8x8x64xbf16> to vector<64x64xbf16>
    %c7 = arith.constant 7 : index
    %c0_26 = arith.constant 0 : index
    %c0_27 = arith.constant 0 : index
    %53 = vector.load %arg2[%c7, %c0_26, %c0_27] : memref<9x64x64xbf16, #tpu.memory_space<vmem>>, vector<1x64x64xbf16>
    %54 = vector.shape_cast %53 : vector<1x64x64xbf16> to vector<64x64xbf16>
    %cst_28 = arith.constant dense<0.000000e+00> : vector<64x64xf32>
    %55 = tpu.matmul %52, %54, %cst_28 {dimension_numbers = #tpu.dot_dimension_numbers<[1], [0], [0], [1], [0, 0, 1, 1], [], []>} : vector<64x64xbf16>, vector<64x64xbf16>, vector<64x64xf32> -> vector<64x64xf32>
    %56 = arith.addf %50, %55 : vector<64x64xf32>
    %57 = vector.extract_strided_slice %44 {offsets = [0, 2, 0], sizes = [8, 8, 64], strides = [1, 1, 1]} : vector<8x10x64xbf16> to vector<8x8x64xbf16>
    %58 = vector.shape_cast %57 : vector<8x8x64xbf16> to vector<64x64xbf16>
    %c8 = arith.constant 8 : index
    %c0_29 = arith.constant 0 : index
    %c0_30 = arith.constant 0 : index
    %59 = vector.load %arg2[%c8, %c0_29, %c0_30] : memref<9x64x64xbf16, #tpu.memory_space<vmem>>, vector<1x64x64xbf16>
    %60 = vector.shape_cast %59 : vector<1x64x64xbf16> to vector<64x64xbf16>
    %cst_31 = arith.constant dense<0.000000e+00> : vector<64x64xf32>
    %61 = tpu.matmul %58, %60, %cst_31 {dimension_numbers = #tpu.dot_dimension_numbers<[1], [0], [0], [1], [0, 0, 1, 1], [], []>} : vector<64x64xbf16>, vector<64x64xbf16>, vector<64x64xf32> -> vector<64x64xf32>
    %62 = arith.addf %56, %61 : vector<64x64xf32>
    %63 = arith.truncf %62 : vector<64x64xf32> to vector<64x64xbf16>
    %c0_32 = arith.constant 0 : index
    %c0_33 = arith.constant 0 : index
    %64 = vector.load %arg3[%c0_32, %c0_33] : memref<64x64xbf16, #tpu.memory_space<vmem>>, vector<64x64xbf16>
    tpu.vector_store %arg3[%c0_32, %c0_33], %63 {strides = array<i32>} : memref<64x64xbf16, #tpu.memory_space<vmem>>, vector<64x64xbf16>,
    return
  }
  func.func @transform_0(%arg0: i32) -> (i32, i32, i32) {
    %c0_i32 = arith.constant 0 : i32
    %c0_i32_0 = arith.constant 0 : i32
    %c0_i32_1 = arith.constant 0 : i32
    %c0_i32_2 = arith.constant 0 : i32
    return %c0_i32, %c0_i32_0, %c0_i32_1 : i32, i32, i32
  }
  func.func @transform_1(%arg0: i32) -> (i32, i32, i32) {
    %c0_i32 = arith.constant 0 : i32
    %c0_i32_0 = arith.constant 0 : i32
    %c0_i32_1 = arith.constant 0 : i32
    %c0_i32_2 = arith.constant 0 : i32
    return %c0_i32, %c0_i32_0, %c0_i32_1 : i32, i32, i32
  }
  func.func @transform_2(%arg0: i32) -> (i32, i32) {
    %c0_i32 = arith.constant 0 : i32
    %c0_i32_0 = arith.constant 0 : i32
    return %arg0, %c0_i32 : i32, i32
  }
}

</mosaic_0001>

<bundles_post_ra>
// kernel: squeeze.1
= control target key start
LH: loop header
LB: loop body
LE: loop exit
PB: predicated region body
PF: predicated region fallthrough
CT: control target
= control target key end

     0   :  { %vm363_vm0 = vcmask 64512   ;;  %s4651_s18 = smov 120   ;;  %s4653_s2 = smov 104   ;;  %s5796_s0 = inlined_call_operand.vmem [shape: bf16[1,3,64,64], index: 0, kind: input, shape index: {}]   ;;  %s5797_s1 = inlined_call_operand.vmem [shape: bf16[3,8,8,8,8], index: 1, kind: output, shape index: {}]  }
   0x1   :  { %v3635_v0 = vld [vmem:[%s5796_s0] sm:$0xff]   ;;  %v4127_v1 = vld [vmem:[%s5796_s0 + $0x10] sm:$0xff]   ;;  %v4128_v9 = vld [vmem:[%s5796_s0 + $0x8] sm:$0xff]   ;;  %s4654_s3 = smov 96   ;;  %s4655_s4 = smov 88  }
   0x2   :  { %v4125_v2 = vld [vmem:[%s5796_s0 + $0x20] sm:$0xff]   ;;  %v3636_v3 = vunpack.c.l.bf16 %v3635_v0  ;;  %v3637_v4 = vunpack.c.h.bf16 %v3635_v0  ;;  %v3628_v5 = vunpack.c.l.bf16 %v4127_v1  ;;  %v3629_v6 = vunpack.c.h.bf16 %v4127_v1  ;;  %v4126_v10 = vld [vmem:[%s5796_s0 + $0x18] sm:$0xff]   ;;  %v4124_v13 = vld [vmem:[%s5796_s0 + $0x28] sm:$0xff]   ;;  %s4656_s5 = smov 80   ;;  %s4657_s6 = smov 72  }
   0x3   :  { %v3620_v7 = vunpack.c.l.bf16 %v4125_v2  ;;  %v3621_v8 = vunpack.c.h.bf16 %v4125_v2  ;;  %v3632_v15 = vunpack.c.l.bf16 %v4128_v9  ;;  %v3633_v16 = vunpack.c.h.bf16 %v4128_v9  ;;  %v4123_v24 = vld [vmem:[%s5796_s0 + $0x30] sm:$0xff]   ;;  %v4122_v25 = vld [vmem:[%s5796_s0 + $0x38] sm:$0xff]   ;;  %v4121_v26 = vld [vmem:[%s5796_s0 + $0x40] sm:$0xff]  }
   0x4   :  { %370 = vst.msk [vmem:[#allocation0 + $0x40] ss:$8 sm:$0xf] %vm363_vm0, %v3637_v4   ;;  %v4684_v11 = vpack.i.bf16 %v3637_v4, %v3636_v3  ;;  %v4686_v12 = vpack.i.bf16 %v3629_v6, %v3628_v5  ;;  %v3624_v17 = vunpack.c.l.bf16 %v4126_v10  ;;  %v3625_v18 = vunpack.c.h.bf16 %v4126_v10  ;;  %v4120_v36 = vld [vmem:[%s5796_s0 + $0x48] sm:$0xff]   ;;  %v4119_v37 = vld [vmem:[%s5796_s0 + $0x50] sm:$0xff]   ;;  %v4118_v38 = vld [vmem:[%s5796_s0 + $0x58] sm:$0xff]  }
   0x5   :  { %372 = vst.msk [vmem:[#allocation0 + $0x40] ss:$8 sm:$0xf0] %vm363_vm0, %v3637_v4   ;;  %v4692_v14 = vpack.i.bf16 %v3621_v8, %v3620_v7  ;;  %v3616_v19 = vunpack.c.l.bf16 %v4124_v13  ;;  %v3617_v20 = vunpack.c.h.bf16 %v4124_v13  ;;  %v4705_v21 = vpack.i.bf16 %v3633_v16, %v3632_v15  ;;  %s4652_s0 = smov 112  }
   0x6   :  { %4232 = vrot.lane.b32.xlu0 %v4684_v11, %s4651_s18  ;;  %364 = vst.msk [vmem:[#allocation0] ss:$8 sm:$0xf] %vm363_vm0, %v3636_v3   ;;  %4242 = vrot.lane.b32.xlu1 %v4686_v12, %s4651_s18  ;;  %v4707_v22 = vpack.i.bf16 %v3625_v18, %v3624_v17  ;;  %v3612_v27 = vunpack.c.l.bf16 %v4123_v24  ;;  %v3613_v28 = vunpack.c.h.bf16 %v4123_v24  ;;  %v3608_v29 = vunpack.c.l.bf16 %v4122_v25 }
   0x7   :  { %365 = vst.msk [vmem:[#allocation0] ss:$8 sm:$0xf0] %vm363_vm0, %v3636_v3   ;;  %4252 = vrot.lane.b32.xlu2 %v4692_v14, %s4651_s18  ;;  %v4710_v23 = vpack.i.bf16 %v3617_v20, %v3616_v19  ;;  %v3609_v30 = vunpack.c.h.bf16 %v4122_v25  ;;  %v3604_v31 = vunpack.c.l.bf16 %v4121_v26  ;;  %v3605_v32 = vunpack.c.h.bf16 %v4121_v26 }
   0x8   :  { %398 = vst.msk [vmem:[#allocation0 + $0x140] ss:$8 sm:$0xf] %vm363_vm0, %v3629_v6   ;;  %v4734_v33 = vpack.i.bf16 %v3613_v28, %v3612_v27  ;;  %v3600_v39 = vunpack.c.l.bf16 %v4120_v36  ;;  %v3601_v40 = vunpack.c.h.bf16 %v4120_v36  ;;  %v3596_v41 = vunpack.c.l.bf16 %v4119_v37 }
   0x9   :  { %400 = vst.msk [vmem:[#allocation0 + $0x140] ss:$8 sm:$0xf0] %vm363_vm0, %v3629_v6   ;;  %v4736_v34 = vpack.i.bf16 %v3609_v30, %v3608_v29  ;;  %v4739_v35 = vpack.i.bf16 %v3605_v32, %v3604_v31  ;;  %v3597_v42 = vunpack.c.h.bf16 %v4119_v37  ;;  %v3592_v43 = vunpack.c.l.bf16 %v4118_v38 }
   0xa   :  { %391 = vst.msk [vmem:[#allocation0 + $0x100] ss:$8 sm:$0xf] %vm363_vm0, %v3628_v5   ;;  %v3593_v44 = vunpack.c.h.bf16 %v4118_v38  ;;  %v4763_v45 = vpack.i.bf16 %v3601_v40, %v3600_v39 }
   0xb   :  { %393 = vst.msk [vmem:[#allocation0 + $0x100] ss:$8 sm:$0xf0] %vm363_vm0, %v3628_v5   ;;  %v4765_v46 = vpack.i.bf16 %v3597_v42, %v3596_v41 }
   0xc   :  { %426 = vst.msk [vmem:[#allocation0 + $0x240] ss:$8 sm:$0xf] %vm363_vm0, %v3621_v8   ;;  %v4768_v47 = vpack.i.bf16 %v3593_v44, %v3592_v43 }
   0xd   :  { %428 = vst.msk [vmem:[#allocation0 + $0x240] ss:$8 sm:$0xf0] %vm363_vm0, %v3621_v8  }
   0xe   :  { %419 = vst.msk [vmem:[#allocation0 + $0x200] ss:$8 sm:$0xf] %vm363_vm0, %v3620_v7   ;;  %4237 = vrot.lane.b32.xlu0 %v4705_v21, %s4651_s18  ;;  %4247 = vrot.lane.b32.xlu1 %v4707_v22, %s4651_s18 }
   0xf   :  { %421 = vst.msk [vmem:[#allocation0 + $0x200] ss:$8 sm:$0xf0] %vm363_vm0, %v3620_v7   ;;  %4257 = vrot.lane.b32.xlu2 %v4710_v23, %s4651_s18 }
  0x10   :  { %384 = vst.msk [vmem:[#allocation0 + $0xc0] ss:$8 sm:$0xf] %vm363_vm0, %v3633_v16  }
  0x11   :  { %386 = vst.msk [vmem:[#allocation0 + $0xc0] ss:$8 sm:$0xf0] %vm363_vm0, %v3633_v16  }
  0x12   :  { %377 = vst.msk [vmem:[#allocation0 + $0x80] ss:$8 sm:$0xf] %vm363_vm0, %v3632_v15  }
  0x13   :  { %379 = vst.msk [vmem:[#allocation0 + $0x80] ss:$8 sm:$0xf0] %vm363_vm0, %v3632_v15  }
  0x14   :  { %405 = vst.msk [vmem:[#allocation0 + $0x180] ss:$8 sm:$0xf] %vm363_vm0, %v3624_v17  }
  0x15   :  { %407 = vst.msk [vmem:[#allocation0 + $0x180] ss:$8 sm:$0xf0] %vm363_vm0, %v3624_v17  }
  0x16   :  { %412 = vst.msk [vmem:[#allocation0 + $0x1c0] ss:$8 sm:$0xf] %vm363_vm0, %v3625_v18   ;;  %4262 = vrot.lane.b32.xlu0 %v4734_v33, %s4651_s18  ;;  %4267 = vrot.lane.b32.xlu1 %v4736_v34, %s4651_s18 }
  0x17   :  { %414 = vst.msk [vmem:[#allocation0 + $0x1c0] ss:$8 sm:$0xf0] %vm363_vm0, %v3625_v18   ;;  %4272 = vrot.lane.b32.xlu2 %v4739_v35, %s4651_s18 }
  0x18   :  { %433 = vst.msk [vmem:[#allocation0 + $0x280] ss:$8 sm:$0xf] %vm363_vm0, %v3616_v19  }
  0x19   :  { %435 = vst.msk [vmem:[#allocation0 + $0x280] ss:$8 sm:$0xf0] %vm363_vm0, %v3616_v19  }
  0x1a   :  { %440 = vst.msk [vmem:[#allocation0 + $0x2c0] ss:$8 sm:$0xf] %vm363_vm0, %v3617_v20  }
  0x1b   :  { %442 = vst.msk [vmem:[#allocation0 + $0x2c0] ss:$8 sm:$0xf0] %vm363_vm0, %v3617_v20  }
  0x1c   :  { %447 = vst.msk [vmem:[#allocation0 + $0x300] ss:$8 sm:$0xf] %vm363_vm0, %v3612_v27  }
  0x1d   :  { %449 = vst.msk [vmem:[#allocation0 + $0x300] ss:$8 sm:$0xf0] %vm363_vm0, %v3612_v27  }
  0x1e   :  { %454 = vst.msk [vmem:[#allocation0 + $0x340] ss:$8 sm:$0xf] %vm363_vm0, %v3613_v28   ;;  %4277 = vrot.lane.b32.xlu0 %v4763_v45, %s4651_s18  ;;  %4282 = vrot.lane.b32.xlu1 %v4765_v46, %s4651_s18 }
  0x1f   :  { %456 = vst.msk [vmem:[#allocation0 + $0x340] ss:$8 sm:$0xf0] %vm363_vm0, %v3613_v28   ;;  %4287 = vrot.lane.b32.xlu2 %v4768_v47, %s4651_s18 }
  0x20   :  { %461 = vst.msk [vmem:[#allocation0 + $0x380] ss:$8 sm:$0xf] %vm363_vm0, %v3608_v29  }
  0x21   :  { %463 = vst.msk [vmem:[#allocation0 + $0x380] ss:$8 sm:$0xf0] %vm363_vm0, %v3608_v29  }
  0x22   :  { %468 = vst.msk [vmem:[#allocation0 + $0x3c0] ss:$8 sm:$0xf] %vm363_vm0, %v3609_v30  }
  0x23   :  { %470 = vst.msk [vmem:[#allocation0 + $0x3c0] ss:$8 sm:$0xf0] %vm363_vm0, %v3609_v30  }
  0x24   :  { %475 = vst.msk [vmem:[#allocation0 + $0x400] ss:$8 sm:$0xf] %vm363_vm0, %v3604_v31  }
  0x25   :  { %477 = vst.msk [vmem:[#allocation0 + $0x400] ss:$8 sm:$0xf0] %vm363_vm0, %v3604_v31  }
  0x26   :  { %482 = vst.msk [vmem:[#allocation0 + $0x440] ss:$8 sm:$0xf] %vm363_vm0, %v3605_v32   ;;  %4292 = vrot.lane.b32.xlu0 %v4684_v11, %s4652_s0  ;;  %4297 = vrot.lane.b32.xlu1 %v4705_v21, %s4652_s0 }
  0x27   :  { %484 = vst.msk [vmem:[#allocation0 + $0x440] ss:$8 sm:$0xf0] %vm363_vm0, %v3605_v32   ;;  %4302 = vrot.lane.b32.xlu2 %v4686_v12, %s4652_s0 }
  0x28   :  { %489 = vst.msk [vmem:[#allocation0 + $0x480] ss:$8 sm:$0xf] %vm363_vm0, %v3600_v39  }
  0x29   :  { %491 = vst.msk [vmem:[#allocation0 + $0x480] ss:$8 sm:$0xf0] %vm363_vm0, %v3600_v39  }
  0x2a   :  { %496 = vst.msk [vmem:[#allocation0 + $0x4c0] ss:$8 sm:$0xf] %vm363_vm0, %v3601_v40  }
  0x2b   :  { %498 = vst.msk [vmem:[#allocation0 + $0x4c0] ss:$8 sm:$0xf0] %vm363_vm0, %v3601_v40  }
  0x2c   :  { %503 = vst.msk [vmem:[#allocation0 + $0x500] ss:$8 sm:$0xf] %vm363_vm0, %v3596_v41  }
  0x2d   :  { %505 = vst.msk [vmem:[#allocation0 + $0x500] ss:$8 sm:$0xf0] %vm363_vm0, %v3596_v41  }
  0x2e   :  { %510 = vst.msk [vmem:[#allocation0 + $0x540] ss:$8 sm:$0xf] %vm363_vm0, %v3597_v42   ;;  %4307 = vrot.lane.b32.xlu0 %v4707_v22, %s4652_s0  ;;  %4312 = vrot.lane.b32.xlu1 %v4692_v14, %s4652_s0 }
  0x2f   :  { %512 = vst.msk [vmem:[#allocation0 + $0x540] ss:$8 sm:$0xf0] %vm363_vm0, %v3597_v42   ;;  %4317 = vrot.lane.b32.xlu2 %v4710_v23, %s4652_s0 }
  0x30   :  { %517 = vst.msk [vmem:[#allocation0 + $0x580] ss:$8 sm:$0xf] %vm363_vm0, %v3592_v43  }
  0x31   :  { %519 = vst.msk [vmem:[#allocation0 + $0x580] ss:$8 sm:$0xf0] %vm363_vm0, %v3592_v43  }
  0x32   :  { %524 = vst.msk [vmem:[#allocation0 + $0x5c0] ss:$8 sm:$0xf] %vm363_vm0, %v3593_v44  }
  0x33   :  { %526 = vst.msk [vmem:[#allocation0 + $0x5c0] ss:$8 sm:$0xf0] %vm363_vm0, %v3593_v44  }
  0x36   :  { %4322 = vrot.lane.b32.xlu0 %v4734_v33, %s4652_s0  ;;  %4327 = vrot.lane.b32.xlu1 %v4736_v34, %s4652_s0 }
  0x37   :  { %4332 = vrot.lane.b32.xlu2 %v4739_v35, %s4652_s0 }
  0x3e   :  { %4337 = vrot.lane.b32.xlu0 %v4763_v45, %s4652_s0  ;;  %4342 = vrot.lane.b32.xlu1 %v4765_v46, %s4652_s0 }
  0x3f   :  { %4347 = vrot.lane.b32.xlu2 %v4768_v47, %s4652_s0 }
  0x46   :  { %4352 = vrot.lane.b32.xlu0 %v4684_v11, %s4653_s2  ;;  %4357 = vrot.lane.b32.xlu1 %v4705_v21, %s4653_s2 }
  0x47   :  { %4362 = vrot.lane.b32.xlu2 %v4686_v12, %s4653_s2 }
  0x4e   :  { %4367 = vrot.lane.b32.xlu0 %v4707_v22, %s4653_s2  ;;  %4372 = vrot.lane.b32.xlu1 %v4692_v14, %s4653_s2 }
  0x4f   :  { %4377 = vrot.lane.b32.xlu2 %v4710_v23, %s4653_s2 }
  0x56   :  { %4382 = vrot.lane.b32.xlu0 %v4734_v33, %s4653_s2  ;;  %4387 = vrot.lane.b32.xlu1 %v4736_v34, %s4653_s2 }
  0x57   :  { %4392 = vrot.lane.b32.xlu2 %v4739_v35, %s4653_s2 }
  0x5e   :  { %4397 = vrot.lane.b32.xlu0 %v4763_v45, %s4653_s2  ;;  %4402 = vrot.lane.b32.xlu1 %v4765_v46, %s4653_s2 }
  0x5f   :  { %4407 = vrot.lane.b32.xlu2 %v4768_v47, %s4653_s2 }
  0x61   :  { %v4253_v48 = vpop.permute.xlu2 %4252 }
  0x62   :  { %v4255_v49 = vunpack.i.h.bf16 %v4253_v48  ;;  %v4254_v50 = vunpack.i.l.bf16 %v4253_v48 }
  0x64   :  { %613 = vst.msk [vmem:[#allocation0 + $0x241] ss:$8 sm:$0xf] %vm363_vm0, %v4255_v49  }
  0x65   :  { %615 = vst.msk [vmem:[#allocation0 + $0x241] ss:$8 sm:$0xf0] %vm363_vm0, %v4255_v49  }
  0x66   :  { %604 = vst.msk [vmem:[#allocation0 + $0x201] ss:$8 sm:$0xf] %vm363_vm0, %v4254_v50   ;;  %4412 = vrot.lane.b32.xlu0 %v4684_v11, %s4654_s3  ;;  %4417 = vrot.lane.b32.xlu1 %v4705_v21, %s4654_s3 }
  0x67   :  { %606 = vst.msk [vmem:[#allocation0 + $0x201] ss:$8 sm:$0xf0] %vm363_vm0, %v4254_v50   ;;  %4422 = vrot.lane.b32.xlu2 %v4686_v12, %s4654_s3 }
  0x69   :  { %v4258_v51 = vpop.permute.xlu2 %4257 }
  0x6a   :  { %v4260_v52 = vunpack.i.h.bf16 %v4258_v51  ;;  %v4259_v53 = vunpack.i.l.bf16 %v4258_v51 }
  0x6c   :  { %631 = vst.msk [vmem:[#allocation0 + $0x2c1] ss:$8 sm:$0xf] %vm363_vm0, %v4260_v52  }
  0x6d   :  { %633 = vst.msk [vmem:[#allocation0 + $0x2c1] ss:$8 sm:$0xf0] %vm363_vm0, %v4260_v52  }
  0x6e   :  { %622 = vst.msk [vmem:[#allocation0 + $0x281] ss:$8 sm:$0xf] %vm363_vm0, %v4259_v53   ;;  %4427 = vrot.lane.b32.xlu0 %v4707_v22, %s4654_s3  ;;  %4432 = vrot.lane.b32.xlu1 %v4692_v14, %s4654_s3 }
  0x6f   :  { %624 = vst.msk [vmem:[#allocation0 + $0x281] ss:$8 sm:$0xf0] %vm363_vm0, %v4259_v53   ;;  %4437 = vrot.lane.b32.xlu2 %v4710_v23, %s4654_s3 }
  0x71   :  { %v4273_v54 = vpop.permute.xlu2 %4272 }
  0x72   :  { %v4275_v55 = vunpack.i.h.bf16 %v4273_v54  ;;  %v4274_v56 = vunpack.i.l.bf16 %v4273_v54 }
  0x74   :  { %685 = vst.msk [vmem:[#allocation0 + $0x441] ss:$8 sm:$0xf] %vm363_vm0, %v4275_v55  }
  0x75   :  { %687 = vst.msk [vmem:[#allocation0 + $0x441] ss:$8 sm:$0xf0] %vm363_vm0, %v4275_v55  }
  0x76   :  { %676 = vst.msk [vmem:[#allocation0 + $0x401] ss:$8 sm:$0xf] %vm363_vm0, %v4274_v56   ;;  %4442 = vrot.lane.b32.xlu0 %v4734_v33, %s4654_s3  ;;  %4447 = vrot.lane.b32.xlu1 %v4736_v34, %s4654_s3 }
  0x77   :  { %678 = vst.msk [vmem:[#allocation0 + $0x401] ss:$8 sm:$0xf0] %vm363_vm0, %v4274_v56   ;;  %4452 = vrot.lane.b32.xlu2 %v4739_v35, %s4654_s3 }
  0x78   :  { %v4233_v57 = vpop.permute.xlu0 %4232  ;;  %v4243_v58 = vpop.permute.xlu1 %4242 }
  0x79   :  { %v4235_v59 = vunpack.i.h.bf16 %v4233_v57  ;;  %v4234_v60 = vunpack.i.l.bf16 %v4233_v57  ;;  %v4288_v61 = vpop.permute.xlu2 %4287  ;;  %v4245_v62 = vunpack.i.h.bf16 %v4243_v58  ;;  %v4244_v63 = vunpack.i.l.bf16 %v4243_v58 }
  0x7a   :  { %v4290_v0 = vunpack.i.h.bf16 %v4288_v61  ;;  %v4289_v3 = vunpack.i.l.bf16 %v4288_v61 }
  0x7b   :  { %541 = vst.msk [vmem:[#allocation0 + $0x41] ss:$8 sm:$0xf] %vm363_vm0, %v4235_v59  }
  0x7c   :  { %543 = vst.msk [vmem:[#allocation0 + $0x41] ss:$8 sm:$0xf0] %vm363_vm0, %v4235_v59  }
  0x7d   :  { %532 = vst.msk [vmem:[#allocation0 + $0x1] ss:$8 sm:$0xf] %vm363_vm0, %v4234_v60  }
  0x7e   :  { %534 = vst.msk [vmem:[#allocation0 + $0x1] ss:$8 sm:$0xf0] %vm363_vm0, %v4234_v60   ;;  %4457 = vrot.lane.b32.xlu0 %v4763_v45, %s4654_s3  ;;  %4462 = vrot.lane.b32.xlu1 %v4765_v46, %s4654_s3 }
  0x7f   :  { %577 = vst.msk [vmem:[#allocation0 + $0x141] ss:$8 sm:$0xf] %vm363_vm0, %v4245_v62   ;;  %4467 = vrot.lane.b32.xlu2 %v4768_v47, %s4654_s3 }
  0x80   :  { %579 = vst.msk [vmem:[#allocation0 + $0x141] ss:$8 sm:$0xf0] %vm363_vm0, %v4245_v62   ;;  %v4238_v1 = vpop.permute.xlu0 %4237  ;;  %v4248_v2 = vpop.permute.xlu1 %4247 }
  0x81   :  { %568 = vst.msk [vmem:[#allocation0 + $0x101] ss:$8 sm:$0xf] %vm363_vm0, %v4244_v63   ;;  %v4303_v4 = vpop.permute.xlu2 %4302  ;;  %v4240_v5 = vunpack.i.h.bf16 %v4238_v1  ;;  %v4239_v6 = vunpack.i.l.bf16 %v4238_v1  ;;  %v4250_v7 = vunpack.i.h.bf16 %v4248_v2  ;;  %v4249_v10 = vunpack.i.l.bf16 %v4248_v2 }
  0x82   :  { %570 = vst.msk [vmem:[#allocation0 + $0x101] ss:$8 sm:$0xf0] %vm363_vm0, %v4244_v63   ;;  %v4305_v15 = vunpack.i.h.bf16 %v4303_v4  ;;  %v4304_v16 = vunpack.i.l.bf16 %v4303_v4 }
  0x83   :  { %739 = vst.msk [vmem:[#allocation0 + $0x5c1] ss:$8 sm:$0xf] %vm363_vm0, %v4290_v0  }
  0x84   :  { %741 = vst.msk [vmem:[#allocation0 + $0x5c1] ss:$8 sm:$0xf0] %vm363_vm0, %v4290_v0  }
  0x85   :  { %730 = vst.msk [vmem:[#allocation0 + $0x581] ss:$8 sm:$0xf] %vm363_vm0, %v4289_v3  }
  0x86   :  { %732 = vst.msk [vmem:[#allocation0 + $0x581] ss:$8 sm:$0xf0] %vm363_vm0, %v4289_v3   ;;  %4472 = vrot.lane.b32.xlu0 %v4684_v11, %s4655_s4  ;;  %4477 = vrot.lane.b32.xlu1 %v4705_v21, %s4655_s4 }
  0x87   :  { %559 = vst.msk [vmem:[#allocation0 + $0xc1] ss:$8 sm:$0xf] %vm363_vm0, %v4240_v5   ;;  %4482 = vrot.lane.b32.xlu2 %v4686_v12, %s4655_s4 }
  0x88   :  { %561 = vst.msk [vmem:[#allocation0 + $0xc1] ss:$8 sm:$0xf0] %vm363_vm0, %v4240_v5   ;;  %v4263_v8 = vpop.permute.xlu0 %4262  ;;  %v4268_v9 = vpop.permute.xlu1 %4267 }
  0x89   :  { %550 = vst.msk [vmem:[#allocation0 + $0x81] ss:$8 sm:$0xf] %vm363_vm0, %v4239_v6   ;;  %v4318_v13 = vpop.permute.xlu2 %4317  ;;  %v4265_v17 = vunpack.i.h.bf16 %v4263_v8  ;;  %v4264_v20 = vunpack.i.l.bf16 %v4263_v8  ;;  %v4270_v25 = vunpack.i.h.bf16 %v4268_v9  ;;  %v4269_v26 = vunpack.i.l.bf16 %v4268_v9 }
  0x8a   :  { %552 = vst.msk [vmem:[#allocation0 + $0x81] ss:$8 sm:$0xf0] %vm363_vm0, %v4239_v6   ;;  %v4320_v27 = vunpack.i.h.bf16 %v4318_v13  ;;  %v4319_v30 = vunpack.i.l.bf16 %v4318_v13 }
  0x8b   :  { %595 = vst.msk [vmem:[#allocation0 + $0x1c1] ss:$8 sm:$0xf] %vm363_vm0, %v4250_v7  }
  0x8c   :  { %597 = vst.msk [vmem:[#allocation0 + $0x1c1] ss:$8 sm:$0xf0] %vm363_vm0, %v4250_v7  }
  0x8d   :  { %586 = vst.msk [vmem:[#allocation0 + $0x181] ss:$8 sm:$0xf] %vm363_vm0, %v4249_v10  }
  0x8e   :  { %588 = vst.msk [vmem:[#allocation0 + $0x181] ss:$8 sm:$0xf0] %vm363_vm0, %v4249_v10   ;;  %4487 = vrot.lane.b32.xlu0 %v4707_v22, %s4655_s4  ;;  %4492 = vrot.lane.b32.xlu1 %v4692_v14, %s4655_s4 }
  0x8f   :  { %792 = vst.msk [vmem:[#allocation0 + $0x142] ss:$8 sm:$0xf] %vm363_vm0, %v4305_v15   ;;  %4497 = vrot.lane.b32.xlu2 %v4710_v23, %s4655_s4 }
  0x90   :  { %794 = vst.msk [vmem:[#allocation0 + $0x142] ss:$8 sm:$0xf0] %vm363_vm0, %v4305_v15   ;;  %v4278_v18 = vpop.permute.xlu0 %4277  ;;  %v4283_v19 = vpop.permute.xlu1 %4282 }
  0x91   :  { %783 = vst.msk [vmem:[#allocation0 + $0x102] ss:$8 sm:$0xf] %vm363_vm0, %v4304_v16   ;;  %v4333_v24 = vpop.permute.xlu2 %4332  ;;  %v4280_v32 = vunpack.i.h.bf16 %v4278_v18  ;;  %v4279_v36 = vunpack.i.l.bf16 %v4278_v18  ;;  %v4285_v37 = vunpack.i.h.bf16 %v4283_v19  ;;  %v4284_v40 = vunpack.i.l.bf16 %v4283_v19 }
  0x92   :  { %785 = vst.msk [vmem:[#allocation0 + $0x102] ss:$8 sm:$0xf0] %vm363_vm0, %v4304_v16   ;;  %v4335_v42 = vunpack.i.h.bf16 %v4333_v24  ;;  %v4334_v43 = vunpack.i.l.bf16 %v4333_v24 }
  0x93   :  { %649 = vst.msk [vmem:[#allocation0 + $0x341] ss:$8 sm:$0xf] %vm363_vm0, %v4265_v17  }
  0x94   :  { %651 = vst.msk [vmem:[#allocation0 + $0x341] ss:$8 sm:$0xf0] %vm363_vm0, %v4265_v17  }
  0x95   :  { %640 = vst.msk [vmem:[#allocation0 + $0x301] ss:$8 sm:$0xf] %vm363_vm0, %v4264_v20  }
  0x96   :  { %642 = vst.msk [vmem:[#allocation0 + $0x301] ss:$8 sm:$0xf0] %vm363_vm0, %v4264_v20   ;;  %4502 = vrot.lane.b32.xlu0 %v4734_v33, %s4655_s4  ;;  %4507 = vrot.lane.b32.xlu1 %v4736_v34, %s4655_s4 }
  0x97   :  { %667 = vst.msk [vmem:[#allocation0 + $0x3c1] ss:$8 sm:$0xf] %vm363_vm0, %v4270_v25   ;;  %4512 = vrot.lane.b32.xlu2 %v4739_v35, %s4655_s4 }
  0x98   :  { %669 = vst.msk [vmem:[#allocation0 + $0x3c1] ss:$8 sm:$0xf0] %vm363_vm0, %v4270_v25   ;;  %v4293_v28 = vpop.permute.xlu0 %4292  ;;  %v4298_v29 = vpop.permute.xlu1 %4297 }
  0x99   :  { %658 = vst.msk [vmem:[#allocation0 + $0x381] ss:$8 sm:$0xf] %vm363_vm0, %v4269_v26   ;;  %v4909_v31 = vpop.permute.xlu2 %4347  ;;  %v4295_v44 = vunpack.i.h.bf16 %v4293_v28  ;;  %v4294_v50 = vunpack.i.l.bf16 %v4293_v28  ;;  %v4300_v52 = vunpack.i.h.bf16 %v4298_v29  ;;  %v4299_v53 = vunpack.i.l.bf16 %v4298_v29 }
  0x9a   :  { %660 = vst.msk [vmem:[#allocation0 + $0x381] ss:$8 sm:$0xf0] %vm363_vm0, %v4269_v26   ;;  %v4350_v54 = vunpack.i.h.bf16 %v4909_v31  ;;  %v4349_v57 = vunpack.i.l.bf16 %v4909_v31 }
  0x9b   :  { %846 = vst.msk [vmem:[#allocation0 + $0x2c2] ss:$8 sm:$0xf] %vm363_vm0, %v4320_v27  }
  0x9c   :  { %848 = vst.msk [vmem:[#allocation0 + $0x2c2] ss:$8 sm:$0xf0] %vm363_vm0, %v4320_v27  }
  0x9d   :  { %837 = vst.msk [vmem:[#allocation0 + $0x282] ss:$8 sm:$0xf] %vm363_vm0, %v4319_v30  }
  0x9e   :  { %839 = vst.msk [vmem:[#allocation0 + $0x282] ss:$8 sm:$0xf0] %vm363_vm0, %v4319_v30   ;;  %4517 = vrot.lane.b32.xlu0 %v4763_v45, %s4655_s4  ;;  %4522 = vrot.lane.b32.xlu1 %v4765_v46, %s4655_s4 }
  0x9f   :  { %703 = vst.msk [vmem:[#allocation0 + $0x4c1] ss:$8 sm:$0xf] %vm363_vm0, %v4280_v32   ;;  %4527 = vrot.lane.b32.xlu2 %v4768_v47, %s4655_s4 }
  0xa0   :  { %705 = vst.msk [vmem:[#allocation0 + $0x4c1] ss:$8 sm:$0xf0] %vm363_vm0, %v4280_v32   ;;  %v4308_v38 = vpop.permute.xlu0 %4307  ;;  %v4924_v39 = vpop.permute.xlu1 %4312 }
  0xa1   :  { %694 = vst.msk [vmem:[#allocation0 + $0x481] ss:$8 sm:$0xf] %vm363_vm0, %v4279_v36   ;;  %v4927_v41 = vpop.permute.xlu2 %4362  ;;  %v4310_v58 = vunpack.i.h.bf16 %v4308_v38  ;;  %v4309_v60 = vunpack.i.l.bf16 %v4308_v38  ;;  %v4315_v61 = vunpack.i.h.bf16 %v4924_v39  ;;  %v4314_v62 = vunpack.i.l.bf16 %v4924_v39 }
  0xa2   :  { %696 = vst.msk [vmem:[#allocation0 + $0x481] ss:$8 sm:$0xf0] %vm363_vm0, %v4279_v36   ;;  %v4365_v0 = vunpack.i.h.bf16 %v4927_v41  ;;  %v4364_v2 = vunpack.i.l.bf16 %v4927_v41 }
  0xa3   :  { %721 = vst.msk [vmem:[#allocation0 + $0x541] ss:$8 sm:$0xf] %vm363_vm0, %v4285_v37  }
  0xa4   :  { %723 = vst.msk [vmem:[#allocation0 + $0x541] ss:$8 sm:$0xf0] %vm363_vm0, %v4285_v37  }
  0xa5   :  { %712 = vst.msk [vmem:[#allocation0 + $0x501] ss:$8 sm:$0xf] %vm363_vm0, %v4284_v40  }
  0xa6   :  { %714 = vst.msk [vmem:[#allocation0 + $0x501] ss:$8 sm:$0xf0] %vm363_vm0, %v4284_v40   ;;  %4532 = vrot.lane.b32.xlu0 %v4684_v11, %s4656_s5  ;;  %4537 = vrot.lane.b32.xlu1 %v4705_v21, %s4656_s5 }
  0xa7   :  { %900 = vst.msk [vmem:[#allocation0 + $0x442] ss:$8 sm:$0xf] %vm363_vm0, %v4335_v42   ;;  %4542 = vrot.lane.b32.xlu2 %v4686_v12, %s4656_s5 }
  0xa8   :  { %902 = vst.msk [vmem:[#allocation0 + $0x442] ss:$8 sm:$0xf0] %vm363_vm0, %v4335_v42   ;;  %v4323_v48 = vpop.permute.xlu0 %4322  ;;  %v4942_v49 = vpop.permute.xlu1 %4327 }
  0xa9   :  { %891 = vst.msk [vmem:[#allocation0 + $0x402] ss:$8 sm:$0xf] %vm363_vm0, %v4334_v43   ;;  %v4945_v51 = vpop.permute.xlu2 %4377  ;;  %v4325_v3 = vunpack.i.h.bf16 %v4323_v48  ;;  %v4324_v5 = vunpack.i.l.bf16 %v4323_v48  ;;  %v4330_v6 = vunpack.i.h.bf16 %v4942_v49  ;;  %v4329_v7 = vunpack.i.l.bf16 %v4942_v49 }
  0xaa   :  { %893 = vst.msk [vmem:[#allocation0 + $0x402] ss:$8 sm:$0xf0] %vm363_vm0, %v4334_v43   ;;  %v4380_v9 = vunpack.i.h.bf16 %v4945_v51  ;;  %v4379_v13 = vunpack.i.l.bf16 %v4945_v51 }
  0xab   :  { %756 = vst.msk [vmem:[#allocation0 + $0x42] ss:$8 sm:$0xf] %vm363_vm0, %v4295_v44  }
  0xac   :  { %758 = vst.msk [vmem:[#allocation0 + $0x42] ss:$8 sm:$0xf0] %vm363_vm0, %v4295_v44  }
  0xad   :  { %747 = vst.msk [vmem:[#allocation0 + $0x2] ss:$8 sm:$0xf] %vm363_vm0, %v4294_v50  }
  0xae   :  { %749 = vst.msk [vmem:[#allocation0 + $0x2] ss:$8 sm:$0xf0] %vm363_vm0, %v4294_v50   ;;  %4547 = vrot.lane.b32.xlu0 %v4707_v22, %s4656_s5  ;;  %4552 = vrot.lane.b32.xlu1 %v4692_v14, %s4656_s5 }
  0xaf   :  { %774 = vst.msk [vmem:[#allocation0 + $0xc2] ss:$8 sm:$0xf] %vm363_vm0, %v4300_v52   ;;  %4557 = vrot.lane.b32.xlu2 %v4710_v23, %s4656_s5 }
  0xb0   :  { %776 = vst.msk [vmem:[#allocation0 + $0xc2] ss:$8 sm:$0xf0] %vm363_vm0, %v4300_v52   ;;  %v4961_v55 = vpop.permute.xlu0 %4337  ;;  %v4963_v56 = vpop.permute.xlu1 %4342 }
  0xb1   :  { %765 = vst.msk [vmem:[#allocation0 + $0x82] ss:$8 sm:$0xf] %vm363_vm0, %v4299_v53   ;;  %v4969_v59 = vpop.permute.xlu2 %4392  ;;  %v4340_v15 = vunpack.i.h.bf16 %v4961_v55  ;;  %v4339_v17 = vunpack.i.l.bf16 %v4961_v55  ;;  %v4345_v18 = vunpack.i.h.bf16 %v4963_v56  ;;  %v4344_v19 = vunpack.i.l.bf16 %v4963_v56 }
  0xb2   :  { %767 = vst.msk [vmem:[#allocation0 + $0x82] ss:$8 sm:$0xf0] %vm363_vm0, %v4299_v53   ;;  %v4394_v20 = vunpack.i.l.bf16 %v4969_v59 }
  0xb3   :  { %954 = vst.msk [vmem:[#allocation0 + $0x5c2] ss:$8 sm:$0xf] %vm363_vm0, %v4350_v54  }
  0xb4   :  { %956 = vst.msk [vmem:[#allocation0 + $0x5c2] ss:$8 sm:$0xf0] %vm363_vm0, %v4350_v54  }
  0xb5   :  { %945 = vst.msk [vmem:[#allocation0 + $0x582] ss:$8 sm:$0xf] %vm363_vm0, %v4349_v57  }
  0xb6   :  { %947 = vst.msk [vmem:[#allocation0 + $0x582] ss:$8 sm:$0xf0] %vm363_vm0, %v4349_v57   ;;  %4562 = vrot.lane.b32.xlu0 %v4734_v33, %s4656_s5  ;;  %4567 = vrot.lane.b32.xlu1 %v4736_v34, %s4656_s5 }
  0xb7   :  { %810 = vst.msk [vmem:[#allocation0 + $0x1c2] ss:$8 sm:$0xf] %vm363_vm0, %v4310_v58   ;;  %4572 = vrot.lane.b32.xlu2 %v4739_v35, %s4656_s5 }
  0xb8   :  { %812 = vst.msk [vmem:[#allocation0 + $0x1c2] ss:$8 sm:$0xf0] %vm363_vm0, %v4310_v58   ;;  %v4986_v63 = vpop.permute.xlu0 %4352  ;;  %v4990_v1 = vpop.permute.xlu1 %4357 }
  0xb9   :  { %801 = vst.msk [vmem:[#allocation0 + $0x182] ss:$8 sm:$0xf] %vm363_vm0, %v4309_v60   ;;  %v4997_v4 = vpop.permute.xlu2 %4407  ;;  %v4355_v24 = vunpack.i.h.bf16 %v4986_v63  ;;  %v4354_v26 = vunpack.i.l.bf16 %v4986_v63  ;;  %v4360_v27 = vunpack.i.h.bf16 %v4990_v1  ;;  %v4359_v28 = vunpack.i.l.bf16 %v4990_v1 }
  0xba   :  { %803 = vst.msk [vmem:[#allocation0 + $0x182] ss:$8 sm:$0xf0] %vm363_vm0, %v4309_v60   ;;  %v4409_v29 = vunpack.i.l.bf16 %v4997_v4 }
  0xbb   :  { %828 = vst.msk [vmem:[#allocation0 + $0x242] ss:$8 sm:$0xf] %vm363_vm0, %v4315_v61  }
  0xbc   :  { %830 = vst.msk [vmem:[#allocation0 + $0x242] ss:$8 sm:$0xf0] %vm363_vm0, %v4315_v61  }
  0xbd   :  { %819 = vst.msk [vmem:[#allocation0 + $0x202] ss:$8 sm:$0xf] %vm363_vm0, %v4314_v62  }
  0xbe   :  { %821 = vst.msk [vmem:[#allocation0 + $0x202] ss:$8 sm:$0xf0] %vm363_vm0, %v4314_v62   ;;  %4577 = vrot.lane.b32.xlu0 %v4763_v45, %s4656_s5  ;;  %4582 = vrot.lane.b32.xlu1 %v4765_v46, %s4656_s5 }
  0xbf   :  { %1007 = vst.msk [vmem:[#allocation0 + $0x143] ss:$8 sm:$0xf] %vm363_vm0, %v4365_v0   ;;  %4587 = vrot.lane.b32.xlu2 %v4768_v47, %s4656_s5 }
  0xc0   :  { %1009 = vst.msk [vmem:[#allocation0 + $0x143] ss:$8 sm:$0xf0] %vm363_vm0, %v4365_v0   ;;  %v5014_v8 = vpop.permute.xlu0 %4367  ;;  %v5018_v10 = vpop.permute.xlu1 %4372 }
  0xc1   :  { %998 = vst.msk [vmem:[#allocation0 + $0x103] ss:$8 sm:$0xf] %vm363_vm0, %v4364_v2   ;;  %v5026_v16 = vpop.permute.xlu2 %4422  ;;  %v4370_v30 = vunpack.i.h.bf16 %v5014_v8  ;;  %v4369_v32 = vunpack.i.l.bf16 %v5014_v8  ;;  %v4375_v36 = vunpack.i.h.bf16 %v5018_v10  ;;  %v4374_v37 = vunpack.i.l.bf16 %v5018_v10 }
  0xc2   :  { %1000 = vst.msk [vmem:[#allocation0 + $0x103] ss:$8 sm:$0xf0] %vm363_vm0, %v4364_v2   ;;  %v4424_v38 = vunpack.i.l.bf16 %v5026_v16 }
  0xc3   :  { %864 = vst.msk [vmem:[#allocation0 + $0x342] ss:$8 sm:$0xf] %vm363_vm0, %v4325_v3  }
  0xc4   :  { %866 = vst.msk [vmem:[#allocation0 + $0x342] ss:$8 sm:$0xf0] %vm363_vm0, %v4325_v3  }
  0xc5   :  { %855 = vst.msk [vmem:[#allocation0 + $0x302] ss:$8 sm:$0xf] %vm363_vm0, %v4324_v5  }
  0xc6   :  { %857 = vst.msk [vmem:[#allocation0 + $0x302] ss:$8 sm:$0xf0] %vm363_vm0, %v4324_v5   ;;  %4592 = vrot.lane.b32.xlu0 %v4684_v11, %s4657_s6  ;;  %4597 = vrot.lane.b32.xlu1 %v4705_v21, %s4657_s6 }
  0xc7   :  { %882 = vst.msk [vmem:[#allocation0 + $0x3c2] ss:$8 sm:$0xf] %vm363_vm0, %v4330_v6   ;;  %4602 = vrot.lane.b32.xlu2 %v4686_v12, %s4657_s6  ;;  %v4395_v12 = vunpack.i.h.bf16 %v4969_v59 }
  0xc8   :  { %884 = vst.msk [vmem:[#allocation0 + $0x3c2] ss:$8 sm:$0xf0] %vm363_vm0, %v4330_v6   ;;  %v5044_v11 = vpop.permute.xlu0 %4382  ;;  %v5048_v21 = vpop.permute.xlu1 %4387 }
  0xc9   :  { %873 = vst.msk [vmem:[#allocation0 + $0x382] ss:$8 sm:$0xf] %vm363_vm0, %v4329_v7   ;;  %v5056_v25 = vpop.permute.xlu2 %4437  ;;  %v4385_v39 = vunpack.i.h.bf16 %v5044_v11  ;;  %v4384_v41 = vunpack.i.l.bf16 %v5044_v11  ;;  %v4390_v42 = vunpack.i.h.bf16 %v5048_v21  ;;  %v4389_v43 = vunpack.i.l.bf16 %v5048_v21 }
  0xca   :  { %875 = vst.msk [vmem:[#allocation0 + $0x382] ss:$8 sm:$0xf0] %vm363_vm0, %v4329_v7   ;;  %v4439_v44 = vunpack.i.l.bf16 %v5056_v25 }
  0xcb   :  { %1061 = vst.msk [vmem:[#allocation0 + $0x2c3] ss:$8 sm:$0xf] %vm363_vm0, %v4380_v9  }
  0xcc   :  { %1063 = vst.msk [vmem:[#allocation0 + $0x2c3] ss:$8 sm:$0xf0] %vm363_vm0, %v4380_v9  }
  0xcd   :  { %1052 = vst.msk [vmem:[#allocation0 + $0x283] ss:$8 sm:$0xf] %vm363_vm0, %v4379_v13  }
  0xce   :  { %1054 = vst.msk [vmem:[#allocation0 + $0x283] ss:$8 sm:$0xf0] %vm363_vm0, %v4379_v13   ;;  %4607 = vrot.lane.b32.xlu0 %v4707_v22, %s4657_s6  ;;  %4612 = vrot.lane.b32.xlu1 %v4692_v14, %s4657_s6  ;;  %v4410_v22 = vunpack.i.h.bf16 %v4997_v4 }
  0xcf   :  { %918 = vst.msk [vmem:[#allocation0 + $0x4c2] ss:$8 sm:$0xf] %vm363_vm0, %v4340_v15   ;;  %4617 = vrot.lane.b32.xlu2 %v4710_v23, %s4657_s6 }
  0xd0   :  { %920 = vst.msk [vmem:[#allocation0 + $0x4c2] ss:$8 sm:$0xf0] %vm363_vm0, %v4340_v15   ;;  %v5074_v14 = vpop.permute.xlu0 %4397  ;;  %v5078_v23 = vpop.permute.xlu1 %4402 }
  0xd1   :  { %909 = vst.msk [vmem:[#allocation0 + $0x482] ss:$8 sm:$0xf] %vm363_vm0, %v4339_v17   ;;  %v5086_v31 = vpop.permute.xlu2 %4452  ;;  %v4400_v48 = vunpack.i.h.bf16 %v5074_v14  ;;  %v4399_v50 = vunpack.i.l.bf16 %v5074_v14  ;;  %v4405_v51 = vunpack.i.h.bf16 %v5078_v23  ;;  %v4404_v52 = vunpack.i.l.bf16 %v5078_v23 }
  0xd2   :  { %911 = vst.msk [vmem:[#allocation0 + $0x482] ss:$8 sm:$0xf0] %vm363_vm0, %v4339_v17   ;;  %v4455_v54 = vunpack.i.h.bf16 %v5086_v31  ;;  %v4454_v56 = vunpack.i.l.bf16 %v5086_v31 }
  0xd3   :  { %936 = vst.msk [vmem:[#allocation0 + $0x542] ss:$8 sm:$0xf] %vm363_vm0, %v4345_v18  }
  0xd4   :  { %938 = vst.msk [vmem:[#allocation0 + $0x542] ss:$8 sm:$0xf0] %vm363_vm0, %v4345_v18  }
  0xd5   :  { %927 = vst.msk [vmem:[#allocation0 + $0x502] ss:$8 sm:$0xf] %vm363_vm0, %v4344_v19  }
  0xd6   :  { %929 = vst.msk [vmem:[#allocation0 + $0x502] ss:$8 sm:$0xf0] %vm363_vm0, %v4344_v19   ;;  %4622 = vrot.lane.b32.xlu0 %v4734_v33, %s4657_s6  ;;  %4627 = vrot.lane.b32.xlu1 %v4736_v34, %s4657_s6  ;;  %v4425_v34 = vunpack.i.h.bf16 %v5026_v16 }
  0xd7   :  { %1115 = vst.msk [vmem:[#allocation0 + $0x443] ss:$8 sm:$0xf] %vm363_vm0, %v4395_v12   ;;  %4632 = vrot.lane.b32.xlu2 %v4739_v35, %s4657_s6 }
  0xd8   :  { %1117 = vst.msk [vmem:[#allocation0 + $0x443] ss:$8 sm:$0xf0] %vm363_vm0, %v4395_v12   ;;  %v5104_v33 = vpop.permute.xlu0 %4412  ;;  %v5108_v35 = vpop.permute.xlu1 %4417 }
  0xd9   :  { %1106 = vst.msk [vmem:[#allocation0 + $0x403] ss:$8 sm:$0xf] %vm363_vm0, %v4394_v20   ;;  %v5116_v40 = vpop.permute.xlu2 %4467  ;;  %v4415_v57 = vunpack.i.h.bf16 %v5104_v33  ;;  %v4414_v59 = vunpack.i.l.bf16 %v5104_v33  ;;  %v4420_v60 = vunpack.i.h.bf16 %v5108_v35  ;;  %v4419_v61 = vunpack.i.l.bf16 %v5108_v35 }
  0xda   :  { %1108 = vst.msk [vmem:[#allocation0 + $0x403] ss:$8 sm:$0xf0] %vm363_vm0, %v4394_v20   ;;  %v4470_v63 = vunpack.i.h.bf16 %v5116_v40  ;;  %v4469_v1 = vunpack.i.l.bf16 %v5116_v40 }
  0xdb   :  { %971 = vst.msk [vmem:[#allocation0 + $0x43] ss:$8 sm:$0xf] %vm363_vm0, %v4355_v24  }
  0xdc   :  { %973 = vst.msk [vmem:[#allocation0 + $0x43] ss:$8 sm:$0xf0] %vm363_vm0, %v4355_v24  }
  0xdd   :  { %962 = vst.msk [vmem:[#allocation0 + $0x3] ss:$8 sm:$0xf] %vm363_vm0, %v4354_v26  }
  0xde   :  { %964 = vst.msk [vmem:[#allocation0 + $0x3] ss:$8 sm:$0xf0] %vm363_vm0, %v4354_v26   ;;  %4637 = vrot.lane.b32.xlu0 %v4763_v45, %s4657_s6  ;;  %4642 = vrot.lane.b32.xlu1 %v4765_v46, %s4657_s6  ;;  %v4440_v46 = vunpack.i.h.bf16 %v5056_v25 }
  0xdf   :  { %989 = vst.msk [vmem:[#allocation0 + $0xc3] ss:$8 sm:$0xf] %vm363_vm0, %v4360_v27   ;;  %4647 = vrot.lane.b32.xlu2 %v4768_v47, %s4657_s6 }
  0xe0   :  { %991 = vst.msk [vmem:[#allocation0 + $0xc3] ss:$8 sm:$0xf0] %vm363_vm0, %v4360_v27   ;;  %v5134_v45 = vpop.permute.xlu0 %4427  ;;  %v5138_v47 = vpop.permute.xlu1 %4432 }
  0xe1   :  { %980 = vst.msk [vmem:[#allocation0 + $0x83] ss:$8 sm:$0xf] %vm363_vm0, %v4359_v28   ;;  %v5146_v49 = vpop.permute.xlu2 %4482  ;;  %v4430_v2 = vunpack.i.h.bf16 %v5134_v45  ;;  %v4429_v4 = vunpack.i.l.bf16 %v5134_v45  ;;  %v4435_v5 = vunpack.i.h.bf16 %v5138_v47  ;;  %v4434_v6 = vunpack.i.l.bf16 %v5138_v47 }
  0xe2   :  { %982 = vst.msk [vmem:[#allocation0 + $0x83] ss:$8 sm:$0xf0] %vm363_vm0, %v4359_v28   ;;  %v4485_v8 = vunpack.i.h.bf16 %v5146_v49  ;;  %v4484_v10 = vunpack.i.l.bf16 %v5146_v49 }
  0xe3   :  { %1169 = vst.msk [vmem:[#allocation0 + $0x5c3] ss:$8 sm:$0xf] %vm363_vm0, %v4410_v22  }
  0xe4   :  { %1171 = vst.msk [vmem:[#allocation0 + $0x5c3] ss:$8 sm:$0xf0] %vm363_vm0, %v4410_v22  }
  0xe5   :  { %1160 = vst.msk [vmem:[#allocation0 + $0x583] ss:$8 sm:$0xf] %vm363_vm0, %v4409_v29  }
  0xe6   :  { %1162 = vst.msk [vmem:[#allocation0 + $0x583] ss:$8 sm:$0xf0] %vm363_vm0, %v4409_v29  }
  0xe7   :  { %1025 = vst.msk [vmem:[#allocation0 + $0x1c3] ss:$8 sm:$0xf] %vm363_vm0, %v4370_v30  }
  0xe8   :  { %1027 = vst.msk [vmem:[#allocation0 + $0x1c3] ss:$8 sm:$0xf0] %vm363_vm0, %v4370_v30   ;;  %v5158_v53 = vpop.permute.xlu0 %4442  ;;  %v5162_v55 = vpop.permute.xlu1 %4447 }
  0xe9   :  { %1016 = vst.msk [vmem:[#allocation0 + $0x183] ss:$8 sm:$0xf] %vm363_vm0, %v4369_v32   ;;  %v5170_v58 = vpop.permute.xlu2 %4497  ;;  %v4445_v13 = vunpack.i.h.bf16 %v5158_v53  ;;  %v4444_v16 = vunpack.i.l.bf16 %v5158_v53  ;;  %v4450_v17 = vunpack.i.h.bf16 %v5162_v55  ;;  %v4449_v18 = vunpack.i.l.bf16 %v5162_v55 }
  0xea   :  { %1018 = vst.msk [vmem:[#allocation0 + $0x183] ss:$8 sm:$0xf0] %vm363_vm0, %v4369_v32   ;;  %v4500_v11 = vunpack.i.h.bf16 %v5170_v58  ;;  %v4499_v21 = vunpack.i.l.bf16 %v5170_v58 }
  0xeb   :  { %1043 = vst.msk [vmem:[#allocation0 + $0x243] ss:$8 sm:$0xf] %vm363_vm0, %v4375_v36  }
  0xec   :  { %1045 = vst.msk [vmem:[#allocation0 + $0x243] ss:$8 sm:$0xf0] %vm363_vm0, %v4375_v36  }
  0xed   :  { %1034 = vst.msk [vmem:[#allocation0 + $0x203] ss:$8 sm:$0xf] %vm363_vm0, %v4374_v37  }
  0xee   :  { %1036 = vst.msk [vmem:[#allocation0 + $0x203] ss:$8 sm:$0xf0] %vm363_vm0, %v4374_v37  }
  0xef   :  { %1222 = vst.msk [vmem:[#allocation0 + $0x144] ss:$8 sm:$0xf] %vm363_vm0, %v4425_v34  }
  0xf0   :  { %1224 = vst.msk [vmem:[#allocation0 + $0x144] ss:$8 sm:$0xf0] %vm363_vm0, %v4425_v34   ;;  %v5182_v62 = vpop.permute.xlu0 %4457  ;;  %v5186_v0 = vpop.permute.xlu1 %4462 }
  0xf1   :  { %1213 = vst.msk [vmem:[#allocation0 + $0x104] ss:$8 sm:$0xf] %vm363_vm0, %v4424_v38   ;;  %v5194_v3 = vpop.permute.xlu2 %4512  ;;  %v4460_v20 = vunpack.i.h.bf16 %v5182_v62  ;;  %v4459_v25 = vunpack.i.l.bf16 %v5182_v62  ;;  %v4465_v26 = vunpack.i.h.bf16 %v5186_v0  ;;  %v4464_v27 = vunpack.i.l.bf16 %v5186_v0 }
  0xf2   :  { %1215 = vst.msk [vmem:[#allocation0 + $0x104] ss:$8 sm:$0xf0] %vm363_vm0, %v4424_v38   ;;  %v4515_v14 = vunpack.i.h.bf16 %v5194_v3  ;;  %v4514_v23 = vunpack.i.l.bf16 %v5194_v3 }
  0xf3   :  { %1079 = vst.msk [vmem:[#allocation0 + $0x343] ss:$8 sm:$0xf] %vm363_vm0, %v4385_v39  }
  0xf4   :  { %1081 = vst.msk [vmem:[#allocation0 + $0x343] ss:$8 sm:$0xf0] %vm363_vm0, %v4385_v39  }
  0xf5   :  { %1070 = vst.msk [vmem:[#allocation0 + $0x303] ss:$8 sm:$0xf] %vm363_vm0, %v4384_v41  }
  0xf6   :  { %1072 = vst.msk [vmem:[#allocation0 + $0x303] ss:$8 sm:$0xf0] %vm363_vm0, %v4384_v41  }
  0xf7   :  { %1097 = vst.msk [vmem:[#allocation0 + $0x3c3] ss:$8 sm:$0xf] %vm363_vm0, %v4390_v42  }
  0xf8   :  { %1099 = vst.msk [vmem:[#allocation0 + $0x3c3] ss:$8 sm:$0xf0] %vm363_vm0, %v4390_v42   ;;  %v5206_v7 = vpop.permute.xlu0 %4472  ;;  %v5210_v9 = vpop.permute.xlu1 %4477 }
  0xf9   :  { %1088 = vst.msk [vmem:[#allocation0 + $0x383] ss:$8 sm:$0xf] %vm363_vm0, %v4389_v43   ;;  %v5218_v15 = vpop.permute.xlu2 %4527  ;;  %v4475_v29 = vunpack.i.h.bf16 %v5206_v7  ;;  %v4474_v31 = vunpack.i.l.bf16 %v5206_v7  ;;  %v4480_v32 = vunpack.i.h.bf16 %v5210_v9  ;;  %v4479_v36 = vunpack.i.l.bf16 %v5210_v9 }
  0xfa   :  { %1090 = vst.msk [vmem:[#allocation0 + $0x383] ss:$8 sm:$0xf0] %vm363_vm0, %v4389_v43   ;;  %v4530_v33 = vunpack.i.h.bf16 %v5218_v15  ;;  %v4529_v35 = vunpack.i.l.bf16 %v5218_v15 }
  0xfb   :  { %1276 = vst.msk [vmem:[#allocation0 + $0x2c4] ss:$8 sm:$0xf] %vm363_vm0, %v4440_v46  }
  0xfc   :  { %1278 = vst.msk [vmem:[#allocation0 + $0x2c4] ss:$8 sm:$0xf0] %vm363_vm0, %v4440_v46  }
  0xfd   :  { %1267 = vst.msk [vmem:[#allocation0 + $0x284] ss:$8 sm:$0xf] %vm363_vm0, %v4439_v44  }
  0xfe   :  { %1269 = vst.msk [vmem:[#allocation0 + $0x284] ss:$8 sm:$0xf0] %vm363_vm0, %v4439_v44  }
  0xff   :  { %1133 = vst.msk [vmem:[#allocation0 + $0x4c3] ss:$8 sm:$0xf] %vm363_vm0, %v4400_v48  }
 0x100   :  { %1135 = vst.msk [vmem:[#allocation0 + $0x4c3] ss:$8 sm:$0xf0] %vm363_vm0, %v4400_v48   ;;  %v5230_v19 = vpop.permute.xlu0 %4487  ;;  %v5234_v12 = vpop.permute.xlu1 %4492 }
 0x101   :  { %1124 = vst.msk [vmem:[#allocation0 + $0x483] ss:$8 sm:$0xf] %vm363_vm0, %v4399_v50   ;;  %v5242_v24 = vpop.permute.xlu2 %4542  ;;  %v4490_v38 = vunpack.i.h.bf16 %v5230_v19  ;;  %v4489_v40 = vunpack.i.l.bf16 %v5230_v19  ;;  %v4495_v41 = vunpack.i.h.bf16 %v5234_v12  ;;  %v4494_v42 = vunpack.i.l.bf16 %v5234_v12 }
 0x102   :  { %1126 = vst.msk [vmem:[#allocation0 + $0x483] ss:$8 sm:$0xf0] %vm363_vm0, %v4399_v50   ;;  %v4545_v45 = vunpack.i.h.bf16 %v5242_v24  ;;  %v4544_v47 = vunpack.i.l.bf16 %v5242_v24 }
 0x103   :  { %1151 = vst.msk [vmem:[#allocation0 + $0x543] ss:$8 sm:$0xf] %vm363_vm0, %v4405_v51  }
 0x104   :  { %1153 = vst.msk [vmem:[#allocation0 + $0x543] ss:$8 sm:$0xf0] %vm363_vm0, %v4405_v51  }
 0x105   :  { %1142 = vst.msk [vmem:[#allocation0 + $0x503] ss:$8 sm:$0xf] %vm363_vm0, %v4404_v52  }
 0x106   :  { %1144 = vst.msk [vmem:[#allocation0 + $0x503] ss:$8 sm:$0xf0] %vm363_vm0, %v4404_v52  }
 0x107   :  { %1330 = vst.msk [vmem:[#allocation0 + $0x444] ss:$8 sm:$0xf] %vm363_vm0, %v4455_v54  }
 0x108   :  { %1332 = vst.msk [vmem:[#allocation0 + $0x444] ss:$8 sm:$0xf0] %vm363_vm0, %v4455_v54   ;;  %v5254_v28 = vpop.permute.xlu0 %4502  ;;  %v5258_v22 = vpop.permute.xlu1 %4507 }
 0x109   :  { %1321 = vst.msk [vmem:[#allocation0 + $0x404] ss:$8 sm:$0xf] %vm363_vm0, %v4454_v56   ;;  %v5266_v30 = vpop.permute.xlu2 %4557  ;;  %v4505_v44 = vunpack.i.h.bf16 %v5254_v28  ;;  %v4504_v49 = vunpack.i.l.bf16 %v5254_v28  ;;  %v4510_v50 = vunpack.i.h.bf16 %v5258_v22  ;;  %v4509_v51 = vunpack.i.l.bf16 %v5258_v22 }
 0x10a   :  { %1323 = vst.msk [vmem:[#allocation0 + $0x404] ss:$8 sm:$0xf0] %vm363_vm0, %v4454_v56   ;;  %v4560_v53 = vunpack.i.h.bf16 %v5266_v30  ;;  %v4559_v55 = vunpack.i.l.bf16 %v5266_v30 }
 0x10b   :  { %1186 = vst.msk [vmem:[#allocation0 + $0x44] ss:$8 sm:$0xf] %vm363_vm0, %v4415_v57  }
 0x10c   :  { %1188 = vst.msk [vmem:[#allocation0 + $0x44] ss:$8 sm:$0xf0] %vm363_vm0, %v4415_v57  }
 0x10d   :  { %1177 = vst.msk [vmem:[#allocation0 + $0x4] ss:$8 sm:$0xf] %vm363_vm0, %v4414_v59  }
 0x10e   :  { %1179 = vst.msk [vmem:[#allocation0 + $0x4] ss:$8 sm:$0xf0] %vm363_vm0, %v4414_v59  }
 0x10f   :  { %1204 = vst.msk [vmem:[#allocation0 + $0xc4] ss:$8 sm:$0xf] %vm363_vm0, %v4420_v60  }
 0x110   :  { %1206 = vst.msk [vmem:[#allocation0 + $0xc4] ss:$8 sm:$0xf0] %vm363_vm0, %v4420_v60   ;;  %v5278_v37 = vpop.permute.xlu0 %4517  ;;  %v5282_v34 = vpop.permute.xlu1 %4522 }
 0x111   :  { %1195 = vst.msk [vmem:[#allocation0 + $0x84] ss:$8 sm:$0xf] %vm363_vm0, %v4419_v61   ;;  %v5290_v39 = vpop.permute.xlu2 %4572  ;;  %v4520_v56 = vunpack.i.h.bf16 %v5278_v37  ;;  %v4519_v58 = vunpack.i.l.bf16 %v5278_v37  ;;  %v4525_v59 = vunpack.i.h.bf16 %v5282_v34  ;;  %v4524_v60 = vunpack.i.l.bf16 %v5282_v34 }
 0x112   :  { %1197 = vst.msk [vmem:[#allocation0 + $0x84] ss:$8 sm:$0xf0] %vm363_vm0, %v4419_v61   ;;  %v4575_v61 = vunpack.i.h.bf16 %v5290_v39  ;;  %v4574_v62 = vunpack.i.l.bf16 %v5290_v39 }
 0x113   :  { %1384 = vst.msk [vmem:[#allocation0 + $0x5c4] ss:$8 sm:$0xf] %vm363_vm0, %v4470_v63  }
 0x114   :  { %1386 = vst.msk [vmem:[#allocation0 + $0x5c4] ss:$8 sm:$0xf0] %vm363_vm0, %v4470_v63  }
 0x115   :  { %1375 = vst.msk [vmem:[#allocation0 + $0x584] ss:$8 sm:$0xf] %vm363_vm0, %v4469_v1  }
 0x116   :  { %1377 = vst.msk [vmem:[#allocation0 + $0x584] ss:$8 sm:$0xf0] %vm363_vm0, %v4469_v1  }
 0x117   :  { %1240 = vst.msk [vmem:[#allocation0 + $0x1c4] ss:$8 sm:$0xf] %vm363_vm0, %v4430_v2  }
 0x118   :  { %1242 = vst.msk [vmem:[#allocation0 + $0x1c4] ss:$8 sm:$0xf0] %vm363_vm0, %v4430_v2   ;;  %v5302_v43 = vpop.permute.xlu0 %4532  ;;  %v5306_v46 = vpop.permute.xlu1 %4537 }
 0x119   :  { %1231 = vst.msk [vmem:[#allocation0 + $0x184] ss:$8 sm:$0xf] %vm363_vm0, %v4429_v4   ;;  %v5314_v48 = vpop.permute.xlu2 %4587  ;;  %v4535_v63 = vunpack.i.h.bf16 %v5302_v43  ;;  %v4534_v0 = vunpack.i.l.bf16 %v5302_v43  ;;  %v4540_v3 = vunpack.i.h.bf16 %v5306_v46 }
 0x11a   :  { %1233 = vst.msk [vmem:[#allocation0 + $0x184] ss:$8 sm:$0xf0] %vm363_vm0, %v4429_v4   ;;  %v4539_v4 = vunpack.i.l.bf16 %v5306_v46  ;;  %v4589_v7 = vunpack.i.l.bf16 %v5314_v48 }
 0x11b   :  { %1258 = vst.msk [vmem:[#allocation0 + $0x244] ss:$8 sm:$0xf] %vm363_vm0, %v4435_v5  }
 0x11c   :  { %1260 = vst.msk [vmem:[#allocation0 + $0x244] ss:$8 sm:$0xf0] %vm363_vm0, %v4435_v5  }
 0x11d   :  { %1249 = vst.msk [vmem:[#allocation0 + $0x204] ss:$8 sm:$0xf] %vm363_vm0, %v4434_v6  }
 0x11e   :  { %1251 = vst.msk [vmem:[#allocation0 + $0x204] ss:$8 sm:$0xf0] %vm363_vm0, %v4434_v6   ;;  %v4590_v6 = vunpack.i.h.bf16 %v5314_v48 }
 0x11f   :  { %1437 = vst.msk [vmem:[#allocation0 + $0x145] ss:$8 sm:$0xf] %vm363_vm0, %v4485_v8  }
 0x120   :  { %1439 = vst.msk [vmem:[#allocation0 + $0x145] ss:$8 sm:$0xf0] %vm363_vm0, %v4485_v8   ;;  %v4548_v52 = vpop.permute.xlu0 %4547  ;;  %v5328_v54 = vpop.permute.xlu1 %4552 }
 0x121   :  { %1428 = vst.msk [vmem:[#allocation0 + $0x105] ss:$8 sm:$0xf] %vm363_vm0, %v4484_v10   ;;  %v5336_v57 = vpop.permute.xlu2 %4602  ;;  %v4550_v8 = vunpack.i.h.bf16 %v4548_v52  ;;  %v4549_v9 = vunpack.i.l.bf16 %v4548_v52 }
 0x122   :  { %1430 = vst.msk [vmem:[#allocation0 + $0x105] ss:$8 sm:$0xf0] %vm363_vm0, %v4484_v10   ;;  %v4555_v10 = vunpack.i.h.bf16 %v5328_v54  ;;  %v4605_v15 = vunpack.i.h.bf16 %v5336_v57 }
 0x123   :  { %1294 = vst.msk [vmem:[#allocation0 + $0x344] ss:$8 sm:$0xf] %vm363_vm0, %v4445_v13  }
 0x124   :  { %1296 = vst.msk [vmem:[#allocation0 + $0x344] ss:$8 sm:$0xf0] %vm363_vm0, %v4445_v13   ;;  %v4554_v13 = vunpack.i.l.bf16 %v5328_v54 }
 0x125   :  { %1285 = vst.msk [vmem:[#allocation0 + $0x304] ss:$8 sm:$0xf] %vm363_vm0, %v4444_v16  }
 0x126   :  { %1287 = vst.msk [vmem:[#allocation0 + $0x304] ss:$8 sm:$0xf0] %vm363_vm0, %v4444_v16   ;;  %v4604_v16 = vunpack.i.l.bf16 %v5336_v57 }
 0x127   :  { %1312 = vst.msk [vmem:[#allocation0 + $0x3c4] ss:$8 sm:$0xf] %vm363_vm0, %v4450_v17  }
 0x128   :  { %1314 = vst.msk [vmem:[#allocation0 + $0x3c4] ss:$8 sm:$0xf0] %vm363_vm0, %v4450_v17   ;;  %v4563_v1 = vpop.permute.xlu0 %4562  ;;  %v5359_v2 = vpop.permute.xlu1 %4567 }
 0x129   :  { %1303 = vst.msk [vmem:[#allocation0 + $0x384] ss:$8 sm:$0xf] %vm363_vm0, %v4449_v18   ;;  %v5367_v5 = vpop.permute.xlu2 %4617  ;;  %v4565_v19 = vunpack.i.h.bf16 %v4563_v1 }
 0x12a   :  { %1305 = vst.msk [vmem:[#allocation0 + $0x384] ss:$8 sm:$0xf0] %vm363_vm0, %v4449_v18   ;;  %v4620_v46 = vunpack.i.h.bf16 %v5367_v5 }
 0x12b   :  { %1491 = vst.msk [vmem:[#allocation0 + $0x2c5] ss:$8 sm:$0xf] %vm363_vm0, %v4500_v11  }
 0x12c   :  { %1493 = vst.msk [vmem:[#allocation0 + $0x2c5] ss:$8 sm:$0xf0] %vm363_vm0, %v4500_v11   ;;  %v4564_v11 = vunpack.i.l.bf16 %v4563_v1 }
 0x12d   :  { %1482 = vst.msk [vmem:[#allocation0 + $0x285] ss:$8 sm:$0xf] %vm363_vm0, %v4499_v21  }
 0x12e   :  { %1484 = vst.msk [vmem:[#allocation0 + $0x285] ss:$8 sm:$0xf0] %vm363_vm0, %v4499_v21   ;;  %v4570_v21 = vunpack.i.h.bf16 %v5359_v2 }
 0x12f   :  { %1348 = vst.msk [vmem:[#allocation0 + $0x4c4] ss:$8 sm:$0xf] %vm363_vm0, %v4460_v20  }
 0x130   :  { %1350 = vst.msk [vmem:[#allocation0 + $0x4c4] ss:$8 sm:$0xf0] %vm363_vm0, %v4460_v20   ;;  %v5391_v17 = vpop.permute.xlu0 %4577  ;;  %v5393_v18 = vpop.permute.xlu1 %4582  ;;  %v4569_v20 = vunpack.i.l.bf16 %v5359_v2 }
 0x131   :  { %1339 = vst.msk [vmem:[#allocation0 + $0x484] ss:$8 sm:$0xf] %vm363_vm0, %v4459_v25   ;;  %v5399_v12 = vpop.permute.xlu2 %4632  ;;  %v4585_v52 = vunpack.i.h.bf16 %v5393_v18 }
 0x132   :  { %1341 = vst.msk [vmem:[#allocation0 + $0x484] ss:$8 sm:$0xf0] %vm363_vm0, %v4459_v25  }
 0x133   :  { %1366 = vst.msk [vmem:[#allocation0 + $0x544] ss:$8 sm:$0xf] %vm363_vm0, %v4465_v26  }
 0x134   :  { %1368 = vst.msk [vmem:[#allocation0 + $0x544] ss:$8 sm:$0xf0] %vm363_vm0, %v4465_v26  }
 0x135   :  { %1357 = vst.msk [vmem:[#allocation0 + $0x504] ss:$8 sm:$0xf] %vm363_vm0, %v4464_v27  }
 0x136   :  { %1359 = vst.msk [vmem:[#allocation0 + $0x504] ss:$8 sm:$0xf0] %vm363_vm0, %v4464_v27  }
 0x137   :  { %1545 = vst.msk [vmem:[#allocation0 + $0x445] ss:$8 sm:$0xf] %vm363_vm0, %v4515_v14  }
 0x138   :  { %1547 = vst.msk [vmem:[#allocation0 + $0x445] ss:$8 sm:$0xf0] %vm363_vm0, %v4515_v14   ;;  %v5437_v48 = vpop.permute.xlu1 %4597 }
 0x139   :  { %1536 = vst.msk [vmem:[#allocation0 + $0x405] ss:$8 sm:$0xf] %vm363_vm0, %v4514_v23  }
 0x13a   :  { %1538 = vst.msk [vmem:[#allocation0 + $0x405] ss:$8 sm:$0xf0] %vm363_vm0, %v4514_v23  }
 0x13b   :  { %1401 = vst.msk [vmem:[#allocation0 + $0x45] ss:$8 sm:$0xf] %vm363_vm0, %v4475_v29  }
 0x13c   :  { %1403 = vst.msk [vmem:[#allocation0 + $0x45] ss:$8 sm:$0xf0] %vm363_vm0, %v4475_v29  }
 0x13d   :  { %1392 = vst.msk [vmem:[#allocation0 + $0x5] ss:$8 sm:$0xf] %vm363_vm0, %v4474_v31  }
 0x13e   :  { %1394 = vst.msk [vmem:[#allocation0 + $0x5] ss:$8 sm:$0xf0] %vm363_vm0, %v4474_v31  }
 0x13f   :  { %1419 = vst.msk [vmem:[#allocation0 + $0xc5] ss:$8 sm:$0xf] %vm363_vm0, %v4480_v32  }
 0x140   :  { %1421 = vst.msk [vmem:[#allocation0 + $0xc5] ss:$8 sm:$0xf0] %vm363_vm0, %v4480_v32  }
 0x141   :  { %1410 = vst.msk [vmem:[#allocation0 + $0x85] ss:$8 sm:$0xf] %vm363_vm0, %v4479_v36  }
 0x142   :  { %1412 = vst.msk [vmem:[#allocation0 + $0x85] ss:$8 sm:$0xf0] %vm363_vm0, %v4479_v36  }
 0x143   :  { %1599 = vst.msk [vmem:[#allocation0 + $0x5c5] ss:$8 sm:$0xf] %vm363_vm0, %v4530_v33  }
 0x144   :  { %1601 = vst.msk [vmem:[#allocation0 + $0x5c5] ss:$8 sm:$0xf0] %vm363_vm0, %v4530_v33  }
 0x145   :  { %1590 = vst.msk [vmem:[#allocation0 + $0x585] ss:$8 sm:$0xf] %vm363_vm0, %v4529_v35  }
 0x146   :  { %1592 = vst.msk [vmem:[#allocation0 + $0x585] ss:$8 sm:$0xf0] %vm363_vm0, %v4529_v35  }
 0x147   :  { %1455 = vst.msk [vmem:[#allocation0 + $0x1c5] ss:$8 sm:$0xf] %vm363_vm0, %v4490_v38  }
 0x148   :  { %1457 = vst.msk [vmem:[#allocation0 + $0x1c5] ss:$8 sm:$0xf0] %vm363_vm0, %v4490_v38  }
 0x149   :  { %1446 = vst.msk [vmem:[#allocation0 + $0x185] ss:$8 sm:$0xf] %vm363_vm0, %v4489_v40  }
 0x14a   :  { %1448 = vst.msk [vmem:[#allocation0 + $0x185] ss:$8 sm:$0xf0] %vm363_vm0, %v4489_v40  }
 0x14b   :  { %1473 = vst.msk [vmem:[#allocation0 + $0x245] ss:$8 sm:$0xf] %vm363_vm0, %v4495_v41  }
 0x14c   :  { %1475 = vst.msk [vmem:[#allocation0 + $0x245] ss:$8 sm:$0xf0] %vm363_vm0, %v4495_v41  }
 0x14d   :  { %1464 = vst.msk [vmem:[#allocation0 + $0x205] ss:$8 sm:$0xf] %vm363_vm0, %v4494_v42  }
 0x14e   :  { %1466 = vst.msk [vmem:[#allocation0 + $0x205] ss:$8 sm:$0xf0] %vm363_vm0, %v4494_v42  }
 0x14f   :  { %1652 = vst.msk [vmem:[#allocation0 + $0x146] ss:$8 sm:$0xf] %vm363_vm0, %v4545_v45  }
 0x150   :  { %1654 = vst.msk [vmem:[#allocation0 + $0x146] ss:$8 sm:$0xf0] %vm363_vm0, %v4545_v45  }
 0x151   :  { %1643 = vst.msk [vmem:[#allocation0 + $0x106] ss:$8 sm:$0xf] %vm363_vm0, %v4544_v47  }
 0x152   :  { %1645 = vst.msk [vmem:[#allocation0 + $0x106] ss:$8 sm:$0xf0] %vm363_vm0, %v4544_v47   ;;  %v4619_v47 = vunpack.i.l.bf16 %v5367_v5 }
 0x153   :  { %1509 = vst.msk [vmem:[#allocation0 + $0x345] ss:$8 sm:$0xf] %vm363_vm0, %v4505_v44  }
 0x154   :  { %1511 = vst.msk [vmem:[#allocation0 + $0x345] ss:$8 sm:$0xf0] %vm363_vm0, %v4505_v44   ;;  %v5435_v44 = vpop.permute.xlu0 %4592 }
 0x155   :  { %1500 = vst.msk [vmem:[#allocation0 + $0x305] ss:$8 sm:$0xf] %vm363_vm0, %v4504_v49  }
 0x156   :  { %1502 = vst.msk [vmem:[#allocation0 + $0x305] ss:$8 sm:$0xf0] %vm363_vm0, %v4504_v49   ;;  %v4580_v49 = vunpack.i.h.bf16 %v5391_v17 }
 0x157   :  { %1527 = vst.msk [vmem:[#allocation0 + $0x3c5] ss:$8 sm:$0xf] %vm363_vm0, %v4510_v50  }
 0x158   :  { %1529 = vst.msk [vmem:[#allocation0 + $0x3c5] ss:$8 sm:$0xf0] %vm363_vm0, %v4510_v50   ;;  %v4579_v50 = vunpack.i.l.bf16 %v5391_v17  ;;  %v4635_v17 = vunpack.i.h.bf16 %v5399_v12 }
 0x159   :  { %1518 = vst.msk [vmem:[#allocation0 + $0x385] ss:$8 sm:$0xf] %vm363_vm0, %v4509_v51  }
 0x15a   :  { %1520 = vst.msk [vmem:[#allocation0 + $0x385] ss:$8 sm:$0xf0] %vm363_vm0, %v4509_v51   ;;  %v5447_v51 = vpop.permute.xlu2 %4647 }
 0x15b   :  { %1706 = vst.msk [vmem:[#allocation0 + $0x2c6] ss:$8 sm:$0xf] %vm363_vm0, %v4560_v53  }
 0x15c   :  { %1708 = vst.msk [vmem:[#allocation0 + $0x2c6] ss:$8 sm:$0xf0] %vm363_vm0, %v4560_v53   ;;  %v4584_v53 = vunpack.i.l.bf16 %v5393_v18  ;;  %v4634_v18 = vunpack.i.l.bf16 %v5399_v12  ;;  %v5491_v12 = vpop.permute.xlu0 %4607 }
 0x15d   :  { %1697 = vst.msk [vmem:[#allocation0 + $0x286] ss:$8 sm:$0xf] %vm363_vm0, %v4559_v55  }
 0x15e   :  { %1699 = vst.msk [vmem:[#allocation0 + $0x286] ss:$8 sm:$0xf0] %vm363_vm0, %v4559_v55  }
 0x15f   :  { %1563 = vst.msk [vmem:[#allocation0 + $0x4c5] ss:$8 sm:$0xf] %vm363_vm0, %v4520_v56  }
 0x160   :  { %1565 = vst.msk [vmem:[#allocation0 + $0x4c5] ss:$8 sm:$0xf0] %vm363_vm0, %v4520_v56  }
 0x161   :  { %1554 = vst.msk [vmem:[#allocation0 + $0x485] ss:$8 sm:$0xf] %vm363_vm0, %v4519_v58  }
 0x162   :  { %1556 = vst.msk [vmem:[#allocation0 + $0x485] ss:$8 sm:$0xf0] %vm363_vm0, %v4519_v58  }
 0x163   :  { %1581 = vst.msk [vmem:[#allocation0 + $0x545] ss:$8 sm:$0xf] %vm363_vm0, %v4525_v59  }
 0x164   :  { %1583 = vst.msk [vmem:[#allocation0 + $0x545] ss:$8 sm:$0xf0] %vm363_vm0, %v4525_v59  }
 0x165   :  { %1572 = vst.msk [vmem:[#allocation0 + $0x505] ss:$8 sm:$0xf] %vm363_vm0, %v4524_v60  }
 0x166   :  { %1574 = vst.msk [vmem:[#allocation0 + $0x505] ss:$8 sm:$0xf0] %vm363_vm0, %v4524_v60  }
 0x167   :  { %1760 = vst.msk [vmem:[#allocation0 + $0x446] ss:$8 sm:$0xf] %vm363_vm0, %v4575_v61  }
 0x168   :  { %1762 = vst.msk [vmem:[#allocation0 + $0x446] ss:$8 sm:$0xf0] %vm363_vm0, %v4575_v61  }
 0x169   :  { %1751 = vst.msk [vmem:[#allocation0 + $0x406] ss:$8 sm:$0xf] %vm363_vm0, %v4574_v62  }
 0x16a   :  { %1753 = vst.msk [vmem:[#allocation0 + $0x406] ss:$8 sm:$0xf0] %vm363_vm0, %v4574_v62  }
 0x16b   :  { %1616 = vst.msk [vmem:[#allocation0 + $0x46] ss:$8 sm:$0xf] %vm363_vm0, %v4535_v63  }
 0x16c   :  { %1618 = vst.msk [vmem:[#allocation0 + $0x46] ss:$8 sm:$0xf0] %vm363_vm0, %v4535_v63  }
 0x16d   :  { %1607 = vst.msk [vmem:[#allocation0 + $0x6] ss:$8 sm:$0xf] %vm363_vm0, %v4534_v0  }
 0x16e   :  { %1609 = vst.msk [vmem:[#allocation0 + $0x6] ss:$8 sm:$0xf0] %vm363_vm0, %v4534_v0  }
 0x16f   :  { %1634 = vst.msk [vmem:[#allocation0 + $0xc6] ss:$8 sm:$0xf] %vm363_vm0, %v4540_v3  }
 0x170   :  { %1636 = vst.msk [vmem:[#allocation0 + $0xc6] ss:$8 sm:$0xf0] %vm363_vm0, %v4540_v3  }
 0x171   :  { %1625 = vst.msk [vmem:[#allocation0 + $0x86] ss:$8 sm:$0xf] %vm363_vm0, %v4539_v4  }
 0x172   :  { %1627 = vst.msk [vmem:[#allocation0 + $0x86] ss:$8 sm:$0xf0] %vm363_vm0, %v4539_v4  }
 0x173   :  { %1814 = vst.msk [vmem:[#allocation0 + $0x5c6] ss:$8 sm:$0xf] %vm363_vm0, %v4590_v6  }
 0x174   :  { %1816 = vst.msk [vmem:[#allocation0 + $0x5c6] ss:$8 sm:$0xf0] %vm363_vm0, %v4590_v6  }
 0x175   :  { %1805 = vst.msk [vmem:[#allocation0 + $0x586] ss:$8 sm:$0xf] %vm363_vm0, %v4589_v7  }
 0x176   :  { %1807 = vst.msk [vmem:[#allocation0 + $0x586] ss:$8 sm:$0xf0] %vm363_vm0, %v4589_v7  }
 0x177   :  { %1670 = vst.msk [vmem:[#allocation0 + $0x1c6] ss:$8 sm:$0xf] %vm363_vm0, %v4550_v8  }
 0x178   :  { %1672 = vst.msk [vmem:[#allocation0 + $0x1c6] ss:$8 sm:$0xf0] %vm363_vm0, %v4550_v8  }
 0x179   :  { %1661 = vst.msk [vmem:[#allocation0 + $0x186] ss:$8 sm:$0xf] %vm363_vm0, %v4549_v9  }
 0x17a   :  { %1663 = vst.msk [vmem:[#allocation0 + $0x186] ss:$8 sm:$0xf0] %vm363_vm0, %v4549_v9  }
 0x17b   :  { %1688 = vst.msk [vmem:[#allocation0 + $0x246] ss:$8 sm:$0xf] %vm363_vm0, %v4555_v10  }
 0x17c   :  { %1690 = vst.msk [vmem:[#allocation0 + $0x246] ss:$8 sm:$0xf0] %vm363_vm0, %v4555_v10  }
 0x17d   :  { %1679 = vst.msk [vmem:[#allocation0 + $0x206] ss:$8 sm:$0xf] %vm363_vm0, %v4554_v13  }
 0x17e   :  { %1681 = vst.msk [vmem:[#allocation0 + $0x206] ss:$8 sm:$0xf0] %vm363_vm0, %v4554_v13  }
 0x17f   :  { %1867 = vst.msk [vmem:[#allocation0 + $0x147] ss:$8 sm:$0xf] %vm363_vm0, %v4605_v15  }
 0x180   :  { %1869 = vst.msk [vmem:[#allocation0 + $0x147] ss:$8 sm:$0xf0] %vm363_vm0, %v4605_v15  }
 0x181   :  { %1858 = vst.msk [vmem:[#allocation0 + $0x107] ss:$8 sm:$0xf] %vm363_vm0, %v4604_v16  }
 0x182   :  { %1860 = vst.msk [vmem:[#allocation0 + $0x107] ss:$8 sm:$0xf0] %vm363_vm0, %v4604_v16  }
 0x183   :  { %1724 = vst.msk [vmem:[#allocation0 + $0x346] ss:$8 sm:$0xf] %vm363_vm0, %v4565_v19  }
 0x184   :  { %1726 = vst.msk [vmem:[#allocation0 + $0x346] ss:$8 sm:$0xf0] %vm363_vm0, %v4565_v19   ;;  %v4595_v19 = vunpack.i.h.bf16 %v5435_v44 }
 0x185   :  { %1715 = vst.msk [vmem:[#allocation0 + $0x306] ss:$8 sm:$0xf] %vm363_vm0, %v4564_v11  }
 0x186   :  { %1717 = vst.msk [vmem:[#allocation0 + $0x306] ss:$8 sm:$0xf0] %vm363_vm0, %v4564_v11   ;;  %v2313_v23 = vld [vmem:[#allocation0 + $0x140] sm:$0xff]  ;;  %v2320_v29 = vld [vmem:[#allocation0 + $0x148] sm:$0xff]  ;;  %v2327_v39 = vld [vmem:[#allocation0 + $0x150] sm:$0xff]  ;;  %v4594_v11 = vunpack.i.l.bf16 %v5435_v44 }
 0x187   :  { %v2341_v24 = vld [vmem:[#allocation0 + $0x160] sm:$0xff]  ;;  %v2348_v25 = vld [vmem:[#allocation0 + $0x168] sm:$0xff]  ;;  %v2355_v26 = vld [vmem:[#allocation0 + $0x170] sm:$0xff]  ;;  %1742 = vst.msk [vmem:[#allocation0 + $0x3c6] ss:$8 sm:$0xf] %vm363_vm0, %v4570_v21   ;;  %v3741_v43 = vpack.c.bf16 %v2320_v29, %v2313_v23 }
 0x188   :  { %v3751_v27 = vpack.c.bf16 %v2348_v25, %v2341_v24  ;;  %v2362_v28 = vld [vmem:[#allocation0 + $0x178] sm:$0xff]  ;;  %v2257_v14 = vld [vmem:[#allocation0 + $0x100] sm:$0xff]  ;;  %v2264_v22 = vld [vmem:[#allocation0 + $0x108] sm:$0xff]  ;;  %1744 = vst.msk [vmem:[#allocation0 + $0x3c6] ss:$8 sm:$0xf0] %vm363_vm0, %v4570_v21   ;;  %v4600_v21 = vunpack.i.h.bf16 %v5437_v48 }
 0x189   :  { %v3756_v30 = vpack.c.bf16 %v2362_v28, %v2355_v26  ;;  %v2271_v31 = vld [vmem:[#allocation0 + $0x110] sm:$0xff]  ;;  %v2278_v32 = vld [vmem:[#allocation0 + $0x118] sm:$0xff]  ;;  %v2285_v36 = vld [vmem:[#allocation0 + $0x120] sm:$0xff]  ;;  %v3721_v37 = vpack.c.bf16 %v2264_v22, %v2257_v14  ;;  %1733 = vst.msk [vmem:[#allocation0 + $0x386] ss:$8 sm:$0xf] %vm363_vm0, %v4569_v20  }
 0x18a   :  { %4150 = vst [vmem:[%s5797_s1 + $0xb0] sm:$0xff] %v3751_v27   ;;  %v2292_v33 = vld [vmem:[#allocation0 + $0x128] sm:$0xff]  ;;  %v2299_v34 = vld [vmem:[#allocation0 + $0x130] sm:$0xff]  ;;  %v2306_v35 = vld [vmem:[#allocation0 + $0x138] sm:$0xff]  ;;  %v3726_v38 = vpack.c.bf16 %v2278_v32, %v2271_v31 }
 0x18b   :  { %4151 = vst [vmem:[%s5797_s1 + $0xb8] sm:$0xff] %v3756_v30   ;;  %v2334_v40 = vld [vmem:[#allocation0 + $0x158] sm:$0xff]  ;;  %v3731_v41 = vpack.c.bf16 %v2292_v33, %v2285_v36  ;;  %v3736_v42 = vpack.c.bf16 %v2306_v35, %v2299_v34 }
 0x18c   :  { %1735 = vst.msk [vmem:[#allocation0 + $0x386] ss:$8 sm:$0xf0] %vm363_vm0, %v4569_v20   ;;  %v3746_v45 = vpack.c.bf16 %v2334_v40, %v2327_v39  ;;  %v4599_v20 = vunpack.i.l.bf16 %v5437_v48 }
 0x18d   :  { %4144 = vst [vmem:[%s5797_s1 + $0x80] sm:$0xff] %v3721_v37  }
 0x18e   :  { %4145 = vst [vmem:[%s5797_s1 + $0x88] sm:$0xff] %v3726_v38  }
 0x18f   :  { %4146 = vst [vmem:[%s5797_s1 + $0x90] sm:$0xff] %v3731_v41  }
 0x190   :  { %4147 = vst [vmem:[%s5797_s1 + $0x98] sm:$0xff] %v3736_v42  }
 0x191   :  { %4148 = vst [vmem:[%s5797_s1 + $0xa0] sm:$0xff] %v3741_v43  }
 0x192   :  { %4149 = vst [vmem:[%s5797_s1 + $0xa8] sm:$0xff] %v3746_v45   ;;  %v5513_v45 = vpop.permute.xlu1 %4612 }
 0x193   :  { %1921 = vst.msk [vmem:[#allocation0 + $0x2c7] ss:$8 sm:$0xf] %vm363_vm0, %v4620_v46  }
 0x194   :  { %1923 = vst.msk [vmem:[#allocation0 + $0x2c7] ss:$8 sm:$0xf0] %vm363_vm0, %v4620_v46  }
 0x195   :  { %1912 = vst.msk [vmem:[#allocation0 + $0x287] ss:$8 sm:$0xf] %vm363_vm0, %v4619_v47  }
 0x196   :  { %1914 = vst.msk [vmem:[#allocation0 + $0x287] ss:$8 sm:$0xf0] %vm363_vm0, %v4619_v47   ;;  %v4650_v47 = vunpack.i.h.bf16 %v5447_v51  ;;  %v4649_v51 = vunpack.i.l.bf16 %v5447_v51 }
 0x197   :  { %1778 = vst.msk [vmem:[#allocation0 + $0x4c6] ss:$8 sm:$0xf] %vm363_vm0, %v4580_v49  }
 0x198   :  { %1780 = vst.msk [vmem:[#allocation0 + $0x4c6] ss:$8 sm:$0xf0] %vm363_vm0, %v4580_v49  }
 0x199   :  { %1769 = vst.msk [vmem:[#allocation0 + $0x486] ss:$8 sm:$0xf] %vm363_vm0, %v4579_v50  }
 0x19a   :  { %v2649_v54 = vld [vmem:[#allocation0 + $0x2c0] sm:$0xff]  ;;  %1771 = vst.msk [vmem:[#allocation0 + $0x486] ss:$8 sm:$0xf0] %vm363_vm0, %v4579_v50   ;;  %v2656_v55 = vld [vmem:[#allocation0 + $0x2c8] sm:$0xff]  ;;  %v2663_v56 = vld [vmem:[#allocation0 + $0x2d0] sm:$0xff] }
 0x19b   :  { %v2670_v57 = vld [vmem:[#allocation0 + $0x2d8] sm:$0xff]  ;;  %1796 = vst.msk [vmem:[#allocation0 + $0x546] ss:$8 sm:$0xf] %vm363_vm0, %v4585_v52   ;;  %v2677_v61 = vld [vmem:[#allocation0 + $0x2e0] sm:$0xff]  ;;  %v2684_v4 = vld [vmem:[#allocation0 + $0x2e8] sm:$0xff]  ;;  %v3861_v10 = vpack.c.bf16 %v2656_v55, %v2649_v54 }
 0x19c   :  { %v2593_v58 = vld [vmem:[#allocation0 + $0x280] sm:$0xff]  ;;  %v2600_v59 = vld [vmem:[#allocation0 + $0x288] sm:$0xff]  ;;  %v2607_v60 = vld [vmem:[#allocation0 + $0x290] sm:$0xff]  ;;  %1798 = vst.msk [vmem:[#allocation0 + $0x546] ss:$8 sm:$0xf0] %vm363_vm0, %v4585_v52   ;;  %v3866_v13 = vpack.c.bf16 %v2670_v57, %v2663_v56  ;;  %v3871_v15 = vpack.c.bf16 %v2684_v4, %v2677_v61 }
 0x19d   :  { %v2614_v62 = vld [vmem:[#allocation0 + $0x298] sm:$0xff]  ;;  %v2621_v63 = vld [vmem:[#allocation0 + $0x2a0] sm:$0xff]  ;;  %v2628_v0 = vld [vmem:[#allocation0 + $0x2a8] sm:$0xff]  ;;  %v3841_v1 = vpack.c.bf16 %v2600_v59, %v2593_v58  ;;  %1787 = vst.msk [vmem:[#allocation0 + $0x506] ss:$8 sm:$0xf] %vm363_vm0, %v4584_v53  }
 0x19e   :  { %v2635_v2 = vld [vmem:[#allocation0 + $0x2b0] sm:$0xff]  ;;  %v2642_v3 = vld [vmem:[#allocation0 + $0x2b8] sm:$0xff]  ;;  %v3846_v5 = vpack.c.bf16 %v2614_v62, %v2607_v60  ;;  %v3851_v6 = vpack.c.bf16 %v2628_v0, %v2621_v63  ;;  %1789 = vst.msk [vmem:[#allocation0 + $0x506] ss:$8 sm:$0xf0] %vm363_vm0, %v4584_v53  }
 0x19f   :  { %v2691_v7 = vld [vmem:[#allocation0 + $0x2f0] sm:$0xff]  ;;  %v2698_v8 = vld [vmem:[#allocation0 + $0x2f8] sm:$0xff]  ;;  %v3856_v9 = vpack.c.bf16 %v2642_v3, %v2635_v2  ;;  %4168 = vst [vmem:[%s5797_s1 + $0x140] sm:$0xff] %v3841_v1  }
 0x1a0   :  { %4169 = vst [vmem:[%s5797_s1 + $0x148] sm:$0xff] %v3846_v5   ;;  %v3876_v16 = vpack.c.bf16 %v2698_v8, %v2691_v7 }
 0x1a1   :  { %4170 = vst [vmem:[%s5797_s1 + $0x150] sm:$0xff] %v3851_v6  }
 0x1a2   :  { %4171 = vst [vmem:[%s5797_s1 + $0x158] sm:$0xff] %v3856_v9  }
 0x1a3   :  { %4172 = vst [vmem:[%s5797_s1 + $0x160] sm:$0xff] %v3861_v10  }
 0x1a4   :  { %4173 = vst [vmem:[%s5797_s1 + $0x168] sm:$0xff] %v3866_v13  }
 0x1a5   :  { %4174 = vst [vmem:[%s5797_s1 + $0x170] sm:$0xff] %v3871_v15  }
 0x1a6   :  { %4175 = vst [vmem:[%s5797_s1 + $0x178] sm:$0xff] %v3876_v16  }
 0x1a7   :  { %1975 = vst.msk [vmem:[#allocation0 + $0x447] ss:$8 sm:$0xf] %vm363_vm0, %v4635_v17  }
 0x1a8   :  { %1977 = vst.msk [vmem:[#allocation0 + $0x447] ss:$8 sm:$0xf0] %vm363_vm0, %v4635_v17  }
 0x1a9   :  { %1966 = vst.msk [vmem:[#allocation0 + $0x407] ss:$8 sm:$0xf] %vm363_vm0, %v4634_v18  }
 0x1aa   :  { %1968 = vst.msk [vmem:[#allocation0 + $0x407] ss:$8 sm:$0xf0] %vm363_vm0, %v4634_v18  }
 0x1ab   :  { %1831 = vst.msk [vmem:[#allocation0 + $0x47] ss:$8 sm:$0xf] %vm363_vm0, %v4595_v19  }
 0x1ac   :  { %1833 = vst.msk [vmem:[#allocation0 + $0x47] ss:$8 sm:$0xf0] %vm363_vm0, %v4595_v19  }
 0x1ad   :  { %1822 = vst.msk [vmem:[#allocation0 + $0x7] ss:$8 sm:$0xf] %vm363_vm0, %v4594_v11  }
 0x1ae   :  { %v2985_v24 = vld [vmem:[#allocation0 + $0x440] sm:$0xff]  ;;  %1824 = vst.msk [vmem:[#allocation0 + $0x7] ss:$8 sm:$0xf0] %vm363_vm0, %v4594_v11   ;;  %v2992_v25 = vld [vmem:[#allocation0 + $0x448] sm:$0xff]  ;;  %v2999_v26 = vld [vmem:[#allocation0 + $0x450] sm:$0xff] }
 0x1af   :  { %v3006_v27 = vld [vmem:[#allocation0 + $0x458] sm:$0xff]  ;;  %1849 = vst.msk [vmem:[#allocation0 + $0xc7] ss:$8 sm:$0xf] %vm363_vm0, %v4600_v21   ;;  %v3013_v23 = vld [vmem:[#allocation0 + $0x460] sm:$0xff]  ;;  %v3020_v33 = vld [vmem:[#allocation0 + $0x468] sm:$0xff]  ;;  %v3981_v41 = vpack.c.bf16 %v2992_v25, %v2985_v24  ;;  %v5559_v24 = vpop.permute.xlu1 %4627 }
 0x1b0   :  { %v2929_v28 = vld [vmem:[#allocation0 + $0x400] sm:$0xff]  ;;  %v2936_v14 = vld [vmem:[#allocation0 + $0x408] sm:$0xff]  ;;  %v2943_v22 = vld [vmem:[#allocation0 + $0x410] sm:$0xff]  ;;  %1851 = vst.msk [vmem:[#allocation0 + $0xc7] ss:$8 sm:$0xf0] %vm363_vm0, %v4600_v21   ;;  %v3986_v42 = vpack.c.bf16 %v3006_v27, %v2999_v26  ;;  %v3991_v43 = vpack.c.bf16 %v3020_v33, %v3013_v23  ;;  %v4610_v33 = vunpack.i.h.bf16 %v5491_v12  ;;  %v4609_v12 = vunpack.i.l.bf16 %v5491_v12 }
 0x1b1   :  { %v2950_v29 = vld [vmem:[#allocation0 + $0x418] sm:$0xff]  ;;  %v2957_v30 = vld [vmem:[#allocation0 + $0x420] sm:$0xff]  ;;  %v2964_v31 = vld [vmem:[#allocation0 + $0x428] sm:$0xff]  ;;  %v3961_v32 = vpack.c.bf16 %v2936_v14, %v2929_v28  ;;  %1840 = vst.msk [vmem:[#allocation0 + $0x87] ss:$8 sm:$0xf] %vm363_vm0, %v4599_v20  }
 0x1b2   :  { %v2971_v36 = vld [vmem:[#allocation0 + $0x430] sm:$0xff]  ;;  %v2978_v37 = vld [vmem:[#allocation0 + $0x438] sm:$0xff]  ;;  %v3966_v34 = vpack.c.bf16 %v2950_v29, %v2943_v22  ;;  %v3971_v35 = vpack.c.bf16 %v2964_v31, %v2957_v30  ;;  %1842 = vst.msk [vmem:[#allocation0 + $0x87] ss:$8 sm:$0xf0] %vm363_vm0, %v4599_v20   ;;  %v2089_v57 = vld [vmem:[#allocation0 + $0x40] sm:$0xff]  ;;  %v5557_v20 = vpop.permute.xlu0 %4622 }
 0x1b3   :  { %v3027_v38 = vld [vmem:[#allocation0 + $0x470] sm:$0xff]  ;;  %v3034_v39 = vld [vmem:[#allocation0 + $0x478] sm:$0xff]  ;;  %v3976_v40 = vpack.c.bf16 %v2978_v37, %v2971_v36  ;;  %4192 = vst [vmem:[%s5797_s1 + $0x200] sm:$0xff] %v3961_v32   ;;  %v2096_v58 = vld [vmem:[#allocation0 + $0x48] sm:$0xff] }
 0x1b4   :  { %4193 = vst [vmem:[%s5797_s1 + $0x208] sm:$0xff] %v3966_v34   ;;  %v3996_v46 = vpack.c.bf16 %v3034_v39, %v3027_v38  ;;  %v2034_v44 = vld [vmem:[#allocation0] sm:$0xff]  ;;  %v2040_v48 = vld [vmem:[#allocation0 + $0x8] sm:$0xff]  ;;  %v2047_v49 = vld [vmem:[#allocation0 + $0x10] sm:$0xff]  ;;  %v3661_v0 = vpack.c.bf16 %v2096_v58, %v2089_v57 }
 0x1b5   :  { %4194 = vst [vmem:[%s5797_s1 + $0x210] sm:$0xff] %v3971_v35   ;;  %v2054_v50 = vld [vmem:[#allocation0 + $0x18] sm:$0xff]  ;;  %v2061_v52 = vld [vmem:[#allocation0 + $0x20] sm:$0xff]  ;;  %v2068_v53 = vld [vmem:[#allocation0 + $0x28] sm:$0xff]  ;;  %v3641_v56 = vpack.c.bf16 %v2040_v48, %v2034_v44 }
 0x1b6   :  { %4195 = vst [vmem:[%s5797_s1 + $0x218] sm:$0xff] %v3976_v40   ;;  %v2075_v54 = vld [vmem:[#allocation0 + $0x30] sm:$0xff]  ;;  %v2082_v55 = vld [vmem:[#allocation0 + $0x38] sm:$0xff]  ;;  %v3646_v59 = vpack.c.bf16 %v2054_v50, %v2047_v49  ;;  %v3651_v62 = vpack.c.bf16 %v2068_v53, %v2061_v52  ;;  %v2117_v9 = vld [vmem:[#allocation0 + $0x60] sm:$0xff] }
 0x1b7   :  { %4196 = vst [vmem:[%s5797_s1 + $0x220] sm:$0xff] %v3981_v41   ;;  %v2103_v60 = vld [vmem:[#allocation0 + $0x50] sm:$0xff]  ;;  %v2110_v61 = vld [vmem:[#allocation0 + $0x58] sm:$0xff]  ;;  %v3656_v63 = vpack.c.bf16 %v2082_v55, %v2075_v54  ;;  %v2124_v10 = vld [vmem:[#allocation0 + $0x68] sm:$0xff] }
 0x1b8   :  { %4197 = vst [vmem:[%s5797_s1 + $0x228] sm:$0xff] %v3986_v42   ;;  %v3666_v1 = vpack.c.bf16 %v2110_v61, %v2103_v60  ;;  %v2131_v22 = vld [vmem:[#allocation0 + $0x70] sm:$0xff]  ;;  %v2138_v23 = vld [vmem:[#allocation0 + $0x78] sm:$0xff]  ;;  %v3671_v36 = vpack.c.bf16 %v2124_v10, %v2117_v9  ;;  %v2145_v34 = vld [vmem:[#allocation0 + $0x80] sm:$0xff]  ;;  %v4615_v61 = vunpack.i.h.bf16 %v5513_v45  ;;  %v4614_v45 = vunpack.i.l.bf16 %v5513_v45 }
 0x1b9   :  { %4198 = vst [vmem:[%s5797_s1 + $0x230] sm:$0xff] %v3991_v43   ;;  %v3676_v37 = vpack.c.bf16 %v2138_v23, %v2131_v22  ;;  %v2152_v35 = vld [vmem:[#allocation0 + $0x88] sm:$0xff]  ;;  %v2159_v38 = vld [vmem:[#allocation0 + $0x90] sm:$0xff]  ;;  %v2166_v39 = vld [vmem:[#allocation0 + $0x98] sm:$0xff]  ;;  %v4630_v23 = vunpack.i.h.bf16 %v5559_v24  ;;  %v4629_v24 = vunpack.i.l.bf16 %v5559_v24 }
 0x1ba   :  { %4199 = vst [vmem:[%s5797_s1 + $0x238] sm:$0xff] %v3996_v46   ;;  %v2173_v40 = vld [vmem:[#allocation0 + $0xa0] sm:$0xff]  ;;  %v2180_v41 = vld [vmem:[#allocation0 + $0xa8] sm:$0xff]  ;;  %v2187_v42 = vld [vmem:[#allocation0 + $0xb0] sm:$0xff]  ;;  %v3681_v46 = vpack.c.bf16 %v2152_v35, %v2145_v34  ;;  %v3686_v48 = vpack.c.bf16 %v2166_v39, %v2159_v38 }
 0x1bb   :  { %2029 = vst.msk [vmem:[#allocation0 + $0x5c7] ss:$8 sm:$0xf] %vm363_vm0, %v4650_v47   ;;  %v2194_v43 = vld [vmem:[#allocation0 + $0xb8] sm:$0xff]  ;;  %v2208_v44 = vld [vmem:[#allocation0 + $0xc8] sm:$0xff]  ;;  %v2215_v49 = vld [vmem:[#allocation0 + $0xd0] sm:$0xff] }
 0x1bc   :  { %2031 = vst.msk [vmem:[#allocation0 + $0x5c7] ss:$8 sm:$0xf0] %vm363_vm0, %v4650_v47   ;;  %v2201_v47 = vld [vmem:[#allocation0 + $0xc0] sm:$0xff]  ;;  %v2222_v50 = vld [vmem:[#allocation0 + $0xd8] sm:$0xff]  ;;  %v2236_v53 = vld [vmem:[#allocation0 + $0xe8] sm:$0xff]  ;;  %v3696_v54 = vpack.c.bf16 %v2194_v43, %v2187_v42 }
 0x1bd   :  { %2020 = vst.msk [vmem:[#allocation0 + $0x587] ss:$8 sm:$0xf] %vm363_vm0, %v4649_v51   ;;  %v2229_v52 = vld [vmem:[#allocation0 + $0xe0] sm:$0xff]  ;;  %v2243_v55 = vld [vmem:[#allocation0 + $0xf0] sm:$0xff]  ;;  %v3701_v57 = vpack.c.bf16 %v2208_v44, %v2201_v47  ;;  %v3706_v58 = vpack.c.bf16 %v2222_v50, %v2215_v49 }
 0x1be   :  { %2022 = vst.msk [vmem:[#allocation0 + $0x587] ss:$8 sm:$0xf0] %vm363_vm0, %v4649_v51   ;;  %v3691_v51 = vpack.c.bf16 %v2180_v41, %v2173_v40 }
 0x1bf   :  { %3642 = vst [vmem:[%s5797_s1] sm:$0xff] %v3641_v56   ;;  %v2250_v56 = vld [vmem:[#allocation0 + $0xf8] sm:$0xff] }
 0x1c0   :  { %4129 = vst [vmem:[%s5797_s1 + $0x8] sm:$0xff] %v3646_v59   ;;  %v3711_v59 = vpack.c.bf16 %v2236_v53, %v2229_v52  ;;  %v3716_v60 = vpack.c.bf16 %v2250_v56, %v2243_v55 }
 0x1c1   :  { %4130 = vst [vmem:[%s5797_s1 + $0x10] sm:$0xff] %v3651_v62   ;;  %v5610_v62 = vpop.permute.xlu0 %4637 }
 0x1c2   :  { %v3321_v2 = vld [vmem:[#allocation0 + $0x5c0] sm:$0xff]  ;;  %v3328_v3 = vld [vmem:[#allocation0 + $0x5c8] sm:$0xff]  ;;  %v3335_v4 = vld [vmem:[#allocation0 + $0x5d0] sm:$0xff]  ;;  %4131 = vst [vmem:[%s5797_s1 + $0x18] sm:$0xff] %v3656_v63   ;;  %v4625_v63 = vunpack.i.h.bf16 %v5557_v20  ;;  %v4640_v53 = vunpack.i.h.bf16 %v5610_v62 }
 0x1c3   :  { %v4101_v5 = vpack.c.bf16 %v3328_v3, %v3321_v2  ;;  %v3342_v6 = vld [vmem:[#allocation0 + $0x5d8] sm:$0xff]  ;;  %v3349_v7 = vld [vmem:[#allocation0 + $0x5e0] sm:$0xff]  ;;  %v3356_v8 = vld [vmem:[#allocation0 + $0x5e8] sm:$0xff]  ;;  %4132 = vst [vmem:[%s5797_s1 + $0x20] sm:$0xff] %v3661_v0  }
 0x1c4   :  { %v3265_v13 = vld [vmem:[#allocation0 + $0x580] sm:$0xff]  ;;  %v3272_v15 = vld [vmem:[#allocation0 + $0x588] sm:$0xff]  ;;  %v3279_v16 = vld [vmem:[#allocation0 + $0x590] sm:$0xff]  ;;  %v4106_v17 = vpack.c.bf16 %v3342_v6, %v3335_v4  ;;  %4133 = vst [vmem:[%s5797_s1 + $0x28] sm:$0xff] %v3666_v1   ;;  %v4111_v30 = vpack.c.bf16 %v3356_v8, %v3349_v7  ;;  %v4624_v4 = vunpack.i.l.bf16 %v5557_v20 }
 0x1c5   :  { %v4081_v18 = vpack.c.bf16 %v3272_v15, %v3265_v13  ;;  %v3286_v19 = vld [vmem:[#allocation0 + $0x598] sm:$0xff]  ;;  %v3293_v11 = vld [vmem:[#allocation0 + $0x5a0] sm:$0xff]  ;;  %v3300_v21 = vld [vmem:[#allocation0 + $0x5a8] sm:$0xff]  ;;  %4220 = vst [vmem:[%s5797_s1 + $0x2e0] sm:$0xff] %v4101_v5  }
 0x1c6   :  { %v4086_v25 = vpack.c.bf16 %v3286_v19, %v3279_v16  ;;  %v4091_v26 = vpack.c.bf16 %v3300_v21, %v3293_v11  ;;  %v3307_v27 = vld [vmem:[#allocation0 + $0x5b0] sm:$0xff]  ;;  %v3314_v28 = vld [vmem:[#allocation0 + $0x5b8] sm:$0xff]  ;;  %4221 = vst [vmem:[%s5797_s1 + $0x2e8] sm:$0xff] %v4106_v17  }
 0x1c7   :  { %v3363_v14 = vld [vmem:[#allocation0 + $0x5f0] sm:$0xff]  ;;  %4216 = vst [vmem:[%s5797_s1 + $0x2c0] sm:$0xff] %v4081_v18   ;;  %v4096_v29 = vpack.c.bf16 %v3314_v28, %v3307_v27  ;;  %v3370_v31 = vld [vmem:[#allocation0 + $0x5f8] sm:$0xff] }
 0x1c8   :  { %4217 = vst [vmem:[%s5797_s1 + $0x2c8] sm:$0xff] %v4086_v25   ;;  %v4116_v32 = vpack.c.bf16 %v3370_v31, %v3363_v14  ;;  %v5641_v14 = vpop.permute.xlu1 %4642 }
 0x1c9   :  { %4218 = vst [vmem:[%s5797_s1 + $0x2d0] sm:$0xff] %v4091_v26  }
 0x1ca   :  { %4219 = vst [vmem:[%s5797_s1 + $0x2d8] sm:$0xff] %v4096_v29  }
 0x1cb   :  { %4222 = vst [vmem:[%s5797_s1 + $0x2f0] sm:$0xff] %v4111_v30  }
 0x1cc   :  { %4223 = vst [vmem:[%s5797_s1 + $0x2f8] sm:$0xff] %v4116_v32  }
 0x1cd   :  { %4134 = vst [vmem:[%s5797_s1 + $0x30] sm:$0xff] %v3671_v36  }
 0x1ce   :  { %4135 = vst [vmem:[%s5797_s1 + $0x38] sm:$0xff] %v3676_v37  }
 0x1cf   :  { %1885 = vst.msk [vmem:[#allocation0 + $0x1c7] ss:$8 sm:$0xf] %vm363_vm0, %v4610_v33  }
 0x1d0   :  { %1887 = vst.msk [vmem:[#allocation0 + $0x1c7] ss:$8 sm:$0xf0] %vm363_vm0, %v4610_v33  }
 0x1d1   :  { %1876 = vst.msk [vmem:[#allocation0 + $0x187] ss:$8 sm:$0xf] %vm363_vm0, %v4609_v12  }
 0x1d2   :  { %1878 = vst.msk [vmem:[#allocation0 + $0x187] ss:$8 sm:$0xf0] %vm363_vm0, %v4609_v12  }
 0x1d3   :  { %4136 = vst [vmem:[%s5797_s1 + $0x40] sm:$0xff] %v3681_v46  }
 0x1d4   :  { %4137 = vst [vmem:[%s5797_s1 + $0x48] sm:$0xff] %v3686_v48  }
 0x1d5   :  { %4138 = vst [vmem:[%s5797_s1 + $0x50] sm:$0xff] %v3691_v51  }
 0x1d6   :  { %4139 = vst [vmem:[%s5797_s1 + $0x58] sm:$0xff] %v3696_v54   ;;  %v2425_v10 = vld [vmem:[#allocation0 + $0x1c0] sm:$0xff]  ;;  %v2432_v13 = vld [vmem:[#allocation0 + $0x1c8] sm:$0xff]  ;;  %v2439_v16 = vld [vmem:[#allocation0 + $0x1d0] sm:$0xff] }
 0x1d7   :  { %4140 = vst [vmem:[%s5797_s1 + $0x60] sm:$0xff] %v3701_v57   ;;  %v2446_v17 = vld [vmem:[#allocation0 + $0x1d8] sm:$0xff]  ;;  %v2453_v19 = vld [vmem:[#allocation0 + $0x1e0] sm:$0xff]  ;;  %v2460_v11 = vld [vmem:[#allocation0 + $0x1e8] sm:$0xff]  ;;  %v3781_v26 = vpack.c.bf16 %v2432_v13, %v2425_v10 }
 0x1d8   :  { %4141 = vst [vmem:[%s5797_s1 + $0x68] sm:$0xff] %v3706_v58   ;;  %v2369_v0 = vld [vmem:[#allocation0 + $0x180] sm:$0xff]  ;;  %v2376_v1 = vld [vmem:[#allocation0 + $0x188] sm:$0xff]  ;;  %v2383_v2 = vld [vmem:[#allocation0 + $0x190] sm:$0xff]  ;;  %v3786_v27 = vpack.c.bf16 %v2446_v17, %v2439_v16  ;;  %v3791_v28 = vpack.c.bf16 %v2460_v11, %v2453_v19  ;;  %v4639_v58 = vunpack.i.l.bf16 %v5610_v62 }
 0x1d9   :  { %4142 = vst [vmem:[%s5797_s1 + $0x70] sm:$0xff] %v3711_v59   ;;  %v2390_v3 = vld [vmem:[#allocation0 + $0x198] sm:$0xff]  ;;  %v2397_v5 = vld [vmem:[#allocation0 + $0x1a0] sm:$0xff]  ;;  %v2404_v6 = vld [vmem:[#allocation0 + $0x1a8] sm:$0xff]  ;;  %v3761_v9 = vpack.c.bf16 %v2376_v1, %v2369_v0 }
 0x1da   :  { %4143 = vst [vmem:[%s5797_s1 + $0x78] sm:$0xff] %v3716_v60   ;;  %v2411_v7 = vld [vmem:[#allocation0 + $0x1b0] sm:$0xff]  ;;  %v2418_v8 = vld [vmem:[#allocation0 + $0x1b8] sm:$0xff]  ;;  %v3766_v15 = vpack.c.bf16 %v2390_v3, %v2383_v2  ;;  %v3771_v18 = vpack.c.bf16 %v2404_v6, %v2397_v5 }
 0x1db   :  { %1903 = vst.msk [vmem:[#allocation0 + $0x247] ss:$8 sm:$0xf] %vm363_vm0, %v4615_v61   ;;  %v3776_v21 = vpack.c.bf16 %v2418_v8, %v2411_v7  ;;  %v2467_v20 = vld [vmem:[#allocation0 + $0x1f0] sm:$0xff]  ;;  %v2474_v25 = vld [vmem:[#allocation0 + $0x1f8] sm:$0xff] }
 0x1dc   :  { %1905 = vst.msk [vmem:[#allocation0 + $0x247] ss:$8 sm:$0xf0] %vm363_vm0, %v4615_v61   ;;  %v3796_v22 = vpack.c.bf16 %v2474_v25, %v2467_v20 }
 0x1dd   :  { %1894 = vst.msk [vmem:[#allocation0 + $0x207] ss:$8 sm:$0xf] %vm363_vm0, %v4614_v45  }
 0x1de   :  { %1896 = vst.msk [vmem:[#allocation0 + $0x207] ss:$8 sm:$0xf0] %vm363_vm0, %v4614_v45  }
 0x1df   :  { %1939 = vst.msk [vmem:[#allocation0 + $0x347] ss:$8 sm:$0xf] %vm363_vm0, %v4625_v63  }
 0x1e0   :  { %1941 = vst.msk [vmem:[#allocation0 + $0x347] ss:$8 sm:$0xf0] %vm363_vm0, %v4625_v63  }
 0x1e1   :  { %1930 = vst.msk [vmem:[#allocation0 + $0x307] ss:$8 sm:$0xf] %vm363_vm0, %v4624_v4  }
 0x1e2   :  { %1932 = vst.msk [vmem:[#allocation0 + $0x307] ss:$8 sm:$0xf0] %vm363_vm0, %v4624_v4   ;;  %v2537_v38 = vld [vmem:[#allocation0 + $0x240] sm:$0xff]  ;;  %v2544_v39 = vld [vmem:[#allocation0 + $0x248] sm:$0xff]  ;;  %v2551_v40 = vld [vmem:[#allocation0 + $0x250] sm:$0xff] }
 0x1e3   :  { %4152 = vst [vmem:[%s5797_s1 + $0xc0] sm:$0xff] %v3761_v9   ;;  %v2558_v41 = vld [vmem:[#allocation0 + $0x258] sm:$0xff]  ;;  %v2565_v43 = vld [vmem:[#allocation0 + $0x260] sm:$0xff]  ;;  %v2572_v46 = vld [vmem:[#allocation0 + $0x268] sm:$0xff]  ;;  %v3821_v49 = vpack.c.bf16 %v2544_v39, %v2537_v38 }
 0x1e4   :  { %4153 = vst [vmem:[%s5797_s1 + $0xc8] sm:$0xff] %v3766_v15   ;;  %v2481_v29 = vld [vmem:[#allocation0 + $0x200] sm:$0xff]  ;;  %v2488_v30 = vld [vmem:[#allocation0 + $0x208] sm:$0xff]  ;;  %v2495_v31 = vld [vmem:[#allocation0 + $0x210] sm:$0xff]  ;;  %v3826_v50 = vpack.c.bf16 %v2558_v41, %v2551_v40  ;;  %v3831_v51 = vpack.c.bf16 %v2572_v46, %v2565_v43 }
 0x1e5   :  { %4154 = vst [vmem:[%s5797_s1 + $0xd0] sm:$0xff] %v3771_v18   ;;  %v2502_v32 = vld [vmem:[#allocation0 + $0x218] sm:$0xff]  ;;  %v2509_v36 = vld [vmem:[#allocation0 + $0x220] sm:$0xff]  ;;  %v2516_v37 = vld [vmem:[#allocation0 + $0x228] sm:$0xff]  ;;  %v3801_v35 = vpack.c.bf16 %v2488_v30, %v2481_v29 }
 0x1e6   :  { %4155 = vst [vmem:[%s5797_s1 + $0xd8] sm:$0xff] %v3776_v21   ;;  %v2523_v33 = vld [vmem:[#allocation0 + $0x230] sm:$0xff]  ;;  %v2530_v34 = vld [vmem:[#allocation0 + $0x238] sm:$0xff]  ;;  %v3806_v12 = vpack.c.bf16 %v2502_v32, %v2495_v31  ;;  %v3811_v42 = vpack.c.bf16 %v2516_v37, %v2509_v36  ;;  %v2761_v63 = vld [vmem:[#allocation0 + $0x340] sm:$0xff] }
 0x1e7   :  { %4156 = vst [vmem:[%s5797_s1 + $0xe0] sm:$0xff] %v3781_v26   ;;  %v3816_v47 = vpack.c.bf16 %v2530_v34, %v2523_v33  ;;  %v2579_v44 = vld [vmem:[#allocation0 + $0x270] sm:$0xff]  ;;  %v2586_v48 = vld [vmem:[#allocation0 + $0x278] sm:$0xff]  ;;  %v2768_v0 = vld [vmem:[#allocation0 + $0x348] sm:$0xff] }
 0x1e8   :  { %4157 = vst [vmem:[%s5797_s1 + $0xe8] sm:$0xff] %v3786_v27   ;;  %v3836_v52 = vpack.c.bf16 %v2586_v48, %v2579_v44  ;;  %v2705_v54 = vld [vmem:[#allocation0 + $0x300] sm:$0xff]  ;;  %v2712_v55 = vld [vmem:[#allocation0 + $0x308] sm:$0xff]  ;;  %v2719_v56 = vld [vmem:[#allocation0 + $0x310] sm:$0xff]  ;;  %v3901_v6 = vpack.c.bf16 %v2768_v0, %v2761_v63 }
 0x1e9   :  { %4158 = vst [vmem:[%s5797_s1 + $0xf0] sm:$0xff] %v3791_v28   ;;  %v2726_v57 = vld [vmem:[#allocation0 + $0x318] sm:$0xff]  ;;  %v2733_v59 = vld [vmem:[#allocation0 + $0x320] sm:$0xff]  ;;  %v2740_v60 = vld [vmem:[#allocation0 + $0x328] sm:$0xff]  ;;  %v3881_v45 = vpack.c.bf16 %v2712_v55, %v2705_v54 }
 0x1ea   :  { %4159 = vst [vmem:[%s5797_s1 + $0xf8] sm:$0xff] %v3796_v22   ;;  %v2747_v61 = vld [vmem:[#allocation0 + $0x330] sm:$0xff]  ;;  %v2754_v62 = vld [vmem:[#allocation0 + $0x338] sm:$0xff]  ;;  %v3886_v1 = vpack.c.bf16 %v2726_v57, %v2719_v56  ;;  %v3891_v4 = vpack.c.bf16 %v2740_v60, %v2733_v59  ;;  %v2789_v18 = vld [vmem:[#allocation0 + $0x360] sm:$0xff] }
 0x1eb   :  { %1957 = vst.msk [vmem:[#allocation0 + $0x3c7] ss:$8 sm:$0xf] %vm363_vm0, %v4630_v23   ;;  %v2775_v2 = vld [vmem:[#allocation0 + $0x350] sm:$0xff]  ;;  %v2782_v3 = vld [vmem:[#allocation0 + $0x358] sm:$0xff]  ;;  %v3896_v5 = vpack.c.bf16 %v2754_v62, %v2747_v61  ;;  %v2796_v19 = vld [vmem:[#allocation0 + $0x368] sm:$0xff] }
 0x1ec   :  { %1959 = vst.msk [vmem:[#allocation0 + $0x3c7] ss:$8 sm:$0xf0] %vm363_vm0, %v4630_v23   ;;  %v3906_v7 = vpack.c.bf16 %v2782_v3, %v2775_v2  ;;  %v2810_v36 = vld [vmem:[#allocation0 + $0x378] sm:$0xff]  ;;  %v3911_v38 = vpack.c.bf16 %v2796_v19, %v2789_v18 }
 0x1ed   :  { %1948 = vst.msk [vmem:[#allocation0 + $0x387] ss:$8 sm:$0xf] %vm363_vm0, %v4629_v24  }
 0x1ee   :  { %1950 = vst.msk [vmem:[#allocation0 + $0x387] ss:$8 sm:$0xf0] %vm363_vm0, %v4629_v24   ;;  %v2803_v24 = vld [vmem:[#allocation0 + $0x370] sm:$0xff] }
 0x1ef   :  { %4160 = vst [vmem:[%s5797_s1 + $0x100] sm:$0xff] %v3801_v35   ;;  %v3916_v39 = vpack.c.bf16 %v2810_v36, %v2803_v24 }
 0x1f0   :  { %4161 = vst [vmem:[%s5797_s1 + $0x108] sm:$0xff] %v3806_v12   ;;  %v4645_v12 = vunpack.i.h.bf16 %v5641_v14  ;;  %v4644_v14 = vunpack.i.l.bf16 %v5641_v14 }
 0x1f1   :  { %4162 = vst [vmem:[%s5797_s1 + $0x110] sm:$0xff] %v3811_v42  }
 0x1f2   :  { %4163 = vst [vmem:[%s5797_s1 + $0x118] sm:$0xff] %v3816_v47   ;;  %v2894_v54 = vld [vmem:[#allocation0 + $0x3d8] sm:$0xff] }
 0x1f3   :  { %4164 = vst [vmem:[%s5797_s1 + $0x120] sm:$0xff] %v3821_v49   ;;  %v2908_v2 = vld [vmem:[#allocation0 + $0x3e8] sm:$0xff]  ;;  %v2915_v19 = vld [vmem:[#allocation0 + $0x3f0] sm:$0xff] }
 0x1f4   :  { %4165 = vst [vmem:[%s5797_s1 + $0x128] sm:$0xff] %v3826_v50   ;;  %v2817_v40 = vld [vmem:[#allocation0 + $0x380] sm:$0xff]  ;;  %v2824_v41 = vld [vmem:[#allocation0 + $0x388] sm:$0xff]  ;;  %v2831_v42 = vld [vmem:[#allocation0 + $0x390] sm:$0xff] }
 0x1f5   :  { %4166 = vst [vmem:[%s5797_s1 + $0x130] sm:$0xff] %v3831_v51   ;;  %v2838_v43 = vld [vmem:[#allocation0 + $0x398] sm:$0xff]  ;;  %v2845_v46 = vld [vmem:[#allocation0 + $0x3a0] sm:$0xff]  ;;  %v2852_v47 = vld [vmem:[#allocation0 + $0x3a8] sm:$0xff]  ;;  %v3921_v49 = vpack.c.bf16 %v2824_v41, %v2817_v40 }
 0x1f6   :  { %4167 = vst [vmem:[%s5797_s1 + $0x138] sm:$0xff] %v3836_v52   ;;  %v2859_v44 = vld [vmem:[#allocation0 + $0x3b0] sm:$0xff]  ;;  %v2866_v48 = vld [vmem:[#allocation0 + $0x3b8] sm:$0xff]  ;;  %v2873_v50 = vld [vmem:[#allocation0 + $0x3c0] sm:$0xff]  ;;  %v3926_v52 = vpack.c.bf16 %v2838_v43, %v2831_v42  ;;  %v3931_v55 = vpack.c.bf16 %v2852_v47, %v2845_v46 }
 0x1f7   :  { %1993 = vst.msk [vmem:[#allocation0 + $0x4c7] ss:$8 sm:$0xf] %vm363_vm0, %v4640_v53   ;;  %v2880_v51 = vld [vmem:[#allocation0 + $0x3c8] sm:$0xff]  ;;  %v3936_v56 = vpack.c.bf16 %v2866_v48, %v2859_v44 }
 0x1f8   :  { %1995 = vst.msk [vmem:[#allocation0 + $0x4c7] ss:$8 sm:$0xf0] %vm363_vm0, %v4640_v53   ;;  %v2887_v53 = vld [vmem:[#allocation0 + $0x3d0] sm:$0xff]  ;;  %v3941_v57 = vpack.c.bf16 %v2880_v51, %v2873_v50 }
 0x1f9   :  { %1984 = vst.msk [vmem:[#allocation0 + $0x487] ss:$8 sm:$0xf] %vm363_vm0, %v4639_v58  }
 0x1fa   :  { %1986 = vst.msk [vmem:[#allocation0 + $0x487] ss:$8 sm:$0xf0] %vm363_vm0, %v4639_v58   ;;  %v3946_v58 = vpack.c.bf16 %v2894_v54, %v2887_v53 }
 0x1fb   :  { %4176 = vst [vmem:[%s5797_s1 + $0x180] sm:$0xff] %v3881_v45  }
 0x1fc   :  { %4177 = vst [vmem:[%s5797_s1 + $0x188] sm:$0xff] %v3886_v1   ;;  %v2901_v1 = vld [vmem:[#allocation0 + $0x3e0] sm:$0xff] }
 0x1fd   :  { %4178 = vst [vmem:[%s5797_s1 + $0x190] sm:$0xff] %v3891_v4  }
 0x1fe   :  { %v3097_v8 = vld [vmem:[#allocation0 + $0x4c0] sm:$0xff]  ;;  %v3104_v9 = vld [vmem:[#allocation0 + $0x4c8] sm:$0xff]  ;;  %v3111_v10 = vld [vmem:[#allocation0 + $0x4d0] sm:$0xff]  ;;  %4179 = vst [vmem:[%s5797_s1 + $0x198] sm:$0xff] %v3896_v5  }
 0x1ff   :  { %v4021_v13 = vpack.c.bf16 %v3104_v9, %v3097_v8  ;;  %v3118_v15 = vld [vmem:[#allocation0 + $0x4d8] sm:$0xff]  ;;  %v3125_v16 = vld [vmem:[#allocation0 + $0x4e0] sm:$0xff]  ;;  %v3132_v17 = vld [vmem:[#allocation0 + $0x4e8] sm:$0xff]  ;;  %4180 = vst [vmem:[%s5797_s1 + $0x1a0] sm:$0xff] %v3901_v6  }
 0x200   :  { %v3041_v11 = vld [vmem:[#allocation0 + $0x480] sm:$0xff]  ;;  %v3048_v21 = vld [vmem:[#allocation0 + $0x488] sm:$0xff]  ;;  %v3055_v20 = vld [vmem:[#allocation0 + $0x490] sm:$0xff]  ;;  %v4026_v25 = vpack.c.bf16 %v3118_v15, %v3111_v10  ;;  %4181 = vst [vmem:[%s5797_s1 + $0x1a8] sm:$0xff] %v3906_v7   ;;  %v4031_v33 = vpack.c.bf16 %v3132_v17, %v3125_v16 }
 0x201   :  { %v4001_v26 = vpack.c.bf16 %v3048_v21, %v3041_v11  ;;  %v3062_v27 = vld [vmem:[#allocation0 + $0x498] sm:$0xff]  ;;  %v3069_v28 = vld [vmem:[#allocation0 + $0x4a0] sm:$0xff]  ;;  %v3076_v22 = vld [vmem:[#allocation0 + $0x4a8] sm:$0xff]  ;;  %4204 = vst [vmem:[%s5797_s1 + $0x260] sm:$0xff] %v4021_v13  }
 0x202   :  { %v4006_v23 = vpack.c.bf16 %v3062_v27, %v3055_v20  ;;  %v4011_v29 = vpack.c.bf16 %v3076_v22, %v3069_v28  ;;  %v3083_v30 = vld [vmem:[#allocation0 + $0x4b0] sm:$0xff]  ;;  %v3090_v31 = vld [vmem:[#allocation0 + $0x4b8] sm:$0xff]  ;;  %4205 = vst [vmem:[%s5797_s1 + $0x268] sm:$0xff] %v4026_v25   ;;  %v3951_v27 = vpack.c.bf16 %v2908_v2, %v2901_v1 }
 0x203   :  { %v3139_v32 = vld [vmem:[#allocation0 + $0x4f0] sm:$0xff]  ;;  %4200 = vst [vmem:[%s5797_s1 + $0x240] sm:$0xff] %v4001_v26   ;;  %v4016_v37 = vpack.c.bf16 %v3090_v31, %v3083_v30  ;;  %v3146_v34 = vld [vmem:[#allocation0 + $0x4f8] sm:$0xff] }
 0x204   :  { %4201 = vst [vmem:[%s5797_s1 + $0x248] sm:$0xff] %v4006_v23   ;;  %v4036_v35 = vpack.c.bf16 %v3146_v34, %v3139_v32  ;;  %v2922_v11 = vld [vmem:[#allocation0 + $0x3f8] sm:$0xff] }
 0x205   :  { %4202 = vst [vmem:[%s5797_s1 + $0x250] sm:$0xff] %v4011_v29   ;;  %v3956_v28 = vpack.c.bf16 %v2922_v11, %v2915_v19 }
 0x206   :  { %4203 = vst [vmem:[%s5797_s1 + $0x258] sm:$0xff] %v4016_v37  }
 0x207   :  { %4206 = vst [vmem:[%s5797_s1 + $0x270] sm:$0xff] %v4031_v33  }
 0x208   :  { %4207 = vst [vmem:[%s5797_s1 + $0x278] sm:$0xff] %v4036_v35  }
 0x209   :  { %4182 = vst [vmem:[%s5797_s1 + $0x1b0] sm:$0xff] %v3911_v38  }
 0x20a   :  { %4183 = vst [vmem:[%s5797_s1 + $0x1b8] sm:$0xff] %v3916_v39  }
 0x20b   :  { %2011 = vst.msk [vmem:[#allocation0 + $0x547] ss:$8 sm:$0xf] %vm363_vm0, %v4645_v12  }
 0x20c   :  { %2013 = vst.msk [vmem:[#allocation0 + $0x547] ss:$8 sm:$0xf0] %vm363_vm0, %v4645_v12  }
 0x20d   :  { %2002 = vst.msk [vmem:[#allocation0 + $0x507] ss:$8 sm:$0xf] %vm363_vm0, %v4644_v14  }
 0x20e   :  { %2004 = vst.msk [vmem:[#allocation0 + $0x507] ss:$8 sm:$0xf0] %vm363_vm0, %v4644_v14  }
 0x20f   :  { %4184 = vst [vmem:[%s5797_s1 + $0x1c0] sm:$0xff] %v3921_v49  }
 0x210   :  { %4185 = vst [vmem:[%s5797_s1 + $0x1c8] sm:$0xff] %v3926_v52  }
 0x211   :  { %4186 = vst [vmem:[%s5797_s1 + $0x1d0] sm:$0xff] %v3931_v55  }
 0x212   :  { %v3209_v59 = vld [vmem:[#allocation0 + $0x540] sm:$0xff]  ;;  %v3216_v60 = vld [vmem:[#allocation0 + $0x548] sm:$0xff]  ;;  %v3223_v61 = vld [vmem:[#allocation0 + $0x550] sm:$0xff]  ;;  %4187 = vst [vmem:[%s5797_s1 + $0x1d8] sm:$0xff] %v3936_v56  }
 0x213   :  { %v4061_v62 = vpack.c.bf16 %v3216_v60, %v3209_v59  ;;  %v3230_v45 = vld [vmem:[#allocation0 + $0x558] sm:$0xff]  ;;  %v3237_v63 = vld [vmem:[#allocation0 + $0x560] sm:$0xff]  ;;  %v3244_v0 = vld [vmem:[#allocation0 + $0x568] sm:$0xff]  ;;  %4188 = vst [vmem:[%s5797_s1 + $0x1e0] sm:$0xff] %v3941_v57  }
 0x214   :  { %v3153_v3 = vld [vmem:[#allocation0 + $0x500] sm:$0xff]  ;;  %v3160_v4 = vld [vmem:[#allocation0 + $0x508] sm:$0xff]  ;;  %v3167_v5 = vld [vmem:[#allocation0 + $0x510] sm:$0xff]  ;;  %v4066_v6 = vpack.c.bf16 %v3230_v45, %v3223_v61  ;;  %4189 = vst [vmem:[%s5797_s1 + $0x1e8] sm:$0xff] %v3946_v58   ;;  %v4071_v20 = vpack.c.bf16 %v3244_v0, %v3237_v63 }
 0x215   :  { %v4041_v7 = vpack.c.bf16 %v3160_v4, %v3153_v3  ;;  %v3174_v8 = vld [vmem:[#allocation0 + $0x518] sm:$0xff]  ;;  %v3181_v9 = vld [vmem:[#allocation0 + $0x520] sm:$0xff]  ;;  %v3188_v10 = vld [vmem:[#allocation0 + $0x528] sm:$0xff]  ;;  %4212 = vst [vmem:[%s5797_s1 + $0x2a0] sm:$0xff] %v4061_v62  }
 0x216   :  { %v4046_v13 = vpack.c.bf16 %v3174_v8, %v3167_v5  ;;  %v4051_v15 = vpack.c.bf16 %v3188_v10, %v3181_v9  ;;  %v3195_v16 = vld [vmem:[#allocation0 + $0x530] sm:$0xff]  ;;  %v3202_v17 = vld [vmem:[#allocation0 + $0x538] sm:$0xff]  ;;  %4213 = vst [vmem:[%s5797_s1 + $0x2a8] sm:$0xff] %v4066_v6  }
 0x217   :  { %v3251_v18 = vld [vmem:[#allocation0 + $0x570] sm:$0xff]  ;;  %4208 = vst [vmem:[%s5797_s1 + $0x280] sm:$0xff] %v4041_v7   ;;  %v4056_v21 = vpack.c.bf16 %v3202_v17, %v3195_v16  ;;  %v3258_v25 = vld [vmem:[#allocation0 + $0x578] sm:$0xff] }
 0x218   :  { %4209 = vst [vmem:[%s5797_s1 + $0x288] sm:$0xff] %v4046_v13   ;;  %v4076_v26 = vpack.c.bf16 %v3258_v25, %v3251_v18 }
 0x219   :  { %4210 = vst [vmem:[%s5797_s1 + $0x290] sm:$0xff] %v4051_v15  }
 0x21a   :  { %4211 = vst [vmem:[%s5797_s1 + $0x298] sm:$0xff] %v4056_v21  }
 0x21b   :  { %4214 = vst [vmem:[%s5797_s1 + $0x2b0] sm:$0xff] %v4071_v20  }
 0x21c   :  { %4215 = vst [vmem:[%s5797_s1 + $0x2b8] sm:$0xff] %v4076_v26  }
 0x21d   :  { %4190 = vst [vmem:[%s5797_s1 + $0x1f0] sm:$0xff] %v3951_v27  }
 0x21e   :  { %4191 = vst [vmem:[%s5797_s1 + $0x1f8] sm:$0xff] %v3956_v28  }

// kernel: sam_encoder_nuke_forward.16
= control target key start
LH: loop header
LB: loop body
LE: loop exit
PB: predicated region body
PF: predicated region fallthrough
CT: control target
= control target key end

     0   :  { %vm37_vm0 = vcmask 523264   ;;  %v492_v20 = vmov 64.0   ;;  %s783_s0 = inlined_call_operand.vmem [shape: bf16[64,64], index: 0, kind: input, shape index: {}]   ;;  %s784_s3 = inlined_call_operand.vmem [shape: f32[1,64], index: 3, kind: input, shape index: {}]   ;;  %s785_s4 = inlined_call_operand.vmem [shape: f32[1,64], index: 4, kind: input, shape index: {}]   ;;  %s786_s1 = inlined_call_operand.vmem [shape: bf16[64,192], index: 1, kind: input, shape index: {}]   ;;  %s787_s2 = inlined_call_operand.vmem [shape: f32[1,192], index: 2, kind: input, shape index: {}]   ;;  %s788_s5 = inlined_call_operand.vmem [shape: bf16[64,192], index: 5, kind: output, shape index: {}]  }
   0x1   :  { %v462_v0 = vld [vmem:[%s783_s0 + $0x18] sm:$0xff]   ;;  %v461_v1 = vld [vmem:[%s783_s0 + $0x10] sm:$0xff]   ;;  %v445_v2 = vld [vmem:[%s783_s0] sm:$0xff]   ;;  %474 = vrcp.f32 %v492_v20 }
   0x2   :  { %v458_v3 = vunpack.c.l.bf16 %v462_v0  ;;  %v454_v4 = vunpack.c.l.bf16 %v461_v1  ;;  %v446_v5 = vunpack.c.l.bf16 %v445_v2  ;;  %v459_v9 = vunpack.c.h.bf16 %v462_v0  ;;  %v460_v15 = vld [vmem:[%s783_s0 + $0x8] sm:$0xff]  }
   0x3   :  { %v455_v10 = vunpack.c.h.bf16 %v461_v1  ;;  %v447_v11 = vunpack.c.h.bf16 %v445_v2  ;;  %v450_v16 = vunpack.c.l.bf16 %v460_v15  ;;  %v451_v17 = vunpack.c.h.bf16 %v460_v15 }
   0x4   :  { %v56_v6 = vsel %vm37_vm0, %v458_v3, 0.0  ;;  %v50_v7 = vsel %vm37_vm0, %v454_v4, 0.0  ;;  %v38_v8 = vsel %vm37_vm0, %v446_v5, 0.0  ;;  %v59_v12 = vsel %vm37_vm0, %v459_v9, 0.0 }
   0x5   :  { %57 = vadd.xlane.f32.xlu2 %v56_v6  ;;  %51 = vadd.xlane.f32.xlu0 %v50_v7  ;;  %v53_v13 = vsel %vm37_vm0, %v455_v10, 0.0  ;;  %v41_v14 = vsel %vm37_vm0, %v447_v11, 0.0  ;;  %v44_v18 = vsel %vm37_vm0, %v450_v16, 0.0  ;;  %v47_v19 = vsel %vm37_vm0, %v451_v17, 0.0  ;;  %v424_v7 = vld [vmem:[%s786_s1 + $0x38] sm:$0xf0] }
   0x6   :  { %39 = vadd.xlane.f32.xlu1 %v38_v8 }
   0x7   :  { %v475_v21 = vpop.eup %474 }
   0x8   :  { %v63_v22 = vmul.f32 64.0, %v475_v21  ;;  %vm67_vm1 = vweird.f32 %v475_v21 }
   0xa   :  { %v64_v23 = vsub.f32 1.0, %v63_v22  ;;  %v408_v22 = vld [vmem:[%s786_s1 + $0x18] sm:$0xf0] }
   0xc   :  { %v65_v24 = vmul.f32 %v475_v21, %v64_v23 }
   0xd   :  { %60 = vadd.xlane.f32.xlu2 %v59_v12  ;;  %54 = vadd.xlane.f32.xlu0 %v53_v13  ;;  %v416_v13 = vld [vmem:[%s786_s1 + $0x28] sm:$0xf0] }
   0xe   :  { %42 = vadd.xlane.f32.xlu1 %v41_v14  ;;  %v66_v25 = vadd.f32 %v475_v21, %v65_v24 }
  0x10   :  { %v543_v26 = vsel %vm67_vm1, %v475_v21, %v66_v25 }
  0x15   :  { %45 = vadd.xlane.f32.xlu0 %v44_v18  ;;  %v438_v18 = vld [vmem:[%s786_s1 + $0x14] sm:$0xf] }
  0x16   :  { %48 = vadd.xlane.f32.xlu1 %v47_v19  ;;  %v411_v24 = vor.u32 %v438_v18, %v408_v22  ;;  %v673_v22 = vld [vmem:[%s784_s3] ss:$0 sm:$0xff] }
  0x78   :  { %v58_v27 = vpop.xlane.xlu2 %57  ;;  %v52_v28 = vpop.xlane.xlu0 %51 }
  0x79   :  { %v73_v29 = vmul.f32 %v543_v26, %v52_v28  ;;  %v40_v30 = vpop.xlane.xlu1 %39  ;;  %v75_v40 = vmul.f32 %v543_v26, %v58_v27  ;;  %v398_v28 = vld [vmem:[%s786_s1] sm:$0xf] }
  0x7a   :  { %v69_v31 = vmul.f32 %v543_v26, %v40_v30 }
  0x7b   :  { %v547_v32 = vsub.f32 %v454_v4, %v73_v29  ;;  %v567_v48 = vsub.f32 %v458_v3, %v75_v40  ;;  %v422_v3 = vld [vmem:[%s786_s1 + $0x30] sm:$0xf]  ;;  %v443_v4 = vld [vmem:[%s786_s1 + $0x34] sm:$0xf0]  ;;  %v437_v29 = vld [vmem:[%s786_s1 + $0x4] sm:$0xf0] }
  0x7c   :  { %v549_v33 = vsub.f32 %v446_v5, %v69_v31  ;;  %v442_v5 = vld [vmem:[%s786_s1 + $0x34] sm:$0xf]  ;;  %v423_v6 = vor.u32 %v443_v4, %v422_v3  ;;  %v399_v30 = vor.u32 %v437_v29, %v398_v28  ;;  %v436_v31 = vld [vmem:[%s786_s1 + $0x4] sm:$0xf] }
  0x7d   :  { %v89_v34 = vmul.f32 %v547_v32, %v547_v32  ;;  %v91_v57 = vmul.f32 %v567_v48, %v567_v48  ;;  %v427_v8 = vor.u32 %v442_v5, %v424_v7 }
  0x7e   :  { %v85_v35 = vmul.f32 %v549_v33, %v549_v33  ;;  %319 = vmatpush.bf16.msra.mxu0 %v423_v6  ;;  %463 = vmatpush.bf16.msra.mxu2 %v423_v6 }
  0x7f   :  { %v105_v36 = vsel %vm37_vm0, %v89_v34, 0.0  ;;  %v111_v61 = vsel %vm37_vm0, %v91_v57, 0.0  ;;  %348 = vmatpush.bf16.msra.mxu1 %v427_v8  ;;  %467 = vmatpush.bf16.msra.mxu3 %v427_v8  ;;  %v400_v34 = vld [vmem:[%s786_s1 + $0x8] sm:$0xf0] }
  0x80   :  { %v61_v37 = vpop.xlane.xlu2 %60  ;;  %106 = vadd.xlane.f32.xlu2 %v105_v36  ;;  %v55_v38 = vpop.xlane.xlu0 %54  ;;  %v93_v39 = vsel %vm37_vm0, %v85_v35, 0.0  ;;  %v403_v35 = vor.u32 %v436_v31, %v400_v34  ;;  %v473_v34 = vld [vmem:[%s785_s4] ss:$0 sm:$0xff] }
  0x81   :  { %v76_v41 = vmul.f32 %v543_v26, %v61_v37  ;;  %v74_v42 = vmul.f32 %v543_v26, %v55_v38  ;;  %94 = vadd.xlane.f32.xlu1 %v93_v39  ;;  %v43_v43 = vpop.xlane.xlu1 %42 }
  0x82   :  { %v70_v44 = vmul.f32 %v543_v26, %v43_v43 }
  0x83   :  { %v561_v45 = vsub.f32 %v459_v9, %v76_v41  ;;  %v563_v46 = vsub.f32 %v455_v10, %v74_v42  ;;  %v414_v9 = vld [vmem:[%s786_s1 + $0x20] sm:$0xf]  ;;  %v441_v10 = vld [vmem:[%s786_s1 + $0x24] sm:$0xf0] }
  0x84   :  { %v565_v47 = vsub.f32 %v447_v11, %v70_v44  ;;  %v440_v11 = vld [vmem:[%s786_s1 + $0x24] sm:$0xf]  ;;  %v415_v12 = vor.u32 %v441_v10, %v414_v9 }
  0x85   :  { %v90_v49 = vmul.f32 %v563_v46, %v563_v46  ;;  %v92_v50 = vmul.f32 %v561_v45, %v561_v45  ;;  %v419_v14 = vor.u32 %v440_v11, %v416_v13 }
  0x86   :  { %v86_v51 = vmul.f32 %v565_v47, %v565_v47  ;;  %320 = vmatpush.bf16.msra.mxu0 %v415_v12  ;;  %464 = vmatpush.bf16.msra.mxu2 %v415_v12 }
  0x87   :  { %v108_v52 = vsel %vm37_vm0, %v90_v49, 0.0  ;;  %v114_v53 = vsel %vm37_vm0, %v92_v50, 0.0  ;;  %349 = vmatpush.bf16.msra.mxu1 %v419_v14  ;;  %468 = vmatpush.bf16.msra.mxu3 %v419_v14 }
  0x88   :  { %109 = vadd.xlane.f32.xlu0 %v108_v52  ;;  %v46_v54 = vpop.xlane.xlu0 %45  ;;  %v96_v55 = vsel %vm37_vm0, %v86_v51, 0.0 }
  0x89   :  { %v71_v56 = vmul.f32 %v543_v26, %v46_v54  ;;  %115 = vadd.xlane.f32.xlu1 %v114_v53  ;;  %97 = vadd.xlane.f32.xlu2 %v96_v55  ;;  %v49_v58 = vpop.xlane.xlu1 %48 }
  0x8a   :  { %v72_v59 = vmul.f32 %v543_v26, %v49_v58 }
  0x8b   :  { %v582_v60 = vsub.f32 %v450_v16, %v71_v56  ;;  %v406_v16 = vld [vmem:[%s786_s1 + $0x10] sm:$0xf]  ;;  %350 = vmatpush.bf16.msra.mxu1 %v411_v24  ;;  %469 = vmatpush.bf16.msra.mxu3 %v411_v24 }
  0x8c   :  { %v587_v63 = vsub.f32 %v451_v17, %v72_v59  ;;  %v439_v17 = vld [vmem:[%s786_s1 + $0x14] sm:$0xf0] }
  0x8d   :  { %v87_v62 = vmul.f32 %v582_v60, %v582_v60  ;;  %v407_v21 = vor.u32 %v439_v17, %v406_v16 }
  0x8e   :  { %v88_v1 = vmul.f32 %v587_v63, %v587_v63 }
  0x8f   :  { %v99_v0 = vsel %vm37_vm0, %v87_v62, 0.0  ;;  %321 = vmatpush.bf16.msra.mxu0 %v407_v21  ;;  %465 = vmatpush.bf16.msra.mxu2 %v407_v21 }
  0x90   :  { %112 = vadd.xlane.f32.xlu0 %v111_v61  ;;  %v102_v2 = vsel %vm37_vm0, %v88_v1, 0.0  ;;  %351 = vmatpush.bf16.msra.mxu1 %v403_v35 }
  0x91   :  { %100 = vadd.xlane.f32.xlu2 %v99_v0  ;;  %470 = vmatpush.bf16.msra.mxu3 %v403_v35 }
  0x93   :  { %322 = vmatpush.bf16.msra.mxu0 %v399_v30  ;;  %466 = vmatpush.bf16.msra.mxu2 %v399_v30 }
  0x98   :  { %103 = vadd.xlane.f32.xlu0 %v102_v2 }
  0xf3   :  { %v107_v15 = vpop.xlane.xlu2 %106 }
  0xf4   :  { %v121_v19 = vmul.f32 %v107_v15, %v543_v26  ;;  %v95_v20 = vpop.xlane.xlu1 %94 }
  0xf5   :  { %v117_v23 = vmul.f32 %v95_v20, %v543_v26 }
  0xf6   :  { %v129_v25 = vadd.f32 1e-06, %v121_v19 }
  0xf7   :  { %v125_v27 = vadd.f32 1e-06, %v117_v23 }
  0xf8   :  { %476 = vrsqrt.f32 %v129_v25  ;;  %vm179_vm5 = vweird.f32 %v129_v25 }
  0xf9   :  { %478 = vrsqrt.f32 %v125_v27  ;;  %vm139_vm3 = vweird.f32 %v125_v27 }
  0xfb   :  { %v110_v36 = vpop.xlane.xlu0 %109 }
  0xfc   :  { %v122_v37 = vmul.f32 %v110_v36, %v543_v26  ;;  %v98_v38 = vpop.xlane.xlu2 %97  ;;  %v116_v39 = vpop.xlane.xlu1 %115 }
  0xfd   :  { %v118_v40 = vmul.f32 %v98_v38, %v543_v26  ;;  %v124_v41 = vmul.f32 %v116_v39, %v543_v26 }
  0xfe   :  { %v477_v42 = vpop.eup %476  ;;  %v130_v43 = vadd.f32 1e-06, %v122_v37 }
  0xff   :  { %v479_v44 = vpop.eup %478  ;;  %v174_v49 = vmul.f32 %v477_v42, %v129_v25  ;;  %v646_v50 = vadd.f32 1e-06, %v118_v40  ;;  %v648_v51 = vadd.f32 1e-06, %v124_v41  ;;  %vm180_vm2 = vweird.f32 %v477_v42 }
 0x100   :  { %v134_v52 = vmul.f32 %v479_v44, %v125_v27  ;;  %480 = vrsqrt.f32 %v130_v43  ;;  %vm140_vm4 = vweird.f32 %v479_v44  ;;  %vm181_vm6 = vmor %vm179_vm5, %vm180_vm2  ;;  %vm189_vm11 = vweird.f32 %v130_v43 }
 0x101   :  { %v175_v53 = vmul.f32 %v477_v42, %v174_v49  ;;  %482 = vrsqrt.f32 %v646_v50  ;;  %vm141_vm7 = vmor %vm139_vm3, %vm140_vm4  ;;  %vm149_vm9 = vweird.f32 %v646_v50  ;;  %vm209_vm14 = vweird.f32 %v648_v51 }
 0x102   :  { %v135_v54 = vmul.f32 %v479_v44, %v134_v52  ;;  %484 = vrsqrt.f32 %v648_v51 }
 0x103   :  { %v176_v55 = vmul.f32 0.5, %v175_v53  ;;  %v113_v56 = vpop.xlane.xlu0 %112 }
 0x104   :  { %v136_v57 = vmul.f32 0.5, %v135_v54  ;;  %v123_v58 = vmul.f32 %v113_v56, %v543_v26  ;;  %v101_v59 = vpop.xlane.xlu2 %100 }
 0x105   :  { %v177_v61 = vsub.f32 1.5, %v176_v55  ;;  %v119_v62 = vmul.f32 %v101_v59, %v543_v26 }
 0x106   :  { %v481_v0 = vpop.eup %480  ;;  %v137_v1 = vsub.f32 1.5, %v136_v57  ;;  %v654_v2 = vadd.f32 1e-06, %v123_v58 }
 0x107   :  { %v483_v3 = vpop.eup %482  ;;  %v178_v4 = vmul.f32 %v477_v42, %v177_v61  ;;  %v184_v5 = vmul.f32 %v481_v0, %v130_v43  ;;  %v656_v6 = vadd.f32 1e-06, %v119_v62  ;;  %vm190_vm8 = vweird.f32 %v481_v0 }
 0x108   :  { %v658_v7 = vpop.eup %484  ;;  %v138_v8 = vmul.f32 %v479_v44, %v137_v1  ;;  %v144_v9 = vmul.f32 %v483_v3, %v646_v50  ;;  %486 = vrsqrt.f32 %v654_v2  ;;  %vm150_vm10 = vweird.f32 %v483_v3  ;;  %vm191_vm12 = vmor %vm189_vm11, %vm190_vm8 }
 0x109   :  { %v185_v10 = vmul.f32 %v481_v0, %v184_v5  ;;  %v204_v11 = vmul.f32 %v658_v7, %v648_v51  ;;  %v182_v12 = vsel %vm181_vm6, %v477_v42, %v178_v4  ;;  %488 = vrsqrt.f32 %v656_v6  ;;  %vm151_vm13 = vmor %vm149_vm9, %vm150_vm10 }
 0x10a   :  { %v145_v13 = vmul.f32 %v483_v3, %v144_v9  ;;  %v142_v14 = vsel %vm141_vm7, %v479_v44, %v138_v8  ;;  %v217_v20 = vmul.f32 %v182_v12, %v547_v32  ;;  %vm210_vm15 = vweird.f32 %v658_v7 }
 0x10b   :  { %v186_v15 = vmul.f32 0.5, %v185_v10  ;;  %v205_v16 = vmul.f32 %v658_v7, %v204_v11  ;;  %v104_v17 = vpop.xlane.xlu0 %103  ;;  %v213_v24 = vmul.f32 %v142_v14, %v549_v33  ;;  %vm199_vm1 = vweird.f32 %v654_v2  ;;  %vm701_vm5 = vmor %vm209_vm14, %vm210_vm15 }
 0x10c   :  { %v146_v18 = vmul.f32 0.5, %v145_v13  ;;  %v120_v19 = vmul.f32 %v104_v17, %v543_v26  ;;  %v229_v35 = vmul.f32 %v673_v22, %v217_v20  ;;  %vm159_vm2 = vweird.f32 %v656_v6 }
 0x10d   :  { %v187_v21 = vsub.f32 1.5, %v186_v15  ;;  %v206_v26 = vmul.f32 0.5, %v205_v16  ;;  %v225_v39 = vmul.f32 %v673_v22, %v213_v24  ;;  %vm381_vm11 = vcmask 1043456  }
 0x10e   :  { %v487_v23 = vpop.eup %486  ;;  %v147_v25 = vsub.f32 1.5, %v146_v18  ;;  %v676_v27 = vadd.f32 1e-06, %v120_v19  ;;  %v241_v50 = vadd.f32 %v473_v34, %v229_v35 }
 0x10f   :  { %v188_v28 = vmul.f32 %v481_v0, %v187_v21  ;;  %v194_v32 = vmul.f32 %v487_v23, %v654_v2  ;;  %v489_v30 = vpop.eup %488  ;;  %v207_v41 = vsub.f32 1.5, %v206_v26  ;;  %vm200_vm3 = vweird.f32 %v487_v23 }
 0x110   :  { %v148_v29 = vmul.f32 %v483_v3, %v147_v25  ;;  %490 = vrsqrt.f32 %v676_v27  ;;  %v154_v38 = vmul.f32 %v489_v30, %v656_v6  ;;  %vm160_vm4 = vweird.f32 %v489_v30  ;;  %vm201_vm6 = vmor %vm199_vm1, %vm200_vm3 }
 0x111   :  { %v192_v31 = vsel %vm191_vm12, %v481_v0, %v188_v28  ;;  %v195_v33 = vmul.f32 %v487_v23, %v194_v32  ;;  %v208_v55 = vmul.f32 %v658_v7, %v207_v41  ;;  %vm710_vm7 = vmor %vm159_vm2, %vm160_vm4  ;;  %vm169_vm8 = vweird.f32 %v676_v27 }
 0x112   :  { %v218_v36 = vmul.f32 %v192_v31, %v563_v46  ;;  %v152_v37 = vsel %vm151_vm13, %v483_v3, %v148_v29  ;;  %v155_v43 = vmul.f32 %v489_v30, %v154_v38  ;;  %vm382_vm12 = vcmask 523268  }
 0x113   :  { %v214_v40 = vmul.f32 %v152_v37, %v565_v47  ;;  %v196_v42 = vmul.f32 0.5, %v195_v33  ;;  %v237_v47 = vadd.f32 %v473_v34, %v225_v39  ;;  %v212_v2 = vsel %vm701_vm5, %v658_v7, %v208_v55  ;;  %vm739_vm13 = vmor %vm382_vm12, %vm381_vm11 }
 0x114   :  { %v230_v44 = vmul.f32 %v673_v22, %v218_v36  ;;  %v156_v53 = vmul.f32 0.5, %v155_v43  ;;  %v220_v10 = vmul.f32 %v212_v2, %v561_v45 }
 0x115   :  { %v197_v49 = vsub.f32 1.5, %v196_v42  ;;  %v226_v46 = vmul.f32 %v673_v22, %v214_v40 }
 0x116   :  { %v491_v52 = vpop.eup %490  ;;  %v242_v54 = vadd.f32 %v473_v34, %v230_v44  ;;  %v157_v61 = vsub.f32 1.5, %v156_v53  ;;  %v232_v15 = vmul.f32 %v673_v22, %v220_v10 }
 0x117   :  { %v198_v57 = vmul.f32 %v487_v23, %v197_v49  ;;  %v164_v58 = vmul.f32 %v491_v52, %v676_v27  ;;  %v238_v59 = vadd.f32 %v473_v34, %v226_v46  ;;  %vm170_vm9 = vweird.f32 %v491_v52 }
 0x118   :  { %v247_v62 = vpack.c.bf16 %v242_v54, %v241_v50  ;;  %v158_v4 = vmul.f32 %v489_v30, %v157_v61  ;;  %vm171_vm10 = vmor %vm169_vm8, %vm170_vm9  ;;  %v244_v20 = vadd.f32 %v473_v34, %v232_v15 }
 0x119   :  { %v202_v0 = vsel %vm201_vm6, %v487_v23, %v198_v57  ;;  %v165_v51 = vmul.f32 %v491_v52, %v164_v58  ;;  %v245_v3 = vpack.c.bf16 %v238_v59, %v237_v47 }
 0x11a   :  { %430 = vmatmul.msk.bf16.vlgmr.msra.gmra.mxu2 %vm37_vm0, %v247_v62  ;;  %434 = vmatmul.msk.bf16.vlgmr.msra.gmra.mxu3 %vm37_vm0, %v247_v62  ;;  %v219_v6 = vmul.f32 %v202_v0, %v567_v48  ;;  %v162_v8 = vsel %vm710_vm7, %v489_v30, %v158_v4 }
 0x11b   :  { %v166_v5 = vmul.f32 0.5, %v165_v51  ;;  %428 = vmatmul.msk.bf16.vlgmr.msra.gmra.mxu0 %vm37_vm0, %v245_v3  ;;  %432 = vmatmul.msk.bf16.vlgmr.msra.gmra.mxu1 %vm37_vm0, %v245_v3  ;;  %v215_v11 = vmul.f32 %v162_v8, %v582_v60  ;;  %v257_v60 = vld [vmem:[%s787_s2] sm:$0x3] }
 0x11c   :  { %v231_v7 = vmul.f32 %v673_v22, %v219_v6 }
 0x11d   :  { %v167_v9 = vsub.f32 1.5, %v166_v5  ;;  %v227_v48 = vmul.f32 %v673_v22, %v215_v11 }
 0x11e   :  { %v243_v17 = vadd.f32 %v473_v34, %v231_v7 }
 0x11f   :  { %v168_v12 = vmul.f32 %v491_v52, %v167_v9  ;;  %v239_v18 = vadd.f32 %v473_v34, %v227_v48 }
 0x120   :  { %v248_v21 = vpack.c.bf16 %v244_v20, %v243_v17 }
 0x121   :  { %v172_v13 = vsel %vm171_vm10, %v491_v52, %v168_v12 }
 0x122   :  { %v216_v14 = vmul.f32 %v172_v13, %v587_v63  ;;  %v259_v63 = vperm.slane %v257_v60, 0 }
 0x124   :  { %v228_v16 = vmul.f32 %v673_v22, %v216_v14  ;;  %v260_v22 = vperm.slane %v257_v60, 1 }
 0x126   :  { %v240_v19 = vadd.f32 %v473_v34, %v228_v16 }
 0x128   :  { %v246_v45 = vpack.c.bf16 %v240_v19, %v239_v18 }
 0x12a   :  { %431 = vmatmul.msk.bf16.gmra.mxu2 %vm37_vm0, %v248_v21  ;;  %435 = vmatmul.msk.bf16.gmra.mxu3 %vm37_vm0, %v248_v21 }
 0x12b   :  { %429 = vmatmul.msk.bf16.gmra.mxu0 %vm37_vm0, %v246_v45  ;;  %433 = vmatmul.msk.bf16.gmra.mxu1 %vm37_vm0, %v246_v45 }
 0x198   :  { %v324_v23 = vpop.f32.mrf.mxu0  ;;  %v353_v24 = vpop.f32.mrf.mxu1 }
 0x199   :  { %v325_v25 = vadd.f32 %v324_v23, %v259_v63  ;;  %v354_v27 = vadd.f32 %v353_v24, %v260_v22 }
 0x19b   :  { %v373_v26 = vpack.c.bf16 %v354_v27, %v325_v25 }
 0x19d   :  { %384 = vst.msk [vmem:[%s788_s5] sm:$0xff] %vm739_vm13, %v373_v26  ;;  %v334_v32 = vpop.f32.mrf.mxu2  ;;  %v363_v29 = vpop.f32.mrf.mxu3 }
 0x19e   :  { %v335_v30 = vadd.f32 %v334_v32, %v259_v63  ;;  %v364_v31 = vadd.f32 %v363_v29, %v260_v22 }
 0x1a0   :  { %v377_v33 = vpack.c.bf16 %v364_v31, %v335_v30  ;;  %v326_v34 = vpop.f32.mrf.mxu0  ;;  %v355_v35 = vpop.f32.mrf.mxu1 }
 0x1a1   :  { %v327_v36 = vadd.f32 %v326_v34, %v259_v63  ;;  %v356_v37 = vadd.f32 %v355_v35, %v260_v22 }
 0x1a2   :  { %388 = vst.msk [vmem:[%s788_s5 + $0x20] sm:$0xff] %vm739_vm13, %v377_v33 }
 0x1a3   :  { %v374_v38 = vpack.c.bf16 %v356_v37, %v327_v36 }
 0x1a5   :  { %385 = vst.msk [vmem:[%s788_s5 + $0x8] sm:$0xff] %vm739_vm13, %v374_v38  ;;  %v336_v39 = vpop.f32.mrf.mxu2  ;;  %v365_v40 = vpop.f32.mrf.mxu3 }
 0x1a6   :  { %v337_v41 = vadd.f32 %v336_v39, %v259_v63  ;;  %v366_v42 = vadd.f32 %v365_v40, %v260_v22 }
 0x1a8   :  { %v378_v43 = vpack.c.bf16 %v366_v42, %v337_v41  ;;  %v329_v44 = vpop.f32.mrf.mxu0  ;;  %v358_v49 = vpop.f32.mrf.mxu1 }
 0x1a9   :  { %v330_v46 = vadd.f32 %v329_v44, %v259_v63  ;;  %v359_v50 = vadd.f32 %v358_v49, %v260_v22 }
 0x1aa   :  { %389 = vst.msk [vmem:[%s788_s5 + $0x28] sm:$0xff] %vm739_vm13, %v378_v43 }
 0x1ab   :  { %v375_v52 = vpack.c.bf16 %v359_v50, %v330_v46 }
 0x1ad   :  { %386 = vst.msk [vmem:[%s788_s5 + $0x10] sm:$0xff] %vm739_vm13, %v375_v52  ;;  %v339_v53 = vpop.f32.mrf.mxu2  ;;  %v368_v47 = vpop.f32.mrf.mxu3 }
 0x1ae   :  { %v340_v54 = vadd.f32 %v339_v53, %v259_v63  ;;  %v369_v55 = vadd.f32 %v368_v47, %v260_v22 }
 0x1b0   :  { %v379_v56 = vpack.c.bf16 %v369_v55, %v340_v54  ;;  %v331_v57 = vpop.f32.mrf.mxu0  ;;  %v360_v58 = vpop.f32.mrf.mxu1 }
 0x1b1   :  { %v332_v59 = vadd.f32 %v331_v57, %v259_v63  ;;  %v361_v61 = vadd.f32 %v360_v58, %v260_v22 }
 0x1b2   :  { %390 = vst.msk [vmem:[%s788_s5 + $0x30] sm:$0xff] %vm739_vm13, %v379_v56 }
 0x1b3   :  { %v376_v62 = vpack.c.bf16 %v361_v61, %v332_v59 }
 0x1b5   :  { %387 = vst.msk [vmem:[%s788_s5 + $0x18] sm:$0xff] %vm739_vm13, %v376_v62  ;;  %v341_v0 = vpop.f32.mrf.mxu2  ;;  %v370_v1 = vpop.f32.mrf.mxu3 }
 0x1b6   :  { %v342_v51 = vadd.f32 %v341_v0, %v259_v63  ;;  %v371_v3 = vadd.f32 %v370_v1, %v260_v22 }
 0x1b8   :  { %v380_v4 = vpack.c.bf16 %v371_v3, %v342_v51 }
 0x1ba   :  { %391 = vst.msk [vmem:[%s788_s5 + $0x38] sm:$0xff] %vm739_vm13, %v380_v4 }

// kernel: sam_encoder_nuke_forward.15
= control target key start
LH: loop header
LB: loop body
LE: loop exit
PB: predicated region body
PF: predicated region fallthrough
CT: control target
= control target key end

     0   :  { %vm162_vm0 = vcmask 523264   ;;  %vm265_vm1 = vcmask 519168   ;;  %s574_s1 = inlined_call_operand.vmem [shape: bf16[192,64], index: 1, kind: input, shape index: {}]   ;;  %s575_s0 = inlined_call_operand.vmem [shape: bf16[64,192], index: 0, kind: input, shape index: {}]   ;;  %s576_s2 = inlined_call_operand.vmem [shape: f32[1,64], index: 2, kind: input, shape index: {}]   ;;  %s577_s3 = inlined_call_operand.vmem [shape: bf16[64,64], index: 3, kind: input, shape index: {}]   ;;  %s578_s4 = inlined_call_operand.vmem [shape: bf16[64,64], index: 4, kind: output, shape index: {}]  }
   0x1   :  { %v377_v0 = vld [vmem:[%s574_s1 + $0x38] sm:$0xff]  ;;  %v376_v2 = vld [vmem:[%s574_s1 + $0x30] sm:$0xff]  ;;  %v375_v4 = vld [vmem:[%s574_s1 + $0x28] sm:$0xff] }
   0x2   :  { %v381_v1 = vld [vmem:[%s574_s1 + $0x58] sm:$0xff]  ;;  %175 = vmatpush.bf16.msra.mxu0 %v377_v0  ;;  %401 = vmatpush.bf16.msra.mxu2 %v377_v0  ;;  %v380_v3 = vld [vmem:[%s574_s1 + $0x50] sm:$0xff]  ;;  %v379_v5 = vld [vmem:[%s574_s1 + $0x48] sm:$0xff] }
   0x3   :  { %409 = vmatpush.bf16.msra.mxu3 %v381_v1  ;;  %208 = vmatpush.bf16.msra.mxu1 %v381_v1  ;;  %v374_v6 = vld [vmem:[%s574_s1 + $0x20] sm:$0xff]  ;;  %v364_v8 = vld [vmem:[%s575_s0 + $0x14] sm:$0xf]  ;;  %v290_v9 = vld [vmem:[%s575_s0 + $0x18] sm:$0xf0] }
   0x4   :  { %v378_v7 = vld [vmem:[%s574_s1 + $0x40] sm:$0xff]  ;;  %v282_v11 = vld [vmem:[%s575_s0 + $0x8] sm:$0xf0]  ;;  %v293_v12 = vor.u32 %v364_v8, %v290_v9  ;;  %v373_v13 = vld [vmem:[%s574_s1 + $0x18] sm:$0xff] }
   0x5   :  { %v362_v10 = vld [vmem:[%s575_s0 + $0x4] sm:$0xf]  ;;  %v372_v15 = vld [vmem:[%s574_s1 + $0x10] sm:$0xff]  ;;  %v371_v16 = vld [vmem:[%s574_s1 + $0x8] sm:$0xff] }
   0x6   :  { %176 = vmatpush.bf16.msra.mxu0 %v376_v2  ;;  %402 = vmatpush.bf16.msra.mxu2 %v376_v2  ;;  %v285_v14 = vor.u32 %v362_v10, %v282_v11  ;;  %v370_v17 = vld [vmem:[%s574_s1] sm:$0xff]  ;;  %v363_v19 = vld [vmem:[%s575_s0 + $0x4] sm:$0xf0]  ;;  %v298_v23 = vld [vmem:[%s575_s0 + $0x28] sm:$0xf0] }
   0x7   :  { %410 = vmatpush.bf16.msra.mxu3 %v380_v3  ;;  %209 = vmatpush.bf16.msra.mxu1 %v380_v3  ;;  %v280_v18 = vld [vmem:[%s575_s0] sm:$0xf]  ;;  %v367_v21 = vld [vmem:[%s575_s0 + $0x24] sm:$0xf0]  ;;  %v366_v22 = vld [vmem:[%s575_s0 + $0x24] sm:$0xf] }
   0x8   :  { %v296_v20 = vld [vmem:[%s575_s0 + $0x20] sm:$0xf]  ;;  %v281_v24 = vor.u32 %v363_v19, %v280_v18  ;;  %v301_v26 = vor.u32 %v366_v22, %v298_v23  ;;  %v288_v27 = vld [vmem:[%s575_s0 + $0x10] sm:$0xf]  ;;  %v365_v28 = vld [vmem:[%s575_s0 + $0x14] sm:$0xf0] }
   0x9   :  { %v297_v25 = vor.u32 %v367_v21, %v296_v20  ;;  %v304_v29 = vld [vmem:[%s575_s0 + $0x30] sm:$0xf]  ;;  %v369_v30 = vld [vmem:[%s575_s0 + $0x34] sm:$0xf0]  ;;  %v368_v31 = vld [vmem:[%s575_s0 + $0x34] sm:$0xf]  ;;  %v289_v33 = vor.u32 %v365_v28, %v288_v27 }
   0xa   :  { %177 = vmatpush.bf16.msra.mxu0 %v375_v4  ;;  %403 = vmatpush.bf16.msra.mxu2 %v375_v4  ;;  %v306_v32 = vld [vmem:[%s575_s0 + $0x38] sm:$0xf0]  ;;  %v305_v34 = vor.u32 %v369_v30, %v304_v29  ;;  %v413_v37 = vld [vmem:[%s576_s2] ss:$0 sm:$0xff]  ;;  %v399_v46 = vld [vmem:[%s577_s3 + $0x10] sm:$0xff]  }
   0xb   :  { %411 = vmatpush.bf16.msra.mxu3 %v379_v5  ;;  %210 = vmatpush.bf16.msra.mxu1 %v379_v5  ;;  %v309_v35 = vor.u32 %v368_v31, %v306_v32  ;;  %v383_v39 = vld [vmem:[%s577_s3] sm:$0xff]   ;;  %v392_v51 = vunpack.c.l.bf16 %v399_v46  ;;  %v398_v61 = vld [vmem:[%s577_s3 + $0x8] sm:$0xff]   ;;  %v393_v2 = vunpack.c.h.bf16 %v399_v46  ;;  %v400_v10 = vld [vmem:[%s577_s3 + $0x18] sm:$0xff]  }
   0xc   :  { %v384_v43 = vunpack.c.l.bf16 %v383_v39  ;;  %v385_v55 = vunpack.c.h.bf16 %v383_v39  ;;  %v388_v5 = vunpack.c.l.bf16 %v398_v61  ;;  %v389_v19 = vunpack.c.h.bf16 %v398_v61 }
   0xd   :  { %v397_v28 = vunpack.c.h.bf16 %v400_v10 }
   0xe   :  { %178 = vmatpush.bf16.msra.mxu0 %v374_v6  ;;  %404 = vmatpush.bf16.msra.mxu2 %v374_v6 }
   0xf   :  { %412 = vmatpush.bf16.msra.mxu3 %v378_v7  ;;  %211 = vmatpush.bf16.msra.mxu1 %v378_v7 }
  0x12   :  { %359 = vmatmul.msk.bf16.vlgmr.msra.gmra.mxu3 %vm162_vm0, %v293_v12  ;;  %179 = vmatpush.bf16.msra.mxu0 %v373_v13 }
  0x13   :  { %405 = vmatpush.bf16.msra.mxu2 %v373_v13  ;;  %358 = vmatmul.msk.bf16.vlgmr.msra.gmra.mxu1 %vm162_vm0, %v285_v14 }
  0x16   :  { %180 = vmatpush.bf16.msra.mxu0 %v372_v15 }
  0x17   :  { %406 = vmatpush.bf16.msra.mxu2 %v372_v15 }
  0x1a   :  { %181 = vmatpush.bf16.msra.mxu0 %v371_v16 }
  0x1b   :  { %407 = vmatpush.bf16.msra.mxu2 %v371_v16  ;;  %v396_v16 = vunpack.c.l.bf16 %v400_v10 }
  0x1e   :  { %182 = vmatpush.bf16.msra.mxu0 %v370_v17 }
  0x1f   :  { %408 = vmatpush.bf16.msra.mxu2 %v370_v17 }
  0x21   :  { %183 = vmatmul.bf16.vlgmr.msra.gmra.mxu0 %v281_v24 }
  0x22   :  { %193 = vmatmul.bf16.vlgmr.msra.gmra.mxu2 %v297_v25  ;;  %360 = vmatmul.msk.bf16.gmra.mxu3 %vm162_vm0, %v301_v26 }
  0x31   :  { %188 = vmatmul.bf16.gmra.mxu0 %v289_v33 }
  0x32   :  { %198 = vmatmul.bf16.gmra.mxu2 %v305_v34  ;;  %361 = vmatmul.msk.bf16.gmra.mxu3 %vm162_vm0, %v309_v35 }
  0x90   :  { %v213_v38 = vpop.f32.mrf.mxu1 }
  0x95   :  { %v218_v36 = vpop.f32.mrf.mxu3 }
  0x98   :  { %v215_v53 = vpop.f32.mrf.mxu1 }
  0x9d   :  { %v220_v40 = vpop.f32.mrf.mxu3 }
  0x9e   :  { %v184_v41 = vpop.f32.mrf.mxu0 }
  0x9f   :  { %v185_v42 = vadd.f32 %v413_v37, %v184_v41 }
  0xa1   :  { %v214_v44 = vadd.f32 %v213_v38, %v185_v42 }
  0xa3   :  { %v249_v45 = vadd.f32 %v384_v43, %v214_v44 }
  0xa5   :  { %v257_v47 = vpack.c.bf16 %v249_v45, %v249_v45  ;;  %v194_v48 = vpop.f32.mrf.mxu2  ;;  %v223_v49 = vpop.f32.mrf.mxu3 }
  0xa6   :  { %v195_v50 = vadd.f32 %v413_v37, %v194_v48  ;;  %v186_v52 = vpop.f32.mrf.mxu0 }
  0xa7   :  { %266 = vst.msk [vmem:[%s578_s4] sm:$0xf] %vm265_vm1, %v257_v47  ;;  %v187_v54 = vadd.f32 %v413_v37, %v186_v52 }
  0xa8   :  { %v224_v56 = vadd.f32 %v223_v49, %v195_v50 }
  0xa9   :  { %v216_v57 = vadd.f32 %v215_v53, %v187_v54 }
  0xaa   :  { %v253_v58 = vadd.f32 %v392_v51, %v224_v56 }
  0xab   :  { %v250_v59 = vadd.f32 %v385_v55, %v216_v57 }
  0xac   :  { %v261_v60 = vpack.c.bf16 %v253_v58, %v253_v58 }
  0xad   :  { %v258_v62 = vpack.c.bf16 %v250_v59, %v250_v59  ;;  %v196_v63 = vpop.f32.mrf.mxu2  ;;  %v225_v0 = vpop.f32.mrf.mxu3 }
  0xae   :  { %270 = vst.msk [vmem:[%s578_s4 + $0x10] sm:$0xf] %vm265_vm1, %v261_v60  ;;  %v197_v1 = vadd.f32 %v413_v37, %v196_v63  ;;  %v189_v3 = vpop.f32.mrf.mxu0 }
  0xaf   :  { %267 = vst.msk [vmem:[%s578_s4 + $0x4] sm:$0xf] %vm265_vm1, %v258_v62  ;;  %v190_v4 = vadd.f32 %v413_v37, %v189_v3 }
  0xb0   :  { %v226_v6 = vadd.f32 %v225_v0, %v197_v1 }
  0xb1   :  { %v219_v7 = vadd.f32 %v218_v36, %v190_v4 }
  0xb2   :  { %v254_v8 = vadd.f32 %v393_v2, %v226_v6 }
  0xb3   :  { %v251_v9 = vadd.f32 %v388_v5, %v219_v7 }
  0xb4   :  { %v262_v11 = vpack.c.bf16 %v254_v8, %v254_v8 }
  0xb5   :  { %v259_v12 = vpack.c.bf16 %v251_v9, %v251_v9  ;;  %v199_v13 = vpop.f32.mrf.mxu2  ;;  %v228_v14 = vpop.f32.mrf.mxu3 }
  0xb6   :  { %271 = vst.msk [vmem:[%s578_s4 + $0x14] sm:$0xf] %vm265_vm1, %v262_v11  ;;  %v200_v15 = vadd.f32 %v413_v37, %v199_v13  ;;  %v191_v17 = vpop.f32.mrf.mxu0 }
  0xb7   :  { %268 = vst.msk [vmem:[%s578_s4 + $0x8] sm:$0xf] %vm265_vm1, %v259_v12  ;;  %v192_v18 = vadd.f32 %v413_v37, %v191_v17 }
  0xb8   :  { %v229_v20 = vadd.f32 %v228_v14, %v200_v15 }
  0xb9   :  { %v221_v21 = vadd.f32 %v220_v40, %v192_v18 }
  0xba   :  { %v255_v22 = vadd.f32 %v396_v16, %v229_v20 }
  0xbb   :  { %v252_v23 = vadd.f32 %v389_v19, %v221_v21 }
  0xbc   :  { %v263_v24 = vpack.c.bf16 %v255_v22, %v255_v22 }
  0xbd   :  { %v260_v25 = vpack.c.bf16 %v252_v23, %v252_v23  ;;  %v201_v26 = vpop.f32.mrf.mxu2  ;;  %v230_v29 = vpop.f32.mrf.mxu3 }
  0xbe   :  { %272 = vst.msk [vmem:[%s578_s4 + $0x18] sm:$0xf] %vm265_vm1, %v263_v24  ;;  %v202_v27 = vadd.f32 %v413_v37, %v201_v26 }
  0xbf   :  { %269 = vst.msk [vmem:[%s578_s4 + $0xc] sm:$0xf] %vm265_vm1, %v260_v25 }
  0xc0   :  { %v231_v30 = vadd.f32 %v230_v29, %v202_v27 }
  0xc2   :  { %v256_v31 = vadd.f32 %v397_v28, %v231_v30 }
  0xc4   :  { %v264_v32 = vpack.c.bf16 %v256_v31, %v256_v31 }
  0xc6   :  { %273 = vst.msk [vmem:[%s578_s4 + $0x1c] sm:$0xf] %vm265_vm1, %v264_v32 }

// kernel: sam_encoder_nuke_forward.18
= control target key start
LH: loop header
LB: loop body
LE: loop exit
PB: predicated region body
PF: predicated region fallthrough
CT: control target
= control target key end

     0   :  { %vm82_vm0 = vcmask 523264   ;;  %vm156_vm1 = vcmask 519168   ;;  %s341_s1 = inlined_call_operand.vmem [shape: bf16[64,64], index: 1, kind: input, shape index: {}]   ;;  %s342_s2 = inlined_call_operand.vmem [shape: f32[1,64], index: 2, kind: input, shape index: {}]   ;;  %s343_s0 = inlined_call_operand.vmem [shape: bf16[64,64], index: 0, kind: input, shape index: {}]   ;;  %s344_s3 = inlined_call_operand.vmem [shape: bf16[64,64], index: 3, kind: input, shape index: {}, may-alias: {3,4}]   ;;  %s345_s4 = inlined_call_operand.vmem [shape: bf16[64,64], index: 4, kind: output, shape index: {}, may-alias: {3,4}]  }
   0x1   :  { %v212_v0 = vld [vmem:[%s341_s1 + $0x18] sm:$0xff]  ;;  %v211_v1 = vld [vmem:[%s341_s1 + $0x10] sm:$0xff]  ;;  %v210_v2 = vld [vmem:[%s341_s1 + $0x8] sm:$0xff] }
   0x2   :  { %99 = vmatpush.bf16.msra.mxu0 %v212_v0  ;;  %232 = vmatpush.bf16.msra.mxu1 %v212_v0  ;;  %v209_v3 = vld [vmem:[%s341_s1] sm:$0xff]  ;;  %v206_v5 = vld [vmem:[%s343_s0 + $0x8] sm:$0xff]  ;;  %v207_v6 = vld [vmem:[%s343_s0 + $0x10] sm:$0xff] }
   0x3   :  { %233 = vmatpush.bf16.msra.mxu2 %v212_v0  ;;  %234 = vmatpush.bf16.msra.mxu3 %v212_v0  ;;  %v205_v4 = vld [vmem:[%s343_s0] sm:$0xff]  ;;  %v208_v7 = vld [vmem:[%s343_s0 + $0x18] sm:$0xff]  ;;  %v229_v9 = vld [vmem:[%s344_s3 + $0x8] sm:$0xff]  }
   0x4   :  { %v214_v8 = vld [vmem:[%s344_s3] sm:$0xff]   ;;  %v219_v12 = vunpack.c.l.bf16 %v229_v9  ;;  %v230_v19 = vld [vmem:[%s344_s3 + $0x10] sm:$0xff]   ;;  %v231_v20 = vld [vmem:[%s344_s3 + $0x18] sm:$0xff]   ;;  %v220_v28 = vunpack.c.h.bf16 %v229_v9 }
   0x5   :  { %v244_v10 = vld [vmem:[%s342_s2] ss:$0 sm:$0xff]  ;;  %v215_v11 = vunpack.c.l.bf16 %v214_v8  ;;  %v223_v23 = vunpack.c.l.bf16 %v230_v19  ;;  %v227_v24 = vunpack.c.l.bf16 %v231_v20  ;;  %v216_v27 = vunpack.c.h.bf16 %v214_v8 }
   0x6   :  { %100 = vmatpush.bf16.msra.mxu0 %v211_v1  ;;  %235 = vmatpush.bf16.msra.mxu1 %v211_v1  ;;  %v224_v43 = vunpack.c.h.bf16 %v230_v19  ;;  %v228_v44 = vunpack.c.h.bf16 %v231_v20 }
   0x7   :  { %236 = vmatpush.bf16.msra.mxu2 %v211_v1  ;;  %237 = vmatpush.bf16.msra.mxu3 %v211_v1 }
   0xa   :  { %101 = vmatpush.bf16.msra.mxu0 %v210_v2  ;;  %238 = vmatpush.bf16.msra.mxu1 %v210_v2 }
   0xb   :  { %239 = vmatpush.bf16.msra.mxu2 %v210_v2  ;;  %240 = vmatpush.bf16.msra.mxu3 %v210_v2 }
   0xe   :  { %102 = vmatpush.bf16.msra.mxu0 %v209_v3  ;;  %241 = vmatpush.bf16.msra.mxu1 %v209_v3 }
   0xf   :  { %242 = vmatpush.bf16.msra.mxu2 %v209_v3  ;;  %243 = vmatpush.bf16.msra.mxu3 %v209_v3 }
  0x11   :  { %201 = vmatmul.msk.bf16.vlgmr.msra.gmra.mxu0 %vm82_vm0, %v205_v4  ;;  %202 = vmatmul.msk.bf16.vlgmr.msra.gmra.mxu1 %vm82_vm0, %v206_v5 }
  0x12   :  { %203 = vmatmul.msk.bf16.vlgmr.msra.gmra.mxu2 %vm82_vm0, %v207_v6  ;;  %204 = vmatmul.msk.bf16.vlgmr.msra.gmra.mxu3 %vm82_vm0, %v208_v7 }
  0x8e   :  { %v104_v13 = vpop.f32.mrf.mxu0  ;;  %v109_v14 = vpop.f32.mrf.mxu1 }
  0x8f   :  { %v105_v15 = vadd.f32 %v244_v10, %v104_v13  ;;  %v110_v16 = vadd.f32 %v244_v10, %v109_v14 }
  0x91   :  { %v140_v17 = vadd.f32 %v215_v11, %v105_v15  ;;  %v142_v18 = vadd.f32 %v219_v12, %v110_v16 }
  0x93   :  { %v148_v21 = vpack.c.bf16 %v140_v17, %v140_v17  ;;  %v150_v22 = vpack.c.bf16 %v142_v18, %v142_v18 }
  0x95   :  { %157 = vst.msk [vmem:[%s345_s4] sm:$0xf] %vm156_vm1, %v148_v21  ;;  %v114_v25 = vpop.f32.mrf.mxu2  ;;  %v119_v26 = vpop.f32.mrf.mxu3 }
  0x96   :  { %159 = vst.msk [vmem:[%s345_s4 + $0x8] sm:$0xf] %vm156_vm1, %v150_v22  ;;  %v115_v29 = vadd.f32 %v244_v10, %v114_v25  ;;  %v120_v30 = vadd.f32 %v244_v10, %v119_v26  ;;  %v106_v31 = vpop.f32.mrf.mxu0  ;;  %v111_v32 = vpop.f32.mrf.mxu1 }
  0x97   :  { %v107_v33 = vadd.f32 %v244_v10, %v106_v31  ;;  %v112_v34 = vadd.f32 %v244_v10, %v111_v32 }
  0x98   :  { %v144_v35 = vadd.f32 %v223_v23, %v115_v29  ;;  %v146_v36 = vadd.f32 %v227_v24, %v120_v30 }
  0x99   :  { %v141_v37 = vadd.f32 %v216_v27, %v107_v33  ;;  %v143_v38 = vadd.f32 %v220_v28, %v112_v34 }
  0x9a   :  { %v152_v39 = vpack.c.bf16 %v144_v35, %v144_v35  ;;  %v154_v40 = vpack.c.bf16 %v146_v36, %v146_v36 }
  0x9b   :  { %v149_v41 = vpack.c.bf16 %v141_v37, %v141_v37  ;;  %v151_v42 = vpack.c.bf16 %v143_v38, %v143_v38 }
  0x9c   :  { %161 = vst.msk [vmem:[%s345_s4 + $0x10] sm:$0xf] %vm156_vm1, %v152_v39 }
  0x9d   :  { %163 = vst.msk [vmem:[%s345_s4 + $0x18] sm:$0xf] %vm156_vm1, %v154_v40  ;;  %v116_v45 = vpop.f32.mrf.mxu2  ;;  %v121_v46 = vpop.f32.mrf.mxu3 }
  0x9e   :  { %158 = vst.msk [vmem:[%s345_s4 + $0x4] sm:$0xf] %vm156_vm1, %v149_v41  ;;  %v117_v47 = vadd.f32 %v244_v10, %v116_v45  ;;  %v122_v48 = vadd.f32 %v244_v10, %v121_v46 }
  0x9f   :  { %160 = vst.msk [vmem:[%s345_s4 + $0xc] sm:$0xf] %vm156_vm1, %v151_v42 }
  0xa0   :  { %v145_v49 = vadd.f32 %v224_v43, %v117_v47  ;;  %v147_v50 = vadd.f32 %v228_v44, %v122_v48 }
  0xa2   :  { %v153_v51 = vpack.c.bf16 %v145_v49, %v145_v49  ;;  %v155_v52 = vpack.c.bf16 %v147_v50, %v147_v50 }
  0xa4   :  { %162 = vst.msk [vmem:[%s345_s4 + $0x14] sm:$0xf] %vm156_vm1, %v153_v51 }
  0xa5   :  { %164 = vst.msk [vmem:[%s345_s4 + $0x1c] sm:$0xf] %vm156_vm1, %v155_v52 }

// kernel: sam_encoder_nuke_forward.19
= control target key start
LH: loop header
LB: loop body
LE: loop exit
PB: predicated region body
PF: predicated region fallthrough
CT: control target
= control target key end

     0   :  { %vm37_vm0 = vcmask 523264   ;;  %v665_v20 = vmov 64.0   ;;  %s1061_s0 = inlined_call_operand.vmem [shape: bf16[64,64], index: 0, kind: input, shape index: {}]   ;;  %s1062_s3 = inlined_call_operand.vmem [shape: f32[1,64], index: 3, kind: input, shape index: {}]   ;;  %s1063_s4 = inlined_call_operand.vmem [shape: f32[1,64], index: 4, kind: input, shape index: {}]   ;;  %s1064_s1 = inlined_call_operand.vmem [shape: bf16[64,256], index: 1, kind: input, shape index: {}]   ;;  %s1065_s2 = inlined_call_operand.vmem [shape: f32[1,256], index: 2, kind: input, shape index: {}]   ;;  %s1066_s5 = inlined_call_operand.vmem [shape: bf16[64,256], index: 5, kind: output, shape index: {}]  }
   0x1   :  { %v603_v0 = vld [vmem:[%s1061_s0 + $0x18] sm:$0xff]   ;;  %v602_v1 = vld [vmem:[%s1061_s0 + $0x10] sm:$0xff]   ;;  %v586_v2 = vld [vmem:[%s1061_s0] sm:$0xff]   ;;  %615 = vrcp.f32 %v665_v20 }
   0x2   :  { %v599_v3 = vunpack.c.l.bf16 %v603_v0  ;;  %v595_v4 = vunpack.c.l.bf16 %v602_v1  ;;  %v587_v5 = vunpack.c.l.bf16 %v586_v2  ;;  %v600_v9 = vunpack.c.h.bf16 %v603_v0  ;;  %v601_v15 = vld [vmem:[%s1061_s0 + $0x8] sm:$0xff]  }
   0x3   :  { %v596_v10 = vunpack.c.h.bf16 %v602_v1  ;;  %v588_v11 = vunpack.c.h.bf16 %v586_v2  ;;  %v591_v16 = vunpack.c.l.bf16 %v601_v15  ;;  %v592_v17 = vunpack.c.h.bf16 %v601_v15 }
   0x4   :  { %v56_v6 = vsel %vm37_vm0, %v599_v3, 0.0  ;;  %v50_v7 = vsel %vm37_vm0, %v595_v4, 0.0  ;;  %v38_v8 = vsel %vm37_vm0, %v587_v5, 0.0  ;;  %v59_v12 = vsel %vm37_vm0, %v600_v9, 0.0 }
   0x5   :  { %57 = vadd.xlane.f32.xlu2 %v56_v6  ;;  %51 = vadd.xlane.f32.xlu0 %v50_v7  ;;  %v53_v13 = vsel %vm37_vm0, %v596_v10, 0.0  ;;  %v41_v14 = vsel %vm37_vm0, %v588_v11, 0.0  ;;  %v44_v18 = vsel %vm37_vm0, %v591_v16, 0.0  ;;  %v47_v19 = vsel %vm37_vm0, %v592_v17, 0.0  ;;  %v565_v7 = vld [vmem:[%s1064_s1 + $0x38] sm:$0xf0] }
   0x6   :  { %39 = vadd.xlane.f32.xlu1 %v38_v8 }
   0x7   :  { %v616_v21 = vpop.eup %615 }
   0x8   :  { %v63_v22 = vmul.f32 64.0, %v616_v21  ;;  %vm67_vm1 = vweird.f32 %v616_v21 }
   0xa   :  { %v64_v23 = vsub.f32 1.0, %v63_v22  ;;  %v549_v22 = vld [vmem:[%s1064_s1 + $0x18] sm:$0xf0] }
   0xc   :  { %v65_v24 = vmul.f32 %v616_v21, %v64_v23 }
   0xd   :  { %60 = vadd.xlane.f32.xlu2 %v59_v12  ;;  %54 = vadd.xlane.f32.xlu0 %v53_v13  ;;  %v557_v13 = vld [vmem:[%s1064_s1 + $0x28] sm:$0xf0] }
   0xe   :  { %42 = vadd.xlane.f32.xlu1 %v41_v14  ;;  %v66_v25 = vadd.f32 %v616_v21, %v65_v24 }
  0x10   :  { %v716_v26 = vsel %vm67_vm1, %v616_v21, %v66_v25 }
  0x15   :  { %45 = vadd.xlane.f32.xlu0 %v44_v18  ;;  %v579_v18 = vld [vmem:[%s1064_s1 + $0x14] sm:$0xf] }
  0x16   :  { %48 = vadd.xlane.f32.xlu1 %v47_v19  ;;  %v552_v24 = vor.u32 %v579_v18, %v549_v22  ;;  %v846_v22 = vld [vmem:[%s1062_s3] ss:$0 sm:$0xff] }
  0x78   :  { %v58_v27 = vpop.xlane.xlu2 %57  ;;  %v52_v28 = vpop.xlane.xlu0 %51 }
  0x79   :  { %v73_v29 = vmul.f32 %v716_v26, %v52_v28  ;;  %v40_v30 = vpop.xlane.xlu1 %39  ;;  %v75_v40 = vmul.f32 %v716_v26, %v58_v27  ;;  %v539_v28 = vld [vmem:[%s1064_s1] sm:$0xf] }
  0x7a   :  { %v69_v31 = vmul.f32 %v716_v26, %v40_v30 }
  0x7b   :  { %v720_v32 = vsub.f32 %v595_v4, %v73_v29  ;;  %v740_v48 = vsub.f32 %v599_v3, %v75_v40  ;;  %v563_v3 = vld [vmem:[%s1064_s1 + $0x30] sm:$0xf]  ;;  %v584_v4 = vld [vmem:[%s1064_s1 + $0x34] sm:$0xf0]  ;;  %v578_v29 = vld [vmem:[%s1064_s1 + $0x4] sm:$0xf0] }
  0x7c   :  { %v722_v33 = vsub.f32 %v587_v5, %v69_v31  ;;  %v583_v5 = vld [vmem:[%s1064_s1 + $0x34] sm:$0xf]  ;;  %v564_v6 = vor.u32 %v584_v4, %v563_v3  ;;  %v540_v30 = vor.u32 %v578_v29, %v539_v28  ;;  %v577_v31 = vld [vmem:[%s1064_s1 + $0x4] sm:$0xf] }
  0x7d   :  { %v89_v34 = vmul.f32 %v720_v32, %v720_v32  ;;  %v91_v57 = vmul.f32 %v740_v48, %v740_v48  ;;  %v568_v8 = vor.u32 %v583_v5, %v565_v7 }
  0x7e   :  { %v85_v35 = vmul.f32 %v722_v33, %v722_v33  ;;  %319 = vmatpush.bf16.msra.mxu0 %v564_v6  ;;  %604 = vmatpush.bf16.msra.mxu2 %v564_v6 }
  0x7f   :  { %v105_v36 = vsel %vm37_vm0, %v89_v34, 0.0  ;;  %v111_v61 = vsel %vm37_vm0, %v91_v57, 0.0  ;;  %348 = vmatpush.bf16.msra.mxu1 %v568_v8  ;;  %608 = vmatpush.bf16.msra.mxu3 %v568_v8  ;;  %v541_v34 = vld [vmem:[%s1064_s1 + $0x8] sm:$0xf0] }
  0x80   :  { %v61_v37 = vpop.xlane.xlu2 %60  ;;  %106 = vadd.xlane.f32.xlu2 %v105_v36  ;;  %v55_v38 = vpop.xlane.xlu0 %54  ;;  %v93_v39 = vsel %vm37_vm0, %v85_v35, 0.0  ;;  %v544_v35 = vor.u32 %v577_v31, %v541_v34  ;;  %v614_v34 = vld [vmem:[%s1063_s4] ss:$0 sm:$0xff] }
  0x81   :  { %v76_v41 = vmul.f32 %v716_v26, %v61_v37  ;;  %v74_v42 = vmul.f32 %v716_v26, %v55_v38  ;;  %94 = vadd.xlane.f32.xlu1 %v93_v39  ;;  %v43_v43 = vpop.xlane.xlu1 %42 }
  0x82   :  { %v70_v44 = vmul.f32 %v716_v26, %v43_v43 }
  0x83   :  { %v734_v45 = vsub.f32 %v600_v9, %v76_v41  ;;  %v736_v46 = vsub.f32 %v596_v10, %v74_v42  ;;  %v555_v9 = vld [vmem:[%s1064_s1 + $0x20] sm:$0xf]  ;;  %v582_v10 = vld [vmem:[%s1064_s1 + $0x24] sm:$0xf0] }
  0x84   :  { %v738_v47 = vsub.f32 %v588_v11, %v70_v44  ;;  %v581_v11 = vld [vmem:[%s1064_s1 + $0x24] sm:$0xf]  ;;  %v556_v12 = vor.u32 %v582_v10, %v555_v9 }
  0x85   :  { %v90_v49 = vmul.f32 %v736_v46, %v736_v46  ;;  %v92_v50 = vmul.f32 %v734_v45, %v734_v45  ;;  %v560_v14 = vor.u32 %v581_v11, %v557_v13 }
  0x86   :  { %v86_v51 = vmul.f32 %v738_v47, %v738_v47  ;;  %320 = vmatpush.bf16.msra.mxu0 %v556_v12  ;;  %605 = vmatpush.bf16.msra.mxu2 %v556_v12 }
  0x87   :  { %v108_v52 = vsel %vm37_vm0, %v90_v49, 0.0  ;;  %v114_v53 = vsel %vm37_vm0, %v92_v50, 0.0  ;;  %349 = vmatpush.bf16.msra.mxu1 %v560_v14  ;;  %609 = vmatpush.bf16.msra.mxu3 %v560_v14 }
  0x88   :  { %109 = vadd.xlane.f32.xlu0 %v108_v52  ;;  %v46_v54 = vpop.xlane.xlu0 %45  ;;  %v96_v55 = vsel %vm37_vm0, %v86_v51, 0.0 }
  0x89   :  { %v71_v56 = vmul.f32 %v716_v26, %v46_v54  ;;  %115 = vadd.xlane.f32.xlu1 %v114_v53  ;;  %97 = vadd.xlane.f32.xlu2 %v96_v55  ;;  %v49_v58 = vpop.xlane.xlu1 %48 }
  0x8a   :  { %v72_v59 = vmul.f32 %v716_v26, %v49_v58 }
  0x8b   :  { %v755_v60 = vsub.f32 %v591_v16, %v71_v56  ;;  %v547_v16 = vld [vmem:[%s1064_s1 + $0x10] sm:$0xf]  ;;  %350 = vmatpush.bf16.msra.mxu1 %v552_v24  ;;  %610 = vmatpush.bf16.msra.mxu3 %v552_v24 }
  0x8c   :  { %v760_v63 = vsub.f32 %v592_v17, %v72_v59  ;;  %v580_v17 = vld [vmem:[%s1064_s1 + $0x14] sm:$0xf0] }
  0x8d   :  { %v87_v62 = vmul.f32 %v755_v60, %v755_v60  ;;  %v548_v21 = vor.u32 %v580_v17, %v547_v16 }
  0x8e   :  { %v88_v1 = vmul.f32 %v760_v63, %v760_v63 }
  0x8f   :  { %v99_v0 = vsel %vm37_vm0, %v87_v62, 0.0  ;;  %321 = vmatpush.bf16.msra.mxu0 %v548_v21  ;;  %606 = vmatpush.bf16.msra.mxu2 %v548_v21 }
  0x90   :  { %112 = vadd.xlane.f32.xlu0 %v111_v61  ;;  %v102_v2 = vsel %vm37_vm0, %v88_v1, 0.0  ;;  %351 = vmatpush.bf16.msra.mxu1 %v544_v35 }
  0x91   :  { %100 = vadd.xlane.f32.xlu2 %v99_v0  ;;  %611 = vmatpush.bf16.msra.mxu3 %v544_v35 }
  0x93   :  { %322 = vmatpush.bf16.msra.mxu0 %v540_v30  ;;  %607 = vmatpush.bf16.msra.mxu2 %v540_v30 }
  0x98   :  { %103 = vadd.xlane.f32.xlu0 %v102_v2 }
  0xf3   :  { %v107_v15 = vpop.xlane.xlu2 %106 }
  0xf4   :  { %v121_v19 = vmul.f32 %v107_v15, %v716_v26  ;;  %v95_v20 = vpop.xlane.xlu1 %94 }
  0xf5   :  { %v117_v23 = vmul.f32 %v95_v20, %v716_v26 }
  0xf6   :  { %v129_v25 = vadd.f32 1e-06, %v121_v19 }
  0xf7   :  { %v125_v27 = vadd.f32 1e-06, %v117_v23 }
  0xf8   :  { %617 = vrsqrt.f32 %v129_v25  ;;  %vm179_vm5 = vweird.f32 %v129_v25 }
  0xf9   :  { %619 = vrsqrt.f32 %v125_v27  ;;  %vm139_vm3 = vweird.f32 %v125_v27 }
  0xfb   :  { %v110_v36 = vpop.xlane.xlu0 %109 }
  0xfc   :  { %v122_v37 = vmul.f32 %v110_v36, %v716_v26  ;;  %v98_v38 = vpop.xlane.xlu2 %97  ;;  %v116_v39 = vpop.xlane.xlu1 %115 }
  0xfd   :  { %v118_v40 = vmul.f32 %v98_v38, %v716_v26  ;;  %v124_v41 = vmul.f32 %v116_v39, %v716_v26 }
  0xfe   :  { %v618_v42 = vpop.eup %617  ;;  %v130_v43 = vadd.f32 1e-06, %v122_v37 }
  0xff   :  { %v620_v44 = vpop.eup %619  ;;  %v174_v49 = vmul.f32 %v618_v42, %v129_v25  ;;  %v819_v50 = vadd.f32 1e-06, %v118_v40  ;;  %v821_v51 = vadd.f32 1e-06, %v124_v41  ;;  %vm180_vm2 = vweird.f32 %v618_v42 }
 0x100   :  { %v134_v52 = vmul.f32 %v620_v44, %v125_v27  ;;  %621 = vrsqrt.f32 %v130_v43  ;;  %vm140_vm4 = vweird.f32 %v620_v44  ;;  %vm181_vm6 = vmor %vm179_vm5, %vm180_vm2  ;;  %vm189_vm11 = vweird.f32 %v130_v43 }
 0x101   :  { %v175_v53 = vmul.f32 %v618_v42, %v174_v49  ;;  %623 = vrsqrt.f32 %v819_v50  ;;  %vm141_vm7 = vmor %vm139_vm3, %vm140_vm4  ;;  %vm149_vm9 = vweird.f32 %v819_v50  ;;  %vm209_vm14 = vweird.f32 %v821_v51 }
 0x102   :  { %v135_v54 = vmul.f32 %v620_v44, %v134_v52  ;;  %625 = vrsqrt.f32 %v821_v51 }
 0x103   :  { %v176_v55 = vmul.f32 0.5, %v175_v53  ;;  %v113_v56 = vpop.xlane.xlu0 %112 }
 0x104   :  { %v136_v57 = vmul.f32 0.5, %v135_v54  ;;  %v123_v58 = vmul.f32 %v113_v56, %v716_v26  ;;  %v101_v59 = vpop.xlane.xlu2 %100 }
 0x105   :  { %v177_v61 = vsub.f32 1.5, %v176_v55  ;;  %v119_v62 = vmul.f32 %v101_v59, %v716_v26 }
 0x106   :  { %v622_v0 = vpop.eup %621  ;;  %v137_v1 = vsub.f32 1.5, %v136_v57  ;;  %v827_v2 = vadd.f32 1e-06, %v123_v58 }
 0x107   :  { %v624_v3 = vpop.eup %623  ;;  %v178_v4 = vmul.f32 %v618_v42, %v177_v61  ;;  %v184_v5 = vmul.f32 %v622_v0, %v130_v43  ;;  %v829_v6 = vadd.f32 1e-06, %v119_v62  ;;  %vm190_vm8 = vweird.f32 %v622_v0 }
 0x108   :  { %v831_v7 = vpop.eup %625  ;;  %v138_v8 = vmul.f32 %v620_v44, %v137_v1  ;;  %v144_v9 = vmul.f32 %v624_v3, %v819_v50  ;;  %627 = vrsqrt.f32 %v827_v2  ;;  %vm150_vm10 = vweird.f32 %v624_v3  ;;  %vm191_vm12 = vmor %vm189_vm11, %vm190_vm8 }
 0x109   :  { %v185_v10 = vmul.f32 %v622_v0, %v184_v5  ;;  %v204_v11 = vmul.f32 %v831_v7, %v821_v51  ;;  %v182_v12 = vsel %vm181_vm6, %v618_v42, %v178_v4  ;;  %629 = vrsqrt.f32 %v829_v6  ;;  %vm151_vm13 = vmor %vm149_vm9, %vm150_vm10 }
 0x10a   :  { %v145_v13 = vmul.f32 %v624_v3, %v144_v9  ;;  %v142_v14 = vsel %vm141_vm7, %v620_v44, %v138_v8  ;;  %v217_v20 = vmul.f32 %v182_v12, %v720_v32  ;;  %vm210_vm15 = vweird.f32 %v831_v7 }
 0x10b   :  { %v186_v15 = vmul.f32 0.5, %v185_v10  ;;  %v205_v16 = vmul.f32 %v831_v7, %v204_v11  ;;  %v104_v17 = vpop.xlane.xlu0 %103  ;;  %v213_v24 = vmul.f32 %v142_v14, %v722_v33  ;;  %vm199_vm1 = vweird.f32 %v827_v2  ;;  %vm874_vm5 = vmor %vm209_vm14, %vm210_vm15 }
 0x10c   :  { %v146_v18 = vmul.f32 0.5, %v145_v13  ;;  %v120_v19 = vmul.f32 %v104_v17, %v716_v26  ;;  %v229_v35 = vmul.f32 %v846_v22, %v217_v20  ;;  %vm159_vm2 = vweird.f32 %v829_v6 }
 0x10d   :  { %v187_v21 = vsub.f32 1.5, %v186_v15  ;;  %v206_v26 = vmul.f32 0.5, %v205_v16  ;;  %v225_v39 = vmul.f32 %v846_v22, %v213_v24 }
 0x10e   :  { %v628_v23 = vpop.eup %627  ;;  %v147_v25 = vsub.f32 1.5, %v146_v18  ;;  %v849_v27 = vadd.f32 1e-06, %v120_v19  ;;  %v241_v50 = vadd.f32 %v614_v34, %v229_v35 }
 0x10f   :  { %v188_v28 = vmul.f32 %v622_v0, %v187_v21  ;;  %v194_v32 = vmul.f32 %v628_v23, %v827_v2  ;;  %v630_v30 = vpop.eup %629  ;;  %v207_v41 = vsub.f32 1.5, %v206_v26  ;;  %vm200_vm3 = vweird.f32 %v628_v23 }
 0x110   :  { %v148_v29 = vmul.f32 %v624_v3, %v147_v25  ;;  %631 = vrsqrt.f32 %v849_v27  ;;  %v154_v38 = vmul.f32 %v630_v30, %v829_v6  ;;  %vm160_vm4 = vweird.f32 %v630_v30  ;;  %vm201_vm6 = vmor %vm199_vm1, %vm200_vm3 }
 0x111   :  { %v192_v31 = vsel %vm191_vm12, %v622_v0, %v188_v28  ;;  %v195_v33 = vmul.f32 %v628_v23, %v194_v32  ;;  %v208_v55 = vmul.f32 %v831_v7, %v207_v41  ;;  %vm883_vm7 = vmor %vm159_vm2, %vm160_vm4  ;;  %vm169_vm8 = vweird.f32 %v849_v27 }
 0x112   :  { %v218_v36 = vmul.f32 %v192_v31, %v736_v46  ;;  %v152_v37 = vsel %vm151_vm13, %v624_v3, %v148_v29  ;;  %v155_v43 = vmul.f32 %v630_v30, %v154_v38 }
 0x113   :  { %v214_v40 = vmul.f32 %v152_v37, %v738_v47  ;;  %v196_v42 = vmul.f32 0.5, %v195_v33  ;;  %v237_v47 = vadd.f32 %v614_v34, %v225_v39  ;;  %v212_v2 = vsel %vm874_vm5, %v831_v7, %v208_v55 }
 0x114   :  { %v230_v44 = vmul.f32 %v846_v22, %v218_v36  ;;  %v156_v53 = vmul.f32 0.5, %v155_v43  ;;  %v220_v10 = vmul.f32 %v212_v2, %v734_v45 }
 0x115   :  { %v197_v49 = vsub.f32 1.5, %v196_v42  ;;  %v226_v46 = vmul.f32 %v846_v22, %v214_v40 }
 0x116   :  { %v632_v52 = vpop.eup %631  ;;  %v242_v54 = vadd.f32 %v614_v34, %v230_v44  ;;  %v157_v61 = vsub.f32 1.5, %v156_v53  ;;  %v232_v15 = vmul.f32 %v846_v22, %v220_v10 }
 0x117   :  { %v198_v57 = vmul.f32 %v628_v23, %v197_v49  ;;  %v164_v58 = vmul.f32 %v632_v52, %v849_v27  ;;  %v238_v59 = vadd.f32 %v614_v34, %v226_v46  ;;  %vm170_vm9 = vweird.f32 %v632_v52 }
 0x118   :  { %v247_v62 = vpack.c.bf16 %v242_v54, %v241_v50  ;;  %v158_v4 = vmul.f32 %v630_v30, %v157_v61  ;;  %vm171_vm10 = vmor %vm169_vm8, %vm170_vm9  ;;  %v244_v20 = vadd.f32 %v614_v34, %v232_v15 }
 0x119   :  { %v202_v0 = vsel %vm201_vm6, %v628_v23, %v198_v57  ;;  %v165_v51 = vmul.f32 %v632_v52, %v164_v58  ;;  %v245_v3 = vpack.c.bf16 %v238_v59, %v237_v47 }
 0x11a   :  { %571 = vmatmul.msk.bf16.vlgmr.msra.gmra.mxu2 %vm37_vm0, %v247_v62  ;;  %575 = vmatmul.msk.bf16.vlgmr.msra.gmra.mxu3 %vm37_vm0, %v247_v62  ;;  %v219_v6 = vmul.f32 %v202_v0, %v740_v48  ;;  %v162_v8 = vsel %vm883_vm7, %v630_v30, %v158_v4 }
 0x11b   :  { %v166_v5 = vmul.f32 0.5, %v165_v51  ;;  %569 = vmatmul.msk.bf16.vlgmr.msra.gmra.mxu0 %vm37_vm0, %v245_v3  ;;  %573 = vmatmul.msk.bf16.vlgmr.msra.gmra.mxu1 %vm37_vm0, %v245_v3  ;;  %v215_v11 = vmul.f32 %v162_v8, %v755_v60  ;;  %v257_v60 = vld [vmem:[%s1065_s2] sm:$0x3] }
 0x11c   :  { %v231_v7 = vmul.f32 %v846_v22, %v219_v6 }
 0x11d   :  { %v167_v9 = vsub.f32 1.5, %v166_v5  ;;  %v227_v48 = vmul.f32 %v846_v22, %v215_v11 }
 0x11e   :  { %v243_v17 = vadd.f32 %v614_v34, %v231_v7 }
 0x11f   :  { %v168_v12 = vmul.f32 %v632_v52, %v167_v9  ;;  %v239_v18 = vadd.f32 %v614_v34, %v227_v48 }
 0x120   :  { %v248_v21 = vpack.c.bf16 %v244_v20, %v243_v17 }
 0x121   :  { %v172_v13 = vsel %vm171_vm10, %v632_v52, %v168_v12 }
 0x122   :  { %v216_v14 = vmul.f32 %v172_v13, %v760_v63  ;;  %v912_v63 = vperm.slane %v257_v60, 0 }
 0x124   :  { %v228_v16 = vmul.f32 %v846_v22, %v216_v14  ;;  %v914_v22 = vperm.slane %v257_v60, 1 }
 0x126   :  { %v240_v19 = vadd.f32 %v614_v34, %v228_v16 }
 0x128   :  { %v246_v45 = vpack.c.bf16 %v240_v19, %v239_v18 }
 0x12a   :  { %572 = vmatmul.msk.bf16.gmra.mxu2 %vm37_vm0, %v248_v21  ;;  %576 = vmatmul.msk.bf16.gmra.mxu3 %vm37_vm0, %v248_v21 }
 0x12b   :  { %570 = vmatmul.msk.bf16.gmra.mxu0 %vm37_vm0, %v246_v45  ;;  %574 = vmatmul.msk.bf16.gmra.mxu1 %vm37_vm0, %v246_v45 }
 0x198   :  { %v324_v23 = vpop.f32.mrf.mxu0  ;;  %v353_v24 = vpop.f32.mrf.mxu1 }
 0x199   :  { %v917_v25 = vadd.f32 %v324_v23, %v912_v63  ;;  %v920_v27 = vadd.f32 %v353_v24, %v914_v22 }
 0x19b   :  { %v373_v28 = vmul.f32 %v917_v25, %v917_v25  ;;  %v374_v26 = vmul.f32 %v920_v27, %v920_v27 }
 0x19d   :  { %v389_v32 = vmul.f32 %v373_v28, %v917_v25  ;;  %v390_v29 = vmul.f32 %v374_v26, %v920_v27  ;;  %v334_v30 = vpop.f32.mrf.mxu2  ;;  %v363_v31 = vpop.f32.mrf.mxu3 }
 0x19e   :  { %v929_v33 = vadd.f32 %v334_v30, %v912_v63  ;;  %v932_v34 = vadd.f32 %v363_v31, %v914_v22 }
 0x19f   :  { %v405_v35 = vmul.f32 0.044715, %v389_v32  ;;  %v406_v36 = vmul.f32 0.044715, %v390_v29 }
 0x1a0   :  { %v381_v37 = vmul.f32 %v929_v33, %v929_v33  ;;  %v382_v38 = vmul.f32 %v932_v34, %v932_v34  ;;  %v326_v39 = vpop.f32.mrf.mxu0  ;;  %v355_v40 = vpop.f32.mrf.mxu1 }
 0x1a1   :  { %v421_v41 = vadd.f32 %v405_v35, %v917_v25  ;;  %v422_v42 = vadd.f32 %v406_v36, %v920_v27  ;;  %v941_v43 = vadd.f32 %v326_v39, %v912_v63  ;;  %v944_v44 = vadd.f32 %v355_v40, %v914_v22 }
 0x1a2   :  { %v397_v49 = vmul.f32 %v381_v37, %v929_v33  ;;  %v398_v46 = vmul.f32 %v382_v38, %v932_v34 }
 0x1a3   :  { %v437_v50 = vmul.f32 0.7978846, %v421_v41  ;;  %v438_v52 = vmul.f32 0.7978846, %v422_v42  ;;  %v375_v53 = vmul.f32 %v941_v43, %v941_v43  ;;  %v376_v47 = vmul.f32 %v944_v44, %v944_v44 }
 0x1a4   :  { %v413_v54 = vmul.f32 0.044715, %v397_v49  ;;  %v414_v55 = vmul.f32 0.044715, %v398_v46 }
 0x1a5   :  { %633 = vtanh.f32 %v437_v50  ;;  %v391_v56 = vmul.f32 %v375_v53, %v941_v43  ;;  %v392_v57 = vmul.f32 %v376_v47, %v944_v44  ;;  %v336_v58 = vpop.f32.mrf.mxu2  ;;  %v365_v59 = vpop.f32.mrf.mxu3 }
 0x1a6   :  { %635 = vtanh.f32 %v438_v52  ;;  %v429_v61 = vadd.f32 %v413_v54, %v929_v33  ;;  %v430_v62 = vadd.f32 %v414_v55, %v932_v34  ;;  %v957_v0 = vadd.f32 %v336_v58, %v912_v63 }
 0x1a7   :  { %v407_v1 = vmul.f32 0.044715, %v391_v56  ;;  %v408_v51 = vmul.f32 0.044715, %v392_v57  ;;  %v960_v3 = vadd.f32 %v365_v59, %v914_v22 }
 0x1a8   :  { %v445_v4 = vmul.f32 0.7978846, %v429_v61  ;;  %v446_v2 = vmul.f32 0.7978846, %v430_v62  ;;  %v383_v5 = vmul.f32 %v957_v0, %v957_v0  ;;  %v329_v6 = vpop.f32.mrf.mxu0  ;;  %v358_v8 = vpop.f32.mrf.mxu1 }
 0x1a9   :  { %v423_v9 = vadd.f32 %v407_v1, %v941_v43  ;;  %v424_v10 = vadd.f32 %v408_v51, %v944_v44  ;;  %v384_v11 = vmul.f32 %v960_v3, %v960_v3  ;;  %v969_v12 = vadd.f32 %v329_v6, %v912_v63 }
 0x1aa   :  { %637 = vtanh.f32 %v445_v4  ;;  %v399_v7 = vmul.f32 %v383_v5, %v957_v0  ;;  %v973_v13 = vadd.f32 %v358_v8, %v914_v22 }
 0x1ab   :  { %v634_v14 = vpop.eup %633  ;;  %639 = vtanh.f32 %v446_v2  ;;  %v439_v48 = vmul.f32 0.7978846, %v423_v9  ;;  %v440_v15 = vmul.f32 0.7978846, %v424_v10  ;;  %v400_v16 = vmul.f32 %v384_v11, %v960_v3 }
 0x1ac   :  { %v636_v17 = vpop.eup %635  ;;  %v469_v18 = vadd.f32 1.0, %v634_v14  ;;  %v415_v19 = vmul.f32 0.044715, %v399_v7  ;;  %v377_v20 = vmul.f32 %v969_v12, %v969_v12  ;;  %v378_v45 = vmul.f32 %v973_v13, %v973_v13 }
 0x1ad   :  { %v470_v21 = vadd.f32 1.0, %v636_v17  ;;  %641 = vtanh.f32 %v439_v48  ;;  %v416_v60 = vmul.f32 0.044715, %v400_v16  ;;  %v339_v23 = vpop.f32.mrf.mxu2  ;;  %v368_v24 = vpop.f32.mrf.mxu3 }
 0x1ae   :  { %v485_v28 = vmul.f32 0.5, %v469_v18  ;;  %643 = vtanh.f32 %v440_v15  ;;  %v431_v26 = vadd.f32 %v415_v19, %v957_v0  ;;  %v393_v32 = vmul.f32 %v377_v20, %v969_v12 }
 0x1af   :  { %v486_v29 = vmul.f32 0.5, %v470_v21  ;;  %v432_v30 = vadd.f32 %v416_v60, %v960_v3  ;;  %v394_v31 = vmul.f32 %v378_v45, %v973_v13  ;;  %v985_v35 = vadd.f32 %v339_v23, %v912_v63 }
 0x1b0   :  { %v638_v36 = vpop.eup %637  ;;  %v501_v37 = vmul.f32 %v485_v28, %v917_v25  ;;  %v447_v38 = vmul.f32 0.7978846, %v431_v26  ;;  %v409_v39 = vmul.f32 0.044715, %v393_v32  ;;  %v989_v40 = vadd.f32 %v368_v24, %v914_v22  ;;  %v331_v62 = vpop.f32.mrf.mxu0 }
 0x1b1   :  { %v640_v41 = vpop.eup %639  ;;  %v502_v42 = vmul.f32 %v486_v29, %v920_v27  ;;  %v477_v49 = vadd.f32 1.0, %v638_v36  ;;  %v448_v46 = vmul.f32 0.7978846, %v432_v30  ;;  %v410_v50 = vmul.f32 0.044715, %v394_v31  ;;  %v360_v5 = vpop.f32.mrf.mxu1 }
 0x1b2   :  { %v478_v52 = vadd.f32 1.0, %v640_v41  ;;  %645 = vtanh.f32 %v447_v38  ;;  %v425_v53 = vadd.f32 %v409_v39, %v969_v12  ;;  %v385_v47 = vmul.f32 %v985_v35, %v985_v35 }
 0x1b3   :  { %v642_v54 = vpop.eup %641  ;;  %v517_v25 = vpack.c.bf16 %v502_v42, %v501_v37  ;;  %v493_v55 = vmul.f32 0.5, %v477_v49  ;;  %647 = vtanh.f32 %v448_v46  ;;  %v426_v56 = vadd.f32 %v410_v50, %v973_v13 }
 0x1b4   :  { %v644_v57 = vpop.eup %643  ;;  %v494_v58 = vmul.f32 0.5, %v478_v52  ;;  %v471_v59 = vadd.f32 1.0, %v642_v54  ;;  %v441_v27 = vmul.f32 0.7978846, %v425_v53  ;;  %v401_v61 = vmul.f32 %v385_v47, %v985_v35 }
 0x1b5   :  { %525 = vst [vmem:[%s1066_s5] sm:$0xff] %v517_v25  ;;  %v509_v1 = vmul.f32 %v493_v55, %v929_v33  ;;  %v472_v51 = vadd.f32 1.0, %v644_v57  ;;  %v442_v4 = vmul.f32 0.7978846, %v426_v56  ;;  %v386_v2 = vmul.f32 %v989_v40, %v989_v40  ;;  %v341_v14 = vpop.f32.mrf.mxu2  ;;  %v370_v36 = vpop.f32.mrf.mxu3 }
 0x1b6   :  { %v510_v6 = vmul.f32 %v494_v58, %v932_v34  ;;  %v487_v8 = vmul.f32 0.5, %v471_v59  ;;  %649 = vtanh.f32 %v441_v27  ;;  %v417_v9 = vmul.f32 0.044715, %v401_v61 }
 0x1b7   :  { %v488_v10 = vmul.f32 0.5, %v472_v51  ;;  %651 = vtanh.f32 %v442_v4  ;;  %v402_v11 = vmul.f32 %v386_v2, %v989_v40  ;;  %v1006_v7 = vadd.f32 %v331_v62, %v912_v63 }
 0x1b8   :  { %v646_v33 = vpop.eup %645  ;;  %v521_v48 = vpack.c.bf16 %v510_v6, %v509_v1  ;;  %v503_v15 = vmul.f32 %v487_v8, %v941_v43  ;;  %v433_v16 = vadd.f32 %v417_v9, %v985_v35  ;;  %v1011_v17 = vadd.f32 %v360_v5, %v914_v22 }
 0x1b9   :  { %v648_v34 = vpop.eup %647  ;;  %v504_v18 = vmul.f32 %v488_v10, %v944_v44  ;;  %v479_v19 = vadd.f32 1.0, %v646_v33  ;;  %v418_v20 = vmul.f32 0.044715, %v402_v11  ;;  %v379_v45 = vmul.f32 %v1006_v7, %v1006_v7 }
 0x1ba   :  { %529 = vst [vmem:[%s1066_s5 + $0x20] sm:$0xff] %v521_v48  ;;  %v480_v21 = vadd.f32 1.0, %v648_v34  ;;  %v449_v60 = vmul.f32 0.7978846, %v433_v16  ;;  %v380_v43 = vmul.f32 %v1011_v17, %v1011_v17  ;;  %v1022_v23 = vadd.f32 %v341_v14, %v912_v63 }
 0x1bb   :  { %v518_v24 = vpack.c.bf16 %v504_v18, %v503_v15  ;;  %v495_v28 = vmul.f32 0.5, %v479_v19  ;;  %v434_v44 = vadd.f32 %v418_v20, %v989_v40  ;;  %v395_v26 = vmul.f32 %v379_v45, %v1006_v7 }
 0x1bc   :  { %v650_v32 = vpop.eup %649  ;;  %v496_v29 = vmul.f32 0.5, %v480_v21  ;;  %653 = vtanh.f32 %v449_v60  ;;  %v396_v30 = vmul.f32 %v380_v43, %v1011_v17  ;;  %v387_v31 = vmul.f32 %v1022_v23, %v1022_v23 }
 0x1bd   :  { %v652_v37 = vpop.eup %651  ;;  %526 = vst [vmem:[%s1066_s5 + $0x8] sm:$0xff] %v518_v24  ;;  %v511_v63 = vmul.f32 %v495_v28, %v957_v0  ;;  %v473_v38 = vadd.f32 1.0, %v650_v32  ;;  %v450_v39 = vmul.f32 0.7978846, %v434_v44  ;;  %v411_v41 = vmul.f32 0.044715, %v395_v26 }
 0x1be   :  { %v512_v42 = vmul.f32 %v496_v29, %v960_v3  ;;  %v474_v49 = vadd.f32 1.0, %v652_v37  ;;  %v412_v46 = vmul.f32 0.044715, %v396_v30  ;;  %v403_v50 = vmul.f32 %v387_v31, %v1022_v23 }
 0x1bf   :  { %v489_v52 = vmul.f32 0.5, %v473_v38  ;;  %655 = vtanh.f32 %v450_v39  ;;  %v427_v53 = vadd.f32 %v411_v41, %v1006_v7  ;;  %v371_v47 = vadd.f32 %v370_v36, %v914_v22 }
 0x1c0   :  { %v522_v54 = vpack.c.bf16 %v512_v42, %v511_v63  ;;  %v490_v25 = vmul.f32 0.5, %v474_v49  ;;  %v428_v55 = vadd.f32 %v412_v46, %v1011_v17  ;;  %v419_v0 = vmul.f32 0.044715, %v403_v50 }
 0x1c1   :  { %v505_v56 = vmul.f32 %v489_v52, %v969_v12  ;;  %v443_v57 = vmul.f32 0.7978846, %v427_v53  ;;  %v388_v58 = vmul.f32 %v371_v47, %v371_v47 }
 0x1c2   :  { %v654_v3 = vpop.eup %653  ;;  %530 = vst [vmem:[%s1066_s5 + $0x28] sm:$0xff] %v522_v54  ;;  %v506_v59 = vmul.f32 %v490_v25, %v973_v13  ;;  %v444_v27 = vmul.f32 0.7978846, %v428_v55  ;;  %v435_v61 = vadd.f32 %v419_v0, %v1022_v23 }
 0x1c3   :  { %v481_v22 = vadd.f32 1.0, %v654_v3  ;;  %657 = vtanh.f32 %v443_v57  ;;  %v404_v62 = vmul.f32 %v388_v58, %v371_v47 }
 0x1c4   :  { %v519_v1 = vpack.c.bf16 %v506_v59, %v505_v56  ;;  %659 = vtanh.f32 %v444_v27  ;;  %v451_v51 = vmul.f32 0.7978846, %v435_v61 }
 0x1c5   :  { %v656_v4 = vpop.eup %655  ;;  %v497_v12 = vmul.f32 0.5, %v481_v22  ;;  %v420_v2 = vmul.f32 0.044715, %v404_v62 }
 0x1c6   :  { %527 = vst [vmem:[%s1066_s5 + $0x10] sm:$0xff] %v519_v1  ;;  %v482_v5 = vadd.f32 1.0, %v656_v4  ;;  %661 = vtanh.f32 %v451_v51 }
 0x1c7   :  { %v436_v6 = vadd.f32 %v420_v2, %v371_v47  ;;  %v513_v13 = vmul.f32 %v497_v12, %v985_v35 }
 0x1c8   :  { %v498_v8 = vmul.f32 0.5, %v482_v5 }
 0x1c9   :  { %v658_v9 = vpop.eup %657  ;;  %v452_v10 = vmul.f32 0.7978846, %v436_v6 }
 0x1ca   :  { %v660_v11 = vpop.eup %659  ;;  %v514_v14 = vmul.f32 %v498_v8, %v989_v40  ;;  %v475_v33 = vadd.f32 1.0, %v658_v9 }
 0x1cb   :  { %v476_v48 = vadd.f32 1.0, %v660_v11  ;;  %663 = vtanh.f32 %v452_v10 }
 0x1cc   :  { %v662_v15 = vpop.eup %661  ;;  %v523_v16 = vpack.c.bf16 %v514_v14, %v513_v13  ;;  %v491_v34 = vmul.f32 0.5, %v475_v33 }
 0x1cd   :  { %v492_v18 = vmul.f32 0.5, %v476_v48  ;;  %v483_v19 = vadd.f32 1.0, %v662_v15 }
 0x1ce   :  { %531 = vst [vmem:[%s1066_s5 + $0x30] sm:$0xff] %v523_v16  ;;  %v507_v35 = vmul.f32 %v491_v34, %v1006_v7 }
 0x1cf   :  { %v508_v20 = vmul.f32 %v492_v18, %v1011_v17  ;;  %v499_v45 = vmul.f32 0.5, %v483_v19 }
 0x1d1   :  { %v664_v21 = vpop.eup %663  ;;  %v520_v60 = vpack.c.bf16 %v508_v20, %v507_v35  ;;  %v515_v43 = vmul.f32 %v499_v45, %v1022_v23 }
 0x1d2   :  { %v484_v40 = vadd.f32 1.0, %v664_v21 }
 0x1d3   :  { %528 = vst [vmem:[%s1066_s5 + $0x18] sm:$0xff] %v520_v60 }
 0x1d4   :  { %v500_v24 = vmul.f32 0.5, %v484_v40 }
 0x1d6   :  { %v516_v28 = vmul.f32 %v500_v24, %v371_v47 }
 0x1d8   :  { %v524_v44 = vpack.c.bf16 %v516_v28, %v515_v43 }
 0x1da   :  { %532 = vst [vmem:[%s1066_s5 + $0x38] sm:$0xff] %v524_v44 }

// kernel: sam_encoder_nuke_forward.26
= control target key start
LH: loop header
LB: loop body
LE: loop exit
PB: predicated region body
PF: predicated region fallthrough
CT: control target
= control target key end

     0   :  { %vm79_vm0 = vcmask 523264   ;;  %vm129_vm1 = vcmask 519168   ;;  %s278_s1 = inlined_call_operand.vmem [shape: bf16[64,64], index: 1, kind: input, shape index: {}]   ;;  %s279_s2 = inlined_call_operand.vmem [shape: f32[1,64], index: 2, kind: input, shape index: {}]   ;;  %s280_s0 = inlined_call_operand.vmem [shape: bf16[64,64], index: 0, kind: input, shape index: {}]   ;;  %s281_s3 = inlined_call_operand.vmem [shape: bf16[64,64], index: 3, kind: output, shape index: {}]  }
   0x1   :  { %v185_v0 = vld [vmem:[%s278_s1 + $0x18] sm:$0xff]  ;;  %v184_v1 = vld [vmem:[%s278_s1 + $0x10] sm:$0xff]  ;;  %v183_v2 = vld [vmem:[%s278_s1 + $0x8] sm:$0xff] }
   0x2   :  { %96 = vmatpush.bf16.msra.mxu0 %v185_v0  ;;  %186 = vmatpush.bf16.msra.mxu1 %v185_v0  ;;  %v182_v3 = vld [vmem:[%s278_s1] sm:$0xff]  ;;  %v179_v5 = vld [vmem:[%s280_s0 + $0x8] sm:$0xff]  ;;  %v180_v6 = vld [vmem:[%s280_s0 + $0x10] sm:$0xff] }
   0x3   :  { %187 = vmatpush.bf16.msra.mxu2 %v185_v0  ;;  %188 = vmatpush.bf16.msra.mxu3 %v185_v0  ;;  %v178_v4 = vld [vmem:[%s280_s0] sm:$0xff]  ;;  %v181_v7 = vld [vmem:[%s280_s0 + $0x18] sm:$0xff] }
   0x4   :  { %v198_v8 = vld [vmem:[%s279_s2] ss:$0 sm:$0xff] }
   0x6   :  { %97 = vmatpush.bf16.msra.mxu0 %v184_v1  ;;  %189 = vmatpush.bf16.msra.mxu1 %v184_v1 }
   0x7   :  { %190 = vmatpush.bf16.msra.mxu2 %v184_v1  ;;  %191 = vmatpush.bf16.msra.mxu3 %v184_v1 }
   0xa   :  { %98 = vmatpush.bf16.msra.mxu0 %v183_v2  ;;  %192 = vmatpush.bf16.msra.mxu1 %v183_v2 }
   0xb   :  { %193 = vmatpush.bf16.msra.mxu2 %v183_v2  ;;  %194 = vmatpush.bf16.msra.mxu3 %v183_v2 }
   0xe   :  { %99 = vmatpush.bf16.msra.mxu0 %v182_v3  ;;  %195 = vmatpush.bf16.msra.mxu1 %v182_v3 }
   0xf   :  { %196 = vmatpush.bf16.msra.mxu2 %v182_v3  ;;  %197 = vmatpush.bf16.msra.mxu3 %v182_v3 }
  0x11   :  { %174 = vmatmul.msk.bf16.vlgmr.msra.gmra.mxu0 %vm79_vm0, %v178_v4  ;;  %175 = vmatmul.msk.bf16.vlgmr.msra.gmra.mxu1 %vm79_vm0, %v179_v5 }
  0x12   :  { %176 = vmatmul.msk.bf16.vlgmr.msra.gmra.mxu2 %vm79_vm0, %v180_v6  ;;  %177 = vmatmul.msk.bf16.vlgmr.msra.gmra.mxu3 %vm79_vm0, %v181_v7 }
  0x8e   :  { %v101_v9 = vpop.f32.mrf.mxu0  ;;  %v106_v10 = vpop.f32.mrf.mxu1 }
  0x8f   :  { %v102_v11 = vadd.f32 %v198_v8, %v101_v9  ;;  %v107_v12 = vadd.f32 %v198_v8, %v106_v10 }
  0x91   :  { %v121_v13 = vpack.c.bf16 %v102_v11, %v102_v11  ;;  %v123_v14 = vpack.c.bf16 %v107_v12, %v107_v12 }
  0x93   :  { %130 = vst.msk [vmem:[%s281_s3] sm:$0xf] %vm129_vm1, %v121_v13 }
  0x94   :  { %132 = vst.msk [vmem:[%s281_s3 + $0x8] sm:$0xf] %vm129_vm1, %v123_v14 }
  0x95   :  { %v111_v15 = vpop.f32.mrf.mxu2  ;;  %v116_v16 = vpop.f32.mrf.mxu3 }
  0x96   :  { %v112_v17 = vadd.f32 %v198_v8, %v111_v15  ;;  %v117_v18 = vadd.f32 %v198_v8, %v116_v16  ;;  %v103_v19 = vpop.f32.mrf.mxu0  ;;  %v108_v20 = vpop.f32.mrf.mxu1 }
  0x97   :  { %v104_v21 = vadd.f32 %v198_v8, %v103_v19  ;;  %v109_v22 = vadd.f32 %v198_v8, %v108_v20 }
  0x98   :  { %v125_v23 = vpack.c.bf16 %v112_v17, %v112_v17  ;;  %v127_v24 = vpack.c.bf16 %v117_v18, %v117_v18 }
  0x99   :  { %v122_v25 = vpack.c.bf16 %v104_v21, %v104_v21  ;;  %v124_v26 = vpack.c.bf16 %v109_v22, %v109_v22 }
  0x9a   :  { %134 = vst.msk [vmem:[%s281_s3 + $0x10] sm:$0xf] %vm129_vm1, %v125_v23 }
  0x9b   :  { %136 = vst.msk [vmem:[%s281_s3 + $0x18] sm:$0xf] %vm129_vm1, %v127_v24 }
  0x9c   :  { %131 = vst.msk [vmem:[%s281_s3 + $0x4] sm:$0xf] %vm129_vm1, %v122_v25 }
  0x9d   :  { %133 = vst.msk [vmem:[%s281_s3 + $0xc] sm:$0xf] %vm129_vm1, %v124_v26  ;;  %v113_v27 = vpop.f32.mrf.mxu2  ;;  %v118_v28 = vpop.f32.mrf.mxu3 }
  0x9e   :  { %v114_v29 = vadd.f32 %v198_v8, %v113_v27  ;;  %v119_v30 = vadd.f32 %v198_v8, %v118_v28 }
  0xa0   :  { %v126_v31 = vpack.c.bf16 %v114_v29, %v114_v29  ;;  %v128_v32 = vpack.c.bf16 %v119_v30, %v119_v30 }
  0xa2   :  { %135 = vst.msk [vmem:[%s281_s3 + $0x14] sm:$0xf] %vm129_vm1, %v126_v31 }
  0xa3   :  { %137 = vst.msk [vmem:[%s281_s3 + $0x1c] sm:$0xf] %vm129_vm1, %v128_v32 }

// kernel: sam_encoder_nuke_forward.20
= control target key start
LH: loop header
LB: loop body
LE: loop exit
PB: predicated region body
PF: predicated region fallthrough
CT: control target
= control target key end

     0   :  { %vm287_vm0 = vcmask 519168   ;;  %s634_s1 = inlined_call_operand.vmem [shape: bf16[256,64], index: 1, kind: input, shape index: {}]   ;;  %s635_s2 = inlined_call_operand.vmem [shape: f32[1,64], index: 2, kind: input, shape index: {}]   ;;  %s636_s0 = inlined_call_operand.vmem [shape: bf16[64,256], index: 0, kind: input, shape index: {}]   ;;  %s637_s3 = inlined_call_operand.vmem [shape: bf16[64,64], index: 3, kind: input, shape index: {}, may-alias: {3,4}]   ;;  %s638_s4 = inlined_call_operand.vmem [shape: bf16[64,64], index: 4, kind: output, shape index: {}, may-alias: {3,4}]  }
   0x1   :  { %v411_v0 = vld [vmem:[%s634_s1 + $0x38] sm:$0xff]  ;;  %v410_v2 = vld [vmem:[%s634_s1 + $0x30] sm:$0xff]  ;;  %v409_v4 = vld [vmem:[%s634_s1 + $0x28] sm:$0xff] }
   0x2   :  { %v419_v1 = vld [vmem:[%s634_s1 + $0x78] sm:$0xff]  ;;  %197 = vmatpush.bf16.msra.mxu0 %v411_v0  ;;  %439 = vmatpush.bf16.msra.mxu2 %v411_v0  ;;  %v418_v3 = vld [vmem:[%s634_s1 + $0x70] sm:$0xff]  ;;  %v417_v5 = vld [vmem:[%s634_s1 + $0x68] sm:$0xff] }
   0x3   :  { %226 = vmatpush.bf16.msra.mxu1 %v419_v1  ;;  %447 = vmatpush.bf16.msra.mxu3 %v419_v1  ;;  %v408_v6 = vld [vmem:[%s634_s1 + $0x20] sm:$0xff]  ;;  %v407_v8 = vld [vmem:[%s634_s1 + $0x18] sm:$0xff]  ;;  %v406_v10 = vld [vmem:[%s634_s1 + $0x10] sm:$0xff] }
   0x4   :  { %v416_v7 = vld [vmem:[%s634_s1 + $0x60] sm:$0xff]  ;;  %v415_v9 = vld [vmem:[%s634_s1 + $0x58] sm:$0xff]  ;;  %v414_v11 = vld [vmem:[%s634_s1 + $0x50] sm:$0xff] }
   0x5   :  { %v405_v12 = vld [vmem:[%s634_s1 + $0x8] sm:$0xff]  ;;  %v404_v14 = vld [vmem:[%s634_s1] sm:$0xff]  ;;  %v310_v28 = vld [vmem:[%s636_s0 + $0x10] sm:$0xf] }
   0x6   :  { %198 = vmatpush.bf16.msra.mxu0 %v410_v2  ;;  %440 = vmatpush.bf16.msra.mxu2 %v410_v2  ;;  %v413_v13 = vld [vmem:[%s634_s1 + $0x48] sm:$0xff]  ;;  %v412_v15 = vld [vmem:[%s634_s1 + $0x40] sm:$0xff]  ;;  %v399_v29 = vld [vmem:[%s636_s0 + $0x14] sm:$0xf0] }
   0x7   :  { %227 = vmatpush.bf16.msra.mxu1 %v418_v3  ;;  %448 = vmatpush.bf16.msra.mxu3 %v418_v3  ;;  %v302_v16 = vld [vmem:[%s636_s0] sm:$0xf]  ;;  %v397_v17 = vld [vmem:[%s636_s0 + $0x4] sm:$0xf0]  ;;  %v396_v20 = vld [vmem:[%s636_s0 + $0x4] sm:$0xf]  ;;  %v311_v36 = vor.u32 %v399_v29, %v310_v28 }
   0x8   :  { %v318_v18 = vld [vmem:[%s636_s0 + $0x20] sm:$0xf]  ;;  %v401_v19 = vld [vmem:[%s636_s0 + $0x24] sm:$0xf0]  ;;  %v304_v21 = vld [vmem:[%s636_s0 + $0x8] sm:$0xf0]  ;;  %v303_v24 = vor.u32 %v397_v17, %v302_v16 }
   0x9   :  { %v400_v22 = vld [vmem:[%s636_s0 + $0x24] sm:$0xf]  ;;  %v320_v23 = vld [vmem:[%s636_s0 + $0x28] sm:$0xf0]  ;;  %v319_v25 = vor.u32 %v401_v19, %v318_v18  ;;  %v307_v26 = vor.u32 %v396_v20, %v304_v21  ;;  %v326_v30 = vld [vmem:[%s636_s0 + $0x30] sm:$0xf] }
   0xa   :  { %199 = vmatpush.bf16.msra.mxu0 %v409_v4  ;;  %441 = vmatpush.bf16.msra.mxu2 %v409_v4  ;;  %v323_v27 = vor.u32 %v400_v22, %v320_v23  ;;  %v403_v31 = vld [vmem:[%s636_s0 + $0x34] sm:$0xf0]  ;;  %v398_v32 = vld [vmem:[%s636_s0 + $0x14] sm:$0xf]  ;;  %v312_v33 = vld [vmem:[%s636_s0 + $0x18] sm:$0xf0] }
   0xb   :  { %228 = vmatpush.bf16.msra.mxu1 %v417_v5  ;;  %449 = vmatpush.bf16.msra.mxu3 %v417_v5  ;;  %v402_v34 = vld [vmem:[%s636_s0 + $0x34] sm:$0xf]  ;;  %v328_v35 = vld [vmem:[%s636_s0 + $0x38] sm:$0xf0]  ;;  %v327_v37 = vor.u32 %v403_v31, %v326_v30  ;;  %v315_v38 = vor.u32 %v398_v32, %v312_v33  ;;  %v580_v40 = vld [vmem:[%s635_s2] ss:$0 sm:$0xff] }
   0xc   :  { %v331_v39 = vor.u32 %v402_v34, %v328_v35  ;;  %v421_v41 = vld [vmem:[%s637_s3] sm:$0xff]   ;;  %v437_v47 = vld [vmem:[%s637_s3 + $0x10] sm:$0xff]  }
   0xd   :  { %v422_v45 = vunpack.c.l.bf16 %v421_v41  ;;  %v430_v53 = vunpack.c.l.bf16 %v437_v47  ;;  %v423_v58 = vunpack.c.h.bf16 %v421_v41  ;;  %v431_v4 = vunpack.c.h.bf16 %v437_v47 }
   0xe   :  { %200 = vmatpush.bf16.msra.mxu0 %v408_v6  ;;  %442 = vmatpush.bf16.msra.mxu2 %v408_v6 }
   0xf   :  { %229 = vmatpush.bf16.msra.mxu1 %v416_v7  ;;  %450 = vmatpush.bf16.msra.mxu3 %v416_v7 }
  0x12   :  { %201 = vmatpush.bf16.msra.mxu0 %v407_v8  ;;  %443 = vmatpush.bf16.msra.mxu2 %v407_v8 }
  0x13   :  { %230 = vmatpush.bf16.msra.mxu1 %v415_v9  ;;  %451 = vmatpush.bf16.msra.mxu3 %v415_v9 }
  0x16   :  { %202 = vmatpush.bf16.msra.mxu0 %v406_v10  ;;  %444 = vmatpush.bf16.msra.mxu2 %v406_v10 }
  0x17   :  { %231 = vmatpush.bf16.msra.mxu1 %v414_v11  ;;  %452 = vmatpush.bf16.msra.mxu3 %v414_v11 }
  0x1a   :  { %203 = vmatpush.bf16.msra.mxu0 %v405_v12  ;;  %445 = vmatpush.bf16.msra.mxu2 %v405_v12 }
  0x1b   :  { %232 = vmatpush.bf16.msra.mxu1 %v413_v13  ;;  %453 = vmatpush.bf16.msra.mxu3 %v413_v13 }
  0x1e   :  { %204 = vmatpush.bf16.msra.mxu0 %v404_v14  ;;  %446 = vmatpush.bf16.msra.mxu2 %v404_v14 }
  0x1f   :  { %233 = vmatpush.bf16.msra.mxu1 %v412_v15  ;;  %454 = vmatpush.bf16.msra.mxu3 %v412_v15 }
  0x21   :  { %205 = vmatmul.bf16.vlgmr.msra.gmra.mxu0 %v303_v24  ;;  %215 = vmatmul.bf16.vlgmr.msra.gmra.mxu2 %v319_v25 }
  0x22   :  { %234 = vmatmul.bf16.vlgmr.msra.gmra.mxu1 %v307_v26  ;;  %244 = vmatmul.bf16.vlgmr.msra.gmra.mxu3 %v323_v27 }
  0x31   :  { %210 = vmatmul.bf16.gmra.mxu0 %v311_v36  ;;  %220 = vmatmul.bf16.gmra.mxu2 %v327_v37 }
  0x32   :  { %239 = vmatmul.bf16.gmra.mxu1 %v315_v38  ;;  %249 = vmatmul.bf16.gmra.mxu3 %v331_v39 }
  0x9e   :  { %v206_v42 = vpop.f32.mrf.mxu0 }
  0x9f   :  { %v207_v43 = vadd.f32 %v580_v40, %v206_v42  ;;  %v235_v44 = vpop.f32.mrf.mxu1 }
  0xa1   :  { %v236_v46 = vadd.f32 %v235_v44, %v207_v43 }
  0xa3   :  { %v271_v48 = vadd.f32 %v422_v45, %v236_v46 }
  0xa4   :  { %v216_v49 = vpop.f32.mrf.mxu2 }
  0xa5   :  { %v279_v50 = vpack.c.bf16 %v271_v48, %v271_v48  ;;  %v217_v51 = vadd.f32 %v580_v40, %v216_v49  ;;  %v245_v52 = vpop.f32.mrf.mxu3 }
  0xa6   :  { %v208_v54 = vpop.f32.mrf.mxu0 }
  0xa7   :  { %288 = vst.msk [vmem:[%s638_s4] sm:$0xf] %vm287_vm0, %v279_v50  ;;  %v246_v55 = vadd.f32 %v245_v52, %v217_v51  ;;  %v209_v56 = vadd.f32 %v580_v40, %v208_v54  ;;  %v237_v57 = vpop.f32.mrf.mxu1 }
  0xa9   :  { %v275_v59 = vadd.f32 %v430_v53, %v246_v55  ;;  %v238_v60 = vadd.f32 %v237_v57, %v209_v56 }
  0xab   :  { %v283_v61 = vpack.c.bf16 %v275_v59, %v275_v59  ;;  %v272_v62 = vadd.f32 %v423_v58, %v238_v60 }
  0xac   :  { %v218_v63 = vpop.f32.mrf.mxu2 }
  0xad   :  { %v280_v1 = vpack.c.bf16 %v272_v62, %v272_v62  ;;  %v219_v2 = vadd.f32 %v580_v40, %v218_v63  ;;  %v247_v3 = vpop.f32.mrf.mxu3 }
  0xae   :  { %v436_v0 = vld [vmem:[%s637_s3 + $0x8] sm:$0xff]   ;;  %v211_v5 = vpop.f32.mrf.mxu0 }
  0xaf   :  { %292 = vst.msk [vmem:[%s638_s4 + $0x10] sm:$0xf] %vm287_vm0, %v283_v61  ;;  %v248_v6 = vadd.f32 %v247_v3, %v219_v2  ;;  %v212_v7 = vadd.f32 %v580_v40, %v211_v5  ;;  %v240_v8 = vpop.f32.mrf.mxu1  ;;  %v426_v9 = vunpack.c.l.bf16 %v436_v0  ;;  %v427_v23 = vunpack.c.h.bf16 %v436_v0 }
  0xb0   :  { %289 = vst.msk [vmem:[%s638_s4 + $0x4] sm:$0xf] %vm287_vm0, %v280_v1 }
  0xb1   :  { %v276_v10 = vadd.f32 %v431_v4, %v248_v6  ;;  %v241_v11 = vadd.f32 %v240_v8, %v212_v7 }
  0xb3   :  { %v284_v13 = vpack.c.bf16 %v276_v10, %v276_v10  ;;  %v273_v14 = vadd.f32 %v426_v9, %v241_v11 }
  0xb4   :  { %v221_v15 = vpop.f32.mrf.mxu2 }
  0xb5   :  { %v281_v16 = vpack.c.bf16 %v273_v14, %v273_v14  ;;  %v222_v17 = vadd.f32 %v580_v40, %v221_v15  ;;  %v250_v18 = vpop.f32.mrf.mxu3 }
  0xb6   :  { %v213_v20 = vpop.f32.mrf.mxu0 }
  0xb7   :  { %v438_v12 = vld [vmem:[%s637_s3 + $0x18] sm:$0xff]   ;;  %v251_v21 = vadd.f32 %v250_v18, %v222_v17  ;;  %v214_v22 = vadd.f32 %v580_v40, %v213_v20  ;;  %v242_v24 = vpop.f32.mrf.mxu1 }
  0xb8   :  { %293 = vst.msk [vmem:[%s638_s4 + $0x14] sm:$0xf] %vm287_vm0, %v284_v13  ;;  %v434_v19 = vunpack.c.l.bf16 %v438_v12  ;;  %v435_v32 = vunpack.c.h.bf16 %v438_v12 }
  0xb9   :  { %290 = vst.msk [vmem:[%s638_s4 + $0x8] sm:$0xf] %vm287_vm0, %v281_v16  ;;  %v243_v26 = vadd.f32 %v242_v24, %v214_v22 }
  0xba   :  { %v277_v25 = vadd.f32 %v434_v19, %v251_v21 }
  0xbb   :  { %v274_v28 = vadd.f32 %v427_v23, %v243_v26 }
  0xbc   :  { %v285_v27 = vpack.c.bf16 %v277_v25, %v277_v25  ;;  %v223_v29 = vpop.f32.mrf.mxu2 }
  0xbd   :  { %v282_v30 = vpack.c.bf16 %v274_v28, %v274_v28  ;;  %v224_v31 = vadd.f32 %v580_v40, %v223_v29  ;;  %v252_v33 = vpop.f32.mrf.mxu3 }
  0xbe   :  { %294 = vst.msk [vmem:[%s638_s4 + $0x18] sm:$0xf] %vm287_vm0, %v285_v27 }
  0xbf   :  { %291 = vst.msk [vmem:[%s638_s4 + $0xc] sm:$0xf] %vm287_vm0, %v282_v30  ;;  %v253_v34 = vadd.f32 %v252_v33, %v224_v31 }
  0xc1   :  { %v278_v35 = vadd.f32 %v435_v32, %v253_v34 }
  0xc3   :  { %v286_v36 = vpack.c.bf16 %v278_v35, %v278_v35 }
  0xc5   :  { %295 = vst.msk [vmem:[%s638_s4 + $0x1c] sm:$0xf] %vm287_vm0, %v286_v36 }

// kernel: sam_encoder_nuke_forward.17
= control target key start
LH: loop header
LB: loop body
LE: loop exit
PB: predicated region body
PF: predicated region fallthrough
CT: control target
= control target key end

     0   :  { %vm109_vm0 = vcmask 130048   ;;  %s2855_s24 = smov 112   ;;  %s2856_s15 = smov 96   ;;  %vm36_vm1 = vcmask 523264   ;;  %vm19_vm2 = vcmask 31744   ;;  %vm340_vm3 = vcmask 7168   ;;  %s4113_s1 = inlined_call_operand.vmem [shape: bf16[64,64], index: 1, kind: input, shape index: {}]   ;;  %s4114_s0 = inlined_call_operand.vmem [shape: bf16[64,64], index: 0, kind: input, shape index: {}]   ;;  %s4115_s2 = inlined_call_operand.vmem [shape: bf16[64,64], index: 2, kind: input, shape index: {}]   ;;  %s4116_s3 = inlined_call_operand.vmem [shape: bf16[64,64], index: 3, kind: output, shape index: {}]  }
   0x1   :  { %v2549_v0 = vld [vmem:[%s4113_s1 + $0x18] sm:$0xff]  ;;  %v2646_v1 = vld [vmem:[%s4114_s0 + $0x10] sm:$0xff]   ;;  %v2645_v2 = vld [vmem:[%s4114_s0 + $0x8] sm:$0xff]   ;;  %s2857_s27 = smov 80   ;;  %vm811_vm4 = vcmask 15368   ;;  %vm1323_vm5 = vcmask 23568  }
   0x2   :  { %v2604_v3 = vunpack.c.l.bf16 %v2646_v1  ;;  %v2605_v4 = vunpack.c.h.bf16 %v2646_v1  ;;  %v2600_v5 = vunpack.c.l.bf16 %v2645_v2  ;;  %v2601_v6 = vunpack.c.h.bf16 %v2645_v2  ;;  %v2595_v7 = vld [vmem:[%s4114_s0] sm:$0xff]   ;;  %v2647_v11 = vld [vmem:[%s4114_s0 + $0x18] sm:$0xff]   ;;  %v2548_v18 = vld [vmem:[%s4113_s1 + $0x10] sm:$0xff] }
   0x3   :  { %v132_v8 = vsel %vm109_vm0, %v2549_v0, 0  ;;  %v2596_v9 = vunpack.c.l.bf16 %v2595_v7  ;;  %v2597_v10 = vunpack.c.h.bf16 %v2595_v7  ;;  %v2608_v19 = vunpack.c.l.bf16 %v2647_v11  ;;  %v2555_v27 = vld [vmem:[%s4113_s1 + $0x8] sm:$0xff]  ;;  %v2554_v28 = vld [vmem:[%s4113_s1] sm:$0xff]  ;;  %v2557_v33 = vld [vmem:[%s4113_s1 + $0x18] sm:$0xff] }
   0x4   :  { %138 = vmatpush.bf16.xpose.msra.mxu0 %v132_v8  ;;  %v518_v12 = vmul.f32 0.25, %v2604_v3  ;;  %v519_v13 = vmul.f32 0.25, %v2605_v4  ;;  %v516_v14 = vmul.f32 0.25, %v2600_v5  ;;  %v517_v15 = vmul.f32 0.25, %v2601_v6  ;;  %v2547_v30 = vld [vmem:[%s4113_s1 + $0x8] sm:$0xff]  ;;  %v2556_v34 = vld [vmem:[%s4113_s1 + $0x10] sm:$0xff] }
   0x5   :  { %v514_v16 = vmul.f32 0.25, %v2596_v9  ;;  %v515_v17 = vmul.f32 0.25, %v2597_v10  ;;  %v2609_v22 = vunpack.c.h.bf16 %v2647_v11  ;;  %v129_v24 = vsel %vm109_vm0, %v2548_v18, 0  ;;  %v2559_v32 = vld [vmem:[%s4115_s2 + $0x8] sm:$0xff]  ;;  %v2546_v35 = vld [vmem:[%s4113_s1] sm:$0xff]  ;;  %v2560_v37 = vld [vmem:[%s4115_s2 + $0x10] sm:$0xff] }
   0x6   :  { %v2906_v20 = vpack.c.bf16 %v519_v13, %v518_v12  ;;  %v2908_v21 = vpack.c.bf16 %v517_v15, %v516_v14  ;;  %v520_v25 = vmul.f32 0.25, %v2608_v19  ;;  %v126_v31 = vsel %vm109_vm0, %v2547_v30, 0  ;;  %v2558_v38 = vld [vmem:[%s4115_s2] sm:$0xff]  ;;  %v2561_v40 = vld [vmem:[%s4115_s2 + $0x18] sm:$0xff]  ;;  %v2563_v42 = vld [vmem:[%s4113_s1 + $0x8] sm:$0xff] }
   0x7   :  { %v522_v23 = vpack.c.bf16 %v515_v17, %v514_v16  ;;  %v521_v26 = vmul.f32 0.25, %v2609_v22  ;;  %v123_v36 = vsel %vm109_vm0, %v2546_v35, 0  ;;  %v2562_v39 = vld [vmem:[%s4113_s1] sm:$0xff]  ;;  %v2565_v41 = vld [vmem:[%s4113_s1 + $0x18] sm:$0xff]  ;;  %v2572_v43 = vld [vmem:[%s4113_s1 + $0x10] sm:$0xff]  ;;  %vm1835_vm6 = vcmask 31768  }
   0x8   :  { %550 = vrot.lane.b32.xlu0 %v2906_v20, %s2855_s24  ;;  %548 = vrot.lane.b32.xlu1 %v2908_v21, %s2855_s24  ;;  %v2571_v44 = vld [vmem:[%s4113_s1 + $0x8] sm:$0xff]  ;;  %v2564_v45 = vld [vmem:[%s4113_s1 + $0x10] sm:$0xff]  ;;  %vm993_vm7 = vcmask 261248   ;;  %vm1505_vm8 = vcmask 392448   ;;  %vm2017_vm9 = vcmask 523648   ;;  %vm2373_vm10 = vcmask 519168  }
   0x9   :  { %546 = vrot.lane.b32.xlu2 %v522_v23, %s2855_s24  ;;  %v525_v29 = vpack.c.bf16 %v521_v26, %v520_v25  ;;  %v2573_v46 = vld [vmem:[%s4113_s1 + $0x18] sm:$0xff]  ;;  %v2566_v47 = vld [vmem:[%s4115_s2] sm:$0xff]  ;;  %v2568_v49 = vld [vmem:[%s4115_s2 + $0x10] sm:$0xff] }
   0xa   :  { %v2570_v48 = vld [vmem:[%s4113_s1] sm:$0xff]  ;;  %v2567_v51 = vld [vmem:[%s4115_s2 + $0x8] sm:$0xff]  ;;  %v2569_v53 = vld [vmem:[%s4115_s2 + $0x18] sm:$0xff] }
   0xb   :  { %v2553_v55 = vld [vmem:[%s4115_s2 + $0x18] sm:$0xff]  ;;  %v2552_v58 = vld [vmem:[%s4115_s2 + $0x10] sm:$0xff]  ;;  %v2551_v60 = vld [vmem:[%s4115_s2 + $0x8] sm:$0xff] }
   0xc   :  { %139 = vmatpush.bf16.xpose.msra.mxu0 %v129_v24  ;;  %449 = vmatpush.bf16.msra.mxu1 %v2553_v55  ;;  %v2550_v63 = vld [vmem:[%s4115_s2] sm:$0xff] }
  0x10   :  { %576 = vrot.lane.b32.xlu0 %v2555_v27, %s2855_s24  ;;  %574 = vrot.lane.b32.xlu1 %v2554_v28, %s2855_s24 }
  0x11   :  { %552 = vrot.lane.b32.xlu2 %v525_v29, %s2855_s24  ;;  %450 = vmatpush.bf16.msra.mxu1 %v2552_v58 }
  0x14   :  { %140 = vmatpush.bf16.xpose.msra.mxu0 %v126_v31 }
  0x15   :  { %451 = vmatpush.bf16.msra.mxu1 %v2551_v60 }
  0x18   :  { %902 = vrot.lane.b32.xlu0 %v2559_v32, %s2855_s24  ;;  %580 = vrot.lane.b32.xlu1 %v2557_v33, %s2855_s24 }
  0x19   :  { %578 = vrot.lane.b32.xlu2 %v2556_v34, %s2855_s24  ;;  %452 = vmatpush.bf16.msra.mxu1 %v2550_v63 }
  0x1c   :  { %141 = vmatpush.bf16.xpose.msra.mxu0 %v123_v36 }
  0x20   :  { %1060 = vrot.lane.b32.xlu0 %v2908_v21, %s2856_s15  ;;  %904 = vrot.lane.b32.xlu1 %v2560_v37, %s2855_s24  ;;  %v2858_v37 = vmov -inf  }
  0x21   :  { %900 = vrot.lane.b32.xlu2 %v2558_v38, %s2855_s24  ;;  %20 = vst.msk [vmem:[#allocation2] sm:$0xff] %vm19_vm2, %v2858_v37 }
  0x22   :  { %21 = vst.msk [vmem:[#allocation2 + $0x8] sm:$0xff] %vm19_vm2, %v2858_v37 }
  0x23   :  { %2402 = vmatmul.msk.bf16.vlgmr.msra.gmra.mxu0 %vm109_vm0, %v522_v23  ;;  %22 = vst.msk [vmem:[#allocation2 + $0x10] sm:$0xff] %vm19_vm2, %v2858_v37 }
  0x24   :  { %23 = vst.msk [vmem:[#allocation2 + $0x18] sm:$0xff] %vm19_vm2, %v2858_v37 }
  0x25   :  { %24 = vst.msk [vmem:[#allocation2 + $0x20] sm:$0xff] %vm19_vm2, %v2858_v37 }
  0x26   :  { %25 = vst.msk [vmem:[#allocation2 + $0x28] sm:$0xff] %vm19_vm2, %v2858_v37 }
  0x27   :  { %26 = vst.msk [vmem:[#allocation2 + $0x30] sm:$0xff] %vm19_vm2, %v2858_v37 }
  0x28   :  { %1086 = vrot.lane.b32.xlu0 %v2562_v39, %s2856_s15  ;;  %1062 = vrot.lane.b32.xlu1 %v2906_v20, %s2856_s15  ;;  %27 = vst.msk [vmem:[#allocation2 + $0x38] sm:$0xff] %vm19_vm2, %v2858_v37 }
  0x29   :  { %906 = vrot.lane.b32.xlu2 %v2561_v40, %s2855_s24  ;;  %s2862_s24 = smov 16  }
  0x2f   :  { %v3176_v37 = vld [vmem:[#allocation2 + $0x38] sm:$0xff] }
  0x30   :  { %1092 = vrot.lane.b32.xlu0 %v2565_v41, %s2856_s15  ;;  %1088 = vrot.lane.b32.xlu1 %v2563_v42, %s2856_s15 }
  0x31   :  { %1058 = vrot.lane.b32.xlu2 %v522_v23, %s2856_s15 }
  0x33   :  { %2403 = vmatmul.msk.bf16.gmra.mxu0 %vm109_vm0, %v2908_v21 }
  0x38   :  { %1602 = vrot.lane.b32.xlu0 %v2572_v43, %s2857_s27  ;;  %1600 = vrot.lane.b32.xlu1 %v2571_v44, %s2857_s27 }
  0x39   :  { %1064 = vrot.lane.b32.xlu2 %v525_v29, %s2856_s15 }
  0x40   :  { %1570 = vrot.lane.b32.xlu0 %v522_v23, %s2857_s27  ;;  %1576 = vrot.lane.b32.xlu1 %v525_v29, %s2857_s27 }
  0x41   :  { %1090 = vrot.lane.b32.xlu2 %v2564_v45, %s2856_s15 }
  0x43   :  { %2404 = vmatmul.msk.bf16.gmra.mxu0 %vm109_vm0, %v2906_v20 }
  0x48   :  { %1412 = vrot.lane.b32.xlu0 %v2566_v47, %s2856_s15 }
  0x49   :  { %1604 = vrot.lane.b32.xlu2 %v2573_v46, %s2857_s27 }
  0x50   :  { %1416 = vrot.lane.b32.xlu0 %v2568_v49, %s2856_s15 }
  0x51   :  { %1598 = vrot.lane.b32.xlu2 %v2570_v48, %s2857_s27  ;;  %v2859_v48 = vmov 0  }
  0x52   :  { %2666 = vset.pattern.permute.xlu2 %v2859_v48  ;;  %2667 = vset.pattern.permute.xlu0 %v2859_v48 }
  0x53   :  { %2405 = vmatmul.msk.bf16.gmra.mxu0 %vm109_vm0, %v525_v29  ;;  %2668 = vset.pattern.permute.xlu1 %v2859_v48 }
  0x59   :  { %1572 = vrot.lane.b32.xlu2 %v2908_v21, %s2857_s27 }
  0x61   :  { %1574 = vrot.lane.b32.xlu2 %v2906_v20, %s2857_s27 }
  0x63   :  { %v547_v50 = vpop.permute.xlu2 %546 }
  0x69   :  { %1414 = vrot.lane.b32.xlu2 %v2567_v51, %s2856_s15 }
  0x6b   :  { %v3019_v52 = vpop.permute.xlu2 %552 }
  0x71   :  { %1418 = vrot.lane.b32.xlu2 %v2569_v53, %s2856_s15 }
  0x73   :  { %v579_v54 = vpop.permute.xlu2 %578 }
  0x74   :  { %v601_v8 = vsel %vm109_vm0, %v579_v54, 0  ;;  %v163_v54 = vld [vmem:[#allocation2] sm:$0xff] }
  0x7a   :  { %v3028_v56 = vpop.permute.xlu0 %550  ;;  %v549_v57 = vpop.permute.xlu1 %548 }
  0x7b   :  { %v901_v59 = vpop.permute.xlu2 %900 }
  0x82   :  { %v577_v61 = vpop.permute.xlu0 %576  ;;  %v575_v62 = vpop.permute.xlu1 %574 }
  0x83   :  { %v907_v0 = vpop.permute.xlu2 %906  ;;  %v598_v11 = vsel %vm109_vm0, %v577_v61, 0  ;;  %v595_v17 = vsel %vm109_vm0, %v575_v62, 0 }
  0x84   :  { %928 = vmatpush.bf16.msra.mxu3 %v907_v0 }
  0x8a   :  { %v903_v1 = vpop.permute.xlu0 %902  ;;  %v581_v2 = vpop.permute.xlu1 %580 }
  0x8b   :  { %v3039_v3 = vpop.permute.xlu2 %1058  ;;  %v604_v4 = vsel %vm109_vm0, %v581_v2, 0 }
  0x8c   :  { %610 = vmatpush.bf16.xpose.msra.mxu2 %v604_v4 }
  0x92   :  { %v3042_v5 = vpop.permute.xlu0 %1060  ;;  %v905_v6 = vpop.permute.xlu1 %904 }
  0x93   :  { %v3044_v7 = vpop.permute.xlu2 %1064  ;;  %929 = vmatpush.bf16.msra.mxu3 %v905_v6 }
  0x94   :  { %611 = vmatpush.bf16.xpose.msra.mxu2 %v601_v8 }
  0x97   :  { %930 = vmatpush.bf16.msra.mxu3 %v903_v1  ;;  %v3134_v1 = vld [vmem:[#allocation2 + $0x20] sm:$0xff] }
  0x9a   :  { %v1087_v9 = vpop.permute.xlu0 %1086  ;;  %v3048_v12 = vpop.permute.xlu1 %1062 }
  0x9b   :  { %v1091_v10 = vpop.permute.xlu2 %1090  ;;  %931 = vmatpush.bf16.msra.mxu3 %v901_v59  ;;  %v1107_v33 = vsel %vm109_vm0, %v1087_v9, 0  ;;  %v164_v59 = vld [vmem:[#allocation2 + $0x8] sm:$0xff] }
  0x9c   :  { %612 = vmatpush.bf16.xpose.msra.mxu2 %v598_v11  ;;  %v1113_v24 = vsel %vm109_vm0, %v1091_v10, 0  ;;  %v165_v11 = vld [vmem:[#allocation2 + $0x10] sm:$0xff] }
  0xa0   :  { %v3050_v13 = vpop.f32.mrf.mxu0 }
  0xa1   :  { %v172_v14 = vsel %vm36_vm1, %v3050_v13, -inf }
  0xa2   :  { %v1093_v15 = vpop.permute.xlu0 %1092  ;;  %173 = vmax.xlane.f32.xlu0 %v172_v14  ;;  %v1089_v20 = vpop.permute.xlu1 %1088 }
  0xa3   :  { %v1605_v16 = vpop.permute.xlu2 %1604  ;;  %v1116_v18 = vsel %vm109_vm0, %v1093_v15, 0  ;;  %v1110_v29 = vsel %vm109_vm0, %v1089_v20, 0 }
  0xa4   :  { %613 = vmatpush.bf16.xpose.msra.mxu2 %v595_v17  ;;  %1122 = vmatpush.bf16.xpose.msrb.mxu1 %v1116_v18  ;;  %v1628_v19 = vsel %vm109_vm0, %v1605_v16, 0  ;;  %v166_v17 = vld [vmem:[#allocation2 + $0x18] sm:$0xff] }
  0xa5   :  { %1634 = vmatpush.bf16.xpose.msrb.mxu0 %v1628_v19 }
  0xa8   :  { %v3057_v21 = vpop.f32.mrf.mxu0 }
  0xa9   :  { %v175_v22 = vsel %vm36_vm1, %v3057_v21, -inf }
  0xaa   :  { %v1603_v23 = vpop.permute.xlu0 %1602  ;;  %176 = vmax.xlane.f32.xlu0 %v175_v22  ;;  %v1601_v27 = vpop.permute.xlu1 %1600 }
  0xab   :  { %2442 = vmatmul.msk.bf16.vlgmr.msra.gmra.mxu2 %vm109_vm0, %v547_v50  ;;  %v1625_v25 = vsel %vm109_vm0, %v1603_v23, 0  ;;  %v1599_v26 = vpop.permute.xlu2 %1598  ;;  %v1622_v28 = vsel %vm109_vm0, %v1601_v27, 0  ;;  %v2860_v50 = vmov 0.0   ;;  %v3154_v23 = vld [vmem:[#allocation2 + $0x28] sm:$0xff] }
  0xac   :  { %1123 = vmatpush.bf16.xpose.msrb.mxu1 %v1113_v24  ;;  %v1619_v31 = vsel %vm109_vm0, %v1599_v26, 0  ;;  %38 = vst.msk [vmem:[#allocation4 + $0x8] sm:$0xff] %vm36_vm1, %v2860_v50 }
  0xad   :  { %1635 = vmatpush.bf16.xpose.msrb.mxu0 %v1625_v25  ;;  %28 = vst.msk [vmem:[#allocation3] sm:$0xff] %vm19_vm2, %v2860_v50 }
  0xae   :  { %29 = vst.msk [vmem:[#allocation3 + $0x8] sm:$0xff] %vm19_vm2, %v2860_v50 }
  0xaf   :  { %30 = vst.msk [vmem:[#allocation3 + $0x10] sm:$0xff] %vm19_vm2, %v2860_v50 }
  0xb0   :  { %v3069_v34 = vpop.f32.mrf.mxu0  ;;  %31 = vst.msk [vmem:[#allocation3 + $0x18] sm:$0xff] %vm19_vm2, %v2860_v50 }
  0xb1   :  { %v178_v36 = vsel %vm36_vm1, %v3069_v34, -inf  ;;  %32 = vst.msk [vmem:[#allocation3 + $0x20] sm:$0xff] %vm19_vm2, %v2860_v50 }
  0xb2   :  { %v1571_v32 = vpop.permute.xlu0 %1570  ;;  %179 = vmax.xlane.f32.xlu1 %v178_v36  ;;  %33 = vst.msk [vmem:[#allocation3 + $0x28] sm:$0xff] %vm19_vm2, %v2860_v50 }
  0xb3   :  { %v1573_v30 = vpop.permute.xlu2 %1572  ;;  %34 = vst.msk [vmem:[#allocation3 + $0x30] sm:$0xff] %vm19_vm2, %v2860_v50 }
  0xb4   :  { %1124 = vmatpush.bf16.xpose.msrb.mxu1 %v1110_v29  ;;  %35 = vst.msk [vmem:[#allocation3 + $0x38] sm:$0xff] %vm19_vm2, %v2860_v50 }
  0xb5   :  { %1636 = vmatpush.bf16.xpose.msrb.mxu0 %v1622_v28  ;;  %37 = vst.msk [vmem:[#allocation4] sm:$0xff] %vm36_vm1, %v2860_v50 }
  0xb6   :  { %39 = vst.msk [vmem:[#allocation4 + $0x10] sm:$0xff] %vm36_vm1, %v2860_v50 }
  0xb7   :  { %40 = vst.msk [vmem:[#allocation4 + $0x18] sm:$0xff] %vm36_vm1, %v2860_v50 }
  0xb8   :  { %v3080_v39 = vpop.f32.mrf.mxu0  ;;  %41 = vst.msk [vmem:[#allocation4 + $0x20] sm:$0xff] %vm36_vm1, %v2860_v50 }
  0xb9   :  { %v181_v41 = vsel %vm36_vm1, %v3080_v39, -inf  ;;  %42 = vst.msk [vmem:[#allocation4 + $0x28] sm:$0xff] %vm36_vm1, %v2860_v50 }
  0xba   :  { %v1413_v38 = vpop.permute.xlu0 %1412  ;;  %182 = vmax.xlane.f32.xlu1 %v181_v41  ;;  %43 = vst.msk [vmem:[#allocation4 + $0x30] sm:$0xff] %vm36_vm1, %v2860_v50 }
  0xbb   :  { %2443 = vmatmul.msk.bf16.gmra.mxu2 %vm109_vm0, %v549_v57  ;;  %v1575_v35 = vpop.permute.xlu2 %1574  ;;  %v1577_v57 = vpop.permute.xlu1 %1576  ;;  %44 = vst.msk [vmem:[#allocation4 + $0x38] sm:$0xff] %vm36_vm1, %v2860_v50 }
  0xbc   :  { %1125 = vmatpush.bf16.xpose.msrb.mxu1 %v1107_v33  ;;  %v3172_v33 = vld [vmem:[#allocation2 + $0x30] sm:$0xff] }
  0xbd   :  { %1637 = vmatpush.bf16.xpose.msrb.mxu0 %v1619_v31 }
  0xc0   :  { %v3088_v42 = vpop.f32.mrf.mxu0 }
  0xc1   :  { %v184_v44 = vsel %vm36_vm1, %v3088_v42, -inf }
  0xc2   :  { %185 = vmax.xlane.f32.xlu2 %v184_v44  ;;  %v1417_v45 = vpop.permute.xlu0 %1416 }
  0xc3   :  { %v1415_v40 = vpop.permute.xlu2 %1414 }
  0xc4   :  { %2522 = vmatmul.msk.bf16.vlgmr.msrb.gmra.mxu0 %vm109_vm0, %v1571_v32 }
  0xc8   :  { %v3092_v46 = vpop.f32.mrf.mxu0 }
  0xc9   :  { %v187_v47 = vsel %vm36_vm1, %v3092_v46, -inf }
  0xca   :  { %188 = vmax.xlane.f32.xlu2 %v187_v47 }
  0xcb   :  { %2444 = vmatmul.msk.bf16.gmra.mxu2 %vm109_vm0, %v3028_v56  ;;  %v1419_v43 = vpop.permute.xlu2 %1418 }
  0xcc   :  { %1440 = vmatpush.bf16.msrb.mxu3 %v1419_v43 }
  0xd0   :  { %1441 = vmatpush.bf16.msrb.mxu3 %v1417_v45  ;;  %v3103_v49 = vpop.f32.mrf.mxu0 }
  0xd4   :  { %2523 = vmatmul.msk.bf16.gmra.mxu0 %vm109_vm0, %v1573_v30  ;;  %1442 = vmatpush.bf16.msrb.mxu3 %v1415_v40 }
  0xd8   :  { %1443 = vmatpush.bf16.msrb.mxu3 %v1413_v38  ;;  %v3109_v51 = vpop.f32.mrf.mxu0 }
  0xd9   :  { %v193_v53 = vsel %vm36_vm1, %v3109_v51, -inf }
  0xda   :  { %194 = vmax.xlane.f32.xlu1 %v193_v53 }
  0xdb   :  { %2445 = vmatmul.msk.bf16.gmra.mxu2 %vm109_vm0, %v3019_v52  ;;  %v190_v52 = vsel %vm36_vm1, %v3103_v49, -inf }
  0xdc   :  { %191 = vmax.xlane.f32.xlu0 %v190_v52 }
  0xe4   :  { %2524 = vmatmul.msk.bf16.gmra.mxu0 %vm109_vm0, %v1575_v35 }
  0xf4   :  { %2525 = vmatmul.msk.bf16.gmra.mxu0 %vm109_vm0, %v1577_v57 }
 0x115   :  { %v174_v55 = vpop.xlane.xlu0 %173 }
 0x116   :  { %v196_v56 = vmax.f32 %v163_v54, %v174_v55 }
 0x118   :  { %v204_v58 = vsub.f32 %v163_v54, %v196_v56  ;;  %490 = vst.msk [vmem:[#allocation2] sm:$0xff] %vm340_vm3, %v196_v56  ;;  %230 = vperm.xlu2 %2666, %v196_v56  }
 0x11a   :  { %v212_v29 = vmul.f32 1.442695, %v204_v58 }
 0x11c   :  { %2711 = vpow2.f32 %v212_v29 }
 0x11d   :  { %v177_v60 = vpop.xlane.xlu0 %176 }
 0x11e   :  { %v197_v61 = vmax.f32 %v164_v59, %v177_v60 }
 0x120   :  { %v205_v62 = vsub.f32 %v164_v59, %v197_v61  ;;  %491 = vst.msk [vmem:[#allocation2 + $0x8] sm:$0xff] %vm340_vm3, %v197_v61 }
 0x122   :  { %v214_v30 = vmul.f32 1.442695, %v205_v62  ;;  %v3166_v31 = vpop.eup %2711 }
 0x124   :  { %2713 = vpow2.f32 %v214_v30 }
 0x125   :  { %v180_v9 = vpop.xlane.xlu1 %179 }
 0x126   :  { %v198_v14 = vmax.f32 %v165_v11, %v180_v9 }
 0x127   :  { %v3205_v57 = vld [vmem:[#allocation2 + $0x8] sm:$0xff] }
 0x128   :  { %v206_v16 = vsub.f32 %v165_v11, %v198_v14  ;;  %492 = vst.msk [vmem:[#allocation2 + $0x10] sm:$0xff] %vm340_vm3, %v198_v14 }
 0x12a   :  { %v3169_v32 = vpop.eup %2713  ;;  %v216_v45 = vmul.f32 1.442695, %v206_v16 }
 0x12c   :  { %2715 = vpow2.f32 %v216_v45 }
 0x12d   :  { %v183_v18 = vpop.xlane.xlu1 %182 }
 0x12e   :  { %v3130_v63 = vpop.f32.mrf.mxu2  ;;  %v199_v22 = vmax.f32 %v166_v17, %v183_v18 }
 0x12f   :  { %v643_v19 = vsel %vm36_vm1, %v3130_v63, -inf }
 0x130   :  { %v207_v26 = vsub.f32 %v166_v17, %v199_v22  ;;  %493 = vst.msk [vmem:[#allocation2 + $0x18] sm:$0xff] %vm340_vm3, %v199_v22 }
 0x132   :  { %v3198_v53 = vpop.eup %2715  ;;  %v218_v54 = vmul.f32 1.442695, %v207_v26 }
 0x134   :  { %2717 = vpow2.f32 %v218_v54 }
 0x135   :  { %v186_v4 = vpop.xlane.xlu2 %185 }
 0x136   :  { %v3132_v0 = vpop.f32.mrf.mxu2  ;;  %v3141_v8 = vmax.f32 %v3134_v1, %v186_v4 }
 0x137   :  { %v646_v2 = vsel %vm36_vm1, %v3132_v0, -inf }
 0x138   :  { %494 = vst.msk [vmem:[#allocation2 + $0x20] sm:$0xff] %vm340_vm3, %v3141_v8  ;;  %v208_v26 = vsub.f32 %v3134_v1, %v3141_v8 }
 0x13a   :  { %v3201_v56 = vpop.eup %2717  ;;  %v220_v29 = vmul.f32 1.442695, %v208_v26  ;;  %v637_v26 = vld [vmem:[#allocation2 + $0x10] sm:$0xff] }
 0x13d   :  { %v189_v24 = vpop.xlane.xlu2 %188 }
 0x13e   :  { %v3157_v25 = vmax.f32 %v3154_v23, %v189_v24  ;;  %v3190_v44 = vpop.f32.mrf.mxu2 }
 0x13f   :  { %v649_v47 = vsel %vm36_vm1, %v3190_v44, -inf }
 0x140   :  { %495 = vst.msk [vmem:[#allocation2 + $0x28] sm:$0xff] %vm340_vm3, %v3157_v25 }
 0x141   :  { %v3138_v6 = vpop.f32.mrf.mxu0  ;;  %647 = vmax.xlane.f32.xlu2 %v646_v2 }
 0x142   :  { %v1667_v10 = vsel %vm36_vm1, %v3138_v6, -inf }
 0x143   :  { %1668 = vmax.xlane.f32.xlu0 %v1667_v10 }
 0x146   :  { %v3222_v4 = vpop.f32.mrf.mxu2 }
 0x147   :  { %v652_v9 = vsel %vm36_vm1, %v3222_v4, -inf }
 0x149   :  { %v3147_v15 = vpop.f32.mrf.mxu0 }
 0x14a   :  { %v1670_v20 = vsel %vm36_vm1, %v3147_v15, -inf }
 0x14b   :  { %644 = vmax.xlane.f32.xlu0 %v643_v19  ;;  %1671 = vmax.xlane.f32.xlu1 %v1670_v20 }
 0x14d   :  { %v195_v38 = vpop.xlane.xlu1 %194 }
 0x14e   :  { %v3182_v41 = vmax.f32 %v3176_v37, %v195_v38  ;;  %v3238_v24 = vpop.f32.mrf.mxu2 }
 0x14f   :  { %v192_v36 = vpop.xlane.xlu0 %191 }
 0x150   :  { %v3179_v40 = vmax.f32 %v3172_v33, %v192_v36  ;;  %497 = vst.msk [vmem:[#allocation2 + $0x38] sm:$0xff] %vm340_vm3, %v3182_v41 }
 0x151   :  { %v3162_v27 = vpop.f32.mrf.mxu0 }
 0x152   :  { %v1673_v28 = vsel %vm36_vm1, %v3162_v27, -inf  ;;  %496 = vst.msk [vmem:[#allocation2 + $0x30] sm:$0xff] %vm340_vm3, %v3179_v40 }
 0x153   :  { %1674 = vmax.xlane.f32.xlu2 %v1673_v28 }
 0x159   :  { %v3174_v35 = vpop.f32.mrf.mxu0 }
 0x15a   :  { %v1676_v43 = vsel %vm36_vm1, %v3174_v35, -inf }
 0x15f   :  { %235 = vperm.xlu0 %2667, %v197_v61   ;;  %v3215_v61 = vld [vmem:[#allocation2] sm:$0xff] }
 0x161   :  { %v3194_v50 = vpop.f32.mrf.mxu0 }
 0x162   :  { %v1679_v52 = vsel %vm36_vm1, %v3194_v50, -inf }
 0x164   :  { %359 = vperm.xlu1 %2668, %v3166_v31  }
 0x169   :  { %v3228_v11 = vpop.f32.mrf.mxu0 }
 0x16a   :  { %v1682_v17 = vsel %vm36_vm1, %v3228_v11, -inf }
 0x16b   :  { %364 = vperm.xlu2 %2666, %v3169_v32  }
 0x16c   :  { %240 = vperm.xlu1 %2668, %v198_v14  }
 0x172   :  { %v231_v55 = vpop.permute.xlu2 %230 }
 0x173   :  { %245 = vperm.xlu2 %2666, %v199_v22   ;;  %v268_v14 = vsub.f32 %v3050_v13, %v231_v55 }
 0x175   :  { %v276_v18 = vmul.f32 1.442695, %v268_v14 }
 0x177   :  { %2719 = vpow2.f32 %v276_v18 }
 0x17d   :  { %v3244_v30 = vpop.eup %2719 }
 0x189   :  { %1677 = vmax.xlane.f32.xlu0 %v1676_v43  ;;  %v3250_v43 = vpop.f32.mrf.mxu2 }
 0x196   :  { %650 = vmax.xlane.f32.xlu1 %v649_v47 }
 0x19c   :  { %1680 = vmax.xlane.f32.xlu2 %v1679_v52  ;;  %v658_v52 = vsel %vm36_vm1, %v3250_v43, -inf }
 0x19d   :  { %369 = vperm.xlu0 %2667, %v3198_v53  }
 0x1af   :  { %374 = vperm.xlu1 %2668, %v3201_v56  }
 0x1b4   :  { %250 = vperm.xlu2 %2666, %v3141_v8   ;;  %v648_v58 = vpop.xlane.xlu2 %647 }
 0x1b5   :  { %v3208_v59 = vmax.f32 %v3205_v57, %v648_v58 }
 0x1b6   :  { %v3210_v60 = vpop.xlane.xlu0 %1668 }
 0x1b7   :  { %1003 = vst.msk [vmem:[#allocation2 + $0x8] sm:$0xff] %vm811_vm4, %v3208_v59  ;;  %255 = vperm.xlu1 %2668, %v3157_v25  }
 0x1be   :  { %v645_v62 = vpop.xlane.xlu0 %644  ;;  %v3231_v16 = vpop.xlane.xlu1 %1671 }
 0x1bf   :  { %v3218_v2 = vmax.f32 %v3215_v61, %v645_v62 }
 0x1c1   :  { %1002 = vst.msk [vmem:[#allocation2] sm:$0xff] %vm811_vm4, %v3218_v2 }
 0x1c6   :  { %v3226_v10 = vpop.xlane.xlu2 %1674 }
 0x1c7   :  { %653 = vmax.xlane.f32.xlu0 %v652_v9 }
 0x1ce   :  { %v3235_v19 = vpop.permute.xlu2 %364 }
 0x1cf   :  { %1683 = vmax.xlane.f32.xlu0 %v1682_v17  ;;  %v210_v17 = vsub.f32 %v3172_v33, %v3179_v40 }
 0x1d1   :  { %v236_v20 = vpop.permute.xlu0 %235  ;;  %v224_v18 = vmul.f32 1.442695, %v210_v17 }
 0x1d2   :  { %v269_v22 = vsub.f32 %v3057_v21, %v236_v20  ;;  %v655_v21 = vsel %vm36_vm1, %v3238_v24, -inf }
 0x1d4   :  { %v278_v28 = vmul.f32 1.442695, %v269_v22 }
 0x1d6   :  { %2721 = vpow2.f32 %v278_v28  ;;  %v3242_v13 = vpop.permute.xlu1 %359  ;;  %v246_v36 = vpop.permute.xlu2 %245 }
 0x1d7   :  { %2723 = vpow2.f32 %v220_v29  ;;  %v271_v8 = vsub.f32 %v3080_v39, %v246_v36 }
 0x1d9   :  { %v282_v58 = vmul.f32 1.442695, %v271_v8 }
 0x1dc   :  { %v3246_v38 = vpop.eup %2721 }
 0x1dd   :  { %656 = vmax.xlane.f32.xlu2 %v655_v21  ;;  %v405_v1 = vpack.c.bf16 %v3246_v38, %v3244_v30  ;;  %v3259_v55 = vpop.eup %2723  ;;  %v211_v21 = vsub.f32 %v3176_v37, %v3182_v41  ;;  %v311_v17 = vsel %vm36_vm1, %v3246_v38, 0.0 }
 0x1de   :  { %v241_v45 = vpop.permute.xlu1 %240 }
 0x1df   :  { %v270_v47 = vsub.f32 %v3069_v34, %v241_v45  ;;  %2422 = vmatmul.msk.bf16.vlgmr.msra.gmra.mxu1 %vm36_vm1, %v405_v1  ;;  %v209_v34 = vsub.f32 %v3154_v23, %v3157_v25  ;;  %v675_v23 = vsub.f32 %v3215_v61, %v3218_v2  ;;  %v4117_v25 = vmov 1  }
 0x1e0   :  { %v226_v1 = vmul.f32 1.442695, %v211_v21 }
 0x1e1   :  { %v280_v54 = vmul.f32 1.442695, %v270_v47  ;;  %659 = vmax.xlane.f32.xlu1 %v658_v52  ;;  %v222_v14 = vmul.f32 1.442695, %v209_v34  ;;  %v683_v33 = vmul.f32 1.442695, %v675_v23 }
 0x1e3   :  { %379 = vperm.xlu0 %2667, %v3259_v55   ;;  %2725 = vpow2.f32 %v280_v54 }
 0x1e4   :  { %2727 = vpow2.f32 %v282_v58 }
 0x1e5   :  { %2729 = vpow2.f32 %v222_v14 }
 0x1e6   :  { %2731 = vpow2.f32 %v224_v18 }
 0x1e7   :  { %2733 = vpow2.f32 %v683_v33 }
 0x1e8   :  { %2735 = vpow2.f32 %v226_v1 }
 0x1e9   :  { %v2726_v62 = vpop.eup %2725 }
 0x1ea   :  { %v3262_v9 = vpop.eup %2727  ;;  %v314_v21 = vsel %vm36_vm1, %v2726_v62, 0.0 }
 0x1eb   :  { %v406_v39 = vpack.c.bf16 %v3262_v9, %v2726_v62  ;;  %v3272_v20 = vpop.eup %2729  ;;  %v3329_v62 = vld [vmem:[#allocation2 + $0x28] sm:$0xff] }
 0x1ec   :  { %v3275_v22 = vpop.eup %2731 }
 0x1ed   :  { %v3288_v61 = vpop.eup %2733 }
 0x1ee   :  { %v3295_v45 = vpop.eup %2735 }
 0x1ef   :  { %2423 = vmatmul.msk.bf16.gmra.mxu1 %vm36_vm1, %v406_v39 }
 0x1f5   :  { %260 = vperm.xlu2 %2666, %v3179_v40   ;;  %v3281_v40 = vpop.f32.mrf.mxu2 }
 0x1f6   :  { %v661_v36 = vsel %vm36_vm1, %v3281_v40, -inf }
 0x1fa   :  { %265 = vperm.xlu1 %2668, %v3182_v41  }
 0x1fc   :  { %v3306_v39 = vpop.xlane.xlu0 %1677 }
 0x1fd   :  { %384 = vperm.xlu2 %2666, %v3272_v20   ;;  %v3300_v47 = vpop.f32.mrf.mxu2 }
 0x1fe   :  { %v664_v37 = vsel %vm36_vm1, %v3300_v47, -inf }
 0x202   :  { %389 = vperm.xlu1 %2668, %v3275_v22  }
 0x205   :  { %2671 = vset.pattern.permute.xlu2 %v4117_v25 }
 0x209   :  { %v651_v28 = vpop.xlane.xlu1 %650 }
 0x20a   :  { %v669_v29 = vmax.f32 %v637_v26, %v651_v28  ;;  %2669 = vset.pattern.permute.xlu1 %v4117_v25  ;;  %v638_v28 = vld [vmem:[#allocation2 + $0x18] sm:$0xff] }
 0x20b   :  { %701 = vperm.xlu1 %2669, %v3218_v2  }
 0x20c   :  { %1004 = vst.msk [vmem:[#allocation2 + $0x10] sm:$0xff] %vm811_vm4, %v669_v29  ;;  %v677_v38 = vsub.f32 %v637_v26, %v669_v29 }
 0x20d   :  { %662 = vmax.xlane.f32.xlu0 %v661_v36 }
 0x20e   :  { %v687_v1 = vmul.f32 1.442695, %v677_v38 }
 0x20f   :  { %v3293_v8 = vpop.xlane.xlu2 %1680 }
 0x213   :  { %830 = vperm.xlu1 %2669, %v3288_v61  }
 0x217   :  { %v251_v52 = vpop.permute.xlu2 %250 }
 0x218   :  { %v272_v54 = vsub.f32 %v3088_v42, %v251_v52  ;;  %v370_v42 = vpop.permute.xlu0 %369  ;;  %v308_v52 = vsel %vm36_vm1, %v3244_v30, 0.0 }
 0x21a   :  { %v284_v41 = vmul.f32 1.442695, %v272_v54 }
 0x21c   :  { %2737 = vpow2.f32 %v284_v41 }
 0x221   :  { %394 = vperm.xlu0 %2667, %v3295_v45   ;;  %v3298_v2 = vpop.permute.xlu1 %374 }
 0x222   :  { %v3311_v18 = vpop.eup %2737 }
 0x226   :  { %665 = vmax.xlane.f32.xlu2 %v664_v37  ;;  %v639_v37 = vld [vmem:[#allocation2 + $0x20] sm:$0xff] }
 0x229   :  { %v256_v58 = vpop.permute.xlu1 %255  ;;  %2670 = vset.pattern.permute.xlu0 %v4117_v25 }
 0x22a   :  { %v273_v34 = vsub.f32 %v3092_v46, %v256_v58 }
 0x22c   :  { %v286_v14 = vmul.f32 1.442695, %v273_v34  ;;  %v676_v34 = vsub.f32 %v3205_v57, %v3208_v59 }
 0x22e   :  { %2739 = vpow2.f32 %v286_v14  ;;  %312 = vadd.xlane.f32.xlu2 %v311_v17  ;;  %v349_v14 = vld [vmem:[#allocation4] sm:$0xff] }
 0x22f   :  { %2741 = vpow2.f32 %v687_v1  ;;  %v397_v17 = vmul.f32 %v3242_v13, %v349_v14  ;;  %v350_v1 = vld [vmem:[#allocation4 + $0x8] sm:$0xff] }
 0x234   :  { %v3313_v23 = vpop.eup %2739 }
 0x235   :  { %v407_v33 = vpack.c.bf16 %v3313_v23, %v3311_v18  ;;  %v3322_v54 = vpop.eup %2741 }
 0x237   :  { %2424 = vmatmul.msk.bf16.gmra.mxu1 %vm36_vm1, %v407_v33 }
 0x23a   :  { %v654_v36 = vpop.xlane.xlu0 %653 }
 0x23b   :  { %v670_v46 = vmax.f32 %v638_v28, %v654_v36  ;;  %v685_v36 = vmul.f32 1.442695, %v676_v34 }
 0x23d   :  { %1005 = vst.msk [vmem:[#allocation2 + $0x18] sm:$0xff] %vm811_vm4, %v670_v46  ;;  %315 = vadd.xlane.f32.xlu1 %v314_v21 }
 0x246   :  { %711 = vperm.xlu2 %2671, %v669_v29  }
 0x24b   :  { %309 = vadd.xlane.f32.xlu0 %v308_v52  ;;  %v678_v52 = vsub.f32 %v638_v28, %v670_v46 }
 0x24d   :  { %v689_v57 = vmul.f32 1.442695, %v678_v52  ;;  %v3357_v52 = vpop.xlane.xlu0 %1683 }
 0x24e   :  { %840 = vperm.xlu2 %2671, %v3322_v54  }
 0x250   :  { %v657_v41 = vpop.xlane.xlu2 %656 }
 0x251   :  { %v3325_v58 = vmax.f32 %v639_v37, %v657_v41 }
 0x253   :  { %1006 = vst.msk [vmem:[#allocation2 + $0x20] sm:$0xff] %vm811_vm4, %v3325_v58  ;;  %v679_v30 = vsub.f32 %v639_v37, %v3325_v58  ;;  %v398_v37 = vmul.f32 %v3235_v19, %v350_v1  ;;  %v352_v1 = vld [vmem:[#allocation4 + $0x18] sm:$0xff] }
 0x254   :  { %v660_v26 = vpop.xlane.xlu1 %659 }
 0x255   :  { %v3332_v29 = vmax.f32 %v3329_v62, %v660_v26  ;;  %v691_v33 = vmul.f32 1.442695, %v679_v30 }
 0x256   :  { %716 = vperm.xlu1 %2669, %v670_v46  }
 0x257   :  { %1007 = vst.msk [vmem:[#allocation2 + $0x28] sm:$0xff] %vm811_vm4, %v3332_v29  ;;  %2743 = vpow2.f32 %v691_v33 }
 0x258   :  { %2745 = vpow2.f32 %v685_v36  ;;  %v261_v13 = vpop.permute.xlu2 %260 }
 0x259   :  { %2747 = vpow2.f32 %v689_v57  ;;  %v274_v28 = vsub.f32 %v3103_v49, %v261_v13  ;;  %v400_v49 = vmul.f32 %v3298_v2, %v352_v1  ;;  %v380_v13 = vpop.permute.xlu0 %379 }
 0x25b   :  { %v288_v19 = vmul.f32 1.442695, %v274_v28 }
 0x25c   :  { %v454_v21 = vpop.f32.mrf.mxu1 }
 0x25d   :  { %v474_v38 = vadd.f32 %v454_v21, %v397_v17  ;;  %v3344_v26 = vpop.eup %2743  ;;  %2749 = vpow2.f32 %v288_v19 }
 0x25e   :  { %726 = vperm.xlu1 %2669, %v3332_v29   ;;  %v3346_v34 = vpop.eup %2745 }
 0x25f   :  { %482 = vst.msk [vmem:[#allocation4] sm:$0xff] %vm109_vm0, %v474_v38  ;;  %706 = vperm.xlu0 %2670, %v3208_v59   ;;  %v351_v59 = vld [vmem:[#allocation4 + $0x10] sm:$0xff]  ;;  %v3353_v21 = vpop.eup %2747 }
 0x260   :  { %v399_v46 = vmul.f32 %v370_v42, %v351_v59  ;;  %v641_v59 = vld [vmem:[#allocation2 + $0x30] sm:$0xff]  ;;  %v385_v19 = vpop.permute.xlu2 %384 }
 0x263   :  { %v3360_v57 = vpop.eup %2749 }
 0x264   :  { %v456_v41 = vpop.f32.mrf.mxu1 }
 0x265   :  { %v475_v30 = vadd.f32 %v456_v41, %v398_v37 }
 0x266   :  { %850 = vperm.xlu1 %2669, %v3344_v26  }
 0x267   :  { %483 = vst.msk [vmem:[#allocation4 + $0x8] sm:$0xff] %vm109_vm0, %v475_v30  ;;  %835 = vperm.xlu0 %2670, %v3346_v34  }
 0x26c   :  { %v459_v14 = vpop.f32.mrf.mxu1  ;;  %v266_v17 = vpop.permute.xlu1 %265 }
 0x26d   :  { %v476_v33 = vadd.f32 %v459_v14, %v399_v46  ;;  %v275_v36 = vsub.f32 %v3109_v51, %v266_v17  ;;  %v317_v51 = vsel %vm36_vm1, %v3262_v9, 0.0  ;;  %v323_v9 = vsel %vm36_vm1, %v3313_v23, 0.0  ;;  %v293_v23 = vld [vmem:[#allocation3 + $0x8] sm:$0xff] }
 0x26e   :  { %v680_v46 = vsub.f32 %v3329_v62, %v3332_v29  ;;  %v301_v1 = vmul.f32 %v3169_v32, %v293_v23  ;;  %v294_v32 = vld [vmem:[#allocation3 + $0x10] sm:$0xff]  ;;  %v354_v23 = vld [vmem:[#allocation4 + $0x28] sm:$0xff] }
 0x26f   :  { %484 = vst.msk [vmem:[#allocation4 + $0x10] sm:$0xff] %vm109_vm0, %v476_v33  ;;  %v290_v38 = vmul.f32 1.442695, %v275_v36  ;;  %845 = vperm.xlu0 %2670, %v3353_v21   ;;  %v320_v33 = vsel %vm36_vm1, %v3311_v18, 0.0 }
 0x270   :  { %v693_v14 = vmul.f32 1.442695, %v680_v46 }
 0x271   :  { %2751 = vpow2.f32 %v290_v38 }
 0x272   :  { %2753 = vpow2.f32 %v693_v14 }
 0x274   :  { %v461_v42 = vpop.f32.mrf.mxu1  ;;  %v3378_v17 = vpop.permute.xlu1 %389 }
 0x275   :  { %v477_v37 = vadd.f32 %v461_v42, %v400_v49 }
 0x277   :  { %v3364_v41 = vpop.eup %2751  ;;  %485 = vst.msk [vmem:[#allocation4 + $0x18] sm:$0xff] %vm109_vm0, %v477_v37  ;;  %318 = vadd.xlane.f32.xlu2 %v317_v51 }
 0x278   :  { %v408_v30 = vpack.c.bf16 %v3364_v41, %v3360_v57  ;;  %v3385_v62 = vpop.eup %2753 }
 0x27a   :  { %2425 = vmatmul.msk.bf16.gmra.mxu1 %vm36_vm1, %v408_v30 }
 0x27d   :  { %v702_v29 = vpop.permute.xlu1 %701 }
 0x280   :  { %v663_v2 = vpop.xlane.xlu0 %662 }
 0x281   :  { %v673_v28 = vmax.f32 %v641_v59, %v663_v2  ;;  %v302_v2 = vmul.f32 %v3198_v53, %v294_v32  ;;  %v292_v53 = vld [vmem:[#allocation3] sm:$0xff] }
 0x283   :  { %1008 = vst.msk [vmem:[#allocation2 + $0x30] sm:$0xff] %vm811_vm4, %v673_v28  ;;  %v681_v38 = vsub.f32 %v641_v59, %v673_v28 }
 0x285   :  { %v695_v18 = vmul.f32 1.442695, %v681_v38  ;;  %v3393_v37 = vpop.permute.xlu1 %830 }
 0x287   :  { %2755 = vpow2.f32 %v695_v18 }
 0x28a   :  { %2482 = vmatmul.msk.bf16.vlgmr.msrb.gmra.mxu1 %vm109_vm0, %v3039_v3  ;;  %v642_v3 = vld [vmem:[#allocation2 + $0x38] sm:$0xff] }
 0x28d   :  { %v3398_v30 = vpop.eup %2755 }
 0x28f   :  { %721 = vperm.xlu2 %2671, %v3325_v58  }
 0x290   :  { %324 = vadd.xlane.f32.xlu1 %v323_v9 }
 0x297   :  { %731 = vperm.xlu2 %2671, %v673_v28   ;;  %v353_v28 = vld [vmem:[#allocation4 + $0x20] sm:$0xff] }
 0x298   :  { %v401_v14 = vmul.f32 %v380_v13, %v353_v28 }
 0x299   :  { %v666_v36 = vpop.xlane.xlu2 %665  ;;  %321 = vadd.xlane.f32.xlu0 %v320_v33 }
 0x29a   :  { %v674_v58 = vmax.f32 %v642_v3, %v666_v36  ;;  %2483 = vmatmul.msk.bf16.gmra.mxu1 %vm109_vm0, %v3042_v5  ;;  %v2576_v5 = vld [vmem:[%s4115_s2 + $0x10] sm:$0xff] }
 0x29c   :  { %1009 = vst.msk [vmem:[#allocation2 + $0x38] sm:$0xff] %vm811_vm4, %v674_v58  ;;  %v682_v51 = vsub.f32 %v642_v3, %v674_v58  ;;  %v3403_v3 = vpop.permute.xlu0 %394 }
 0x29e   :  { %v697_v59 = vmul.f32 1.442695, %v682_v51  ;;  %v739_v51 = vsub.f32 %v3130_v63, %v702_v29 }
 0x29f   :  { %855 = vperm.xlu2 %2671, %v3385_v62  }
 0x2a0   :  { %2757 = vpow2.f32 %v697_v59  ;;  %v747_v32 = vmul.f32 1.442695, %v739_v51 }
 0x2a1   :  { %v313_v49 = vpop.xlane.xlu2 %312 }
 0x2a2   :  { %v333_v42 = vadd.f32 %v313_v49, %v301_v1  ;;  %v300_v1 = vmul.f32 %v3166_v31, %v292_v53  ;;  %2759 = vpow2.f32 %v747_v32 }
 0x2a4   :  { %342 = vst.msk [vmem:[#allocation3 + $0x8] sm:$0xff] %vm340_vm3, %v333_v42  ;;  %v326_v42 = vsel %vm36_vm1, %v3360_v57, 0.0  ;;  %v329_v57 = vsel %vm36_vm1, %v3364_v41, 0.0 }
 0x2a9   :  { %1928 = vrot.lane.b32.xlu1 %v2576_v5, %s2857_s27 }
 0x2aa   :  { %2484 = vmatmul.msk.bf16.gmra.mxu1 %vm109_vm0, %v3048_v12  ;;  %v3406_v12 = vpop.eup %2757 }
 0x2ad   :  { %860 = vperm.xlu0 %2670, %v3398_v30  }
 0x2b0   :  { %v316_v9 = vpop.xlane.xlu1 %315 }
 0x2b1   :  { %v334_v46 = vadd.f32 %v316_v9, %v302_v2  ;;  %736 = vperm.xlu1 %2669, %v674_v58   ;;  %v402_v58 = vmul.f32 %v385_v19, %v354_v23 }
 0x2b3   :  { %343 = vst.msk [vmem:[#allocation3 + $0x10] sm:$0xff] %vm340_vm3, %v334_v46 }
 0x2b4   :  { %v464_v33 = vpop.f32.mrf.mxu1 }
 0x2b5   :  { %v478_v36 = vadd.f32 %v464_v33, %v401_v14  ;;  %v2760_v14 = vpop.eup %2759 }
 0x2b7   :  { %486 = vst.msk [vmem:[#allocation4 + $0x20] sm:$0xff] %vm109_vm0, %v478_v36 }
 0x2b9   :  { %865 = vperm.xlu1 %2669, %v3406_v12  }
 0x2ba   :  { %2485 = vmatmul.msk.bf16.gmra.mxu1 %vm109_vm0, %v3044_v7  ;;  %v712_v7 = vpop.permute.xlu2 %711 }
 0x2bb   :  { %v741_v19 = vsub.f32 %v3190_v44, %v712_v7  ;;  %v355_v7 = vld [vmem:[#allocation4 + $0x30] sm:$0xff] }
 0x2bc   :  { %v466_v38 = vpop.f32.mrf.mxu1 }
 0x2bd   :  { %v479_v13 = vadd.f32 %v466_v38, %v402_v58  ;;  %v751_v28 = vmul.f32 1.442695, %v741_v19  ;;  %v295_v38 = vld [vmem:[#allocation3 + $0x18] sm:$0xff] }
 0x2be   :  { %v310_v49 = vpop.xlane.xlu0 %309 }
 0x2bf   :  { %487 = vst.msk [vmem:[#allocation4 + $0x28] sm:$0xff] %vm109_vm0, %v479_v13  ;;  %v332_v18 = vadd.f32 %v310_v49, %v300_v1  ;;  %v303_v1 = vmul.f32 %v3201_v56, %v295_v38 }
 0x2c1   :  { %341 = vst.msk [vmem:[#allocation3] sm:$0xff] %vm340_vm3, %v332_v18 }
 0x2c2   :  { %v3429_v41 = vpop.permute.xlu2 %840 }
 0x2c8   :  { %327 = vadd.xlane.f32.xlu2 %v326_v42  ;;  %v717_v5 = vpop.permute.xlu1 %716 }
 0x2c9   :  { %v742_v9 = vsub.f32 %v3222_v4, %v717_v5  ;;  %v779_v4 = vsel %vm36_vm1, %v2760_v14, 0.0 }
 0x2cb   :  { %v753_v63 = vmul.f32 1.442695, %v742_v9  ;;  %v356_v9 = vld [vmem:[#allocation4 + $0x38] sm:$0xff] }
 0x2d0   :  { %v727_v46 = vpop.permute.xlu1 %726 }
 0x2d1   :  { %v707_v59 = vpop.permute.xlu0 %706  ;;  %v744_v29 = vsub.f32 %v3250_v43, %v727_v46 }
 0x2d2   :  { %v740_v31 = vsub.f32 %v3132_v0, %v707_v59  ;;  %v2577_v0 = vld [vmem:[%s4115_s2 + $0x18] sm:$0xff]  ;;  %v403_v59 = vmul.f32 %v3378_v17, %v355_v7 }
 0x2d3   :  { %v757_v33 = vmul.f32 1.442695, %v744_v29 }
 0x2d4   :  { %v749_v2 = vmul.f32 1.442695, %v740_v31 }
 0x2d6   :  { %2761 = vpow2.f32 %v749_v2 }
 0x2d7   :  { %330 = vadd.xlane.f32.xlu0 %v329_v57  ;;  %2763 = vpow2.f32 %v751_v28 }
 0x2d8   :  { %2765 = vpow2.f32 %v753_v63  ;;  %v3442_v46 = vpop.permute.xlu1 %850 }
 0x2d9   :  { %2767 = vpow2.f32 %v757_v33  ;;  %v3439_v2 = vpop.permute.xlu0 %835 }
 0x2dc   :  { %v2762_v44 = vpop.eup %2761 }
 0x2dd   :  { %v876_v36 = vpack.c.bf16 %v2762_v44, %v2760_v14  ;;  %v2764_v23 = vpop.eup %2763 }
 0x2de   :  { %v785_v43 = vsel %vm36_vm1, %v2764_v23, 0.0  ;;  %v2766_v53 = vpop.eup %2765 }
 0x2df   :  { %2462 = vmatmul.msk.bf16.vlgmr.msra.gmra.mxu3 %vm36_vm1, %v876_v36  ;;  %780 = vadd.xlane.f32.xlu0 %v779_v4  ;;  %v788_v58 = vsel %vm36_vm1, %v2766_v53, 0.0  ;;  %v2768_v13 = vpop.eup %2767  ;;  %v877_v5 = vpack.c.bf16 %v2766_v53, %v2764_v23 }
 0x2e0   :  { %1930 = vrot.lane.b32.xlu2 %v2577_v0, %s2857_s27  ;;  %v794_v18 = vsel %vm36_vm1, %v2768_v13, 0.0  ;;  %v297_v0 = vld [vmem:[#allocation3 + $0x28] sm:$0xff] }
 0x2e1   :  { %v305_v36 = vmul.f32 %v3272_v20, %v297_v0  ;;  %v3449_v23 = vpop.permute.xlu0 %845  ;;  %v298_v0 = vld [vmem:[#allocation3 + $0x30] sm:$0xff] }
 0x2e3   :  { %786 = vadd.xlane.f32.xlu1 %v785_v43 }
 0x2e7   :  { %789 = vadd.xlane.f32.xlu0 %v788_v58  ;;  %v782_v58 = vsel %vm36_vm1, %v2762_v44, 0.0 }
 0x2ea   :  { %v319_v49 = vpop.xlane.xlu2 %318 }
 0x2eb   :  { %v335_v42 = vadd.f32 %v319_v49, %v303_v1  ;;  %795 = vadd.xlane.f32.xlu1 %v794_v18  ;;  %v3459_v18 = vpop.f32.mrf.mxu0 }
 0x2ed   :  { %344 = vst.msk [vmem:[#allocation3 + $0x18] sm:$0xff] %vm340_vm3, %v335_v42 }
 0x2ef   :  { %2463 = vmatmul.msk.bf16.gmra.mxu3 %vm36_vm1, %v877_v5  ;;  %v1685_v5 = vsel %vm36_vm1, %v3459_v18, -inf }
 0x2f2   :  { %v722_v51 = vpop.permute.xlu2 %721 }
 0x2f3   :  { %v743_v32 = vsub.f32 %v3238_v24, %v722_v51  ;;  %v404_v24 = vmul.f32 %v3403_v3, %v356_v9 }
 0x2f5   :  { %v755_v19 = vmul.f32 1.442695, %v743_v32 }
 0x2f7   :  { %2769 = vpow2.f32 %v755_v19  ;;  %v469_v31 = vpop.f32.mrf.mxu1 }
 0x2f8   :  { %v480_v56 = vadd.f32 %v469_v31, %v403_v59 }
 0x2fa   :  { %488 = vst.msk [vmem:[#allocation4 + $0x30] sm:$0xff] %vm109_vm0, %v480_v56  ;;  %v732_v28 = vpop.permute.xlu2 %731 }
 0x2fb   :  { %v745_v57 = vsub.f32 %v3281_v40, %v732_v28 }
 0x2fd   :  { %v2770_v63 = vpop.eup %2769  ;;  %v759_v29 = vmul.f32 1.442695, %v745_v57 }
 0x2fe   :  { %v878_v14 = vpack.c.bf16 %v2768_v13, %v2770_v63  ;;  %v296_v13 = vld [vmem:[#allocation3 + $0x20] sm:$0xff]  ;;  %v791_v51 = vsel %vm36_vm1, %v2770_v63, 0.0 }
 0x2ff   :  { %2771 = vpow2.f32 %v759_v29  ;;  %v471_v17 = vpop.f32.mrf.mxu1  ;;  %v304_v20 = vmul.f32 %v3259_v55, %v296_v13  ;;  %v299_v13 = vld [vmem:[#allocation3 + $0x38] sm:$0xff] }
 0x300   :  { %v481_v33 = vadd.f32 %v471_v17, %v404_v24  ;;  %2464 = vmatmul.msk.bf16.gmra.mxu3 %vm36_vm1, %v878_v14 }
 0x302   :  { %489 = vst.msk [vmem:[#allocation4 + $0x38] sm:$0xff] %vm109_vm0, %v481_v33  ;;  %v3484_v14 = vpop.permute.xlu2 %855 }
 0x303   :  { %v325_v4 = vpop.xlane.xlu1 %324 }
 0x304   :  { %v337_v43 = vadd.f32 %v325_v4, %v305_v36  ;;  %v306_v36 = vmul.f32 %v3275_v22, %v298_v0  ;;  %v307_v22 = vmul.f32 %v3295_v45, %v299_v13 }
 0x305   :  { %v2772_v40 = vpop.eup %2771 }
 0x306   :  { %346 = vst.msk [vmem:[#allocation3 + $0x28] sm:$0xff] %vm340_vm3, %v337_v43  ;;  %v797_v3 = vsel %vm36_vm1, %v2772_v40, 0.0 }
 0x307   :  { %v3453_v53 = vpop.f32.mrf.mxu1  ;;  %798 = vadd.xlane.f32.xlu0 %v797_v3 }
 0x308   :  { %v1155_v38 = vsel %vm36_vm1, %v3453_v53, -inf }
 0x309   :  { %783 = vadd.xlane.f32.xlu2 %v782_v58  ;;  %1156 = vmax.xlane.f32.xlu1 %v1155_v38 }
 0x30c   :  { %v322_v1 = vpop.xlane.xlu0 %321 }
 0x30d   :  { %v336_v49 = vadd.f32 %v322_v1, %v304_v20 }
 0x30f   :  { %345 = vst.msk [vmem:[#allocation3 + $0x20] sm:$0xff] %vm340_vm3, %v336_v49  ;;  %v3462_v42 = vpop.f32.mrf.mxu1 }
 0x310   :  { %v1158_v17 = vsel %vm36_vm1, %v3462_v42, -inf }
 0x311   :  { %1686 = vmax.xlane.f32.xlu2 %v1685_v5 }
 0x317   :  { %v3466_v44 = vpop.f32.mrf.mxu1 }
 0x318   :  { %v1161_v7 = vsel %vm36_vm1, %v3466_v44, -inf }
 0x319   :  { %792 = vadd.xlane.f32.xlu2 %v791_v51  ;;  %1162 = vmax.xlane.f32.xlu0 %v1161_v7  ;;  %v763_v51 = vld [vmem:[#allocation3] sm:$0xff] }
 0x31a   :  { %v771_v7 = vmul.f32 %v3288_v61, %v763_v51 }
 0x31b   :  { %v1929_v55 = vpop.permute.xlu1 %1928 }
 0x31f   :  { %v3471_v32 = vpop.f32.mrf.mxu1  ;;  %v3496_v3 = vpop.permute.xlu0 %860 }
 0x320   :  { %v1164_v19 = vsel %vm36_vm1, %v3471_v32, -inf }
 0x321   :  { %1165 = vmax.xlane.f32.xlu1 %v1164_v19 }
 0x323   :  { %v737_v59 = vpop.permute.xlu1 %736 }
 0x324   :  { %v746_v31 = vsub.f32 %v3300_v47, %v737_v59  ;;  %v765_v59 = vld [vmem:[#allocation3 + $0x10] sm:$0xff] }
 0x326   :  { %v761_v56 = vmul.f32 1.442695, %v746_v31 }
 0x327   :  { %v3476_v28 = vpop.f32.mrf.mxu1 }
 0x328   :  { %2773 = vpow2.f32 %v761_v56  ;;  %v773_v56 = vmul.f32 %v3322_v54, %v765_v59 }
 0x32b   :  { %v3504_v5 = vpop.permute.xlu1 %865 }
 0x32e   :  { %v2774_v9 = vpop.eup %2773 }
 0x32f   :  { %v3478_v57 = vpop.f32.mrf.mxu1  ;;  %v800_v63 = vsel %vm36_vm1, %v2774_v9, 0.0  ;;  %v879_v29 = vpack.c.bf16 %v2774_v9, %v2772_v40  ;;  %v1167_v40 = vsel %vm36_vm1, %v3476_v28, -inf  ;;  %v766_v9 = vld [vmem:[#allocation3 + $0x18] sm:$0xff] }
 0x330   :  { %801 = vadd.xlane.f32.xlu2 %v800_v63  ;;  %v1170_v24 = vsel %vm36_vm1, %v3478_v57, -inf  ;;  %v774_v45 = vmul.f32 %v3353_v21, %v766_v9  ;;  %v2863_v21 = vmov 2  }
 0x331   :  { %1171 = vmax.xlane.f32.xlu0 %v1170_v24  ;;  %2465 = vmatmul.msk.bf16.gmra.mxu3 %vm36_vm1, %v879_v29  ;;  %v768_v24 = vld [vmem:[#allocation3 + $0x28] sm:$0xff] }
 0x332   :  { %v776_v61 = vmul.f32 %v3385_v62, %v768_v24  ;;  %2675 = vset.pattern.permute.xlu2 %v2863_v21  ;;  %2672 = vset.pattern.permute.xlu0 %v2863_v21 }
 0x333   :  { %2673 = vset.pattern.permute.xlu1 %v2863_v21 }
 0x337   :  { %v3486_v47 = vpop.f32.mrf.mxu1 }
 0x338   :  { %1159 = vmax.xlane.f32.xlu2 %v1158_v17  ;;  %v1173_v33 = vsel %vm36_vm1, %v3486_v47, -inf }
 0x339   :  { %1174 = vmax.xlane.f32.xlu1 %v1173_v33 }
 0x33b   :  { %v328_v4 = vpop.xlane.xlu2 %327 }
 0x33c   :  { %v338_v43 = vadd.f32 %v328_v4, %v306_v36 }
 0x33e   :  { %347 = vst.msk [vmem:[#allocation3 + $0x30] sm:$0xff] %vm340_vm3, %v338_v43  ;;  %v764_v43 = vld [vmem:[#allocation3 + $0x8] sm:$0xff] }
 0x33f   :  { %v3498_v38 = vpop.f32.mrf.mxu1 }
 0x340   :  { %1168 = vmax.xlane.f32.xlu2 %v1167_v40  ;;  %v1176_v20 = vsel %vm36_vm1, %v3498_v38, -inf }
 0x343   :  { %v1931_v58 = vpop.permute.xlu2 %1930 }
 0x344   :  { %1952 = vmatpush.bf16.msrb.mxu2 %v1931_v58 }
 0x345   :  { %v769_v62 = vld [vmem:[#allocation3 + $0x30] sm:$0xff] }
 0x346   :  { %v777_v40 = vmul.f32 %v3398_v30, %v769_v62 }
 0x348   :  { %1953 = vmatpush.bf16.msrb.mxu2 %v1929_v55  ;;  %1177 = vmax.xlane.f32.xlu2 %v1176_v20 }
 0x34a   :  { %v331_v1 = vpop.xlane.xlu0 %330 }
 0x34b   :  { %v339_v49 = vadd.f32 %v331_v1, %v307_v22  ;;  %v772_v22 = vmul.f32 %v3346_v34, %v764_v43 }
 0x34d   :  { %348 = vst.msk [vmem:[#allocation3 + $0x38] sm:$0xff] %vm340_vm3, %v339_v49  ;;  %v1147_v49 = vld [vmem:[#allocation2] sm:$0xff] }
 0x352   :  { %v781_v19 = vpop.xlane.xlu0 %780 }
 0x353   :  { %v803_v31 = vadd.f32 %v781_v19, %v771_v7 }
 0x355   :  { %812 = vst.msk [vmem:[#allocation3] sm:$0xff] %vm811_vm4, %v803_v31 }
 0x356   :  { %v787_v55 = vpop.xlane.xlu1 %786 }
 0x357   :  { %v805_v63 = vadd.f32 %v787_v55, %v773_v56  ;;  %v767_v56 = vld [vmem:[#allocation3 + $0x20] sm:$0xff] }
 0x359   :  { %814 = vst.msk [vmem:[#allocation3 + $0x10] sm:$0xff] %vm811_vm4, %v805_v63 }
 0x35a   :  { %v790_v29 = vpop.xlane.xlu0 %789 }
 0x35b   :  { %v806_v17 = vadd.f32 %v790_v29, %v774_v45  ;;  %v775_v29 = vmul.f32 %v3344_v26, %v767_v56 }
 0x35d   :  { %815 = vst.msk [vmem:[#allocation3 + $0x18] sm:$0xff] %vm811_vm4, %v806_v17  ;;  %v1149_v17 = vld [vmem:[#allocation2 + $0x10] sm:$0xff] }
 0x35e   :  { %v796_v0 = vpop.xlane.xlu1 %795 }
 0x35f   :  { %v808_v33 = vadd.f32 %v796_v0, %v776_v61 }
 0x361   :  { %817 = vst.msk [vmem:[#allocation3 + $0x28] sm:$0xff] %vm811_vm4, %v808_v33 }
 0x362   :  { %v933_v36 = vpop.f32.mrf.mxu3 }
 0x363   :  { %961 = vrot.lane.b32.xlu0 %v933_v36, %s2862_s24  ;;  %v3550_v36 = vld [vmem:[#allocation2 + $0x18] sm:$0xff] }
 0x36a   :  { %v935_v54 = vpop.f32.mrf.mxu3 }
 0x36b   :  { %963 = vrot.lane.b32.xlu1 %v935_v54, %s2862_s24 }
 0x372   :  { %v938_v4 = vpop.f32.mrf.mxu3 }
 0x373   :  { %965 = vrot.lane.b32.xlu2 %v938_v4, %s2862_s24 }
 0x37a   :  { %v940_v58 = vpop.f32.mrf.mxu3  ;;  %v799_v13 = vpop.xlane.xlu0 %798 }
 0x37b   :  { %v809_v20 = vadd.f32 %v799_v13, %v777_v40  ;;  %967 = vrot.lane.b32.xlu0 %v940_v58, %s2862_s24  ;;  %v770_v58 = vld [vmem:[#allocation3 + $0x38] sm:$0xff] }
 0x37c   :  { %v784_v1 = vpop.xlane.xlu2 %783  ;;  %v1157_v51 = vpop.xlane.xlu1 %1156 }
 0x37d   :  { %818 = vst.msk [vmem:[#allocation3 + $0x30] sm:$0xff] %vm811_vm4, %v809_v20  ;;  %v804_v7 = vadd.f32 %v784_v1, %v772_v22  ;;  %v3524_v19 = vmax.f32 %v1147_v49, %v1157_v51  ;;  %v3573_v51 = vld [vmem:[#allocation2 + $0x28] sm:$0xff] }
 0x37f   :  { %813 = vst.msk [vmem:[#allocation3 + $0x8] sm:$0xff] %vm811_vm4, %v804_v7  ;;  %v1187_v34 = vsub.f32 %v1147_v49, %v3524_v19 }
 0x380   :  { %1514 = vst.msk [vmem:[#allocation2] sm:$0xff] %vm1323_vm5, %v3524_v19 }
 0x381   :  { %v1195_v9 = vmul.f32 1.442695, %v1187_v34  ;;  %v1148_v34 = vld [vmem:[#allocation2 + $0x8] sm:$0xff] }
 0x383   :  { %v943_v30 = vpop.f32.mrf.mxu3  ;;  %2775 = vpow2.f32 %v1195_v9 }
 0x384   :  { %v3529_v59 = vpop.xlane.xlu2 %1686  ;;  %969 = vrot.lane.b32.xlu1 %v943_v30, %s2862_s24 }
 0x387   :  { %v3533_v31 = vld [vmem:[#allocation2] sm:$0xff] }
 0x388   :  { %v3537_v55 = vmax.f32 %v3533_v31, %v3210_v60 }
 0x389   :  { %v3547_v60 = vpop.eup %2775 }
 0x38a   :  { %v1699_v63 = vsub.f32 %v3533_v31, %v3537_v55  ;;  %2026 = vst.msk [vmem:[#allocation2] sm:$0xff] %vm1835_vm6, %v3537_v55 }
 0x38b   :  { %v945_v45 = vpop.f32.mrf.mxu3 }
 0x38c   :  { %v793_v24 = vpop.xlane.xlu2 %792  ;;  %v1163_v61 = vpop.xlane.xlu0 %1162  ;;  %971 = vrot.lane.b32.xlu2 %v945_v45, %s2862_s24  ;;  %v3587_v45 = vld [vmem:[#allocation2 + $0x30] sm:$0xff] }
 0x38d   :  { %v807_v0 = vadd.f32 %v793_v24, %v775_v29  ;;  %v1181_v33 = vmax.f32 %v1149_v17, %v1163_v61 }
 0x38f   :  { %816 = vst.msk [vmem:[#allocation3 + $0x20] sm:$0xff] %vm811_vm4, %v807_v0  ;;  %v1189_v43 = vsub.f32 %v1149_v17, %v1181_v33 }
 0x390   :  { %1516 = vst.msk [vmem:[#allocation2 + $0x10] sm:$0xff] %vm1323_vm5, %v1181_v33 }
 0x391   :  { %v1199_v20 = vmul.f32 1.442695, %v1189_v43  ;;  %v1151_v43 = vld [vmem:[#allocation2 + $0x20] sm:$0xff] }
 0x393   :  { %2777 = vpow2.f32 %v1199_v20 }
 0x394   :  { %1342 = vperm.xlu2 %2675, %v3547_v60   ;;  %v1166_v54 = vpop.xlane.xlu1 %1165 }
 0x395   :  { %v3553_v26 = vmax.f32 %v3550_v36, %v1166_v54 }
 0x397   :  { %v1661_v4 = vld [vmem:[#allocation2 + $0x10] sm:$0xff]  ;;  %1517 = vst.msk [vmem:[#allocation2 + $0x18] sm:$0xff] %vm1323_vm5, %v3553_v26 }
 0x398   :  { %v3558_v62 = vmax.f32 %v1661_v4, %v3226_v10  ;;  %v778_v10 = vmul.f32 %v3406_v12, %v770_v58 }
 0x399   :  { %v3584_v12 = vpop.eup %2777 }
 0x39a   :  { %2028 = vst.msk [vmem:[#allocation2 + $0x10] sm:$0xff] %vm1835_vm6, %v3558_v62  ;;  %v1701_v61 = vsub.f32 %v1661_v4, %v3558_v62  ;;  %v2864_v4 = vmov 3  }
 0x39c   :  { %1223 = vperm.xlu2 %2675, %v1181_v33   ;;  %v1711_v54 = vmul.f32 1.442695, %v1701_v61  ;;  %v1154_v61 = vld [vmem:[#allocation2 + $0x38] sm:$0xff] }
 0x39e   :  { %v3562_v40 = vld [vmem:[#allocation2 + $0x18] sm:$0xff]  ;;  %2779 = vpow2.f32 %v1711_v54 }
 0x39f   :  { %v3566_v13 = vmax.f32 %v3562_v40, %v3306_v39 }
 0x3a1   :  { %v1702_v22 = vsub.f32 %v3562_v40, %v3566_v13  ;;  %2029 = vst.msk [vmem:[#allocation2 + $0x18] sm:$0xff] %vm1835_vm6, %v3566_v13 }
 0x3a3   :  { %v802_v1 = vpop.xlane.xlu2 %801 }
 0x3a4   :  { %v810_v49 = vadd.f32 %v802_v1, %v778_v10  ;;  %v1172_v7 = vpop.xlane.xlu0 %1171  ;;  %1228 = vperm.xlu2 %2675, %v3553_v26   ;;  %v3631_v25 = vpop.eup %2779 }
 0x3a5   :  { %v3577_v39 = vmax.f32 %v3573_v51, %v1172_v7 }
 0x3a6   :  { %819 = vst.msk [vmem:[#allocation3 + $0x38] sm:$0xff] %vm811_vm4, %v810_v49 }
 0x3a7   :  { %1519 = vst.msk [vmem:[#allocation2 + $0x28] sm:$0xff] %vm1323_vm5, %v3577_v39  ;;  %v4119_v40 = vsub.f32 %v3573_v51, %v3577_v39 }
 0x3ab   :  { %v1160_v56 = vpop.xlane.xlu2 %1159 }
 0x3ac   :  { %v1180_v9 = vmax.f32 %v1148_v34, %v1160_v56  ;;  %1352 = vperm.xlu2 %2675, %v3584_v12   ;;  %v1175_v29 = vpop.xlane.xlu1 %1174 }
 0x3ad   :  { %v3590_v24 = vmax.f32 %v3587_v45, %v1175_v29 }
 0x3ae   :  { %1515 = vst.msk [vmem:[#allocation2 + $0x8] sm:$0xff] %vm1323_vm5, %v1180_v9  ;;  %v3593_v17 = vld [vmem:[#allocation2 + $0x28] sm:$0xff] }
 0x3af   :  { %1520 = vst.msk [vmem:[#allocation2 + $0x30] sm:$0xff] %vm1323_vm5, %v3590_v24  ;;  %v3602_v33 = vmax.f32 %v3593_v17, %v3357_v52 }
 0x3b1   :  { %2031 = vst.msk [vmem:[#allocation2 + $0x28] sm:$0xff] %vm1835_vm6, %v3602_v33 }
 0x3b3   :  { %v1169_v58 = vpop.xlane.xlu2 %1168 }
 0x3b4   :  { %v3606_v20 = vmax.f32 %v1151_v43, %v1169_v58  ;;  %v948_v10 = vpop.f32.mrf.mxu3  ;;  %2680 = vset.pattern.permute.xlu2 %v2864_v4 }
 0x3b5   :  { %973 = vrot.lane.b32.xlu0 %v948_v10, %s2862_s24  ;;  %1740 = vperm.xlu2 %2680, %v3566_v13   ;;  %v3611_v1 = vld [vmem:[#allocation2 + $0x8] sm:$0xff]  ;;  %v1205_v13 = vmul.f32 1.442695, %v4119_v40 }
 0x3b6   :  { %v1665_v52 = vld [vmem:[#allocation2 + $0x30] sm:$0xff]  ;;  %1518 = vst.msk [vmem:[#allocation2 + $0x20] sm:$0xff] %vm1323_vm5, %v3606_v20  ;;  %v3617_v49 = vmax.f32 %v3611_v1, %v3231_v16  ;;  %v1191_v56 = vsub.f32 %v1151_v43, %v3606_v20 }
 0x3b7   :  { %v3620_v7 = vmax.f32 %v1665_v52, %v3529_v59 }
 0x3b8   :  { %2027 = vst.msk [vmem:[#allocation2 + $0x8] sm:$0xff] %vm1835_vm6, %v3617_v49  ;;  %v1203_v10 = vmul.f32 1.442695, %v1191_v56  ;;  %v1188_v56 = vsub.f32 %v1148_v34, %v1180_v9  ;;  %v1190_v34 = vsub.f32 %v3550_v36, %v3553_v26  ;;  %v820_v36 = vld [vmem:[#allocation4] sm:$0xff] }
 0x3b9   :  { %2032 = vst.msk [vmem:[#allocation2 + $0x30] sm:$0xff] %vm1835_vm6, %v3620_v7  ;;  %v868_v26 = vmul.f32 %v3393_v37, %v820_v36 }
 0x3ba   :  { %2781 = vpow2.f32 %v1203_v10  ;;  %v822_v10 = vld [vmem:[#allocation4 + $0x10] sm:$0xff]  ;;  %v1201_v0 = vmul.f32 1.442695, %v1190_v34 }
 0x3bb   :  { %v1178_v58 = vpop.xlane.xlu2 %1177 }
 0x3bc   :  { %v3629_v16 = vmax.f32 %v1154_v61, %v1178_v58  ;;  %v950_v54 = vpop.f32.mrf.mxu3 }
 0x3bd   :  { %975 = vrot.lane.b32.xlu1 %v950_v54, %s2862_s24  ;;  %1213 = vperm.xlu0 %2672, %v3524_v19   ;;  %v3635_v59 = vld [vmem:[#allocation2 + $0x20] sm:$0xff]  ;;  %v1197_v19 = vmul.f32 1.442695, %v1188_v56  ;;  %v870_v56 = vmul.f32 %v3429_v41, %v822_v10  ;;  %v1705_v41 = vsub.f32 %v1665_v52, %v3620_v7 }
 0x3be   :  { %1521 = vst.msk [vmem:[#allocation2 + $0x38] sm:$0xff] %vm1323_vm5, %v3629_v16  ;;  %1864 = vperm.xlu2 %2680, %v3631_v25   ;;  %v3642_v43 = vmax.f32 %v3635_v59, %v3293_v8  ;;  %v1194_v8 = vsub.f32 %v1154_v61, %v3629_v16 }
 0x3bf   :  { %2783 = vpow2.f32 %v1197_v19  ;;  %v1719_v61 = vmul.f32 1.442695, %v1705_v41 }
 0x3c0   :  { %2030 = vst.msk [vmem:[#allocation2 + $0x20] sm:$0xff] %vm1835_vm6, %v3642_v43  ;;  %v3649_v54 = vpop.eup %2781  ;;  %v4121_v51 = vsub.f32 %v3635_v59, %v3642_v43 }
 0x3c5   :  { %1218 = vperm.xlu1 %2673, %v1180_v9   ;;  %2674 = vset.pattern.permute.xlu0 %v2864_v4  ;;  %v1209_v9 = vmul.f32 1.442695, %v1194_v8  ;;  %v3659_v29 = vpop.eup %2783 }
 0x3c6   :  { %2682 = vset.pattern.permute.xlu2 %v2863_v21  ;;  %1725 = vperm.xlu0 %2674, %v3537_v55  }
 0x3c7   :  { %1362 = vperm.xlu2 %2682, %v3649_v54   ;;  %2785 = vpow2.f32 %v1209_v9 }
 0x3c8   :  { %2787 = vpow2.f32 %v1201_v0  ;;  %v2575_v0 = vld [vmem:[%s4115_s2 + $0x8] sm:$0xff] }
 0x3c9   :  { %2789 = vpow2.f32 %v1719_v61 }
 0x3cd   :  { %2676 = vset.pattern.permute.xlu1 %v2864_v4  ;;  %v966_v58 = vpop.permute.xlu2 %965 }
 0x3ce   :  { %v987_v30 = vadd.f32 %v966_v58, %v870_v56  ;;  %1730 = vperm.xlu1 %2676, %v3617_v49   ;;  %2677 = vset.pattern.permute.xlu0 %v2863_v21  ;;  %v3668_v58 = vpop.eup %2785 }
 0x3cf   :  { %1243 = vperm.xlu2 %2682, %v3590_v24   ;;  %1347 = vperm.xlu0 %2677, %v3659_v29   ;;  %v3671_v34 = vpop.eup %2787 }
 0x3d0   :  { %996 = vst.msk [vmem:[#allocation4 + $0x10] sm:$0xff] %vm993_vm7, %v987_v30  ;;  %v821_v30 = vld [vmem:[#allocation4 + $0x8] sm:$0xff]  ;;  %v3681_v56 = vpop.eup %2789 }
 0x3d1   :  { %v869_v37 = vmul.f32 %v3439_v2, %v821_v30  ;;  %v825_v2 = vld [vmem:[#allocation4 + $0x28] sm:$0xff] }
 0x3d2   :  { %v873_v9 = vmul.f32 %v3484_v14, %v825_v2 }
 0x3d5   :  { %v962_v19 = vpop.permute.xlu0 %961 }
 0x3d6   :  { %v985_v8 = vadd.f32 %v962_v19, %v868_v26  ;;  %2678 = vset.pattern.permute.xlu1 %v2863_v21  ;;  %v823_v26 = vld [vmem:[#allocation4 + $0x18] sm:$0xff]  ;;  %v1707_v19 = vmul.f32 1.442695, %v1699_v63  ;;  %v1713_v63 = vmul.f32 1.442695, %v1702_v22  ;;  %v4120_v22 = vsub.f32 %v3611_v1, %v3617_v49  ;;  %v826_v1 = vld [vmem:[#allocation4 + $0x30] sm:$0xff] }
 0x3d7   :  { %1377 = vperm.xlu2 %2682, %v3668_v58   ;;  %1233 = vperm.xlu1 %2678, %v3606_v20   ;;  %v2574_v20 = vld [vmem:[%s4115_s2] sm:$0xff]  ;;  %v871_v61 = vmul.f32 %v3449_v23, %v823_v26  ;;  %v1704_v26 = vsub.f32 %v3593_v17, %v3602_v33  ;;  %v874_v49 = vmul.f32 %v3496_v3, %v826_v1  ;;  %s2865_s2 = smov 32  }
 0x3d8   :  { %994 = vst.msk [vmem:[#allocation4] sm:$0xff] %vm993_vm7, %v985_v8  ;;  %1357 = vperm.xlu0 %2677, %v3671_v34   ;;  %2791 = vpow2.f32 %v1707_v19 }
 0x3dd   :  { %v964_v52 = vpop.permute.xlu1 %963 }
 0x3de   :  { %v986_v10 = vadd.f32 %v964_v52, %v869_v37  ;;  %v824_v37 = vld [vmem:[#allocation4 + $0x20] sm:$0xff]  ;;  %v3706_v2 = vpop.eup %2791 }
 0x3df   :  { %2686 = vset.pattern.permute.xlu2 %v2864_v4  ;;  %1238 = vperm.xlu1 %2678, %v3577_v39   ;;  %v1715_v39 = vmul.f32 1.442695, %v4121_v51 }
 0x3e0   :  { %995 = vst.msk [vmem:[#allocation4 + $0x8] sm:$0xff] %vm993_vm7, %v986_v10  ;;  %1926 = vrot.lane.b32.xlu0 %v2575_v0, %s2857_s27  ;;  %1884 = vperm.xlu2 %2686, %v3681_v56   ;;  %v872_v0 = vmul.f32 %v3442_v46, %v824_v37 }
 0x3e1   :  { %2679 = vset.pattern.permute.xlu0 %v2864_v4 }
 0x3e6   :  { %v972_v41 = vpop.permute.xlu2 %971 }
 0x3e7   :  { %v990_v36 = vadd.f32 %v972_v41, %v873_v9  ;;  %2681 = vset.pattern.permute.xlu1 %v2864_v4  ;;  %v1709_v41 = vmul.f32 1.442695, %v4120_v22 }
 0x3e8   :  { %1924 = vrot.lane.b32.xlu0 %v2574_v20, %s2857_s27  ;;  %2692 = vset.pattern.permute.xlu2 %v2859_v48  ;;  %s2866_s27 = smov 48  }
 0x3e9   :  { %999 = vst.msk [vmem:[#allocation4 + $0x28] sm:$0xff] %vm993_vm7, %v990_v36 }
 0x3ed   :  { %v968_v8 = vpop.permute.xlu0 %967 }
 0x3ee   :  { %v988_v30 = vadd.f32 %v968_v8, %v871_v61  ;;  %v3701_v14 = vpop.permute.xlu2 %1342  ;;  %v1717_v61 = vmul.f32 1.442695, %v1704_v26 }
 0x3f0   :  { %997 = vst.msk [vmem:[#allocation4 + $0x18] sm:$0xff] %vm993_vm7, %v988_v30  ;;  %1735 = vperm.xlu0 %2679, %v3558_v62   ;;  %v3717_v62 = vpop.f32.mrf.mxu0 }
 0x3f1   :  { %v1688_v9 = vsel %vm36_vm1, %v3717_v62, -inf }
 0x3f6   :  { %v1224_v52 = vpop.permute.xlu2 %1223  ;;  %v970_v10 = vpop.permute.xlu1 %969 }
 0x3f7   :  { %v1253_v23 = vsub.f32 %v3466_v44, %v1224_v52  ;;  %v989_v31 = vadd.f32 %v970_v10, %v872_v0  ;;  %v4122_v0 = vsub.f32 %v3587_v45, %v3590_v24 }
 0x3f8   :  { %1854 = vperm.xlu0 %2679, %v3706_v2  }
 0x3f9   :  { %998 = vst.msk [vmem:[#allocation4 + $0x20] sm:$0xff] %vm993_vm7, %v989_v31  ;;  %v1263_v55 = vmul.f32 1.442695, %v1253_v23  ;;  %v1207_v52 = vmul.f32 1.442695, %v4122_v0 }
 0x3fb   :  { %2793 = vpow2.f32 %v1263_v55 }
 0x3fc   :  { %2795 = vpow2.f32 %v1713_v63 }
 0x3fd   :  { %2797 = vpow2.f32 %v1205_v13 }
 0x3fe   :  { %2799 = vpow2.f32 %v1709_v41 }
 0x3ff   :  { %2801 = vpow2.f32 %v1717_v61 }
 0x400   :  { %1745 = vperm.xlu0 %2679, %v3642_v43   ;;  %2803 = vpow2.f32 %v1715_v39  ;;  %v1229_v43 = vpop.permute.xlu2 %1228 }
 0x401   :  { %v3715_v46 = vpop.eup %2793  ;;  %2805 = vpow2.f32 %v1207_v52 }
 0x402   :  { %v3719_v20 = vpop.eup %2795  ;;  %v1297_v44 = vsel %vm36_vm1, %v3715_v46, 0.0 }
 0x403   :  { %v3733_v36 = vpop.eup %2797 }
 0x404   :  { %v3742_v19 = vpop.eup %2799 }
 0x405   :  { %v3747_v30 = vpop.eup %2801 }
 0x408   :  { %1869 = vperm.xlu0 %2679, %v3719_v20   ;;  %v3762_v63 = vpop.permute.xlu2 %1352 }
 0x409   :  { %1298 = vadd.xlane.f32.xlu2 %v1297_v44  ;;  %1689 = vmax.xlane.f32.xlu1 %v1688_v9 }
 0x410   :  { %1750 = vperm.xlu0 %2679, %v3602_v33   ;;  %v3749_v33 = vpop.eup %2803  ;;  %v1741_v22 = vpop.permute.xlu2 %1740 }
 0x411   :  { %v3765_v9 = vpop.eup %2805 }
 0x418   :  { %2683 = vset.pattern.permute.xlu0 %v2863_v21  ;;  %v3783_v1 = vpop.permute.xlu2 %1864 }
 0x419   :  { %1367 = vperm.xlu0 %2683, %v3733_v36  }
 0x421   :  { %1248 = vperm.xlu0 %2683, %v3629_v16   ;;  %v827_v16 = vld [vmem:[#allocation4 + $0x38] sm:$0xff]  ;;  %v3794_v52 = vpop.permute.xlu2 %1362 }
 0x422   :  { %1859 = vperm.xlu1 %2681, %v3742_v19   ;;  %v875_v59 = vmul.f32 %v3504_v5, %v827_v16 }
 0x427   :  { %v974_v8 = vpop.permute.xlu0 %973 }
 0x428   :  { %v991_v17 = vadd.f32 %v974_v8, %v874_v49 }
 0x429   :  { %2685 = vset.pattern.permute.xlu0 %v2864_v4 }
 0x42a   :  { %1000 = vst.msk [vmem:[#allocation4 + $0x30] sm:$0xff] %vm993_vm7, %v991_v17  ;;  %1879 = vperm.xlu0 %2685, %v3747_v30   ;;  %1874 = vperm.xlu1 %2681, %v3749_v33  }
 0x42f   :  { %v1214_v37 = vpop.permute.xlu0 %1213  ;;  %v976_v3 = vpop.permute.xlu1 %975 }
 0x430   :  { %v992_v10 = vadd.f32 %v976_v3, %v875_v59  ;;  %v1251_v23 = vsub.f32 %v3453_v53, %v1214_v37 }
 0x432   :  { %1001 = vst.msk [vmem:[#allocation4 + $0x38] sm:$0xff] %vm993_vm7, %v992_v10  ;;  %1755 = vperm.xlu1 %2681, %v3620_v7   ;;  %v1259_v31 = vmul.f32 1.442695, %v1251_v23 }
 0x434   :  { %2807 = vpow2.f32 %v1259_v31 }
 0x437   :  { %v1219_v55 = vpop.permute.xlu1 %1218 }
 0x438   :  { %v1252_v5 = vsub.f32 %v3462_v42, %v1219_v55  ;;  %v1726_v44 = vpop.permute.xlu0 %1725  ;;  %v1254_v42 = vsub.f32 %v3471_v32, %v1229_v43  ;;  %v1244_v55 = vpop.permute.xlu2 %1243 }
 0x439   :  { %v1763_v49 = vsub.f32 %v3138_v6, %v1726_v44 }
 0x43a   :  { %v1261_v40 = vmul.f32 1.442695, %v1252_v5  ;;  %2684 = vset.pattern.permute.xlu1 %v2863_v21  ;;  %v3769_v24 = vpop.eup %2807  ;;  %v1265_v61 = vmul.f32 1.442695, %v1254_v42 }
 0x43b   :  { %1372 = vperm.xlu1 %2684, %v3765_v9   ;;  %v1771_v17 = vmul.f32 1.442695, %v1763_v49 }
 0x43c   :  { %2809 = vpow2.f32 %v1261_v40 }
 0x440   :  { %v1731_v45 = vpop.permute.xlu1 %1730 }
 0x441   :  { %v1764_v53 = vsub.f32 %v3147_v15, %v1731_v45  ;;  %v3772_v7 = vpop.permute.xlu0 %1347 }
 0x442   :  { %v3774_v13 = vpop.eup %2809 }
 0x443   :  { %v1773_v41 = vmul.f32 1.442695, %v1764_v53  ;;  %v1388_v26 = vpack.c.bf16 %v3774_v13, %v3769_v24  ;;  %2687 = vset.pattern.permute.xlu1 %v2864_v4 }
 0x445   :  { %2811 = vpow2.f32 %v1773_v41  ;;  %2502 = vmatmul.msk.bf16.vlgmr.msrb.gmra.mxu3 %vm36_vm1, %v1388_v26  ;;  %v3807_v41 = vpop.permute.xlu2 %1377 }
 0x446   :  { %2813 = vpow2.f32 %v1265_v61 }
 0x447   :  { %2815 = vpow2.f32 %v1771_v17  ;;  %v1277_v17 = vld [vmem:[#allocation3 + $0x10] sm:$0xff] }
 0x449   :  { %v1234_v51 = vpop.permute.xlu1 %1233 }
 0x44a   :  { %v3781_v15 = vpop.permute.xlu0 %1357  ;;  %v1255_v3 = vsub.f32 %v3476_v28, %v1234_v51  ;;  %v1766_v28 = vsub.f32 %v3174_v35, %v1741_v22 }
 0x44b   :  { %v2812_v39 = vpop.eup %2811 }
 0x44c   :  { %v1806_v32 = vsel %vm36_vm1, %v2812_v39, 0.0  ;;  %v3787_v8 = vpop.eup %2813  ;;  %v1267_v6 = vmul.f32 1.442695, %v1255_v3  ;;  %v1777_v44 = vmul.f32 1.442695, %v1766_v28 }
 0x44d   :  { %1807 = vadd.xlane.f32.xlu2 %v1806_v32  ;;  %v1389_v37 = vpack.c.bf16 %v3787_v8, %v3715_v46  ;;  %v3796_v23 = vpop.eup %2815 }
 0x451   :  { %v1239_v16 = vpop.permute.xlu1 %1238 }
 0x452   :  { %v1927_v59 = vpop.permute.xlu0 %1926  ;;  %v1256_v43 = vsub.f32 %v3478_v57, %v1239_v16  ;;  %v1900_v57 = vpack.c.bf16 %v2812_v39, %v3796_v23  ;;  %v3816_v39 = vpop.permute.xlu2 %1884  ;;  %v1285_v16 = vmul.f32 %v3584_v12, %v1277_v17 }
 0x453   :  { %1954 = vmatpush.bf16.msrb.mxu2 %v1927_v59 }
 0x454   :  { %v1269_v0 = vmul.f32 1.442695, %v1256_v43  ;;  %v1666_v43 = vld [vmem:[#allocation2 + $0x38] sm:$0xff] }
 0x455   :  { %2503 = vmatmul.msk.bf16.gmra.mxu3 %vm36_vm1, %v1389_v37 }
 0x456   :  { %2817 = vpow2.f32 %v1269_v0 }
 0x457   :  { %2819 = vpow2.f32 %v1267_v6 }
 0x458   :  { %2821 = vpow2.f32 %v1777_v44 }
 0x45a   :  { %v1925_v10 = vpop.permute.xlu0 %1924 }
 0x45b   :  { %1955 = vmatpush.bf16.msrb.mxu2 %v1925_v10 }
 0x45c   :  { %v2818_v31 = vpop.eup %2817 }
 0x45d   :  { %v1306_v46 = vsel %vm36_vm1, %v2818_v31, 0.0  ;;  %v3802_v5 = vpop.eup %2819 }
 0x45e   :  { %2542 = vmatmul.msk.bf16.vlgmr.msrb.gmra.mxu2 %vm36_vm1, %v1900_v57  ;;  %1307 = vadd.xlane.f32.xlu2 %v1306_v46  ;;  %v1390_v53 = vpack.c.bf16 %v2818_v31, %v3802_v5  ;;  %v3811_v22 = vpop.eup %2821 }
 0x462   :  { %v1736_v40 = vpop.permute.xlu0 %1735 }
 0x463   :  { %v1765_v45 = vsub.f32 %v3162_v27, %v1736_v40 }
 0x465   :  { %v1775_v42 = vmul.f32 1.442695, %v1765_v45  ;;  %2504 = vmatmul.msk.bf16.gmra.mxu3 %vm36_vm1, %v1390_v53  ;;  %v1257_v53 = vsub.f32 %v3486_v47, %v1244_v55  ;;  %v1294_v47 = vsel %vm36_vm1, %v3774_v13, 0.0 }
 0x467   :  { %2823 = vpow2.f32 %v1775_v42  ;;  %v1271_v42 = vmul.f32 1.442695, %v1257_v53 }
 0x46a   :  { %v3809_v35 = vpop.permute.xlu0 %1854 }
 0x46d   :  { %v2824_v26 = vpop.eup %2823 }
 0x46e   :  { %v1901_v61 = vpack.c.bf16 %v3811_v22, %v2824_v26  ;;  %v1809_v13 = vsel %vm36_vm1, %v2824_v26, 0.0  ;;  %v1280_v26 = vld [vmem:[#allocation3 + $0x28] sm:$0xff] }
 0x470   :  { %2543 = vmatmul.msk.bf16.gmra.mxu2 %vm36_vm1, %v1901_v61 }
 0x472   :  { %v1746_v51 = vpop.permute.xlu0 %1745 }
 0x473   :  { %v1767_v27 = vsub.f32 %v3194_v50, %v1746_v51 }
 0x475   :  { %v1779_v32 = vmul.f32 1.442695, %v1767_v27 }
 0x477   :  { %2825 = vpow2.f32 %v1779_v32 }
 0x47a   :  { %v3818_v49 = vpop.permute.xlu0 %1869 }
 0x47c   :  { %v1299_v59 = vpop.xlane.xlu2 %1298  ;;  %v1690_v37 = vpop.xlane.xlu1 %1689 }
 0x47d   :  { %v2826_v3 = vpop.eup %2825  ;;  %v1317_v0 = vadd.f32 %v1299_v59, %v1285_v16  ;;  %v1698_v6 = vmax.f32 %v1666_v43, %v1690_v37  ;;  %v1803_v59 = vsel %vm36_vm1, %v3796_v23, 0.0  ;;  %v1300_v37 = vsel %vm36_vm1, %v3787_v8, 0.0 }
 0x47e   :  { %v1815_v10 = vsel %vm36_vm1, %v2826_v3, 0.0 }
 0x47f   :  { %1326 = vst.msk [vmem:[#allocation3 + $0x10] sm:$0xff] %vm1323_vm5, %v1317_v0  ;;  %v1706_v50 = vsub.f32 %v1666_v43, %v1698_v6  ;;  %1816 = vadd.xlane.f32.xlu2 %v1815_v10  ;;  %1760 = vperm.xlu0 %2685, %v1698_v6   ;;  %v1812_v10 = vsel %vm36_vm1, %v3811_v22, 0.0 }
 0x480   :  { %2033 = vst.msk [vmem:[#allocation2 + $0x38] sm:$0xff] %vm1835_vm6, %v1698_v6  ;;  %v1303_v6 = vsel %vm36_vm1, %v3802_v5, 0.0 }
 0x481   :  { %v1721_v31 = vmul.f32 1.442695, %v1706_v50  ;;  %v1288_v50 = vmul.f32 %v3733_v36, %v1280_v26 }
 0x482   :  { %v1751_v57 = vpop.permute.xlu0 %1750 }
 0x483   :  { %2827 = vpow2.f32 %v1721_v31  ;;  %v1768_v12 = vsub.f32 %v3228_v11, %v1751_v57 }
 0x485   :  { %v1781_v46 = vmul.f32 1.442695, %v1768_v12 }
 0x486   :  { %v1789_v26 = vld [vmem:[#allocation3 + $0x10] sm:$0xff] }
 0x487   :  { %2829 = vpow2.f32 %v1781_v46  ;;  %2690 = vset.pattern.permute.xlu0 %v2859_v48 }
 0x488   :  { %2831 = vpow2.f32 %v1271_v42 }
 0x489   :  { %v3826_v28 = vpop.eup %2827 }
 0x48a   :  { %1889 = vperm.xlu1 %2687, %v3826_v28  }
 0x48b   :  { %v3829_v44 = vpop.permute.xlu0 %1367 }
 0x48d   :  { %v2830_v40 = vpop.eup %2829 }
 0x48e   :  { %v1902_v45 = vpack.c.bf16 %v2830_v40, %v2826_v3  ;;  %v2832_v27 = vpop.eup %2831  ;;  %v1818_v31 = vsel %vm36_vm1, %v2830_v40, 0.0 }
 0x48f   :  { %v1309_v23 = vsel %vm36_vm1, %v2832_v27, 0.0 }
 0x490   :  { %2544 = vmatmul.msk.bf16.gmra.mxu2 %vm36_vm1, %v1902_v45 }
 0x492   :  { %2688 = vset.pattern.permute.xlu1 %v2859_v48 }
 0x493   :  { %v1249_v11 = vpop.permute.xlu0 %1248 }
 0x494   :  { %v1258_v61 = vsub.f32 %v3498_v38, %v1249_v11  ;;  %v3836_v16 = vpop.permute.xlu1 %1859  ;;  %v1291_v38 = vsel %vm36_vm1, %v3769_v24, 0.0 }
 0x496   :  { %v1273_v51 = vmul.f32 1.442695, %v1258_v61 }
 0x498   :  { %2833 = vpow2.f32 %v1273_v51 }
 0x49c   :  { %v3840_v55 = vpop.permute.xlu1 %1874  ;;  %v3860_v46 = vpop.permute.xlu0 %1879 }
 0x49e   :  { %v2834_v32 = vpop.eup %2833 }
 0x49f   :  { %v1391_v17 = vpack.c.bf16 %v2834_v32, %v2832_v27  ;;  %v1312_v12 = vsel %vm36_vm1, %v2834_v32, 0.0 }
 0x4a1   :  { %2505 = vmatmul.msk.bf16.gmra.mxu3 %vm36_vm1, %v1391_v17 }
 0x4a4   :  { %v1756_v43 = vpop.permute.xlu1 %1755 }
 0x4a5   :  { %v1769_v3 = vsub.f32 %v3459_v18, %v1756_v43 }
 0x4a7   :  { %v1783_v0 = vmul.f32 1.442695, %v1769_v3  ;;  %v1275_v3 = vld [vmem:[#allocation3] sm:$0xff] }
 0x4a9   :  { %1295 = vadd.xlane.f32.xlu0 %v1294_v47  ;;  %2835 = vpow2.f32 %v1783_v0  ;;  %v1283_v0 = vmul.f32 %v3547_v60, %v1275_v3 }
 0x4ad   :  { %v3870_v32 = vpop.permute.xlu1 %1372 }
 0x4af   :  { %v2836_v24 = vpop.eup %2835 }
 0x4b0   :  { %v1821_v18 = vsel %vm36_vm1, %v2836_v24, 0.0 }
 0x4b1   :  { %1804 = vadd.xlane.f32.xlu0 %v1803_v59 }
 0x4b4   :  { %1292 = vadd.xlane.f32.xlu1 %v1291_v38 }
 0x4b9   :  { %1301 = vadd.xlane.f32.xlu0 %v1300_v37 }
 0x4bc   :  { %1810 = vadd.xlane.f32.xlu1 %v1809_v13 }
 0x4c0   :  { %v1808_v8 = vpop.xlane.xlu2 %1807 }
 0x4c1   :  { %1304 = vadd.xlane.f32.xlu0 %v1303_v6 }
 0x4c4   :  { %1310 = vadd.xlane.f32.xlu1 %v1309_v23 }
 0x4c8   :  { %v1445_v22 = vpop.f32.mrf.mxu3 }
 0x4c9   :  { %1813 = vadd.xlane.f32.xlu0 %v1812_v10 }
 0x4cc   :  { %1822 = vadd.xlane.f32.xlu1 %v1821_v18 }
 0x4d0   :  { %v3867_v51 = vpop.f32.mrf.mxu3 }
 0x4d1   :  { %v1308_v5 = vpop.xlane.xlu2 %1307  ;;  %1819 = vadd.xlane.f32.xlu0 %v1818_v31 }
 0x4d2   :  { %v1320_v57 = vadd.f32 %v1308_v5, %v1288_v50  ;;  %v1797_v5 = vmul.f32 %v3631_v25, %v1789_v26 }
 0x4d4   :  { %1329 = vst.msk [vmem:[#allocation3 + $0x28] sm:$0xff] %vm1323_vm5, %v1320_v57 }
 0x4d8   :  { %v1450_v27 = vpop.f32.mrf.mxu3 }
 0x4d9   :  { %1313 = vadd.xlane.f32.xlu0 %v1312_v12 }
 0x4db   :  { %v1792_v3 = vld [vmem:[#allocation3 + $0x28] sm:$0xff] }
 0x4e0   :  { %v1452_v26 = vpop.f32.mrf.mxu3 }
 0x4e1   :  { %v1957_v36 = vpop.f32.mrf.mxu2 }
 0x4e9   :  { %v1959_v59 = vpop.f32.mrf.mxu2 }
 0x4ed   :  { %1473 = vrot.lane.b32.xlu0 %v1445_v22, %s2865_s2 }
 0x4f1   :  { %v1761_v45 = vpop.permute.xlu0 %1760 }
 0x4f2   :  { %v1770_v53 = vsub.f32 %v3717_v62, %v1761_v45  ;;  %v1276_v62 = vld [vmem:[#allocation3 + $0x8] sm:$0xff] }
 0x4f3   :  { %v1284_v17 = vmul.f32 %v3659_v29, %v1276_v62  ;;  %v1278_v29 = vld [vmem:[#allocation3 + $0x18] sm:$0xff] }
 0x4f4   :  { %v1785_v42 = vmul.f32 1.442695, %v1770_v53  ;;  %v1286_v18 = vmul.f32 %v3671_v34, %v1278_v29 }
 0x4f5   :  { %1985 = vrot.lane.b32.xlu0 %v1957_v36, %s2866_s27 }
 0x4f6   :  { %2837 = vpow2.f32 %v1785_v42  ;;  %v1281_v42 = vld [vmem:[#allocation3 + $0x30] sm:$0xff] }
 0x4f7   :  { %v1289_v25 = vmul.f32 %v3765_v9, %v1281_v42 }
 0x4fc   :  { %v2838_v40 = vpop.eup %2837  ;;  %v3874_v43 = vpop.permute.xlu1 %1889 }
 0x4fd   :  { %v1824_v11 = vsel %vm36_vm1, %v2838_v40, 0.0  ;;  %v1903_v61 = vpack.c.bf16 %v2838_v40, %v2836_v24 }
 0x4fe   :  { %1825 = vadd.xlane.f32.xlu2 %v1824_v11 }
 0x4ff   :  { %2545 = vmatmul.msk.bf16.gmra.mxu2 %vm36_vm1, %v1903_v61 }
 0x516   :  { %1477 = vrot.lane.b32.xlu2 %v1450_v27, %s2865_s2 }
 0x51c   :  { %v1296_v47 = vpop.xlane.xlu0 %1295 }
 0x51d   :  { %v1316_v38 = vadd.f32 %v1296_v47, %v1284_v17 }
 0x51e   :  { %1987 = vrot.lane.b32.xlu2 %v1959_v59, %s2866_s27 }
 0x51f   :  { %1325 = vst.msk [vmem:[#allocation3 + $0x8] sm:$0xff] %vm1323_vm5, %v1316_v38 }
 0x524   :  { %v1805_v37 = vpop.xlane.xlu0 %1804 }
 0x526   :  { %v1788_v13 = vld [vmem:[#allocation3 + $0x8] sm:$0xff] }
 0x527   :  { %v1796_v6 = vmul.f32 %v3742_v19, %v1788_v13  ;;  %v1293_v23 = vpop.xlane.xlu1 %1292 }
 0x528   :  { %v1315_v24 = vadd.f32 %v1293_v23, %v1283_v0 }
 0x529   :  { %v1828_v10 = vadd.f32 %v1808_v8, %v1796_v6  ;;  %v1279_v8 = vld [vmem:[#allocation3 + $0x20] sm:$0xff] }
 0x52a   :  { %1324 = vst.msk [vmem:[#allocation3] sm:$0xff] %vm1323_vm5, %v1315_v24  ;;  %v1287_v45 = vmul.f32 %v3649_v54, %v1279_v8 }
 0x52b   :  { %1837 = vst.msk [vmem:[#allocation3 + $0x8] sm:$0xff] %vm1835_vm6, %v1828_v10 }
 0x52c   :  { %v1302_v50 = vpop.xlane.xlu0 %1301 }
 0x52d   :  { %v1318_v31 = vadd.f32 %v1302_v50, %v1286_v18  ;;  %v1282_v50 = vld [vmem:[#allocation3 + $0x38] sm:$0xff] }
 0x52f   :  { %1327 = vst.msk [vmem:[#allocation3 + $0x18] sm:$0xff] %vm1323_vm5, %v1318_v31  ;;  %v1811_v60 = vpop.xlane.xlu1 %1810 }
 0x530   :  { %v1829_v57 = vadd.f32 %v1811_v60, %v1797_v5 }
 0x531   :  { %v1787_v19 = vld [vmem:[#allocation3] sm:$0xff] }
 0x532   :  { %v1795_v12 = vmul.f32 %v3706_v2, %v1787_v19  ;;  %1838 = vst.msk [vmem:[#allocation3 + $0x10] sm:$0xff] %vm1835_vm6, %v1829_v57  ;;  %v2038_v22 = vld [vmem:[#allocation3 + $0x8] sm:$0xff] }
 0x533   :  { %2839 = vrcp.f32 %v2038_v22 }
 0x534   :  { %v1827_v34 = vadd.f32 %v1805_v37, %v1795_v12  ;;  %v1305_v53 = vpop.xlane.xlu0 %1304  ;;  %v1817_v37 = vpop.xlane.xlu2 %1816 }
 0x535   :  { %v1319_v36 = vadd.f32 %v1305_v53, %v1287_v45  ;;  %v1332_v45 = vld [vmem:[#allocation4] sm:$0xff] }
 0x536   :  { %1836 = vst.msk [vmem:[#allocation3] sm:$0xff] %vm1835_vm6, %v1827_v34  ;;  %v1790_v2 = vld [vmem:[#allocation3 + $0x18] sm:$0xff]  ;;  %v1380_v34 = vmul.f32 %v3701_v14, %v1332_v45 }
 0x537   :  { %1328 = vst.msk [vmem:[#allocation3 + $0x20] sm:$0xff] %vm1323_vm5, %v1319_v36  ;;  %v1311_v40 = vpop.xlane.xlu1 %1310  ;;  %v1798_v54 = vmul.f32 %v3719_v20, %v1790_v2  ;;  %v4123_v20 = vmov 1  }
 0x538   :  { %v1321_v11 = vadd.f32 %v1311_v40, %v1289_v25 }
 0x539   :  { %v3890_v61 = vpop.eup %2839  ;;  %v2039_v27 = vld [vmem:[#allocation3 + $0x10] sm:$0xff] }
 0x53a   :  { %1330 = vst.msk [vmem:[#allocation3 + $0x30] sm:$0xff] %vm1323_vm5, %v1321_v11  ;;  %2068 = vperm.xlu0 %2690, %v3890_v61   ;;  %2841 = vrcp.f32 %v2039_v27 }
 0x53c   :  { %v1814_v62 = vpop.xlane.xlu0 %1813 }
 0x53d   :  { %v1830_v17 = vadd.f32 %v1814_v62, %v1798_v54  ;;  %v2037_v47 = vld [vmem:[#allocation3] sm:$0xff] }
 0x53e   :  { %v1791_v59 = vld [vmem:[#allocation3 + $0x20] sm:$0xff]  ;;  %2843 = vrcp.f32 %v2037_v47 }
 0x53f   :  { %v1799_v9 = vmul.f32 %v3749_v33, %v1791_v59  ;;  %1839 = vst.msk [vmem:[#allocation3 + $0x18] sm:$0xff] %vm1835_vm6, %v1830_v17  ;;  %v1823_v23 = vpop.xlane.xlu1 %1822  ;;  %v1800_v33 = vmul.f32 %v3747_v30, %v1792_v3  ;;  %v1290_v30 = vmul.f32 %v3668_v58, %v1282_v50  ;;  %v1455_v58 = vpop.f32.mrf.mxu3 }
 0x540   :  { %v3897_v38 = vpop.eup %2841 }
 0x541   :  { %v1831_v13 = vadd.f32 %v1817_v37, %v1799_v9  ;;  %v1793_v0 = vld [vmem:[#allocation3 + $0x30] sm:$0xff]  ;;  %2073 = vperm.xlu2 %2692, %v3897_v38  }
 0x542   :  { %v1801_v6 = vmul.f32 %v3681_v56, %v1793_v0  ;;  %2691 = vset.pattern.permute.xlu0 %v4123_v20  ;;  %v1962_v56 = vpop.f32.mrf.mxu2  ;;  %v1334_v9 = vld [vmem:[#allocation4 + $0x10] sm:$0xff] }
 0x543   :  { %1840 = vst.msk [vmem:[#allocation3 + $0x20] sm:$0xff] %vm1835_vm6, %v1831_v13  ;;  %2148 = vperm.xlu0 %2691, %v3890_v61   ;;  %v1382_v37 = vmul.f32 %v3762_v63, %v1334_v9 }
 0x544   :  { %v3905_v24 = vpop.eup %2843  ;;  %v1833_v10 = vadd.f32 %v1823_v23, %v1801_v6  ;;  %v1820_v29 = vpop.xlane.xlu0 %1819 }
 0x545   :  { %v1832_v18 = vadd.f32 %v1820_v29, %v1800_v33  ;;  %2063 = vperm.xlu1 %2688, %v3905_v24  }
 0x546   :  { %1842 = vst.msk [vmem:[#allocation3 + $0x30] sm:$0xff] %vm1835_vm6, %v1833_v10  ;;  %v2040_v22 = vld [vmem:[#allocation3 + $0x18] sm:$0xff] }
 0x547   :  { %1841 = vst.msk [vmem:[#allocation3 + $0x28] sm:$0xff] %vm1835_vm6, %v1832_v18  ;;  %v1457_v36 = vpop.f32.mrf.mxu3 }
 0x549   :  { %2693 = vset.pattern.permute.xlu2 %v4123_v20 }
 0x54a   :  { %2153 = vperm.xlu2 %2693, %v3897_v38   ;;  %v2041_v31 = vld [vmem:[#allocation3 + $0x20] sm:$0xff]  ;;  %v1964_v12 = vpop.f32.mrf.mxu2 }
 0x54b   :  { %1479 = vrot.lane.b32.xlu0 %v1452_v26, %s2865_s2  ;;  %2845 = vrcp.f32 %v2041_v31  ;;  %v1335_v31 = vld [vmem:[#allocation4 + $0x18] sm:$0xff] }
 0x54c   :  { %v1314_v5 = vpop.xlane.xlu0 %1313  ;;  %2701 = vset.pattern.permute.xlu0 %v2859_v48 }
 0x54d   :  { %v1322_v60 = vadd.f32 %v1314_v5, %v1290_v30  ;;  %2689 = vset.pattern.permute.xlu1 %v4123_v20  ;;  %v2043_v19 = vld [vmem:[#allocation3 + $0x30] sm:$0xff]  ;;  %v1337_v30 = vld [vmem:[#allocation4 + $0x28] sm:$0xff] }
 0x54e   :  { %2143 = vperm.xlu1 %2689, %v3905_v24   ;;  %2847 = vrcp.f32 %v2043_v19  ;;  %v2042_v59 = vld [vmem:[#allocation3 + $0x28] sm:$0xff]  ;;  %v1385_v5 = vmul.f32 %v3829_v44, %v1337_v30 }
 0x54f   :  { %1331 = vst.msk [vmem:[#allocation3 + $0x38] sm:$0xff] %vm1323_vm5, %v1322_v60  ;;  %2849 = vrcp.f32 %v2040_v22  ;;  %v1460_v14 = vpop.f32.mrf.mxu3 }
 0x550   :  { %2851 = vrcp.f32 %v2042_v59 }
 0x551   :  { %v3918_v57 = vpop.eup %2845 }
 0x552   :  { %2696 = vset.pattern.permute.xlu2 %v2859_v48  ;;  %v1967_v11 = vpop.f32.mrf.mxu2 }
 0x553   :  { %1991 = vrot.lane.b32.xlu0 %v1964_v12, %s2866_s27  ;;  %2083 = vperm.xlu2 %2696, %v3918_v57  }
 0x554   :  { %v3926_v8 = vpop.eup %2847 }
 0x555   :  { %v3937_v42 = vpop.eup %2849 }
 0x556   :  { %1475 = vrot.lane.b32.xlu1 %v3867_v51, %s2865_s2  ;;  %v1794_v54 = vld [vmem:[#allocation3 + $0x38] sm:$0xff]  ;;  %v3955_v6 = vpop.eup %2851 }
 0x557   :  { %2694 = vset.pattern.permute.xlu1 %v2859_v48  ;;  %v1802_v62 = vmul.f32 %v3826_v28, %v1794_v54 }
 0x55a   :  { %v1969_v13 = vpop.f32.mrf.mxu2 }
 0x55b   :  { %2697 = vset.pattern.permute.xlu2 %v4123_v20  ;;  %2093 = vperm.xlu0 %2701, %v3926_v8  }
 0x55c   :  { %2163 = vperm.xlu2 %2697, %v3918_v57  }
 0x55e   :  { %1989 = vrot.lane.b32.xlu1 %v1962_v56, %s2866_s27 }
 0x55f   :  { %v1474_v53 = vpop.permute.xlu0 %1473 }
 0x560   :  { %v1497_v51 = vadd.f32 %v1474_v53, %v1380_v34 }
 0x562   :  { %1506 = vst.msk [vmem:[#allocation4] sm:$0xff] %vm1505_vm8, %v1497_v51 }
 0x563   :  { %2702 = vset.pattern.permute.xlu0 %v4123_v20 }
 0x564   :  { %1483 = vrot.lane.b32.xlu2 %v1457_v36, %s2865_s2  ;;  %2173 = vperm.xlu0 %2702, %v3926_v8   ;;  %v1339_v36 = vld [vmem:[#allocation4 + $0x38] sm:$0xff] }
 0x565   :  { %2704 = vset.pattern.permute.xlu2 %v2863_v21 }
 0x566   :  { %2078 = vperm.xlu1 %2694, %v3937_v42  }
 0x567   :  { %v1986_v2 = vpop.permute.xlu0 %1985 }
 0x569   :  { %v1844_v25 = vld [vmem:[#allocation4] sm:$0xff] }
 0x56a   :  { %v1892_v40 = vmul.f32 %v3809_v35, %v1844_v25  ;;  %v1462_v35 = vpop.f32.mrf.mxu3  ;;  %v1387_v25 = vmul.f32 %v3807_v41, %v1339_v36 }
 0x56c   :  { %v2009_v27 = vadd.f32 %v1986_v2, %v1892_v40  ;;  %1993 = vrot.lane.b32.xlu2 %v1967_v11, %s2866_s27  ;;  %2703 = vset.pattern.permute.xlu0 %v2863_v21 }
 0x56e   :  { %2018 = vst.msk [vmem:[#allocation4] sm:$0xff] %vm2017_vm9, %v2009_v27  ;;  %2695 = vset.pattern.permute.xlu1 %v4123_v20 }
 0x56f   :  { %2158 = vperm.xlu1 %2695, %v3937_v42  }
 0x571   :  { %v1826_v17 = vpop.xlane.xlu2 %1825 }
 0x572   :  { %v1834_v47 = vadd.f32 %v1826_v17, %v1802_v62 }
 0x574   :  { %1843 = vst.msk [vmem:[#allocation3 + $0x38] sm:$0xff] %vm1835_vm6, %v1834_v47  ;;  %1487 = vrot.lane.b32.xlu2 %v1462_v35, %s2865_s2 }
 0x575   :  { %v2053_v56 = vld [vmem:[#allocation4] sm:$0xff] }
 0x577   :  { %1481 = vrot.lane.b32.xlu1 %v1455_v58, %s2865_s2 }
 0x578   :  { %2698 = vset.pattern.permute.xlu1 %v2859_v48 }
 0x579   :  { %v1478_v3 = vpop.permute.xlu2 %1477 }
 0x57a   :  { %v1499_v0 = vadd.f32 %v1478_v3, %v1382_v37 }
 0x57b   :  { %v2044_v28 = vld [vmem:[#allocation3 + $0x38] sm:$0xff] }
 0x57c   :  { %1508 = vst.msk [vmem:[#allocation4 + $0x10] sm:$0xff] %vm1505_vm8, %v1499_v0  ;;  %2233 = vperm.xlu2 %2704, %v3897_v38   ;;  %2853 = vrcp.f32 %v2044_v28 }
 0x57f   :  { %2088 = vperm.xlu1 %2698, %v3955_v6  }
 0x581   :  { %v3966_v33 = vpop.permute.xlu2 %1987 }
 0x582   :  { %v1972_v23 = vpop.f32.mrf.mxu2  ;;  %v2854_v63 = vpop.eup %2853 }
 0x583   :  { %1997 = vrot.lane.b32.xlu0 %v1972_v23, %s2866_s27 }
 0x584   :  { %2705 = vset.pattern.permute.xlu2 %v2859_v48 }
 0x585   :  { %2098 = vperm.xlu2 %2705, %v2854_v63  }
 0x587   :  { %2699 = vset.pattern.permute.xlu1 %v4123_v20 }
 0x588   :  { %2168 = vperm.xlu1 %2699, %v3955_v6  }
 0x58a   :  { %v1974_v10 = vpop.f32.mrf.mxu2 }
 0x58b   :  { %2228 = vperm.xlu0 %2703, %v3890_v61  }
 0x58d   :  { %2706 = vset.pattern.permute.xlu2 %v4123_v20 }
 0x58e   :  { %2178 = vperm.xlu2 %2706, %v2854_v63  }
 0x590   :  { %1485 = vrot.lane.b32.xlu1 %v1460_v14, %s2865_s2 }
 0x591   :  { %2700 = vset.pattern.permute.xlu1 %v2863_v21 }
 0x593   :  { %2253 = vperm.xlu0 %2703, %v3926_v8  }
 0x596   :  { %1999 = vrot.lane.b32.xlu2 %v1974_v10, %s2866_s27 }
 0x597   :  { %2707 = vset.pattern.permute.xlu2 %v2863_v21 }
 0x598   :  { %2223 = vperm.xlu1 %2700, %v3905_v24  }
 0x59b   :  { %v3972_v48 = vpop.permute.xlu2 %2073  ;;  %2709 = vset.pattern.permute.xlu0 %v2864_v4 }
 0x59c   :  { %2308 = vperm.xlu0 %2709, %v3890_v61  }
 0x59e   :  { %2243 = vperm.xlu2 %2707, %v3918_v57  }
 0x5a0   :  { %1995 = vrot.lane.b32.xlu1 %v1969_v13, %s2866_s27 }
 0x5a4   :  { %v3978_v20 = vpop.permute.xlu2 %2153  ;;  %2333 = vperm.xlu0 %2709, %v3926_v8  }
 0x5a6   :  { %2258 = vperm.xlu2 %2707, %v2854_v63  }
 0x5a8   :  { %2238 = vperm.xlu1 %2700, %v3937_v42  }
 0x5ac   :  { %v3982_v21 = vpop.permute.xlu0 %2068 }
 0x5ad   :  { %v3984_v29 = vpop.permute.xlu2 %2083 }
 0x5ae   :  { %2710 = vset.pattern.permute.xlu2 %v2864_v4 }
 0x5af   :  { %2313 = vperm.xlu2 %2710, %v3897_v38   ;;  %v1383_v38 = vmul.f32 %v3781_v15, %v1335_v31  ;;  %v1333_v15 = vld [vmem:[#allocation4 + $0x8] sm:$0xff] }
 0x5b0   :  { %2248 = vperm.xlu1 %2700, %v3955_v6   ;;  %v1381_v44 = vmul.f32 %v3772_v7, %v1333_v15 }
 0x5b5   :  { %v3989_v61 = vpop.permute.xlu0 %2148 }
 0x5b6   :  { %v3991_v18 = vpop.permute.xlu2 %2163 }
 0x5b7   :  { %2323 = vperm.xlu2 %2710, %v3918_v57   ;;  %v2064_v26 = vpop.permute.xlu1 %2063 }
 0x5b8   :  { %v2101_v50 = vmul.f32 %v2064_v26, %v2053_v56  ;;  %2708 = vset.pattern.permute.xlu1 %v2864_v4 }
 0x5b9   :  { %2303 = vperm.xlu1 %2708, %v3905_v24  }
 0x5ba   :  { %2109 = vst.msk [vmem:[#allocation4] sm:$0xff] %vm109_vm0, %v2101_v50 }
 0x5bd   :  { %v1480_v60 = vpop.permute.xlu0 %1479 }
 0x5be   :  { %v1500_v19 = vadd.f32 %v1480_v60, %v1383_v38  ;;  %v1484_v12 = vpop.permute.xlu2 %1483 }
 0x5bf   :  { %v1502_v58 = vadd.f32 %v1484_v12, %v1385_v5  ;;  %2338 = vperm.xlu2 %2710, %v2854_v63   ;;  %v1336_v63 = vld [vmem:[#allocation4 + $0x20] sm:$0xff] }
 0x5c0   :  { %1509 = vst.msk [vmem:[#allocation4 + $0x18] sm:$0xff] %vm1505_vm8, %v1500_v19  ;;  %v2144_v57 = vpop.permute.xlu1 %2143 }
 0x5c1   :  { %1511 = vst.msk [vmem:[#allocation4 + $0x28] sm:$0xff] %vm1505_vm8, %v1502_v58  ;;  %v2133_v4 = vld [vmem:[#allocation4] sm:$0xff]  ;;  %2318 = vperm.xlu1 %2708, %v3937_v42   ;;  %v1846_v42 = vld [vmem:[#allocation4 + $0x10] sm:$0xff] }
 0x5c2   :  { %v2181_v24 = vmul.f32 %v2144_v57, %v2133_v4  ;;  %v1894_v7 = vmul.f32 %v3783_v1, %v1846_v42 }
 0x5c4   :  { %2189 = vst.msk [vmem:[#allocation4] sm:$0xff] %vm993_vm7, %v2181_v24 }
 0x5c5   :  { %v1992_v53 = vpop.permute.xlu0 %1991 }
 0x5c6   :  { %v4003_v8 = vpop.permute.xlu2 %1993 }
 0x5c7   :  { %v1847_v22 = vld [vmem:[#allocation4 + $0x18] sm:$0xff] }
 0x5c8   :  { %v1895_v45 = vmul.f32 %v3818_v49, %v1847_v22  ;;  %v1476_v34 = vpop.permute.xlu1 %1475 }
 0x5c9   :  { %v1498_v51 = vadd.f32 %v1476_v34, %v1381_v44  ;;  %2328 = vperm.xlu1 %2708, %v3955_v6   ;;  %v1338_v34 = vld [vmem:[#allocation4 + $0x30] sm:$0xff] }
 0x5ca   :  { %v2012_v14 = vadd.f32 %v1992_v53, %v1895_v45 }
 0x5cb   :  { %1507 = vst.msk [vmem:[#allocation4 + $0x8] sm:$0xff] %vm1505_vm8, %v1498_v51 }
 0x5cc   :  { %2021 = vst.msk [vmem:[#allocation4 + $0x18] sm:$0xff] %vm2017_vm9, %v2012_v14 }
 0x5cd   :  { %v4022_v0 = vpop.permute.xlu0 %2093 }
 0x5ce   :  { %v1488_v40 = vpop.permute.xlu2 %1487 }
 0x5cf   :  { %v1504_v11 = vadd.f32 %v1488_v40, %v1387_v25 }
 0x5d0   :  { %v1990_v2 = vpop.permute.xlu1 %1989 }
 0x5d1   :  { %1513 = vst.msk [vmem:[#allocation4 + $0x38] sm:$0xff] %vm1505_vm8, %v1504_v11  ;;  %v2011_v49 = vadd.f32 %v1990_v2, %v1894_v7 }
 0x5d2   :  { %v1845_v27 = vld [vmem:[#allocation4 + $0x8] sm:$0xff] }
 0x5d3   :  { %v1893_v54 = vmul.f32 %v3836_v16, %v1845_v27  ;;  %2020 = vst.msk [vmem:[#allocation4 + $0x10] sm:$0xff] %vm2017_vm9, %v2011_v49  ;;  %v2056_v47 = vld [vmem:[#allocation4 + $0x18] sm:$0xff]  ;;  %v2213_v49 = vld [vmem:[#allocation4] sm:$0xff] }
 0x5d5   :  { %v2010_v62 = vadd.f32 %v3966_v33, %v1893_v54  ;;  %v1384_v33 = vmul.f32 %v3794_v52, %v1336_v63 }
 0x5d6   :  { %v2234_v17 = vpop.permute.xlu2 %2233  ;;  %v4031_v31 = vpop.permute.xlu0 %2173 }
 0x5d7   :  { %2019 = vst.msk [vmem:[#allocation4 + $0x8] sm:$0xff] %vm2017_vm9, %v2010_v62 }
 0x5d8   :  { %v2079_v41 = vpop.permute.xlu1 %2078  ;;  %v1851_v50 = vld [vmem:[#allocation4 + $0x38] sm:$0xff] }
 0x5d9   :  { %v2104_v35 = vmul.f32 %v2079_v41, %v2056_v47  ;;  %v1899_v30 = vmul.f32 %v3874_v43, %v1851_v50 }
 0x5da   :  { %v2055_v59 = vld [vmem:[#allocation4 + $0x10] sm:$0xff] }
 0x5db   :  { %v2103_v1 = vmul.f32 %v3972_v48, %v2055_v59  ;;  %2112 = vst.msk [vmem:[#allocation4 + $0x18] sm:$0xff] %vm109_vm0, %v2104_v35  ;;  %v1849_v35 = vld [vmem:[#allocation4 + $0x28] sm:$0xff] }
 0x5dd   :  { %2111 = vst.msk [vmem:[#allocation4 + $0x10] sm:$0xff] %vm109_vm0, %v2103_v1 }
 0x5de   :  { %v2054_v9 = vld [vmem:[#allocation4 + $0x8] sm:$0xff] }
 0x5df   :  { %v2099_v37 = vpop.permute.xlu2 %2098  ;;  %v2102_v16 = vmul.f32 %v3982_v21, %v2054_v9 }
 0x5e1   :  { %v2159_v3 = vpop.permute.xlu1 %2158  ;;  %2110 = vst.msk [vmem:[#allocation4 + $0x8] sm:$0xff] %vm109_vm0, %v2102_v16 }
 0x5e2   :  { %v2136_v13 = vld [vmem:[#allocation4 + $0x18] sm:$0xff] }
 0x5e3   :  { %v2184_v28 = vmul.f32 %v2159_v3, %v2136_v13 }
 0x5e4   :  { %v2135_v6 = vld [vmem:[#allocation4 + $0x10] sm:$0xff] }
 0x5e5   :  { %v2183_v23 = vmul.f32 %v3978_v20, %v2135_v6  ;;  %2192 = vst.msk [vmem:[#allocation4 + $0x18] sm:$0xff] %vm993_vm7, %v2184_v28 }
 0x5e7   :  { %2191 = vst.msk [vmem:[#allocation4 + $0x10] sm:$0xff] %vm993_vm7, %v2183_v23 }
 0x5e8   :  { %v2179_v10 = vpop.permute.xlu2 %2178  ;;  %v2134_v48 = vld [vmem:[#allocation4 + $0x8] sm:$0xff] }
 0x5e9   :  { %v1482_v21 = vpop.permute.xlu1 %1481  ;;  %v2182_v56 = vmul.f32 %v3989_v61, %v2134_v48 }
 0x5ea   :  { %v1501_v26 = vadd.f32 %v1482_v21, %v1384_v33 }
 0x5eb   :  { %2190 = vst.msk [vmem:[#allocation4 + $0x8] sm:$0xff] %vm993_vm7, %v2182_v56 }
 0x5ec   :  { %1510 = vst.msk [vmem:[#allocation4 + $0x20] sm:$0xff] %vm1505_vm8, %v1501_v26  ;;  %v2216_v50 = vld [vmem:[#allocation4 + $0x18] sm:$0xff] }
 0x5ee   :  { %v2215_v20 = vld [vmem:[#allocation4 + $0x10] sm:$0xff] }
 0x5ef   :  { %v2263_v38 = vmul.f32 %v2234_v17, %v2215_v20 }
 0x5f0   :  { %v2000_v5 = vpop.permute.xlu2 %1999 }
 0x5f1   :  { %2271 = vst.msk [vmem:[#allocation4 + $0x10] sm:$0xff] %vm1505_vm8, %v2263_v38  ;;  %v2016_v52 = vadd.f32 %v2000_v5, %v1899_v30  ;;  %v4035_v60 = vpop.permute.xlu1 %2088 }
 0x5f2   :  { %v2214_v44 = vld [vmem:[#allocation4 + $0x8] sm:$0xff] }
 0x5f3   :  { %v1848_v19 = vld [vmem:[#allocation4 + $0x20] sm:$0xff]  ;;  %2025 = vst.msk [vmem:[#allocation4 + $0x38] sm:$0xff] %vm2017_vm9, %v2016_v52 }
 0x5f4   :  { %v1896_v61 = vmul.f32 %v3840_v55, %v1848_v19 }
 0x5f5   :  { %v1998_v12 = vpop.permute.xlu0 %1997 }
 0x5f6   :  { %v2013_v58 = vadd.f32 %v4003_v8, %v1896_v61  ;;  %v1386_v8 = vmul.f32 %v3870_v32, %v1338_v34 }
 0x5f8   :  { %2022 = vst.msk [vmem:[#allocation4 + $0x20] sm:$0xff] %vm2017_vm9, %v2013_v58  ;;  %v2244_v57 = vpop.permute.xlu2 %2243 }
 0x5fa   :  { %v2060_v4 = vld [vmem:[#allocation4 + $0x38] sm:$0xff]  ;;  %v4041_v24 = vpop.permute.xlu1 %2168 }
 0x5fb   :  { %v2108_v43 = vmul.f32 %v2099_v37, %v2060_v4  ;;  %v1897_v37 = vmul.f32 %v3860_v46, %v1849_v35 }
 0x5fd   :  { %2116 = vst.msk [vmem:[#allocation4 + $0x38] sm:$0xff] %vm109_vm0, %v2108_v43  ;;  %v2229_v15 = vpop.permute.xlu0 %2228 }
 0x5fe   :  { %v2262_v22 = vmul.f32 %v2229_v15, %v2214_v44 }
 0x5ff   :  { %v2057_v45 = vld [vmem:[#allocation4 + $0x20] sm:$0xff] }
 0x600   :  { %v2105_v53 = vmul.f32 %v3984_v29, %v2057_v45  ;;  %2270 = vst.msk [vmem:[#allocation4 + $0x8] sm:$0xff] %vm1505_vm8, %v2262_v22  ;;  %v2259_v55 = vpop.permute.xlu2 %2258  ;;  %v2295_v29 = vld [vmem:[#allocation4 + $0x10] sm:$0xff] }
 0x602   :  { %2113 = vst.msk [vmem:[#allocation4 + $0x20] sm:$0xff] %vm109_vm0, %v2105_v53  ;;  %v1486_v51 = vpop.permute.xlu1 %1485 }
 0x603   :  { %v1503_v36 = vadd.f32 %v1486_v51, %v1386_v8 }
 0x604   :  { %v2140_v14 = vld [vmem:[#allocation4 + $0x38] sm:$0xff] }
 0x605   :  { %v2188_v42 = vmul.f32 %v2179_v10, %v2140_v14  ;;  %1512 = vst.msk [vmem:[#allocation4 + $0x30] sm:$0xff] %vm1505_vm8, %v1503_v36  ;;  %v4049_v25 = vpop.permute.xlu0 %2253 }
 0x607   :  { %2196 = vst.msk [vmem:[#allocation4 + $0x38] sm:$0xff] %vm993_vm7, %v2188_v42  ;;  %v2294_v41 = vld [vmem:[#allocation4 + $0x8] sm:$0xff] }
 0x609   :  { %v2137_v40 = vld [vmem:[#allocation4 + $0x20] sm:$0xff]  ;;  %v2314_v11 = vpop.permute.xlu2 %2313 }
 0x60a   :  { %v2185_v7 = vmul.f32 %v3991_v18, %v2137_v40  ;;  %v2343_v2 = vmul.f32 %v2314_v11, %v2295_v29  ;;  %v2224_v32 = vpop.permute.xlu1 %2223 }
 0x60b   :  { %v2261_v27 = vmul.f32 %v2224_v32, %v2213_v49 }
 0x60c   :  { %2193 = vst.msk [vmem:[#allocation4 + $0x20] sm:$0xff] %vm993_vm7, %v2185_v7  ;;  %v1850_v54 = vld [vmem:[#allocation4 + $0x30] sm:$0xff] }
 0x60d   :  { %v1898_v62 = vmul.f32 %v3816_v39, %v1850_v54  ;;  %2351 = vst.msk [vmem:[#allocation4 + $0x10] sm:$0xff] %vm2017_vm9, %v2343_v2 }
 0x60e   :  { %v2220_v17 = vld [vmem:[#allocation4 + $0x38] sm:$0xff]  ;;  %2269 = vst.msk [vmem:[#allocation4] sm:$0xff] %vm1505_vm8, %v2261_v27  ;;  %v2309_v47 = vpop.permute.xlu0 %2308 }
 0x60f   :  { %v2268_v59 = vmul.f32 %v2259_v55, %v2220_v17  ;;  %v2015_v1 = vadd.f32 %v1998_v12, %v1898_v62  ;;  %v2342_v18 = vmul.f32 %v2309_v47, %v2294_v41 }
 0x611   :  { %2276 = vst.msk [vmem:[#allocation4 + $0x38] sm:$0xff] %vm1505_vm8, %v2268_v59  ;;  %v2324_v9 = vpop.permute.xlu2 %2323 }
 0x612   :  { %2024 = vst.msk [vmem:[#allocation4 + $0x30] sm:$0xff] %vm2017_vm9, %v2015_v1  ;;  %v1996_v16 = vpop.permute.xlu1 %1995 }
 0x613   :  { %v2217_v39 = vld [vmem:[#allocation4 + $0x20] sm:$0xff]  ;;  %2350 = vst.msk [vmem:[#allocation4 + $0x8] sm:$0xff] %vm2017_vm9, %v2342_v18  ;;  %v2014_v3 = vadd.f32 %v1996_v16, %v1897_v37 }
 0x614   :  { %v2265_v13 = vmul.f32 %v2244_v57, %v2217_v39  ;;  %v2359_v28 = vld [vmem:[#allocation4 + $0x10] sm:$0xff] }
 0x615   :  { %v2367_v6 = vpack.c.bf16 %v2359_v28, %v2359_v28  ;;  %2023 = vst.msk [vmem:[#allocation4 + $0x28] sm:$0xff] %vm2017_vm9, %v2014_v3 }
 0x616   :  { %2273 = vst.msk [vmem:[#allocation4 + $0x20] sm:$0xff] %vm1505_vm8, %v2265_v13  ;;  %v2334_v36 = vpop.permute.xlu0 %2333 }
 0x617   :  { %2376 = vst.msk [vmem:[%s4116_s3 + $0x8] sm:$0xf] %vm2373_vm10, %v2367_v6 }
 0x618   :  { %v2300_v46 = vld [vmem:[#allocation4 + $0x38] sm:$0xff] }
 0x619   :  { %v2059_v23 = vld [vmem:[#allocation4 + $0x30] sm:$0xff]  ;;  %v2339_v63 = vpop.permute.xlu2 %2338 }
 0x61a   :  { %v2107_v33 = vmul.f32 %v4022_v0, %v2059_v23  ;;  %v2358_v10 = vld [vmem:[#allocation4 + $0x8] sm:$0xff]  ;;  %v2348_v48 = vmul.f32 %v2339_v63, %v2300_v46  ;;  %v2239_v21 = vpop.permute.xlu1 %2238 }
 0x61b   :  { %v2366_v56 = vpack.c.bf16 %v2358_v10, %v2358_v10  ;;  %v2264_v30 = vmul.f32 %v2239_v21, %v2216_v50 }
 0x61c   :  { %2115 = vst.msk [vmem:[#allocation4 + $0x30] sm:$0xff] %vm109_vm0, %v2107_v33  ;;  %v2058_v26 = vld [vmem:[#allocation4 + $0x28] sm:$0xff] }
 0x61d   :  { %2375 = vst.msk [vmem:[%s4116_s3 + $0x4] sm:$0xf] %vm2373_vm10, %v2366_v56  ;;  %v2297_v20 = vld [vmem:[#allocation4 + $0x20] sm:$0xff]  ;;  %v2106_v38 = vmul.f32 %v4035_v60, %v2058_v26 }
 0x61e   :  { %v2345_v5 = vmul.f32 %v2324_v9, %v2297_v20  ;;  %2356 = vst.msk [vmem:[#allocation4 + $0x38] sm:$0xff] %vm2017_vm9, %v2348_v48 }
 0x61f   :  { %2114 = vst.msk [vmem:[#allocation4 + $0x28] sm:$0xff] %vm109_vm0, %v2106_v38 }
 0x620   :  { %2353 = vst.msk [vmem:[#allocation4 + $0x20] sm:$0xff] %vm2017_vm9, %v2345_v5 }
 0x621   :  { %2272 = vst.msk [vmem:[#allocation4 + $0x18] sm:$0xff] %vm1505_vm8, %v2264_v30 }
 0x622   :  { %v2249_v0 = vpop.permute.xlu1 %2248 }
 0x623   :  { %v2139_v52 = vld [vmem:[#allocation4 + $0x30] sm:$0xff] }
 0x624   :  { %v2187_v19 = vmul.f32 %v4031_v31, %v2139_v52  ;;  %v2293_v31 = vld [vmem:[#allocation4] sm:$0xff] }
 0x625   :  { %v2364_v61 = vld [vmem:[#allocation4 + $0x38] sm:$0xff] }
 0x626   :  { %2195 = vst.msk [vmem:[#allocation4 + $0x30] sm:$0xff] %vm993_vm7, %v2187_v19  ;;  %v2372_v12 = vpack.c.bf16 %v2364_v61, %v2364_v61  ;;  %v2138_v58 = vld [vmem:[#allocation4 + $0x28] sm:$0xff] }
 0x627   :  { %v2361_v60 = vld [vmem:[#allocation4 + $0x20] sm:$0xff]  ;;  %v2186_v57 = vmul.f32 %v4041_v24, %v2138_v58 }
 0x628   :  { %v2369_v4 = vpack.c.bf16 %v2361_v60, %v2361_v60  ;;  %2381 = vst.msk [vmem:[%s4116_s3 + $0x1c] sm:$0xf] %vm2373_vm10, %v2372_v12  ;;  %v2296_v34 = vld [vmem:[#allocation4 + $0x18] sm:$0xff] }
 0x629   :  { %2194 = vst.msk [vmem:[#allocation4 + $0x28] sm:$0xff] %vm993_vm7, %v2186_v57 }
 0x62a   :  { %2378 = vst.msk [vmem:[%s4116_s3 + $0x10] sm:$0xf] %vm2373_vm10, %v2369_v4 }
 0x62b   :  { %v2304_v43 = vpop.permute.xlu1 %2303 }
 0x62c   :  { %v2341_v15 = vmul.f32 %v2304_v43, %v2293_v31 }
 0x62d   :  { %v2219_v44 = vld [vmem:[#allocation4 + $0x30] sm:$0xff] }
 0x62e   :  { %v2267_v22 = vmul.f32 %v4049_v25, %v2219_v44  ;;  %2349 = vst.msk [vmem:[#allocation4] sm:$0xff] %vm2017_vm9, %v2341_v15 }
 0x630   :  { %2275 = vst.msk [vmem:[#allocation4 + $0x30] sm:$0xff] %vm1505_vm8, %v2267_v22  ;;  %v2218_v24 = vld [vmem:[#allocation4 + $0x28] sm:$0xff] }
 0x631   :  { %v2266_v45 = vmul.f32 %v2249_v0, %v2218_v24 }
 0x633   :  { %2274 = vst.msk [vmem:[#allocation4 + $0x28] sm:$0xff] %vm1505_vm8, %v2266_v45  ;;  %v2319_v53 = vpop.permute.xlu1 %2318 }
 0x634   :  { %v2344_v55 = vmul.f32 %v2319_v53, %v2296_v34 }
 0x635   :  { %v2357_v8 = vld [vmem:[#allocation4] sm:$0xff] }
 0x636   :  { %v2365_v51 = vpack.c.bf16 %v2357_v8, %v2357_v8  ;;  %2352 = vst.msk [vmem:[#allocation4 + $0x18] sm:$0xff] %vm2017_vm9, %v2344_v55 }
 0x637   :  { %v2299_v14 = vld [vmem:[#allocation4 + $0x30] sm:$0xff] }
 0x638   :  { %v2347_v42 = vmul.f32 %v2334_v36, %v2299_v14  ;;  %2374 = vst.msk [vmem:[%s4116_s3] sm:$0xf] %vm2373_vm10, %v2365_v51 }
 0x63a   :  { %2355 = vst.msk [vmem:[#allocation4 + $0x30] sm:$0xff] %vm2017_vm9, %v2347_v42  ;;  %v2298_v25 = vld [vmem:[#allocation4 + $0x28] sm:$0xff] }
 0x63b   :  { %v2329_v40 = vpop.permute.xlu1 %2328 }
 0x63c   :  { %v2346_v11 = vmul.f32 %v2329_v40, %v2298_v25 }
 0x63d   :  { %v2360_v29 = vld [vmem:[#allocation4 + $0x18] sm:$0xff] }
 0x63e   :  { %v2368_v7 = vpack.c.bf16 %v2360_v29, %v2360_v29  ;;  %2354 = vst.msk [vmem:[#allocation4 + $0x28] sm:$0xff] %vm2017_vm9, %v2346_v11 }
 0x640   :  { %2377 = vst.msk [vmem:[%s4116_s3 + $0xc] sm:$0xf] %vm2373_vm10, %v2368_v7 }
 0x641   :  { %v2363_v2 = vld [vmem:[#allocation4 + $0x30] sm:$0xff] }
 0x642   :  { %v2371_v49 = vpack.c.bf16 %v2363_v2, %v2363_v2 }
 0x644   :  { %2380 = vst.msk [vmem:[%s4116_s3 + $0x18] sm:$0xf] %vm2373_vm10, %v2371_v49 }
 0x645   :  { %v2362_v32 = vld [vmem:[#allocation4 + $0x28] sm:$0xff] }
 0x646   :  { %v2370_v27 = vpack.c.bf16 %v2362_v32, %v2362_v32 }
 0x648   :  { %2379 = vst.msk [vmem:[%s4116_s3 + $0x14] sm:$0xf] %vm2373_vm10, %v2370_v27 }

// kernel: sam_encoder_nuke_forward.27
= control target key start
LH: loop header
LB: loop body
LE: loop exit
PB: predicated region body
PF: predicated region fallthrough
CT: control target
= control target key end

     0   :  { %vm30_vm0 = vcmask 523264   ;;  %v299_v20 = vmov 64.0   ;;  %vm246_vm5 = vcmask 519168   ;;  %s507_s0 = inlined_call_operand.vmem [shape: bf16[64,64], index: 0, kind: input, shape index: {}]   ;;  %s508_s1 = inlined_call_operand.vmem [shape: f32[1,64], index: 1, kind: input, shape index: {}]   ;;  %s509_s2 = inlined_call_operand.vmem [shape: f32[1,64], index: 2, kind: input, shape index: {}]   ;;  %s510_s3 = inlined_call_operand.vmem [shape: bf16[64,64], index: 3, kind: output, shape index: {}]  }
   0x1   :  { %v323_v0 = vld [vmem:[%s507_s0 + $0x10] sm:$0xff]   ;;  %v275_v1 = vld [vmem:[%s507_s0 + $0x8] sm:$0xff]   ;;  %v260_v2 = vld [vmem:[%s507_s0] sm:$0xff]   ;;  %281 = vrcp.f32 %v299_v20 }
   0x2   :  { %v269_v3 = vunpack.c.l.bf16 %v323_v0  ;;  %v265_v4 = vunpack.c.l.bf16 %v275_v1  ;;  %v261_v5 = vunpack.c.l.bf16 %v260_v2  ;;  %v270_v9 = vunpack.c.h.bf16 %v323_v0  ;;  %v277_v15 = vld [vmem:[%s507_s0 + $0x18] sm:$0xff]  }
   0x3   :  { %v266_v10 = vunpack.c.h.bf16 %v275_v1  ;;  %v262_v11 = vunpack.c.h.bf16 %v260_v2  ;;  %v274_v16 = vunpack.c.h.bf16 %v277_v15  ;;  %v273_v17 = vunpack.c.l.bf16 %v277_v15 }
   0x4   :  { %v43_v6 = vsel %vm30_vm0, %v269_v3, 0.0  ;;  %v37_v7 = vsel %vm30_vm0, %v265_v4, 0.0  ;;  %v31_v8 = vsel %vm30_vm0, %v261_v5, 0.0  ;;  %v46_v12 = vsel %vm30_vm0, %v270_v9, 0.0 }
   0x5   :  { %44 = vadd.xlane.f32.xlu2 %v43_v6  ;;  %38 = vadd.xlane.f32.xlu1 %v37_v7  ;;  %v40_v13 = vsel %vm30_vm0, %v266_v10, 0.0  ;;  %v34_v14 = vsel %vm30_vm0, %v262_v11, 0.0  ;;  %v52_v18 = vsel %vm30_vm0, %v274_v16, 0.0  ;;  %v49_v19 = vsel %vm30_vm0, %v273_v17, 0.0 }
   0x6   :  { %32 = vadd.xlane.f32.xlu0 %v31_v8 }
   0x7   :  { %v282_v21 = vpop.eup %281 }
   0x8   :  { %v56_v22 = vmul.f32 64.0, %v282_v21  ;;  %vm60_vm1 = vweird.f32 %v282_v21 }
   0xa   :  { %v57_v23 = vsub.f32 1.0, %v56_v22 }
   0xc   :  { %v58_v24 = vmul.f32 %v282_v21, %v57_v23 }
   0xd   :  { %47 = vadd.xlane.f32.xlu2 %v46_v12  ;;  %41 = vadd.xlane.f32.xlu1 %v40_v13 }
   0xe   :  { %35 = vadd.xlane.f32.xlu0 %v34_v14  ;;  %v59_v25 = vadd.f32 %v282_v21, %v58_v24 }
  0x10   :  { %v344_v26 = vsel %vm60_vm1, %v282_v21, %v59_v25 }
  0x15   :  { %53 = vadd.xlane.f32.xlu1 %v52_v18 }
  0x16   :  { %50 = vadd.xlane.f32.xlu0 %v49_v19 }
  0x78   :  { %v45_v27 = vpop.xlane.xlu2 %44  ;;  %v39_v28 = vpop.xlane.xlu1 %38 }
  0x79   :  { %v64_v29 = vmul.f32 %v344_v26, %v39_v28  ;;  %v33_v30 = vpop.xlane.xlu0 %32  ;;  %v66_v43 = vmul.f32 %v344_v26, %v45_v27 }
  0x7a   :  { %v62_v31 = vmul.f32 %v344_v26, %v33_v30 }
  0x7b   :  { %v348_v32 = vsub.f32 %v265_v4, %v64_v29  ;;  %v372_v50 = vsub.f32 %v269_v3, %v66_v43 }
  0x7c   :  { %v350_v33 = vsub.f32 %v261_v5, %v62_v31 }
  0x7d   :  { %v80_v34 = vmul.f32 %v348_v32, %v348_v32  ;;  %v82_v59 = vmul.f32 %v372_v50, %v372_v50 }
  0x7e   :  { %v78_v35 = vmul.f32 %v350_v33, %v350_v33 }
  0x7f   :  { %v92_v36 = vsel %vm30_vm0, %v80_v34, 0.0  ;;  %v98_v62 = vsel %vm30_vm0, %v82_v59, 0.0 }
  0x80   :  { %v48_v37 = vpop.xlane.xlu2 %47  ;;  %93 = vadd.xlane.f32.xlu1 %v92_v36  ;;  %v42_v38 = vpop.xlane.xlu1 %41  ;;  %v86_v39 = vsel %vm30_vm0, %v78_v35, 0.0 }
  0x81   :  { %v67_v40 = vmul.f32 %v344_v26, %v48_v37  ;;  %v65_v41 = vmul.f32 %v344_v26, %v42_v38  ;;  %87 = vadd.xlane.f32.xlu2 %v86_v39  ;;  %v36_v42 = vpop.xlane.xlu0 %35 }
  0x82   :  { %v63_v44 = vmul.f32 %v344_v26, %v36_v42 }
  0x83   :  { %v362_v45 = vsub.f32 %v270_v9, %v67_v40  ;;  %v364_v46 = vsub.f32 %v266_v10, %v65_v41  ;;  %v412_v41 = vld [vmem:[%s508_s1] ss:$0 sm:$0xff] }
  0x84   :  { %v366_v47 = vsub.f32 %v262_v11, %v63_v44 }
  0x85   :  { %v83_v48 = vmul.f32 %v362_v45, %v362_v45  ;;  %v81_v49 = vmul.f32 %v364_v46, %v364_v46 }
  0x86   :  { %v79_v51 = vmul.f32 %v366_v47, %v366_v47 }
  0x87   :  { %v101_v52 = vsel %vm30_vm0, %v83_v48, 0.0  ;;  %v95_v53 = vsel %vm30_vm0, %v81_v49, 0.0 }
  0x88   :  { %102 = vadd.xlane.f32.xlu1 %v101_v52  ;;  %v89_v54 = vsel %vm30_vm0, %v79_v51, 0.0  ;;  %v54_v55 = vpop.xlane.xlu1 %53  ;;  %v422_v52 = vld [vmem:[%s509_s2] ss:$0 sm:$0xff] }
  0x89   :  { %96 = vadd.xlane.f32.xlu2 %v95_v53  ;;  %90 = vadd.xlane.f32.xlu0 %v89_v54  ;;  %v51_v56 = vpop.xlane.xlu0 %50  ;;  %v69_v58 = vmul.f32 %v344_v26, %v54_v55 }
  0x8a   :  { %v68_v57 = vmul.f32 %v344_v26, %v51_v56 }
  0x8b   :  { %v385_v61 = vsub.f32 %v274_v16, %v69_v58 }
  0x8c   :  { %v383_v60 = vsub.f32 %v273_v17, %v68_v57 }
  0x8d   :  { %v85_v1 = vmul.f32 %v385_v61, %v385_v61 }
  0x8e   :  { %v84_v63 = vmul.f32 %v383_v60, %v383_v60 }
  0x8f   :  { %v107_v2 = vsel %vm30_vm0, %v85_v1, 0.0 }
  0x90   :  { %v104_v0 = vsel %vm30_vm0, %v84_v63, 0.0 }
  0x91   :  { %99 = vadd.xlane.f32.xlu0 %v98_v62  ;;  %105 = vadd.xlane.f32.xlu2 %v104_v0 }
  0x99   :  { %108 = vadd.xlane.f32.xlu0 %v107_v2 }
  0xf3   :  { %v94_v3 = vpop.xlane.xlu1 %93 }
  0xf4   :  { %v112_v4 = vmul.f32 %v94_v3, %v344_v26  ;;  %v88_v5 = vpop.xlane.xlu2 %87 }
  0xf5   :  { %v110_v6 = vmul.f32 %v88_v5, %v344_v26 }
  0xf6   :  { %v120_v7 = vadd.f32 1e-06, %v112_v4 }
  0xf7   :  { %v118_v8 = vadd.f32 1e-06, %v110_v6 }
  0xf8   :  { %283 = vrsqrt.f32 %v120_v7  ;;  %vm152_vm2 = vweird.f32 %v120_v7 }
  0xf9   :  { %285 = vrsqrt.f32 %v118_v8  ;;  %vm132_vm7 = vweird.f32 %v118_v8 }
  0xfb   :  { %v103_v9 = vpop.xlane.xlu1 %102 }
  0xfc   :  { %v115_v10 = vmul.f32 %v103_v9, %v344_v26  ;;  %v97_v11 = vpop.xlane.xlu2 %96  ;;  %v91_v12 = vpop.xlane.xlu0 %90 }
  0xfd   :  { %v113_v13 = vmul.f32 %v97_v11, %v344_v26  ;;  %v111_v14 = vmul.f32 %v91_v12, %v344_v26 }
  0xfe   :  { %v284_v15 = vpop.eup %283  ;;  %v123_v16 = vadd.f32 1e-06, %v115_v10 }
  0xff   :  { %v286_v17 = vpop.eup %285  ;;  %v147_v18 = vmul.f32 %v284_v15, %v120_v7  ;;  %v399_v19 = vadd.f32 1e-06, %v113_v13  ;;  %v401_v20 = vadd.f32 1e-06, %v111_v14  ;;  %vm153_vm3 = vweird.f32 %v284_v15 }
 0x100   :  { %v127_v21 = vmul.f32 %v286_v17, %v118_v8  ;;  %287 = vrsqrt.f32 %v123_v16  ;;  %vm133_vm4 = vweird.f32 %v286_v17  ;;  %vm154_vm6 = vmor %vm152_vm2, %vm153_vm3  ;;  %vm182_vm9 = vweird.f32 %v123_v16 }
 0x101   :  { %v148_v22 = vmul.f32 %v284_v15, %v147_v18  ;;  %289 = vrsqrt.f32 %v399_v19  ;;  %vm134_vm8 = vmor %vm132_vm7, %vm133_vm4  ;;  %vm162_vm11 = vweird.f32 %v399_v19  ;;  %vm142_vm15 = vweird.f32 %v401_v20 }
 0x102   :  { %v128_v23 = vmul.f32 %v286_v17, %v127_v21  ;;  %291 = vrsqrt.f32 %v401_v20 }
 0x103   :  { %v149_v24 = vmul.f32 0.5, %v148_v22 }
 0x104   :  { %v129_v25 = vmul.f32 0.5, %v128_v23  ;;  %v106_v27 = vpop.xlane.xlu2 %105  ;;  %v100_v28 = vpop.xlane.xlu0 %99 }
 0x105   :  { %v150_v29 = vsub.f32 1.5, %v149_v24  ;;  %v116_v30 = vmul.f32 %v106_v27, %v344_v26  ;;  %v114_v31 = vmul.f32 %v100_v28, %v344_v26 }
 0x106   :  { %v288_v34 = vpop.eup %287  ;;  %v130_v35 = vsub.f32 1.5, %v129_v25 }
 0x107   :  { %v290_v36 = vpop.eup %289  ;;  %v151_v37 = vmul.f32 %v284_v15, %v150_v29  ;;  %v177_v38 = vmul.f32 %v288_v34, %v123_v16  ;;  %v407_v39 = vadd.f32 1e-06, %v116_v30  ;;  %v416_v44 = vadd.f32 1e-06, %v114_v31 }
 0x108   :  { %v292_v40 = vpop.eup %291  ;;  %v131_v42 = vmul.f32 %v286_v17, %v130_v35  ;;  %v157_v43 = vmul.f32 %v290_v36, %v399_v19  ;;  %vm183_vm10 = vweird.f32 %v288_v34  ;;  %vm163_vm13 = vweird.f32 %v290_v36 }
 0x109   :  { %v155_v48 = vsel %vm154_vm6, %v284_v15, %v151_v37  ;;  %v178_v49 = vmul.f32 %v288_v34, %v177_v38  ;;  %v137_v51 = vmul.f32 %v292_v40, %v401_v20  ;;  %293 = vrsqrt.f32 %v407_v39  ;;  %vm434_vm12 = vmor %vm182_vm9, %vm183_vm10 }
 0x10a   :  { %v208_v53 = vmul.f32 %v155_v48, %v348_v32  ;;  %v135_v54 = vsel %vm134_vm8, %v286_v17, %v131_v42  ;;  %v158_v55 = vmul.f32 %v290_v36, %v157_v43  ;;  %295 = vrsqrt.f32 %v416_v44  ;;  %vm164_vm0 = vmor %vm162_vm11, %vm163_vm13 }
 0x10b   :  { %v206_v56 = vmul.f32 %v135_v54, %v350_v33  ;;  %v179_v57 = vmul.f32 0.5, %v178_v49  ;;  %v138_v58 = vmul.f32 %v292_v40, %v137_v51  ;;  %vm143_vm14 = vweird.f32 %v292_v40 }
 0x10c   :  { %v220_v59 = vmul.f32 %v412_v41, %v208_v53  ;;  %v159_v62 = vmul.f32 0.5, %v158_v55  ;;  %v109_v63 = vpop.xlane.xlu0 %108  ;;  %vm144_vm1 = vmor %vm142_vm15, %vm143_vm14  ;;  %vm192_vm2 = vweird.f32 %v407_v39  ;;  %vm172_vm7 = vweird.f32 %v416_v44 }
 0x10d   :  { %v218_v0 = vmul.f32 %v412_v41, %v206_v56  ;;  %v180_v32 = vsub.f32 1.5, %v179_v57  ;;  %v139_v1 = vmul.f32 0.5, %v138_v58  ;;  %v117_v2 = vmul.f32 %v109_v63, %v344_v26 }
 0x10e   :  { %v232_v3 = vadd.f32 %v422_v52, %v220_v59  ;;  %v160_v4 = vsub.f32 1.5, %v159_v62 }
 0x10f   :  { %v230_v5 = vadd.f32 %v422_v52, %v218_v0  ;;  %v181_v6 = vmul.f32 %v288_v34, %v180_v32  ;;  %v140_v7 = vsub.f32 1.5, %v139_v1  ;;  %v439_v8 = vadd.f32 1e-06, %v117_v2  ;;  %v294_v9 = vpop.eup %293 }
 0x110   :  { %v240_v10 = vpack.c.bf16 %v232_v3, %v232_v3  ;;  %v161_v11 = vmul.f32 %v290_v36, %v160_v4  ;;  %v187_v14 = vmul.f32 %v294_v9, %v407_v39  ;;  %v296_v15 = vpop.eup %295  ;;  %vm193_vm3 = vweird.f32 %v294_v9 }
 0x111   :  { %v238_v26 = vpack.c.bf16 %v230_v5, %v230_v5  ;;  %v185_v12 = vsel %vm434_vm12, %v288_v34, %v181_v6  ;;  %v141_v13 = vmul.f32 %v292_v40, %v140_v7  ;;  %297 = vrsqrt.f32 %v439_v8  ;;  %vm194_vm6 = vmor %vm192_vm2, %vm193_vm3 }
 0x112   :  { %249 = vst.msk [vmem:[%s510_s3 + $0x8] sm:$0xf] %vm246_vm5, %v240_v10  ;;  %v211_v16 = vmul.f32 %v185_v12, %v362_v45  ;;  %v165_v17 = vsel %vm164_vm0, %v290_v36, %v161_v11  ;;  %v188_v20 = vmul.f32 %v294_v9, %v187_v14  ;;  %v167_v21 = vmul.f32 %v296_v15, %v416_v44 }
 0x113   :  { %247 = vst.msk [vmem:[%s510_s3] sm:$0xf] %vm246_vm5, %v238_v26  ;;  %v209_v18 = vmul.f32 %v165_v17, %v364_v46  ;;  %v145_v19 = vsel %vm144_vm1, %v292_v40, %v141_v13  ;;  %vm173_vm4 = vweird.f32 %v296_v15  ;;  %vm202_vm10 = vweird.f32 %v439_v8 }
 0x114   :  { %v223_v22 = vmul.f32 %v412_v41, %v211_v16  ;;  %v207_v45 = vmul.f32 %v145_v19, %v366_v47  ;;  %v189_v24 = vmul.f32 0.5, %v188_v20  ;;  %v168_v25 = vmul.f32 %v296_v15, %v167_v21  ;;  %vm174_vm8 = vmor %vm172_vm7, %vm173_vm4 }
 0x115   :  { %v221_v23 = vmul.f32 %v412_v41, %v209_v18 }
 0x116   :  { %v235_v27 = vadd.f32 %v422_v52, %v223_v22  ;;  %v219_v28 = vmul.f32 %v412_v41, %v207_v45  ;;  %v190_v29 = vsub.f32 1.5, %v189_v24  ;;  %v169_v30 = vmul.f32 0.5, %v168_v25 }
 0x117   :  { %v233_v46 = vadd.f32 %v422_v52, %v221_v23  ;;  %v298_v31 = vpop.eup %297 }
 0x118   :  { %v243_v34 = vpack.c.bf16 %v235_v27, %v235_v27  ;;  %v231_v35 = vadd.f32 %v422_v52, %v219_v28  ;;  %v191_v36 = vmul.f32 %v294_v9, %v190_v29  ;;  %v170_v37 = vsub.f32 1.5, %v169_v30 }
 0x119   :  { %v241_v47 = vpack.c.bf16 %v233_v46, %v233_v46  ;;  %v197_v38 = vmul.f32 %v298_v31, %v439_v8  ;;  %vm203_vm9 = vweird.f32 %v298_v31 }
 0x11a   :  { %252 = vst.msk [vmem:[%s510_s3 + $0x14] sm:$0xf] %vm246_vm5, %v243_v34  ;;  %v239_v40 = vpack.c.bf16 %v231_v35, %v231_v35  ;;  %v195_v42 = vsel %vm194_vm6, %v294_v9, %v191_v36  ;;  %v171_v43 = vmul.f32 %v296_v15, %v170_v37  ;;  %vm204_vm11 = vmor %vm202_vm10, %vm203_vm9 }
 0x11b   :  { %250 = vst.msk [vmem:[%s510_s3 + $0xc] sm:$0xf] %vm246_vm5, %v241_v47  ;;  %v198_v48 = vmul.f32 %v298_v31, %v197_v38  ;;  %v212_v49 = vmul.f32 %v195_v42, %v383_v60 }
 0x11c   :  { %248 = vst.msk [vmem:[%s510_s3 + $0x4] sm:$0xf] %vm246_vm5, %v239_v40  ;;  %v175_v39 = vsel %vm174_vm8, %v296_v15, %v171_v43 }
 0x11d   :  { %v199_v51 = vmul.f32 0.5, %v198_v48  ;;  %v224_v53 = vmul.f32 %v412_v41, %v212_v49  ;;  %v210_v54 = vmul.f32 %v175_v39, %v372_v50 }
 0x11f   :  { %v200_v55 = vsub.f32 1.5, %v199_v51  ;;  %v236_v44 = vadd.f32 %v422_v52, %v224_v53  ;;  %v222_v56 = vmul.f32 %v412_v41, %v210_v54 }
 0x121   :  { %v201_v57 = vmul.f32 %v298_v31, %v200_v55  ;;  %v244_v58 = vpack.c.bf16 %v236_v44, %v236_v44  ;;  %v234_v60 = vadd.f32 %v422_v52, %v222_v56 }
 0x123   :  { %v205_v59 = vsel %vm204_vm11, %v298_v31, %v201_v57  ;;  %253 = vst.msk [vmem:[%s510_s3 + $0x18] sm:$0xf] %vm246_vm5, %v244_v58  ;;  %v242_v50 = vpack.c.bf16 %v234_v60, %v234_v60 }
 0x124   :  { %v213_v62 = vmul.f32 %v205_v59, %v385_v61 }
 0x125   :  { %251 = vst.msk [vmem:[%s510_s3 + $0x10] sm:$0xf] %vm246_vm5, %v242_v50 }
 0x126   :  { %v225_v63 = vmul.f32 %v412_v41, %v213_v62 }
 0x128   :  { %v237_v0 = vadd.f32 %v422_v52, %v225_v63 }
 0x12a   :  { %v245_v32 = vpack.c.bf16 %v237_v0, %v237_v0 }
 0x12c   :  { %254 = vst.msk [vmem:[%s510_s3 + $0x1c] sm:$0xf] %vm246_vm5, %v245_v32 }

// kernel: sam_encoder_nuke_forward.28
= control target key start
LH: loop header
LB: loop body
LE: loop exit
PB: predicated region body
PF: predicated region fallthrough
CT: control target
= control target key end

     0   :  { %vm40_vm0 = vsmask.f32 3328  ;;  %vm41_vm1 = vsmask.f32 7440  ;;  %vm200_vm2 = vcmask 523264   ;;  %vm335_vm4 = vcmask 1042432   ;;  %s2579_s1 = inlined_call_operand.vmem [shape: bf16[9,64,64], index: 1, kind: input, shape index: {}]   ;;  %s2580_s0 = inlined_call_operand.vmem [shape: bf16[10,10,64], index: 0, kind: input, shape index: {}]   ;;  %s2581_s2 = inlined_call_operand.vmem [shape: bf16[64,64], index: 2, kind: output, shape index: {}]  }
   0x1   :  { %v1770_v0 = vld [vmem:[%s2579_s1 + $0x38] sm:$0xff]  ;;  %v1769_v1 = vld [vmem:[%s2579_s1 + $0x30] sm:$0xff]  ;;  %v1869_v12 = vld [vmem:[%s2580_s0 + $0x20] sm:$0xf]  ;;  %vm336_vm5 = vcmask 1046532   ;;  %vm1396_vm7 = vcmask 519168  }
   0x2   :  { %v1843_v2 = vld [vmem:[%s2580_s0 + $0x10] sm:$0xf]  ;;  %v1848_v3 = vld [vmem:[%s2580_s0 + $0x14] sm:$0x1]  ;;  %1807 = vmatpush.bf16.msra.mxu1 %v1770_v0  ;;  %1808 = vmatpush.bf16.msra.mxu2 %v1770_v0  ;;  %v1853_v4 = vld [vmem:[%s2580_s0 + $0x18] sm:$0xf] }
   0x3   :  { %v1858_v5 = vld [vmem:[%s2580_s0 + $0x1c] sm:$0x1]  ;;  %v72_v6 = vshrl.u32 %v1843_v2, 16  ;;  %v75_v7 = vshll.u32 %v1843_v2, 16  ;;  %1809 = vmatpush.bf16.msra.mxu3 %v1770_v0  ;;  %217 = vmatpush.bf16.msra.mxu0 %v1770_v0  ;;  %v81_v8 = vshll.u32 %v1848_v3, 16  ;;  %v86_v9 = vshrl.u32 %v1853_v4, 16  ;;  %vm1894_vm3 = vmor %vm40_vm0, %vm41_vm1 }
   0x4   :  { %v89_v10 = vshll.u32 %v1853_v4, 16  ;;  %v95_v11 = vshll.u32 %v1858_v5, 16  ;;  %v1874_v15 = vld [vmem:[%s2580_s0 + $0x24] sm:$0x1]  ;;  %v1879_v16 = vld [vmem:[%s2580_s0 + $0x28] sm:$0xf]  ;;  %vm2010_vm6 = vmor %vm335_vm4, %vm336_vm5 }
   0x5   :  { %v74_v13 = vrot.slane %v72_v6, 4  ;;  %v77_v14 = vrot.slane %v75_v7, 5  ;;  %v83_v17 = vrot.slane %v81_v8, 5  ;;  %v88_v18 = vrot.slane %v86_v9, 4  ;;  %v1884_v21 = vld [vmem:[%s2580_s0 + $0x2c] sm:$0x1] }
   0x6   :  { %v91_v19 = vrot.slane %v89_v10, 5  ;;  %v97_v20 = vrot.slane %v95_v11, 5  ;;  %1810 = vmatpush.bf16.msra.mxu1 %v1769_v1  ;;  %1811 = vmatpush.bf16.msra.mxu2 %v1769_v1  ;;  %v1768_v22 = vld [vmem:[%s2579_s1 + $0x28] sm:$0xff]  ;;  %v100_v24 = vshrl.u32 %v1869_v12, 16  ;;  %v103_v25 = vshll.u32 %v1869_v12, 16  ;;  %v1767_v42 = vld [vmem:[%s2579_s1 + $0x20] sm:$0xff] }
   0x7   :  { %v78_v23 = vor.u32 %v77_v14, %v74_v13  ;;  %v109_v26 = vshll.u32 %v1874_v15, 16  ;;  %1812 = vmatpush.bf16.msra.mxu3 %v1769_v1  ;;  %218 = vmatpush.bf16.msra.mxu0 %v1769_v1  ;;  %v114_v29 = vshrl.u32 %v1879_v16, 16  ;;  %v117_v30 = vshll.u32 %v1879_v16, 16  ;;  %v1904_v32 = vld [vmem:[%s2580_s0 + $0x30] sm:$0xf]  ;;  %v1774_v57 = vld [vmem:[%s2579_s1 + $0x58] sm:$0xff] }
   0x8   :  { %v92_v28 = vor.u32 %v91_v19, %v88_v18  ;;  %v123_v31 = vshll.u32 %v1884_v21, 16  ;;  %v102_v34 = vrot.slane %v100_v24, 4  ;;  %v105_v35 = vrot.slane %v103_v25, 5  ;;  %v1909_v37 = vld [vmem:[%s2580_s0 + $0x34] sm:$0x1]  ;;  %v1766_v58 = vld [vmem:[%s2579_s1 + $0x18] sm:$0xff] }
   0x9   :  { %v79_v33 = vrot.slane %v78_v23, 4  ;;  %v111_v36 = vrot.slane %v109_v26, 5  ;;  %v116_v39 = vrot.slane %v114_v29, 4  ;;  %v119_v40 = vrot.slane %v117_v30, 5  ;;  %v1919_v45 = vld [vmem:[%s2580_s0 + $0x38] sm:$0xf] }
   0xa   :  { %v93_v38 = vrot.slane %v92_v28, 4  ;;  %v125_v41 = vrot.slane %v123_v31, 5  ;;  %1813 = vmatpush.bf16.msra.mxu1 %v1768_v22  ;;  %1814 = vmatpush.bf16.msra.mxu2 %v1768_v22  ;;  %v106_v44 = vor.u32 %v105_v35, %v102_v34  ;;  %v128_v46 = vshrl.u32 %v1904_v32, 16  ;;  %v1928_v51 = vld [vmem:[%s2580_s0 + $0x3c] sm:$0x1]  ;;  %v1773_v24 = vld [vmem:[%s2579_s1 + $0x50] sm:$0xff] }
   0xb   :  { %v84_v43 = vsel %vm1894_vm3, %v79_v33, %v83_v17  ;;  %v131_v47 = vshll.u32 %v1904_v32, 16  ;;  %1815 = vmatpush.bf16.msra.mxu3 %v1768_v22  ;;  %219 = vmatpush.bf16.msra.mxu0 %v1768_v22  ;;  %v120_v50 = vor.u32 %v119_v40, %v116_v39  ;;  %v137_v52 = vshll.u32 %v1909_v37, 16  ;;  %v1782_v59 = vld [vmem:[%s2579_s1 + $0x78] sm:$0xff]  ;;  %v1945_v0 = vld [vmem:[%s2580_s0] sm:$0xf]  ;;  %v1765_v25 = vld [vmem:[%s2579_s1 + $0x10] sm:$0xff] }
   0xc   :  { %v98_v48 = vsel %vm1894_vm3, %v93_v38, %v97_v20  ;;  %v166_v49 = vunpack.c.l.b16 %v84_v43  ;;  %v107_v54 = vrot.slane %v106_v44, 4  ;;  %v130_v55 = vrot.slane %v128_v46, 4  ;;  %v1953_v9 = vld [vmem:[%s2580_s0 + $0x4] sm:$0x1]  ;;  %v1958_v10 = vld [vmem:[%s2580_s0 + $0x8] sm:$0xf] }
   0xd   :  { %v167_v53 = vunpack.c.l.b16 %v98_v48  ;;  %v133_v56 = vrot.slane %v131_v47, 5  ;;  %v121_v60 = vrot.slane %v120_v50, 4  ;;  %v139_v61 = vrot.slane %v137_v52, 5  ;;  %v1786_v11 = vld [vmem:[%s2579_s1 + $0x98] sm:$0xff]  ;;  %v19_v28 = vld [vmem:[%s2580_s0 + $0xc] sm:$0x1] }
   0xe   :  { %v142_v62 = vshrl.u32 %v1919_v45, 16  ;;  %v145_v63 = vshll.u32 %v1919_v45, 16  ;;  %1816 = vmatpush.bf16.msra.mxu1 %v1767_v42  ;;  %1817 = vmatpush.bf16.msra.mxu2 %v1767_v42  ;;  %v112_v6 = vsel %vm1894_vm3, %v107_v54, %v111_v36  ;;  %v151_v8 = vshll.u32 %v1928_v51, 16  ;;  %v1781_v33 = vld [vmem:[%s2579_s1 + $0x70] sm:$0xff]  ;;  %v1764_v48 = vld [vmem:[%s2579_s1 + $0x8] sm:$0xff] }
   0xf   :  { %v173_v1 = vpack.c.b16 %v167_v53, %v166_v49  ;;  %v134_v7 = vor.u32 %v133_v56, %v130_v55  ;;  %1818 = vmatpush.bf16.msra.mxu3 %v1767_v42  ;;  %220 = vmatpush.bf16.msra.mxu0 %v1767_v42  ;;  %v126_v13 = vsel %vm1894_vm3, %v121_v60, %v125_v41  ;;  %v168_v14 = vunpack.c.l.b16 %v112_v6  ;;  %v1785_v39 = vld [vmem:[%s2579_s1 + $0x90] sm:$0xff]  ;;  %v1772_v54 = vld [vmem:[%s2579_s1 + $0x48] sm:$0xff] }
  0x10   :  { %v144_v17 = vrot.slane %v142_v62, 4  ;;  %v147_v18 = vrot.slane %v145_v63, 5  ;;  %v169_v19 = vunpack.c.l.b16 %v126_v13  ;;  %v153_v22 = vrot.slane %v151_v8, 5  ;;  %v1780_v55 = vld [vmem:[%s2579_s1 + $0x68] sm:$0xff] }
  0x11   :  { %v135_v20 = vrot.slane %v134_v7, 4  ;;  %v44_v23 = vshrl.u32 %v1945_v0, 16  ;;  %1436 = vmatmul.msk.bf16.vlgmr.msra.gmra.mxu1 %vm200_vm2, %v173_v1  ;;  %v47_v29 = vshll.u32 %v1945_v0, 16  ;;  %v53_v30 = vshll.u32 %v1953_v9, 16  ;;  %v2004_v56 = vld [vmem:[%s2580_s0 + $0x8] sm:$0xf] }
  0x12   :  { %431 = vmatpush.bf16.msrb.mxu2 %v1774_v57  ;;  %302 = vmatpush.bf16.msrb.mxu1 %v1766_v58  ;;  %v148_v26 = vor.u32 %v147_v18, %v144_v17  ;;  %v58_v31 = vshrl.u32 %v1958_v10, 16  ;;  %v174_v34 = vpack.c.b16 %v169_v19, %v168_v14  ;;  %v61_v38 = vshll.u32 %v1958_v10, 16  ;;  %v1784_v60 = vld [vmem:[%s2579_s1 + $0x88] sm:$0xff]  ;;  %v1783_v17 = vld [vmem:[%s2579_s1 + $0x80] sm:$0xff] }
  0x13   :  { %553 = vmatpush.bf16.msrb.mxu3 %v1782_v59  ;;  %v140_v35 = vsel %vm1894_vm3, %v135_v20, %v139_v61  ;;  %v46_v36 = vrot.slane %v44_v23, 4  ;;  %759 = vmatpush.bf16.msrb.mxu0 %v1786_v11  ;;  %v49_v42 = vrot.slane %v47_v29, 5  ;;  %v55_v43 = vrot.slane %v53_v30, 5  ;;  %v2019_v6 = vld [vmem:[%s2580_s0 + $0xc] sm:$0x1]  ;;  %v1763_v11 = vld [vmem:[%s2579_s1] sm:$0xff] }
  0x14   :  { %v149_v40 = vrot.slane %v148_v26, 4  ;;  %v170_v41 = vunpack.c.l.b16 %v140_v35  ;;  %1437 = vmatmul.msk.bf16.vlgmr.msra.gmra.mxu2 %vm200_vm2, %v174_v34  ;;  %v60_v44 = vrot.slane %v58_v31, 4  ;;  %v63_v46 = vrot.slane %v61_v38, 5  ;;  %v2044_v20 = vld [vmem:[%s2580_s0 + $0x10] sm:$0xf]  ;;  %v1802_v35 = vld [vmem:[%s2579_s1 + $0xf8] sm:$0xff] }
  0x15   :  { %v67_v47 = vshll.u32 %v19_v28, 16  ;;  %v50_v50 = vor.u32 %v49_v42, %v46_v36  ;;  %v340_v52 = vrot.slane %v1953_v9, 5  ;;  %v344_v53 = vrot.slane %v19_v28, 5  ;;  %v1771_v9 = vld [vmem:[%s2579_s1 + $0x40] sm:$0xff]  ;;  %v1759_v26 = vld [vmem:[%s2580_s0 + $0x4] sm:$0xf0] }
  0x16   :  { %303 = vmatpush.bf16.msrb.mxu1 %v1765_v25  ;;  %v154_v49 = vsel %vm1894_vm3, %v149_v40, %v153_v22  ;;  %432 = vmatpush.bf16.msrb.mxu2 %v1773_v24  ;;  %v64_v58 = vor.u32 %v63_v46, %v60_v44  ;;  %v1475_v63 = vrot.slane %v1945_v0, 9  ;;  %v1476_v1 = vrot.slane %v1958_v10, 9  ;;  %v1779_v0 = vld [vmem:[%s2579_s1 + $0x60] sm:$0xff]  ;;  %v2049_v22 = vld [vmem:[%s2580_s0 + $0x14] sm:$0x1]  ;;  %v1798_v28 = vld [vmem:[%s2579_s1 + $0xd8] sm:$0xff] }
  0x17   :  { %554 = vmatpush.bf16.msrb.mxu3 %v1781_v33  ;;  %v171_v57 = vunpack.c.l.b16 %v154_v49  ;;  %v69_v59 = vrot.slane %v67_v47, 5  ;;  %760 = vmatpush.bf16.msrb.mxu0 %v1785_v39  ;;  %v51_v61 = vrot.slane %v50_v50, 4  ;;  %v587_v10 = vshrl.u32 %v2004_v56, 16  ;;  %v1441_v25 = vld [vmem:[%s2580_s0] sm:$0xf]  ;;  %v1806_v42 = vld [vmem:[%s2579_s1 + $0x118] sm:$0xff] }
  0x18   :  { %v65_v8 = vrot.slane %v64_v58, 4  ;;  %v590_v13 = vshll.u32 %v2004_v56, 16  ;;  %v341_v18 = vsel %vm2010_vm6, %v1475_v63, %v340_v52  ;;  %v345_v19 = vsel %vm2010_vm6, %v1476_v1, %v344_v53  ;;  %v1797_v49 = vld [vmem:[%s2579_s1 + $0xd0] sm:$0xff]  ;;  %v2083_v53 = vld [vmem:[%s2580_s0 + $0x18] sm:$0xf] }
  0x19   :  { %v175_v7 = vpack.c.b16 %v171_v57, %v170_v41  ;;  %v56_v14 = vsel %vm1894_vm3, %v51_v61, %v55_v43  ;;  %v596_v29 = vshll.u32 %v2019_v6, 16  ;;  %v379_v31 = vunpack.c.l.b16 %v341_v18  ;;  %v1790_v41 = vld [vmem:[%s2579_s1 + $0xb8] sm:$0xff]  ;;  %v1805_v61 = vld [vmem:[%s2579_s1 + $0x110] sm:$0xff] }
  0x1a   :  { %304 = vmatpush.bf16.msrb.mxu1 %v1764_v48  ;;  %433 = vmatpush.bf16.msrb.mxu2 %v1772_v54  ;;  %v70_v23 = vsel %vm1894_vm3, %v65_v8, %v69_v59  ;;  %v164_v24 = vunpack.c.l.b16 %v56_v14  ;;  %v589_v33 = vrot.slane %v587_v10, 4  ;;  %v592_v34 = vrot.slane %v590_v13, 5  ;;  %v1801_v54 = vld [vmem:[%s2579_s1 + $0xf0] sm:$0xff] }
  0x1b   :  { %555 = vmatpush.bf16.msrb.mxu3 %v1780_v55  ;;  %761 = vmatpush.bf16.msrb.mxu0 %v1784_v60  ;;  %v165_v30 = vunpack.c.l.b16 %v70_v23  ;;  %v380_v36 = vunpack.c.l.b16 %v345_v19  ;;  %v601_v38 = vshrl.u32 %v2044_v20, 16  ;;  %v604_v39 = vshll.u32 %v2044_v20, 16  ;;  %v1789_v59 = vld [vmem:[%s2579_s1 + $0xb0] sm:$0xff]  ;;  %v2095_v60 = vld [vmem:[%s2580_s0 + $0x20] sm:$0xf] }
  0x1c   :  { %1438 = vmatmul.msk.bf16.vlgmr.msra.gmra.mxu3 %vm200_vm2, %v175_v7  ;;  %v610_v40 = vshll.u32 %v2049_v22, 16  ;;  %v1442_v44 = vor.u32 %v1759_v26, %v1441_v25  ;;  %v593_v46 = vor.u32 %v592_v34, %v589_v33  ;;  %v598_v52 = vrot.slane %v596_v29, 5  ;;  %v1537_v7 = vld [vmem:[%s2580_s0 + $0x8] sm:$0xf]  ;;  %v1775_v8 = vld [vmem:[%s2580_s0 + $0xc] sm:$0xf0] }
  0x1d   :  { %v172_v43 = vpack.c.b16 %v165_v30, %v164_v24  ;;  %v603_v47 = vrot.slane %v601_v38, 4  ;;  %v606_v48 = vrot.slane %v604_v39, 5  ;;  %v387_v55 = vpack.c.b16 %v380_v36, %v379_v31  ;;  %v1760_v33 = vld [vmem:[%s2580_s0 + $0x14] sm:$0xf0] }
  0x1e   :  { %305 = vmatpush.bf16.msrb.mxu1 %v1763_v11  ;;  %434 = vmatpush.bf16.msrb.mxu2 %v1771_v9  ;;  %v594_v50 = vrot.slane %v593_v46, 4  ;;  %v612_v58 = vrot.slane %v610_v40, 5  ;;  %v615_v1 = vshrl.u32 %v2083_v53, 16  ;;  %v618_v11 = vshll.u32 %v2083_v53, 16  ;;  %v2148_v46 = vld [vmem:[%s2580_s0 + $0x28] sm:$0xf] }
  0x1f   :  { %556 = vmatpush.bf16.msrb.mxu3 %v1779_v0  ;;  %762 = vmatpush.bf16.msrb.mxu0 %v1783_v17  ;;  %v607_v57 = vor.u32 %v606_v48, %v603_v47  ;;  %v629_v10 = vshrl.u32 %v2095_v60, 16  ;;  %v632_v13 = vshll.u32 %v2095_v60, 16  ;;  %v1477_v14 = vrot.slane %v1843_v2, 9  ;;  %v2127_v2 = vld [vmem:[%s2580_s0 + $0x24] sm:$0x1] }
  0x20   :  { %1435 = vmatmul.msk.bf16.vlgmr.msra.gmra.mxu0 %vm200_vm2, %v172_v43  ;;  %v599_v9 = vsel %vm1894_vm3, %v594_v50, %v598_v52  ;;  %v348_v17 = vrot.slane %v1848_v3, 5  ;;  %v1478_v18 = vrot.slane %v1853_v4, 9  ;;  %v352_v19 = vrot.slane %v1858_v5, 5  ;;  %v1445_v5 = vld [vmem:[%s2580_s0 + $0x10] sm:$0xf]  ;;  %v1800_v50 = vld [vmem:[%s2579_s1 + $0xe8] sm:$0xff] }
  0x21   :  { %1471 = vmatmul.msk.bf16.vlgmr.msrb.gmra.mxu1 %vm200_vm2, %v1442_v44  ;;  %v608_v63 = vrot.slane %v607_v57, 4  ;;  %v1538_v23 = vor.u32 %v1775_v8, %v1537_v7  ;;  %v707_v24 = vunpack.c.l.b16 %v599_v9  ;;  %v617_v25 = vrot.slane %v615_v1, 4  ;;  %v1788_v52 = vld [vmem:[%s2579_s1 + $0xa8] sm:$0xff]  ;;  %v1541_v8 = vld [vmem:[%s2580_s0 + $0x18] sm:$0xf] }
  0x22   :  { %1015 = vmatpush.bf16.msra.mxu2 %v1798_v28  ;;  %893 = vmatpush.bf16.msra.mxu1 %v1790_v41  ;;  %v2122_v28 = vld [vmem:[%s2580_s0 + $0x1c] sm:$0x1]  ;;  %v620_v29 = vrot.slane %v618_v11, 5  ;;  %v631_v30 = vrot.slane %v629_v10, 4  ;;  %v634_v31 = vrot.slane %v632_v13, 5  ;;  %v349_v3 = vsel %vm2010_vm6, %v1477_v14, %v348_v17 }
  0x23   :  { %1221 = vmatpush.bf16.msra.mxu3 %v1802_v35  ;;  %1355 = vmatpush.bf16.msra.mxu0 %v1806_v42  ;;  %v613_v0 = vsel %vm1894_vm3, %v608_v63, %v612_v58  ;;  %v353_v4 = vsel %vm2010_vm6, %v1478_v18, %v352_v19  ;;  %v624_v34 = vshll.u32 %v2122_v28, 16  ;;  %v1796_v35 = vld [vmem:[%s2579_s1 + $0xc8] sm:$0xff]  ;;  %v638_v40 = vshll.u32 %v2127_v2, 16  ;;  %v2165_v58 = vld [vmem:[%s2580_s0 + $0x30] sm:$0xf] }
  0x24   :  { %1507 = vmatmul.msk.bf16.vlgmr.msrb.gmra.mxu2 %vm200_vm2, %v387_v55  ;;  %v708_v26 = vunpack.c.l.b16 %v613_v0  ;;  %v621_v38 = vor.u32 %v620_v29, %v617_v25  ;;  %v635_v39 = vor.u32 %v634_v31, %v631_v30  ;;  %v381_v41 = vunpack.c.l.b16 %v349_v3  ;;  %v2207_v3 = vld [vmem:[%s2580_s0 + $0x34] sm:$0x1] }
  0x25   :  { %v382_v42 = vunpack.c.l.b16 %v353_v4  ;;  %v1446_v43 = vor.u32 %v1760_v33, %v1445_v5  ;;  %v626_v44 = vrot.slane %v624_v34, 5  ;;  %v1479_v57 = vrot.slane %v1869_v12, 9  ;;  %v1449_v4 = vld [vmem:[%s2580_s0 + $0x20] sm:$0xf]  ;;  %v1761_v5 = vld [vmem:[%s2580_s0 + $0x24] sm:$0xf0] }
  0x26   :  { %1016 = vmatpush.bf16.msra.mxu2 %v1797_v49  ;;  %894 = vmatpush.bf16.msra.mxu1 %v1789_v59  ;;  %v715_v36 = vpack.c.b16 %v708_v26, %v707_v24  ;;  %v622_v47 = vrot.slane %v621_v38, 4  ;;  %v636_v48 = vrot.slane %v635_v39, 4  ;;  %v640_v49 = vrot.slane %v638_v40, 5  ;;  %v2200_v26 = vld [vmem:[%s2580_s0 + $0x2c] sm:$0x1]  ;;  %v1795_v33 = vld [vmem:[%s2579_s1 + $0xc0] sm:$0xff] }
  0x27   :  { %1222 = vmatpush.bf16.msra.mxu3 %v1801_v54  ;;  %1356 = vmatpush.bf16.msra.mxu0 %v1805_v61  ;;  %v1804_v54 = vld [vmem:[%s2579_s1 + $0x108] sm:$0xff]  ;;  %v388_v55 = vpack.c.b16 %v382_v42, %v381_v41  ;;  %v1481_v59 = vrot.slane %v1904_v32, 9  ;;  %v364_v61 = vrot.slane %v1909_v37, 5  ;;  %v356_v63 = vrot.slane %v1874_v15, 5  ;;  %v1776_v32 = vld [vmem:[%s2580_s0 + $0x1c] sm:$0xf0] }
  0x28   :  { %v643_v1 = vshrl.u32 %v2148_v46, 16  ;;  %v1482_v7 = vrot.slane %v1919_v45, 9  ;;  %v368_v12 = vrot.slane %v1928_v51, 5  ;;  %v627_v37 = vsel %vm1894_vm3, %v622_v47, %v626_v44  ;;  %v2229_v44 = vld [vmem:[%s2580_s0 + $0x40] sm:$0xf] }
  0x29   :  { %v641_v15 = vsel %vm1894_vm3, %v636_v48, %v640_v49  ;;  %v646_v9 = vshll.u32 %v2148_v46, 16  ;;  %v365_v45 = vsel %vm2010_vm6, %v1481_v59, %v364_v61  ;;  %v657_v51 = vshrl.u32 %v2165_v58, 16  ;;  %v1799_v48 = vld [vmem:[%s2579_s1 + $0xe0] sm:$0xff]  ;;  %v1545_v59 = vld [vmem:[%s2580_s0 + $0x28] sm:$0xf] }
  0x2a   :  { %1017 = vmatpush.bf16.msra.mxu2 %v1796_v35  ;;  %895 = vmatpush.bf16.msra.mxu1 %v1788_v52  ;;  %v660_v11 = vshll.u32 %v2165_v58, 16  ;;  %v369_v0 = vsel %vm2010_vm6, %v1482_v7, %v368_v12  ;;  %v385_v10 = vunpack.c.l.b16 %v365_v45  ;;  %v1480_v13 = vrot.slane %v1879_v16, 9  ;;  %v1787_v49 = vld [vmem:[%s2579_s1 + $0xa0] sm:$0xff]  ;;  %v1777_v61 = vld [vmem:[%s2580_s0 + $0x2c] sm:$0xf0] }
  0x2b   :  { %1223 = vmatpush.bf16.msra.mxu3 %v1800_v50  ;;  %1357 = vmatpush.bf16.msra.mxu0 %v1804_v54  ;;  %v360_v14 = vrot.slane %v1884_v21, 5  ;;  %v386_v17 = vunpack.c.l.b16 %v369_v0  ;;  %v1542_v18 = vor.u32 %v1776_v32, %v1541_v8  ;;  %v709_v19 = vunpack.c.l.b16 %v627_v37  ;;  %v1803_v50 = vld [vmem:[%s2579_s1 + $0x100] sm:$0xff] }
  0x2c   :  { %1567 = vmatmul.msk.bf16.vlgmr.msrb.gmra.mxu3 %vm200_vm2, %v1538_v23  ;;  %v710_v23 = vunpack.c.l.b16 %v641_v15  ;;  %v357_v24 = vsel %vm2010_vm6, %v1479_v57, %v356_v63  ;;  %v645_v29 = vrot.slane %v643_v1, 4  ;;  %v648_v30 = vrot.slane %v646_v9, 5 }
  0x2d   :  { %v2195_v25 = vpack.c.b16 %v386_v17, %v385_v10  ;;  %v659_v31 = vrot.slane %v657_v51, 4  ;;  %v662_v16 = vrot.slane %v660_v11, 5  ;;  %v361_v21 = vsel %vm2010_vm6, %v1480_v13, %v360_v14  ;;  %v2260_v10 = vld [vmem:[%s2580_s0 + $0x3c] sm:$0x1]  ;;  %v2265_v13 = vld [vmem:[%s2580_s0 + $0x44] sm:$0x1] }
  0x2e   :  { %v716_v34 = vpack.c.b16 %v710_v23, %v709_v19  ;;  %v383_v35 = vunpack.c.l.b16 %v357_v24  ;;  %v384_v38 = vunpack.c.l.b16 %v361_v21  ;;  %v649_v39 = vor.u32 %v648_v30, %v645_v29  ;;  %1018 = vmatpush.bf16.msra.mxu2 %v1795_v33  ;;  %896 = vmatpush.bf16.msra.mxu1 %v1787_v49  ;;  %v1453_v14 = vld [vmem:[%s2580_s0 + $0x30] sm:$0xf]  ;;  %v1762_v17 = vld [vmem:[%s2580_s0 + $0x34] sm:$0xf0] }
  0x2f   :  { %v663_v40 = vor.u32 %v662_v16, %v659_v31  ;;  %v666_v41 = vshll.u32 %v2207_v3, 16  ;;  %v1450_v42 = vor.u32 %v1761_v5, %v1449_v4  ;;  %1224 = vmatpush.bf16.msra.mxu3 %v1799_v48  ;;  %v685_v7 = vshrl.u32 %v2229_v44, 16  ;;  %1358 = vmatpush.bf16.msra.mxu0 %v1803_v50  ;;  %v2279_v30 = vld [vmem:[%s2580_s0 + $0x10] sm:$0xf]  ;;  %v2284_v31 = vld [vmem:[%s2580_s0 + $0x18] sm:$0xf] }
  0x30   :  { %1595 = vmatmul.msk.bf16.vlgmr.msrb.gmra.mxu0 %vm200_vm2, %v715_v36  ;;  %v652_v36 = vshll.u32 %v2200_v26, 16  ;;  %v389_v52 = vpack.c.b16 %v384_v38, %v383_v35  ;;  %v650_v54 = vrot.slane %v649_v39, 4  ;;  %v688_v12 = vshll.u32 %v2229_v44, 16 }
  0x31   :  { %1472 = vmatmul.msk.bf16.gmra.mxu1 %vm200_vm2, %v1446_v43  ;;  %v2224_v43 = vld [vmem:[%s2580_s0 + $0x38] sm:$0xf]  ;;  %v668_v57 = vrot.slane %v666_v41, 5  ;;  %v1546_v37 = vor.u32 %v1777_v61, %v1545_v59  ;;  %v687_v45 = vrot.slane %v685_v7, 4  ;;  %v680_v19 = vshll.u32 %v2260_v10, 16 }
  0x32   :  { %v654_v47 = vrot.slane %v652_v36, 5  ;;  %v671_v63 = vshrl.u32 %v2224_v43, 16  ;;  %v674_v1 = vshll.u32 %v2224_v43, 16  ;;  %v690_v51 = vrot.slane %v688_v12, 5 }
  0x33   :  { %v694_v24 = vshll.u32 %v2265_v13, 16  ;;  %v1454_v16 = vor.u32 %v1762_v17, %v1453_v14  ;;  %v682_v4 = vrot.slane %v680_v19, 5  ;;  %v1052_v35 = vshll.u32 %v2279_v30, 16 }
  0x34   :  { %1508 = vmatmul.msk.bf16.gmra.mxu2 %vm200_vm2, %v388_v55  ;;  %v664_v55 = vrot.slane %v663_v40, 4  ;;  %v655_v8 = vsel %vm1894_vm3, %v650_v54, %v654_v47  ;;  %v673_v15 = vrot.slane %v671_v63, 4  ;;  %v676_v9 = vrot.slane %v674_v1, 5  ;;  %v1549_v47 = vld [vmem:[%s2580_s0 + $0x38] sm:$0xf] }
  0x35   :  { %v711_v11 = vunpack.c.l.b16 %v655_v8  ;;  %v691_v23 = vor.u32 %v690_v51, %v687_v45  ;;  %v696_v33 = vrot.slane %v694_v24, 5  ;;  %v1063_v36 = vshrl.u32 %v2284_v31, 16  ;;  %v1638_v54 = vld [vmem:[%s2580_s0 + $0x1c] sm:$0x1]  ;;  %v2330_v45 = vld [vmem:[%s2580_s0 + $0x28] sm:$0xf] }
  0x36   :  { %v669_v32 = vsel %vm1894_vm3, %v664_v55, %v668_v57  ;;  %v1066_v38 = vshll.u32 %v2284_v31, 16  ;;  %v802_v39 = vrot.slane %v2019_v6, 5  ;;  %v806_v40 = vrot.slane %v2049_v22, 5  ;;  %v1778_v6 = vld [vmem:[%s2580_s0 + $0x3c] sm:$0xf0] }
  0x37   :  { %v712_v0 = vunpack.c.l.b16 %v669_v32  ;;  %v692_v5 = vrot.slane %v691_v23, 4  ;;  %v1599_v41 = vrot.slane %v2004_v56, 9  ;;  %v1054_v50 = vrot.slane %v1052_v35, 5  ;;  %v1791_v51 = vld [vmem:[%s2580_s0 + $0x14] sm:$0xf0] }
  0x38   :  { %v1068_v56 = vrot.slane %v1066_v38, 5  ;;  %v1550_v59 = vor.u32 %v1778_v6, %v1549_v47  ;;  %v1072_v12 = vshll.u32 %v1638_v54, 16  ;;  %v1091_v24 = vshrl.u32 %v2330_v45, 16 }
  0x39   :  { %v717_v29 = vpack.c.b16 %v712_v0, %v711_v11  ;;  %v697_v49 = vsel %vm1894_vm3, %v692_v5, %v696_v33  ;;  %v803_v55 = vsel %vm2010_vm6, %v1599_v41, %v802_v39  ;;  %v1268_v35 = vrot.slane %v1638_v54, 5 }
  0x3a   :  { %v714_v63 = vunpack.c.l.b16 %v697_v49  ;;  %v841_v8 = vunpack.c.l.b16 %v803_v55  ;;  %v1074_v17 = vrot.slane %v1072_v12, 5  ;;  %v810_v38 = vrot.slane %v2122_v28, 5  ;;  %v2370_v12 = vld [vmem:[%s2580_s0 + $0x30] sm:$0xf] }
  0x3b   :  { %v1602_v39 = vrot.slane %v2095_v60, 9 }
  0x3c   :  { %1568 = vmatmul.msk.bf16.gmra.mxu3 %vm200_vm2, %v1542_v18  ;;  %v677_v18 = vor.u32 %v676_v9, %v673_v15  ;;  %v1661_v15 = vld [vmem:[%s2580_s0 + $0x10] sm:$0xf]  ;;  %v2325_v9 = vld [vmem:[%s2580_s0 + $0x20] sm:$0xf] }
  0x3d   :  { %v1077_v19 = vshrl.u32 %v2325_v9, 16  ;;  %v1080_v23 = vshll.u32 %v2325_v9, 16 }
  0x3e   :  { %v678_v21 = vrot.slane %v677_v18, 4 }
  0x3f   :  { %v1082_v41 = vrot.slane %v1080_v23, 5  ;;  %v1725_v23 = vrot.slane %v2325_v9, 9 }
  0x40   :  { %1596 = vmatmul.msk.bf16.gmra.mxu0 %vm200_vm2, %v716_v34  ;;  %v1049_v34 = vshrl.u32 %v2279_v30, 16  ;;  %v683_v48 = vsel %vm1894_vm3, %v678_v21, %v682_v4  ;;  %v1723_v21 = vrot.slane %v2279_v30, 9  ;;  %v814_v30 = vrot.slane %v2127_v2, 5 }
  0x41   :  { %1473 = vmatmul.msk.bf16.gmra.mxu1 %vm200_vm2, %v1450_v42  ;;  %v1600_v42 = vrot.slane %v2044_v20, 9  ;;  %v1636_v20 = vld [vmem:[%s2580_s0 + $0x14] sm:$0x1]  ;;  %v713_v61 = vunpack.c.l.b16 %v683_v48 }
  0x42   :  { %v1051_v22 = vrot.slane %v1049_v34, 4  ;;  %v1058_v7 = vshll.u32 %v1636_v20, 16  ;;  %v1264_v4 = vrot.slane %v1636_v20, 5  ;;  %v1724_v34 = vrot.slane %v2284_v31, 9  ;;  %v1640_v31 = vld [vmem:[%s2580_s0 + $0x24] sm:$0x1] }
  0x43   :  { %v807_v57 = vsel %vm2010_vm6, %v1600_v42, %v806_v40  ;;  %v1079_v40 = vrot.slane %v1077_v19, 4  ;;  %v1093_v42 = vrot.slane %v1091_v24, 4  ;;  %v815_v6 = vsel %vm2010_vm6, %v1602_v39, %v814_v30  ;;  %v1644_v30 = vld [vmem:[%s2580_s0 + $0x34] sm:$0x1] }
  0x44   :  { %1509 = vmatmul.msk.bf16.gmra.mxu2 %vm200_vm2, %v389_v52  ;;  %v1065_v52 = vrot.slane %v1063_v36, 4  ;;  %v1055_v1 = vor.u32 %v1054_v50, %v1051_v22  ;;  %v842_v32 = vunpack.c.l.b16 %v807_v57  ;;  %v1060_v0 = vrot.slane %v1058_v7, 5 }
  0x45   :  { %v1601_v36 = vrot.slane %v2083_v53, 9  ;;  %v1642_v53 = vld [vmem:[%s2580_s0 + $0x2c] sm:$0x1]  ;;  %v1265_v60 = vsel %vm2010_vm6, %v1723_v21, %v1264_v4  ;;  %v1269_v28 = vsel %vm2010_vm6, %v1724_v34, %v1268_v35  ;;  %v1083_v22 = vor.u32 %v1082_v41, %v1079_v40 }
  0x46   :  { %v1056_v11 = vrot.slane %v1055_v1, 4  ;;  %v849_v18 = vpack.c.b16 %v842_v32, %v841_v8  ;;  %v1086_v50 = vshll.u32 %v1640_v31, 16  ;;  %v1303_v54 = vunpack.c.l.b16 %v1265_v60  ;;  %v2375_v8 = vld [vmem:[%s2580_s0 + $0x38] sm:$0xf]  ;;  %v1665_v32 = vld [vmem:[%s2580_s0 + $0x20] sm:$0xf] }
  0x47   :  { %v811_v2 = vsel %vm2010_vm6, %v1601_v36, %v810_v38  ;;  %v1304_v55 = vunpack.c.l.b16 %v1269_v28  ;;  %v1272_v24 = vrot.slane %v1640_v31, 5  ;;  %v1726_v21 = vrot.slane %v2330_v45, 9 }
  0x48   :  { %v1061_v5 = vsel %vm1894_vm3, %v1056_v11, %v1060_v0  ;;  %v843_v57 = vunpack.c.l.b16 %v811_v2  ;;  %v1105_v0 = vshrl.u32 %v2370_v12, 16  ;;  %v1276_v4 = vrot.slane %v1642_v53, 5 }
  0x49   :  { %v1169_v48 = vunpack.c.l.b16 %v1061_v5  ;;  %v1603_v5 = vrot.slane %v2148_v46, 9  ;;  %v1604_v34 = vrot.slane %v2165_v58, 9  ;;  %v822_v35 = vrot.slane %v2207_v3, 5 }
  0x4a   :  { %v1107_v36 = vrot.slane %v1105_v0, 4  ;;  %v1273_v46 = vsel %vm2010_vm6, %v1725_v23, %v1272_v24  ;;  %v1277_v58 = vsel %vm2010_vm6, %v1726_v21, %v1276_v4  ;;  %v1648_v21 = vld [vmem:[%s2580_s0 + $0x44] sm:$0x1] }
  0x4b   :  { %v823_v40 = vsel %vm2010_vm6, %v1604_v34, %v822_v35  ;;  %v1306_v31 = vunpack.c.l.b16 %v1277_v58  ;;  %v1142_v34 = vshll.u32 %v1648_v21, 16 }
  0x4c   :  { %1569 = vmatmul.msk.bf16.gmra.mxu3 %vm200_vm2, %v1546_v37  ;;  %v718_v37 = vpack.c.b16 %v714_v63, %v713_v61  ;;  %v1084_v61 = vrot.slane %v1083_v22, 4  ;;  %v1088_v63 = vrot.slane %v1086_v50, 5  ;;  %v846_v60 = vunpack.c.l.b16 %v823_v40  ;;  %v1794_v40 = vld [vmem:[%s2580_s0 + $0x44] sm:$0xf0] }
  0x50   :  { %1597 = vmatmul.msk.bf16.gmra.mxu0 %vm200_vm2, %v717_v29  ;;  %v1094_v29 = vshll.u32 %v2330_v45, 16  ;;  %v1646_v45 = vld [vmem:[%s2580_s0 + $0x3c] sm:$0x1] }
  0x51   :  { %1474 = vmatmul.msk.bf16.gmra.mxu1 %vm200_vm2, %v1454_v16  ;;  %v1662_v16 = vor.u32 %v1791_v51, %v1661_v15  ;;  %v1089_v51 = vsel %vm1894_vm3, %v1084_v61, %v1088_v63  ;;  %v1728_v61 = vrot.slane %v2375_v8, 9  ;;  %v1284_v63 = vrot.slane %v1646_v45, 5 }
  0x52   :  { %v1096_v47 = vrot.slane %v1094_v29, 5  ;;  %v1171_v29 = vunpack.c.l.b16 %v1089_v51 }
  0x53   :  { %v1285_v0 = vsel %vm2010_vm6, %v1728_v61, %v1284_v63 }
  0x54   :  { %1510 = vmatmul.msk.bf16.gmra.mxu2 %vm200_vm2, %v2195_v25  ;;  %v1069_v25 = vor.u32 %v1068_v56, %v1065_v52  ;;  %v1097_v52 = vor.u32 %v1096_v47, %v1093_v42  ;;  %v1100_v56 = vshll.u32 %v1642_v53, 16  ;;  %v1114_v42 = vshll.u32 %v1644_v30, 16 }
  0x56   :  { %v1070_v14 = vrot.slane %v1069_v25, 4  ;;  %v1098_v1 = vrot.slane %v1097_v52, 4  ;;  %v1102_v7 = vrot.slane %v1100_v56, 5  ;;  %v1311_v25 = vpack.c.b16 %v1304_v55, %v1303_v54  ;;  %v1669_v56 = vld [vmem:[%s2580_s0 + $0x30] sm:$0xf] }
  0x57   :  { %v1116_v2 = vrot.slane %v1114_v42, 5  ;;  %v2426_v54 = vld [vmem:[%s2580_s0 + $0x48] sm:$0xf]  ;;  %v1793_v55 = vld [vmem:[%s2580_s0 + $0x34] sm:$0xf0] }
  0x58   :  { %v1075_v33 = vsel %vm1894_vm3, %v1070_v14, %v1074_v17  ;;  %v1103_v11 = vsel %vm1894_vm3, %v1098_v1, %v1102_v7  ;;  %v1108_v14 = vshll.u32 %v2370_v12, 16  ;;  %v1119_v17 = vshrl.u32 %v2375_v8, 16 }
  0x59   :  { %v1170_v49 = vunpack.c.l.b16 %v1075_v33  ;;  %v818_v33 = vrot.slane %v2200_v26, 5 }
  0x5a   :  { %v1110_v38 = vrot.slane %v1108_v14, 5  ;;  %v1121_v39 = vrot.slane %v1119_v17, 4  ;;  %v1605_v14 = vrot.slane %v2224_v43, 9  ;;  %v826_v17 = vrot.slane %v2260_v10, 5  ;;  %v1650_v43 = vld [vmem:[%s2580_s0 + $0x4c] sm:$0x1] }
  0x5b   :  { %v1177_v20 = vpack.c.b16 %v1170_v49, %v1169_v48  ;;  %v819_v3 = vsel %vm2010_vm6, %v1603_v5, %v818_v33  ;;  %v1128_v48 = vshll.u32 %v1646_v45, 16  ;;  %v1305_v49 = vunpack.c.l.b16 %v1273_v46 }
  0x5c   :  { %1570 = vmatmul.msk.bf16.gmra.mxu3 %vm200_vm2, %v1550_v59  ;;  %v844_v59 = vunpack.c.l.b16 %v815_v6  ;;  %v1111_v41 = vor.u32 %v1110_v38, %v1107_v36  ;;  %v845_v53 = vunpack.c.l.b16 %v819_v3  ;;  %v1308_v5 = vunpack.c.l.b16 %v1285_v0  ;;  %v1673_v3 = vld [vmem:[%s2580_s0 + $0x40] sm:$0xf] }
  0x5d   :  { %v1130_v22 = vrot.slane %v1128_v48, 5  ;;  %v1312_v50 = vpack.c.b16 %v1306_v31, %v1305_v49  ;;  %v1156_v36 = vshll.u32 %v1650_v43, 16  ;;  %v1144_v45 = vrot.slane %v1142_v34, 5 }
  0x5e   :  { %v850_v15 = vpack.c.b16 %v844_v59, %v843_v57  ;;  %v1112_v28 = vrot.slane %v1111_v41, 4  ;;  %v851_v52 = vpack.c.b16 %v846_v60, %v845_v53  ;;  %v1727_v57 = vrot.slane %v2370_v12, 9 }
  0x5f   :  { %v1280_v59 = vrot.slane %v1644_v30, 5  ;;  %v1150_v12 = vshll.u32 %v2426_v54, 16  ;;  %v1158_v58 = vrot.slane %v1156_v36, 5  ;;  %v1674_v49 = vor.u32 %v1794_v40, %v1673_v3 }
  0x60   :  { %1598 = vmatmul.msk.bf16.gmra.mxu0 %vm200_vm2, %v718_v37  ;;  %v1792_v37 = vld [vmem:[%s2580_s0 + $0x24] sm:$0xf0]  ;;  %v1117_v1 = vsel %vm1894_vm3, %v1112_v28, %v1116_v2  ;;  %v1288_v31 = vrot.slane %v1648_v21, 5  ;;  %v1730_v53 = vrot.slane %v2426_v54, 9  ;;  %v1292_v60 = vrot.slane %v1650_v43, 5 }
  0x61   :  { %1631 = vmatmul.msk.bf16.vlgmr.msra.gmra.mxu1 %vm200_vm2, %v849_v18  ;;  %v1122_v18 = vshll.u32 %v2375_v8, 16  ;;  %v1666_v19 = vor.u32 %v1792_v37, %v1665_v32  ;;  %v1147_v37 = vshrl.u32 %v2426_v54, 16  ;;  %v1173_v8 = vunpack.c.l.b16 %v1117_v1 }
  0x62   :  { %v1293_v27 = vsel %vm2010_vm6, %v1730_v53, %v1292_v60 }
  0x63   :  { %v1124_v9 = vrot.slane %v1122_v18, 5  ;;  %v1606_v18 = vrot.slane %v2229_v44, 9  ;;  %v827_v44 = vsel %vm2010_vm6, %v1605_v14, %v826_v17 }
  0x64   :  { %1691 = vmatmul.msk.bf16.vlgmr.msra.gmra.mxu2 %vm200_vm2, %v1662_v16  ;;  %v1172_v16 = vunpack.c.l.b16 %v1103_v11  ;;  %v1281_v11 = vsel %vm2010_vm6, %v1727_v57, %v1280_v59  ;;  %v847_v38 = vunpack.c.l.b16 %v827_v44 }
  0x65   :  { %v1125_v47 = vor.u32 %v1124_v9, %v1121_v39  ;;  %v1307_v4 = vunpack.c.l.b16 %v1281_v11 }
  0x66   :  { %v1178_v26 = vpack.c.b16 %v1172_v16, %v1171_v29  ;;  %v1149_v29 = vrot.slane %v1147_v37, 4  ;;  %v1152_v16 = vrot.slane %v1150_v12, 5 }
  0x67   :  { %v1126_v6 = vrot.slane %v1125_v47, 4  ;;  %v1313_v9 = vpack.c.b16 %v1308_v5, %v1307_v4 }
  0x68   :  { %v1153_v35 = vor.u32 %v1152_v16, %v1149_v29 }
  0x69   :  { %v1131_v7 = vsel %vm1894_vm3, %v1126_v6, %v1130_v22 }
  0x6a   :  { %v1174_v51 = vunpack.c.l.b16 %v1131_v7  ;;  %v1154_v46 = vrot.slane %v1153_v35, 4 }
  0x6c   :  { %1719 = vmatmul.msk.bf16.vlgmr.msra.gmra.mxu3 %vm200_vm2, %v1177_v20  ;;  %v2421_v20 = vld [vmem:[%s2580_s0 + $0x40] sm:$0xf]  ;;  %v1179_v10 = vpack.c.b16 %v1174_v51, %v1173_v8  ;;  %v1159_v47 = vsel %vm1894_vm3, %v1154_v46, %v1158_v58 }
  0x6d   :  { %v1136_v32 = vshll.u32 %v2421_v20, 16  ;;  %v1729_v48 = vrot.slane %v2421_v20, 9  ;;  %v1176_v2 = vunpack.c.l.b16 %v1159_v47 }
  0x6f   :  { %v1138_v24 = vrot.slane %v1136_v32, 5  ;;  %v1289_v6 = vsel %vm2010_vm6, %v1729_v48, %v1288_v31 }
  0x70   :  { %1755 = vmatmul.msk.bf16.vlgmr.msra.gmra.mxu0 %vm200_vm2, %v1311_v25  ;;  %v1133_v25 = vshrl.u32 %v2421_v20, 16 }
  0x71   :  { %1632 = vmatmul.msk.bf16.gmra.mxu1 %vm200_vm2, %v850_v15  ;;  %v1670_v15 = vor.u32 %v1793_v55, %v1669_v56  ;;  %v1310_v56 = vunpack.c.l.b16 %v1293_v27 }
  0x72   :  { %v1135_v23 = vrot.slane %v1133_v25, 4 }
  0x74   :  { %1692 = vmatmul.msk.bf16.gmra.mxu2 %vm200_vm2, %v1666_v19  ;;  %v830_v19 = vrot.slane %v2265_v13, 5  ;;  %v1139_v33 = vor.u32 %v1138_v24, %v1135_v23 }
  0x76   :  { %v831_v13 = vsel %vm2010_vm6, %v1606_v18, %v830_v19  ;;  %v1140_v30 = vrot.slane %v1139_v33, 4 }
  0x77   :  { %v848_v39 = vunpack.c.l.b16 %v831_v13 }
  0x78   :  { %v1145_v42 = vsel %vm1894_vm3, %v1140_v30, %v1144_v45 }
  0x79   :  { %v1175_v28 = vunpack.c.l.b16 %v1145_v42 }
  0x7b   :  { %v1180_v22 = vpack.c.b16 %v1176_v2, %v1175_v28 }
  0x7c   :  { %1720 = vmatmul.msk.bf16.gmra.mxu3 %vm200_vm2, %v1178_v26  ;;  %v852_v26 = vpack.c.b16 %v848_v39, %v847_v38 }
  0x80   :  { %1756 = vmatmul.msk.bf16.gmra.mxu0 %vm200_vm2, %v1312_v50 }
  0x81   :  { %1633 = vmatmul.msk.bf16.gmra.mxu1 %vm200_vm2, %v851_v52  ;;  %v1309_v52 = vunpack.c.l.b16 %v1289_v6 }
  0x83   :  { %v1314_v54 = vpack.c.b16 %v1310_v56, %v1309_v52 }
  0x84   :  { %1693 = vmatmul.msk.bf16.gmra.mxu2 %vm200_vm2, %v1670_v15 }
  0x8c   :  { %1721 = vmatmul.msk.bf16.gmra.mxu3 %vm200_vm2, %v1179_v10 }
  0x8e   :  { %v2469_v41 = vpop.f32.mrf.mxu1 }
  0x90   :  { %1757 = vmatmul.msk.bf16.gmra.mxu0 %vm200_vm2, %v1313_v9 }
  0x91   :  { %1634 = vmatmul.msk.bf16.gmra.mxu1 %vm200_vm2, %v852_v26 }
  0x94   :  { %1694 = vmatmul.msk.bf16.gmra.mxu2 %vm200_vm2, %v1674_v49 }
  0x96   :  { %v2484_v50 = vpop.f32.mrf.mxu1 }
  0x97   :  { %v2486_v20 = vpop.f32.mrf.mxu2 }
  0x9c   :  { %1722 = vmatmul.msk.bf16.gmra.mxu3 %vm200_vm2, %v1180_v22 }
  0x9d   :  { %v222_v55 = vpop.f32.mrf.mxu0 }
  0x9e   :  { %v307_v59 = vpop.f32.mrf.mxu1 }
  0x9f   :  { %v2489_v57 = vpop.f32.mrf.mxu3  ;;  %v2492_v61 = vpop.f32.mrf.mxu2  ;;  %v308_v33 = vadd.f32 %v307_v59, %v222_v55 }
  0xa0   :  { %1758 = vmatmul.msk.bf16.gmra.mxu0 %vm200_vm2, %v1314_v54 }
  0xa5   :  { %v224_v62 = vpop.f32.mrf.mxu0 }
  0xa6   :  { %v309_v1 = vpop.f32.mrf.mxu1 }
  0xa7   :  { %v2494_v63 = vpop.f32.mrf.mxu3  ;;  %v436_v7 = vpop.f32.mrf.mxu2  ;;  %v310_v30 = vadd.f32 %v309_v1, %v224_v62 }
  0xa8   :  { %v456_v36 = vadd.f32 %v436_v7, %v308_v33 }
  0xad   :  { %v764_v25 = vpop.f32.mrf.mxu0 }
  0xae   :  { %v312_v37 = vpop.f32.mrf.mxu1 }
  0xaf   :  { %v558_v32 = vpop.f32.mrf.mxu3  ;;  %v438_v12 = vpop.f32.mrf.mxu2  ;;  %v313_v49 = vadd.f32 %v312_v37, %v2469_v41 }
  0xb0   :  { %v578_v9 = vadd.f32 %v558_v32, %v456_v36  ;;  %v457_v58 = vadd.f32 %v438_v12, %v310_v30 }
  0xb2   :  { %v784_v26 = vadd.f32 %v764_v25, %v578_v9 }
  0xb5   :  { %v766_v15 = vpop.f32.mrf.mxu0 }
  0xb6   :  { %v314_v51 = vpop.f32.mrf.mxu1 }
  0xb7   :  { %v560_v8 = vpop.f32.mrf.mxu3  ;;  %v441_v11 = vpop.f32.mrf.mxu2  ;;  %v315_v59 = vadd.f32 %v314_v51, %v2484_v50 }
  0xb8   :  { %v579_v47 = vadd.f32 %v560_v8, %v457_v58  ;;  %v458_v60 = vadd.f32 %v441_v11, %v313_v49 }
  0xba   :  { %v785_v2 = vadd.f32 %v766_v15, %v579_v47 }
  0xbd   :  { %v769_v0 = vpop.f32.mrf.mxu0 }
  0xbe   :  { %v317_v17 = vpop.f32.mrf.mxu1 }
  0xbf   :  { %v563_v14 = vpop.f32.mrf.mxu3  ;;  %v443_v18 = vpop.f32.mrf.mxu2  ;;  %v318_v33 = vadd.f32 %v317_v17, %v2486_v20 }
  0xc0   :  { %v580_v56 = vadd.f32 %v563_v14, %v458_v60  ;;  %v459_v1 = vadd.f32 %v443_v18, %v315_v59 }
  0xc2   :  { %v786_v25 = vadd.f32 %v769_v0, %v580_v56 }
  0xc5   :  { %v2496_v19 = vpop.f32.mrf.mxu0 }
  0xc6   :  { %v2498_v24 = vpop.f32.mrf.mxu1 }
  0xc7   :  { %v565_v23 = vpop.f32.mrf.mxu3  ;;  %v446_v29 = vpop.f32.mrf.mxu2  ;;  %v320_v20 = vadd.f32 %v2498_v24, %v2492_v61 }
  0xc8   :  { %v581_v8 = vadd.f32 %v565_v23, %v459_v1  ;;  %v460_v36 = vadd.f32 %v446_v29, %v318_v33 }
  0xca   :  { %v787_v0 = vadd.f32 %v2496_v19, %v581_v8 }
  0xcd   :  { %v2500_v16 = vpop.f32.mrf.mxu0 }
  0xce   :  { %v2504_v43 = vpop.f32.mrf.mxu1 }
  0xcf   :  { %v2502_v21 = vpop.f32.mrf.mxu3  ;;  %v2506_v4 = vpop.f32.mrf.mxu2  ;;  %v323_v24 = vadd.f32 %v2504_v43, %v2489_v57 }
  0xd0   :  { %v582_v23 = vadd.f32 %v2502_v21, %v460_v36  ;;  %v461_v19 = vadd.f32 %v2506_v4, %v320_v20 }
  0xd5   :  { %v2508_v10 = vpop.f32.mrf.mxu0 }
  0xd6   :  { %v2512_v44 = vpop.f32.mrf.mxu1 }
  0xd7   :  { %v2510_v5 = vpop.f32.mrf.mxu3  ;;  %v2514_v13 = vpop.f32.mrf.mxu2  ;;  %v325_v43 = vadd.f32 %v2512_v44, %v2494_v63 }
  0xdd   :  { %v2516_v34 = vpop.f32.mrf.mxu0 }
  0xde   :  { %v898_v38 = vpop.f32.mrf.mxu1 }
  0xdf   :  { %v2518_v35 = vpop.f32.mrf.mxu3  ;;  %v2520_v39 = vpop.f32.mrf.mxu2  ;;  %v918_v42 = vadd.f32 %v898_v38, %v784_v26 }
  0xe5   :  { %v2522_v45 = vpop.f32.mrf.mxu0 }
  0xe6   :  { %v900_v3 = vpop.f32.mrf.mxu1 }
  0xe7   :  { %v2524_v46 = vpop.f32.mrf.mxu3  ;;  %v1020_v40 = vpop.f32.mrf.mxu2  ;;  %v919_v52 = vadd.f32 %v900_v3, %v785_v2 }
  0xe8   :  { %v1040_v48 = vadd.f32 %v1020_v40, %v918_v42  ;;  %v788_v42 = vadd.f32 %v2500_v16, %v582_v23  ;;  %v462_v16 = vadd.f32 %v2514_v13, %v323_v24 }
  0xed   :  { %v1360_v31 = vpop.f32.mrf.mxu0 }
  0xee   :  { %v903_v6 = vpop.f32.mrf.mxu1 }
  0xef   :  { %v1226_v53 = vpop.f32.mrf.mxu3  ;;  %v1022_v27 = vpop.f32.mrf.mxu2  ;;  %v920_v15 = vadd.f32 %v903_v6, %v786_v25 }
  0xf0   :  { %v1246_v28 = vadd.f32 %v1226_v53, %v1040_v48  ;;  %v1041_v55 = vadd.f32 %v1022_v27, %v919_v52 }
  0xf2   :  { %v1380_v22 = vadd.f32 %v1360_v31, %v1246_v28  ;;  %v583_v31 = vadd.f32 %v2510_v5, %v461_v19 }
  0xf4   :  { %v1388_v54 = vpack.c.bf16 %v1380_v22, %v1380_v22  ;;  %v789_v2 = vadd.f32 %v2508_v10, %v583_v31  ;;  %v584_v22 = vadd.f32 %v2518_v35, %v462_v16  ;;  %v463_v10 = vadd.f32 %v2520_v39, %v325_v43 }
  0xf5   :  { %v1362_v41 = vpop.f32.mrf.mxu0 }
  0xf6   :  { %1397 = vst.msk [vmem:[%s2581_s2] sm:$0xf] %vm1396_vm7, %v1388_v54  ;;  %v905_v32 = vpop.f32.mrf.mxu1  ;;  %v790_v59 = vadd.f32 %v2516_v34, %v584_v22  ;;  %v585_v1 = vadd.f32 %v2524_v46, %v463_v10 }
  0xf7   :  { %v1228_v62 = vpop.f32.mrf.mxu3  ;;  %v1025_v37 = vpop.f32.mrf.mxu2  ;;  %v921_v58 = vadd.f32 %v905_v32, %v787_v0 }
  0xf8   :  { %v1247_v7 = vadd.f32 %v1228_v62, %v1041_v55  ;;  %v1042_v14 = vadd.f32 %v1025_v37, %v920_v15  ;;  %v791_v39 = vadd.f32 %v2522_v45, %v585_v1 }
  0xfa   :  { %v1381_v12 = vadd.f32 %v1362_v41, %v1247_v7 }
  0xfc   :  { %v1389_v11 = vpack.c.bf16 %v1381_v12, %v1381_v12 }
  0xfd   :  { %v1365_v50 = vpop.f32.mrf.mxu0 }
  0xfe   :  { %1398 = vst.msk [vmem:[%s2581_s2 + $0x4] sm:$0xf] %vm1396_vm7, %v1389_v11  ;;  %v908_v38 = vpop.f32.mrf.mxu1 }
  0xff   :  { %v1231_v51 = vpop.f32.mrf.mxu3  ;;  %v1027_v9 = vpop.f32.mrf.mxu2  ;;  %v922_v21 = vadd.f32 %v908_v38, %v788_v42 }
 0x100   :  { %v1248_v18 = vadd.f32 %v1231_v51, %v1042_v14  ;;  %v1043_v3 = vadd.f32 %v1027_v9, %v921_v58 }
 0x102   :  { %v1382_v30 = vadd.f32 %v1365_v50, %v1248_v18 }
 0x104   :  { %v1390_v26 = vpack.c.bf16 %v1382_v30, %v1382_v30 }
 0x105   :  { %v1367_v17 = vpop.f32.mrf.mxu0 }
 0x106   :  { %1399 = vst.msk [vmem:[%s2581_s2 + $0x8] sm:$0xf] %vm1396_vm7, %v1390_v26  ;;  %v910_v49 = vpop.f32.mrf.mxu1 }
 0x107   :  { %v1233_v29 = vpop.f32.mrf.mxu3  ;;  %v1030_v47 = vpop.f32.mrf.mxu2  ;;  %v923_v5 = vadd.f32 %v910_v49, %v789_v2 }
 0x108   :  { %v1249_v40 = vadd.f32 %v1233_v29, %v1043_v3  ;;  %v1044_v61 = vadd.f32 %v1030_v47, %v922_v21 }
 0x10a   :  { %v1383_v48 = vadd.f32 %v1367_v17, %v1249_v40 }
 0x10c   :  { %v1391_v53 = vpack.c.bf16 %v1383_v48, %v1383_v48 }
 0x10d   :  { %v1370_v4 = vpop.f32.mrf.mxu0 }
 0x10e   :  { %1400 = vst.msk [vmem:[%s2581_s2 + $0xc] sm:$0xf] %vm1396_vm7, %v1391_v53  ;;  %v913_v57 = vpop.f32.mrf.mxu1 }
 0x10f   :  { %v1236_v60 = vpop.f32.mrf.mxu3  ;;  %v1032_v6 = vpop.f32.mrf.mxu2  ;;  %v924_v62 = vadd.f32 %v913_v57, %v790_v59 }
 0x110   :  { %v1250_v28 = vadd.f32 %v1236_v60, %v1044_v61  ;;  %v1045_v56 = vadd.f32 %v1032_v6, %v923_v5 }
 0x112   :  { %v1384_v27 = vadd.f32 %v1370_v4, %v1250_v28 }
 0x114   :  { %v1392_v52 = vpack.c.bf16 %v1384_v27, %v1384_v27 }
 0x115   :  { %v1372_v13 = vpop.f32.mrf.mxu0 }
 0x116   :  { %1401 = vst.msk [vmem:[%s2581_s2 + $0x10] sm:$0xf] %vm1396_vm7, %v1392_v52  ;;  %v915_v63 = vpop.f32.mrf.mxu1 }
 0x117   :  { %v1238_v54 = vpop.f32.mrf.mxu3  ;;  %v1035_v41 = vpop.f32.mrf.mxu2  ;;  %v925_v15 = vadd.f32 %v915_v63, %v791_v39 }
 0x118   :  { %v1251_v55 = vadd.f32 %v1238_v54, %v1045_v56  ;;  %v1046_v25 = vadd.f32 %v1035_v41, %v924_v62 }
 0x11a   :  { %v1385_v35 = vadd.f32 %v1372_v13, %v1251_v55 }
 0x11c   :  { %v1393_v7 = vpack.c.bf16 %v1385_v35, %v1385_v35 }
 0x11d   :  { %v1375_v44 = vpop.f32.mrf.mxu0 }
 0x11e   :  { %1402 = vst.msk [vmem:[%s2581_s2 + $0x14] sm:$0xf] %vm1396_vm7, %v1393_v7 }
 0x11f   :  { %v1241_v32 = vpop.f32.mrf.mxu3  ;;  %v1037_v12 = vpop.f32.mrf.mxu2 }
 0x120   :  { %v1252_v37 = vadd.f32 %v1241_v32, %v1046_v25  ;;  %v1047_v11 = vadd.f32 %v1037_v12, %v925_v15 }
 0x122   :  { %v1386_v34 = vadd.f32 %v1375_v44, %v1252_v37 }
 0x124   :  { %v1394_v8 = vpack.c.bf16 %v1386_v34, %v1386_v34 }
 0x125   :  { %v1377_v33 = vpop.f32.mrf.mxu0 }
 0x126   :  { %1403 = vst.msk [vmem:[%s2581_s2 + $0x18] sm:$0xf] %vm1396_vm7, %v1394_v8 }
 0x127   :  { %v1243_v46 = vpop.f32.mrf.mxu3 }
 0x128   :  { %v1253_v14 = vadd.f32 %v1243_v46, %v1047_v11 }
 0x12a   :  { %v1387_v50 = vadd.f32 %v1377_v33, %v1253_v14 }
 0x12c   :  { %v1395_v51 = vpack.c.bf16 %v1387_v50, %v1387_v50 }
 0x12e   :  { %1404 = vst.msk [vmem:[%s2581_s2 + $0x1c] sm:$0xf] %vm1396_vm7, %v1395_v51 }

</bundles_post_ra>
